<compile_context>
chip_gen: v7x
topology: tpu7x:2x2x1
jax: 0.10.0
libtpu: 0.0.40
codegen_flags: <defaults>
</compile_context>

<pallas_src>
import jax
import jax.numpy as jnp
from jax.experimental import pallas as pl
from jax.experimental.pallas import tpu as pltpu

C_IN = 1232   # conv2d76 in_channels / conv2d77 out_channels
C_MID = 308   # conv2d76 out_channels / conv2d77 in_channels
H = 14
W = 14
HW = H * W
N_BLOCKS = 2                 # one 616-channel half per v7x TensorCore
C_BLK = C_IN // N_BLOCKS     # 616, multiple of 8 (sublane-aligned)


def gate_kernel(s_ref, w1_ref, b1_ref, w2_ref, b2_ref, g_ref):
    # Single program.  Column orientation (channels on sublanes):
    #   s_ref : (C_IN, 1)      squeeze vector (native NCHW flatten of x240)
    #   w1_ref: (C_MID, C_IN)  conv2d76 weight, native layout
    #   b1_ref: (C_MID, 1)
    #   w2_ref: (C_IN, C_MID)  conv2d77 weight, native layout
    #   b2_ref: (C_IN, 1)
    #   g_ref : (C_IN, 1)      sigmoid gate, computed exactly once
    h = jnp.dot(w1_ref[...], s_ref[...], preferred_element_type=jnp.float32)
    h = jnp.maximum(h + b1_ref[...], 0.0)                       # ReLU, (C_MID, 1)
    g = jnp.dot(w2_ref[...], h, preferred_element_type=jnp.float32)
    g_ref[...] = jax.nn.sigmoid(g + b2_ref[...])                # (C_IN, 1)


def mul_kernel(g_ref, x_ref, o_ref):
    # Streaming broadcast-multiply:
    #   g_ref: (C_BLK, 1)   precomputed gate rows for this program's channels
    #   x_ref: (C_BLK, HW)  feature-map block (native NCHW flatten of x239)
    #   o_ref: (C_BLK, HW)
    o_ref[...] = x_ref[...] * g_ref[...]                        # lane-broadcast


def se_block(x240, x239, w1, b1, w2, b2):
    """x240: (1, C_IN, 1, 1) NCHW; x239: (1, C_IN, H, W) NCHW.
    w1: (C_MID, C_IN, 1, 1), b1: (C_MID,), w2: (C_IN, C_MID, 1, 1), b2: (C_IN,).
    All reshapes below are free (no transposes, no extra HBM traffic)."""
    s = x240.reshape(C_IN, 1).astype(jnp.float32)
    w1m = w1.reshape(C_MID, C_IN).astype(jnp.float32)            # native layout
    w2m = w2.reshape(C_IN, C_MID).astype(jnp.float32)            # native layout
    b1c = b1.reshape(C_MID, 1).astype(jnp.float32)
    b2c = b2.reshape(C_IN, 1).astype(jnp.float32)
    x_mat = x239.reshape(C_IN, HW).astype(jnp.float32)           # NCHW -> (C, HW)

    # --- gate: computed once in a tiny single-program call -------------------
    gate_cost = pl.CostEstimate(
        flops=2 * C_MID * C_IN * 2,
        transcendentals=C_IN,
        bytes_accessed=4 * (C_IN + C_MID * C_IN + C_MID
                            + C_IN * C_MID + C_IN + C_IN),
    )
    gate = pl.pallas_call(
        gate_kernel,
        out_shape=jax.ShapeDtypeStruct((C_IN, 1), jnp.float32),
        grid=(1,),
        in_specs=[
            pl.BlockSpec((C_IN, 1), lambda i: (0, 0)),       # s
            pl.BlockSpec((C_MID, C_IN), lambda i: (0, 0)),   # w1
            pl.BlockSpec((C_MID, 1), lambda i: (0, 0)),      # b1
            pl.BlockSpec((C_IN, C_MID), lambda i: (0, 0)),   # w2
            pl.BlockSpec((C_IN, 1), lambda i: (0, 0)),       # b2
        ],
        out_specs=pl.BlockSpec((C_IN, 1), lambda i: (0, 0)),
        compiler_params=pltpu.CompilerParams(
            dimension_semantics=("arbitrary",),
            vmem_limit_bytes=16 << 20,
        ),
        cost_estimate=gate_cost,
    )(s, w1m, b1c, w2m, b2c)

    # --- streaming broadcast-multiply: 2 parallel channel blocks -------------
    mul_cost = pl.CostEstimate(
        flops=C_IN * HW,
        transcendentals=0,
        bytes_accessed=4 * (C_IN + 2 * C_IN * HW),
    )
    out_mat = pl.pallas_call(
        mul_kernel,
        out_shape=jax.ShapeDtypeStruct((C_IN, HW), jnp.float32),
        grid=(N_BLOCKS,),
        in_specs=[
            pl.BlockSpec((C_BLK, 1), lambda i: (i, 0)),      # gate rows for block i
            pl.BlockSpec((C_BLK, HW), lambda i: (i, 0)),     # x rows for block i
        ],
        out_specs=pl.BlockSpec((C_BLK, HW), lambda i: (i, 0)),
        compiler_params=pltpu.CompilerParams(
            dimension_semantics=("parallel",),
            vmem_limit_bytes=16 << 20,
        ),
        cost_estimate=mul_cost,
    )(gate, x_mat)

    # (C, HW) -> NCHW, zero-cost reshape
    return out_mat.reshape(1, C_IN, H, W)


def se_block_ref(x240, x239, w1, b1, w2, b2):
    s = x240.reshape(1, C_IN).astype(jnp.float32)
    w1t = w1.reshape(C_MID, C_IN).T.astype(jnp.float32)
    w2t = w2.reshape(C_IN, C_MID).T.astype(jnp.float32)
    h = jnp.maximum(s @ w1t + b1.reshape(1, C_MID), 0.0)
    g = jax.nn.sigmoid(h @ w2t + b2.reshape(1, C_IN))
    return x239.astype(jnp.float32) * g.reshape(1, C_IN, 1, 1)


if __name__ == "__main__":
    key = jax.random.PRNGKey(0)
    k1, k2, k3, k4, k5, k6 = jax.random.split(key, 6)

    # deterministic synthetic parameters (Conv2d-shaped, scaled like fan-in init)
    w1 = jax.random.normal(k1, (C_MID, C_IN, 1, 1), jnp.float32) * (1.0 / jnp.sqrt(C_IN))
    b1 = jax.random.normal(k2, (C_MID,), jnp.float32) * 0.01
    w2 = jax.random.normal(k3, (C_IN, C_MID, 1, 1), jnp.float32) * (1.0 / jnp.sqrt(C_MID))
    b2 = jax.random.normal(k4, (C_IN,), jnp.float32) * 0.01

    # deterministic example inputs (module's forward shapes)
    x239 = jax.random.normal(k5, (1, C_IN, H, W), jnp.float32)
    x240 = jax.random.normal(k6, (1, C_IN, 1, 1), jnp.float32)

    out = se_block(x240, x239, w1, b1, w2, b2)
    out = jax.block_until_ready(out)

    ref = se_block_ref(x240, x239, w1, b1, w2, b2)
    assert out.shape == (1, C_IN, H, W)
    assert jnp.allclose(out, ref, atol=1e-4, rtol=1e-4)

    print("KERNEL_OK")
</pallas_src>

<mosaic_0001>
module attributes {stable_mosaic.version = 11 : i64} {
  func.func @gate_kernel(%arg0: i32, %arg1: memref<1232x1xf32, #tpu.memory_space<vmem>>, %arg2: memref<308x1232xf32, #tpu.memory_space<vmem>>, %arg3: memref<308x1xf32, #tpu.memory_space<vmem>>, %arg4: memref<1232x308xf32, #tpu.memory_space<vmem>>, %arg5: memref<1232x1xf32, #tpu.memory_space<vmem>>, %arg6: memref<1232x1xf32, #tpu.memory_space<vmem>>) attributes {dimension_semantics = [#tpu.dimension_semantics<arbitrary>], iteration_bounds = array<i64: 1>, scalar_prefetch = 0 : i64, scratch_operands = 0 : i64, tpu.core_type = #tpu.core_type<tc>, window_params = [{pipeline_mode = #tpu.pipeline_mode<synchronous>, transform_indices = @transform_0, window_bounds = array<i64: 1232, 1>}, {pipeline_mode = #tpu.pipeline_mode<synchronous>, transform_indices = @transform_1, window_bounds = array<i64: 308, 1232>}, {pipeline_mode = #tpu.pipeline_mode<synchronous>, transform_indices = @transform_2, window_bounds = array<i64: 308, 1>}, {pipeline_mode = #tpu.pipeline_mode<synchronous>, transform_indices = @transform_3, window_bounds = array<i64: 1232, 308>}, {pipeline_mode = #tpu.pipeline_mode<synchronous>, transform_indices = @transform_4, window_bounds = array<i64: 1232, 1>}, {pipeline_mode = #tpu.pipeline_mode<synchronous>, transform_indices = @transform_5, window_bounds = array<i64: 1232, 1>}]} {
    %c0 = arith.constant 0 : index
    %c0_0 = arith.constant 0 : index
    %0 = vector.load %arg2[%c0, %c0_0] : memref<308x1232xf32, #tpu.memory_space<vmem>>, vector<308x1232xf32>
    %c0_1 = arith.constant 0 : index
    %c0_2 = arith.constant 0 : index
    %1 = vector.load %arg1[%c0_1, %c0_2] : memref<1232x1xf32, #tpu.memory_space<vmem>>, vector<1232x1xf32>
    %cst = arith.constant dense<0.000000e+00> : vector<308x1xf32>
    %2 = tpu.matmul %0, %1, %cst {dimension_numbers = #tpu.dot_dimension_numbers<[1], [0], [0], [1], [0, 0, 1, 1], [], []>} : vector<308x1232xf32>, vector<1232x1xf32>, vector<308x1xf32> -> vector<308x1xf32>
    %c0_3 = arith.constant 0 : index
    %c0_4 = arith.constant 0 : index
    %3 = vector.load %arg3[%c0_3, %c0_4] : memref<308x1xf32, #tpu.memory_space<vmem>>, vector<308x1xf32>
    %4 = arith.addf %2, %3 : vector<308x1xf32>
    %cst_5 = arith.constant 0.000000e+00 : f32
    %5 = vector.broadcast %cst_5 : f32 to vector<308x1xf32>
    %6 = arith.maximumf %4, %5 : vector<308x1xf32>
    %c0_6 = arith.constant 0 : index
    %c0_7 = arith.constant 0 : index
    %7 = vector.load %arg4[%c0_6, %c0_7] : memref<1232x308xf32, #tpu.memory_space<vmem>>, vector<1232x308xf32>
    %cst_8 = arith.constant dense<0.000000e+00> : vector<1232x1xf32>
    %8 = tpu.matmul %7, %6, %cst_8 {dimension_numbers = #tpu.dot_dimension_numbers<[1], [0], [0], [1], [0, 0, 1, 1], [], []>} : vector<1232x308xf32>, vector<308x1xf32>, vector<1232x1xf32> -> vector<1232x1xf32>
    %c0_9 = arith.constant 0 : index
    %c0_10 = arith.constant 0 : index
    %9 = vector.load %arg5[%c0_9, %c0_10] : memref<1232x1xf32, #tpu.memory_space<vmem>>, vector<1232x1xf32>
    %10 = arith.addf %8, %9 : vector<1232x1xf32>
    %11 = arith.negf %10 : vector<1232x1xf32>
    %12 = math.exp %11 : vector<1232x1xf32>
    %cst_11 = arith.constant 1.000000e+00 : f32
    %13 = vector.broadcast %cst_11 : f32 to vector<1232x1xf32>
    %14 = arith.addf %13, %12 : vector<1232x1xf32>
    %15 = arith.divf %13, %14 : vector<1232x1xf32>
    %c0_12 = arith.constant 0 : index
    %c0_13 = arith.constant 0 : index
    %16 = vector.load %arg6[%c0_12, %c0_13] : memref<1232x1xf32, #tpu.memory_space<vmem>>, vector<1232x1xf32>
    tpu.vector_store %arg6[%c0_12, %c0_13], %15 {strides = array<i32>} : memref<1232x1xf32, #tpu.memory_space<vmem>>, vector<1232x1xf32>,
    return
  }
  func.func @transform_0(%arg0: i32) -> (i32, i32) {
    %c0_i32 = arith.constant 0 : i32
    %c0_i32_0 = arith.constant 0 : i32
    %c0_i32_1 = arith.constant 0 : i32
    return %c0_i32, %c0_i32_0 : i32, i32
  }
  func.func @transform_1(%arg0: i32) -> (i32, i32) {
    %c0_i32 = arith.constant 0 : i32
    %c0_i32_0 = arith.constant 0 : i32
    %c0_i32_1 = arith.constant 0 : i32
    return %c0_i32, %c0_i32_0 : i32, i32
  }
  func.func @transform_2(%arg0: i32) -> (i32, i32) {
    %c0_i32 = arith.constant 0 : i32
    %c0_i32_0 = arith.constant 0 : i32
    %c0_i32_1 = arith.constant 0 : i32
    return %c0_i32, %c0_i32_0 : i32, i32
  }
  func.func @transform_3(%arg0: i32) -> (i32, i32) {
    %c0_i32 = arith.constant 0 : i32
    %c0_i32_0 = arith.constant 0 : i32
    %c0_i32_1 = arith.constant 0 : i32
    return %c0_i32, %c0_i32_0 : i32, i32
  }
  func.func @transform_4(%arg0: i32) -> (i32, i32) {
    %c0_i32 = arith.constant 0 : i32
    %c0_i32_0 = arith.constant 0 : i32
    %c0_i32_1 = arith.constant 0 : i32
    return %c0_i32, %c0_i32_0 : i32, i32
  }
  func.func @transform_5(%arg0: i32) -> (i32, i32) {
    %c0_i32 = arith.constant 0 : i32
    %c0_i32_0 = arith.constant 0 : i32
    %c0_i32_1 = arith.constant 0 : i32
    return %c0_i32, %c0_i32_0 : i32, i32
  }
}

</mosaic_0001>

<bundles_post_ra>
// kernel: tpu_custom_call.1
= control target key start
LH: loop header
LB: loop body
LE: loop exit
PB: predicated region body
PF: predicated region fallthrough
CT: control target
= control target key end

     0   :  { %v7941_v0 = vmov 0.0|0.0   ;;  %vm603_vm0 = vcmask 654336   ;;  %vm3139_vm1 = vcmask 1043456   ;;  %vm2676_vm2 = vcmask 424960   ;;  %s12949_s0 = inlined_call_operand.vmem [shape: f32[1232,1], index: 0, kind: input, shape index: {}]   ;;  %s12950_s1 = inlined_call_operand.vmem [shape: f32[308,1232], index: 1, kind: input, shape index: {}]   ;;  %s12951_s2 = inlined_call_operand.vmem [shape: f32[308,1], index: 2, kind: input, shape index: {}]   ;;  %s12952_s3 = inlined_call_operand.vmem [shape: f32[1232,308], index: 3, kind: input, shape index: {}]   ;;  %s12953_s4 = inlined_call_operand.vmem [shape: f32[1232,1], index: 4, kind: input, shape index: {}]   ;;  %s12954_s5 = inlined_call_operand.vmem [shape: f32[1232,1], index: 5, kind: output, shape index: {}]  }
   0x1   :  { %6650 = vmatprep.subr.bf16.mxu0 %v7941_v0  ;;  %v410_v1 = vld [vmem:[%s12949_s0] sm:$0xff]  ;;  %v411_v2 = vld [vmem:[%s12949_s0 + $0x8] sm:$0xff]  ;;  %v412_v3 = vld [vmem:[%s12949_s0 + $0x10] sm:$0xff]  ;;  %6941 = vmatprep.subr.bf16.mxu1 %v7941_v0  ;;  %vm5737_vm3 = vcmask 7168  }
   0x2   :  { %v6651_v4 = vpack.c.bf16 %v411_v2, %v410_v1  ;;  %v413_v5 = vld [vmem:[%s12949_s0 + $0x18] sm:$0xff]  ;;  %v414_v7 = vld [vmem:[%s12949_s0 + $0x20] sm:$0xff]  ;;  %v415_v8 = vld [vmem:[%s12949_s0 + $0x28] sm:$0xff] }
   0x3   :  { %v6654_v6 = vpack.c.bf16 %v413_v5, %v412_v3  ;;  %v6657_v9 = vpack.c.bf16 %v415_v8, %v414_v7  ;;  %v416_v10 = vld [vmem:[%s12949_s0 + $0x30] sm:$0xff]  ;;  %v417_v11 = vld [vmem:[%s12949_s0 + $0x38] sm:$0xff]  ;;  %v21_v12 = vld [vmem:[%s12950_s1 + $0x8] sm:$0xff] }
   0x4   :  { %6652 = vmatpush1.bf16.msra.mxu0 %v6651_v4  ;;  %v6660_v13 = vpack.c.bf16 %v417_v11, %v416_v10  ;;  %785 = vmatprep.mubr.f32.mxu0 %v21_v12  ;;  %v418_v14 = vld [vmem:[%s12949_s0 + $0x40] sm:$0xff]  ;;  %v419_v15 = vld [vmem:[%s12949_s0 + $0x48] sm:$0xff]  ;;  %v420_v17 = vld [vmem:[%s12949_s0 + $0x50] sm:$0xff] }
   0x5   :  { %6653 = vmatprep.subr.bf16.mxu0 %v7941_v0  ;;  %v6663_v16 = vpack.c.bf16 %v419_v15, %v418_v14  ;;  %v421_v18 = vld [vmem:[%s12949_s0 + $0x58] sm:$0xff]  ;;  %v422_v20 = vld [vmem:[%s12949_s0 + $0x60] sm:$0xff]  ;;  %v423_v21 = vld [vmem:[%s12949_s0 + $0x68] sm:$0xff] }
   0x6   :  { %v6666_v19 = vpack.c.bf16 %v421_v18, %v420_v17  ;;  %v6669_v22 = vpack.c.bf16 %v423_v21, %v422_v20  ;;  %v424_v23 = vld [vmem:[%s12949_s0 + $0x70] sm:$0xff]  ;;  %v425_v24 = vld [vmem:[%s12949_s0 + $0x78] sm:$0xff]  ;;  %v426_v26 = vld [vmem:[%s12949_s0 + $0x80] sm:$0xff] }
   0x7   :  { %v6672_v25 = vpack.c.bf16 %v425_v24, %v424_v23  ;;  %v427_v27 = vld [vmem:[%s12949_s0 + $0x88] sm:$0xff]  ;;  %v428_v29 = vld [vmem:[%s12949_s0 + $0x90] sm:$0xff]  ;;  %v429_v30 = vld [vmem:[%s12949_s0 + $0x98] sm:$0xff] }
   0x8   :  { %6655 = vmatpush1.bf16.msra.mxu0 %v6654_v6  ;;  %v6675_v28 = vpack.c.bf16 %v427_v27, %v426_v26  ;;  %v6678_v31 = vpack.c.bf16 %v429_v30, %v428_v29  ;;  %v430_v32 = vld [vmem:[%s12949_s0 + $0xa0] sm:$0xff]  ;;  %v431_v33 = vld [vmem:[%s12949_s0 + $0xa8] sm:$0xff]  ;;  %v432_v35 = vld [vmem:[%s12949_s0 + $0xb0] sm:$0xff] }
   0x9   :  { %6656 = vmatprep.subr.bf16.mxu0 %v7941_v0  ;;  %v6681_v34 = vpack.c.bf16 %v431_v33, %v430_v32  ;;  %v433_v36 = vld [vmem:[%s12949_s0 + $0xb8] sm:$0xff]  ;;  %v434_v38 = vld [vmem:[%s12949_s0 + $0xc0] sm:$0xff]  ;;  %v435_v39 = vld [vmem:[%s12949_s0 + $0xc8] sm:$0xff] }
   0xa   :  { %v6684_v37 = vpack.c.bf16 %v433_v36, %v432_v35  ;;  %v6687_v40 = vpack.c.bf16 %v435_v39, %v434_v38  ;;  %v436_v41 = vld [vmem:[%s12949_s0 + $0xd0] sm:$0xff]  ;;  %v437_v42 = vld [vmem:[%s12949_s0 + $0xd8] sm:$0xff]  ;;  %v438_v44 = vld [vmem:[%s12949_s0 + $0xe0] sm:$0xff] }
   0xb   :  { %v6690_v43 = vpack.c.bf16 %v437_v42, %v436_v41  ;;  %v439_v45 = vld [vmem:[%s12949_s0 + $0xe8] sm:$0xff]  ;;  %v440_v47 = vld [vmem:[%s12949_s0 + $0xf0] sm:$0xff]  ;;  %v441_v48 = vld [vmem:[%s12949_s0 + $0xf8] sm:$0xff] }
   0xc   :  { %6658 = vmatpush1.bf16.msra.mxu0 %v6657_v9  ;;  %v6693_v46 = vpack.c.bf16 %v439_v45, %v438_v44  ;;  %v6696_v49 = vpack.c.bf16 %v441_v48, %v440_v47  ;;  %v442_v50 = vld [vmem:[%s12949_s0 + $0x100] sm:$0xff]  ;;  %v443_v51 = vld [vmem:[%s12949_s0 + $0x108] sm:$0xff]  ;;  %v31_v54 = vld [vmem:[%s12950_s1 + $0x58] sm:$0xff] }
   0xd   :  { %6659 = vmatprep.subr.bf16.mxu0 %v7941_v0  ;;  %v20_v52 = vld [vmem:[%s12950_s1] sm:$0xff]  ;;  %v6699_v53 = vpack.c.bf16 %v443_v51, %v442_v50  ;;  %v444_v55 = vld [vmem:[%s12949_s0 + $0x110] sm:$0xff]  ;;  %v445_v56 = vld [vmem:[%s12949_s0 + $0x118] sm:$0xff] }
   0xe   :  { %v30_v57 = vld [vmem:[%s12950_s1 + $0x50] sm:$0xff]  ;;  %v6702_v58 = vpack.c.bf16 %v445_v56, %v444_v55  ;;  %v41_v59 = vld [vmem:[%s12950_s1 + $0xa8] sm:$0xff]  ;;  %v446_v60 = vld [vmem:[%s12949_s0 + $0x120] sm:$0xff] }
   0xf   :  { %v447_v61 = vld [vmem:[%s12949_s0 + $0x128] sm:$0xff]  ;;  %v40_v62 = vld [vmem:[%s12950_s1 + $0xa0] sm:$0xff]  ;;  %v51_v1 = vld [vmem:[%s12950_s1 + $0xf8] sm:$0xff] }
  0x10   :  { %6661 = vmatpush1.bf16.msra.mxu0 %v6660_v13  ;;  %v6705_v63 = vpack.c.bf16 %v447_v61, %v446_v60  ;;  %v448_v2 = vld [vmem:[%s12949_s0 + $0x130] sm:$0xff]  ;;  %v449_v3 = vld [vmem:[%s12949_s0 + $0x138] sm:$0xff]  ;;  %v61_v6 = vld [vmem:[%s12950_s1 + $0x148] sm:$0xff] }
  0x11   :  { %6662 = vmatprep.subr.bf16.mxu0 %v7941_v0  ;;  %v50_v4 = vld [vmem:[%s12950_s1 + $0xf0] sm:$0xff]  ;;  %v6708_v5 = vpack.c.bf16 %v449_v3, %v448_v2  ;;  %v450_v7 = vld [vmem:[%s12949_s0 + $0x140] sm:$0xff]  ;;  %v451_v8 = vld [vmem:[%s12949_s0 + $0x148] sm:$0xff] }
  0x12   :  { %v60_v9 = vld [vmem:[%s12950_s1 + $0x140] sm:$0xff]  ;;  %v6711_v10 = vpack.c.bf16 %v451_v8, %v450_v7  ;;  %v71_v11 = vld [vmem:[%s12950_s1 + $0x198] sm:$0xff]  ;;  %v452_v12 = vld [vmem:[%s12949_s0 + $0x150] sm:$0xff] }
  0x13   :  { %v453_v13 = vld [vmem:[%s12949_s0 + $0x158] sm:$0xff]  ;;  %v70_v14 = vld [vmem:[%s12950_s1 + $0x190] sm:$0xff]  ;;  %v454_v17 = vld [vmem:[%s12949_s0 + $0x160] sm:$0xff] }
  0x14   :  { %6664 = vmatpush1.bf16.msra.mxu0 %v6663_v16  ;;  %v6714_v15 = vpack.c.bf16 %v453_v13, %v452_v12  ;;  %v81_v16 = vld [vmem:[%s12950_s1 + $0x1e8] sm:$0xff]  ;;  %v91_v21 = vld [vmem:[%s12950_s1 + $0x238] sm:$0xff]  ;;  %v90_v24 = vld [vmem:[%s12950_s1 + $0x230] sm:$0xff] }
  0x15   :  { %6665 = vmatprep.subr.bf16.mxu0 %v7941_v0  ;;  %v455_v18 = vld [vmem:[%s12949_s0 + $0x168] sm:$0xff]  ;;  %v457_v23 = vld [vmem:[%s12949_s0 + $0x178] sm:$0xff]  ;;  %v458_v27 = vld [vmem:[%s12949_s0 + $0x180] sm:$0xff] }
  0x16   :  { %v6717_v20 = vpack.c.bf16 %v455_v18, %v454_v17  ;;  %v101_v26 = vld [vmem:[%s12950_s1 + $0x288] sm:$0xff]  ;;  %v100_v29 = vld [vmem:[%s12950_s1 + $0x280] sm:$0xff]  ;;  %v460_v32 = vld [vmem:[%s12949_s0 + $0x190] sm:$0xff] }
  0x17   :  { %v461_v33 = vld [vmem:[%s12949_s0 + $0x198] sm:$0xff]  ;;  %v121_v36 = vld [vmem:[%s12950_s1 + $0x328] sm:$0xff]  ;;  %v120_v39 = vld [vmem:[%s12950_s1 + $0x320] sm:$0xff] }
  0x18   :  { %6667 = vmatpush1.bf16.msra.mxu0 %v6666_v19  ;;  %v80_v19 = vld [vmem:[%s12950_s1 + $0x1e0] sm:$0xff]  ;;  %v6726_v35 = vpack.c.bf16 %v461_v33, %v460_v32  ;;  %v463_v38 = vld [vmem:[%s12949_s0 + $0x1a8] sm:$0xff]  ;;  %v131_v41 = vld [vmem:[%s12950_s1 + $0x378] sm:$0xff] }
  0x19   :  { %6668 = vmatprep.subr.bf16.mxu0 %v7941_v0  ;;  %v464_v42 = vld [vmem:[%s12949_s0 + $0x1b0] sm:$0xff]  ;;  %v466_v47 = vld [vmem:[%s12949_s0 + $0x1c0] sm:$0xff]  ;;  %v467_v48 = vld [vmem:[%s12949_s0 + $0x1c8] sm:$0xff] }
  0x1a   :  { %v130_v44 = vld [vmem:[%s12950_s1 + $0x370] sm:$0xff]  ;;  %v6735_v50 = vpack.c.bf16 %v467_v48, %v466_v47  ;;  %v151_v51 = vld [vmem:[%s12950_s1 + $0x418] sm:$0xff]  ;;  %v161_v56 = vld [vmem:[%s12950_s1 + $0x468] sm:$0xff] }
  0x1b   :  { %v171_v61 = vld [vmem:[%s12950_s1 + $0x4b8] sm:$0xff]  ;;  %v181_v3 = vld [vmem:[%s12950_s1 + $0x508] sm:$0xff]  ;;  %v200_v8 = vld [vmem:[%s12950_s1 + $0x5a0] sm:$0xff] }
  0x1c   :  { %6670 = vmatpush1.bf16.msra.mxu0 %v6669_v22  ;;  %v456_v22 = vld [vmem:[%s12949_s0 + $0x170] sm:$0xff]  ;;  %v201_v7 = vld [vmem:[%s12950_s1 + $0x5a8] sm:$0xff]  ;;  %v220_v12 = vld [vmem:[%s12950_s1 + $0x640] sm:$0xff] }
  0x1d   :  { %6671 = vmatprep.subr.bf16.mxu0 %v7941_v0  ;;  %v231_v13 = vld [vmem:[%s12950_s1 + $0x698] sm:$0xff]  ;;  %v250_v18 = vld [vmem:[%s12950_s1 + $0x730] sm:$0xff]  ;;  %v320_v32 = vld [vmem:[%s12950_s1 + $0x960] sm:$0xff] }
  0x1e   :  { %v251_v17 = vld [vmem:[%s12950_s1 + $0x738] sm:$0xff]  ;;  %v401_v47 = vld [vmem:[%s12950_s1 + $0xbe8] sm:$0xf]  ;;  %v400_v48 = vld [vmem:[%s12950_s1 + $0xbe0] sm:$0xf] }
  0x1f   :  { %v331_v33 = vld [vmem:[%s12950_s1 + $0x9b8] sm:$0xff] }
  0x20   :  { %6673 = vmatpush1.bf16.msra.mxu0 %v6672_v25  ;;  %v6720_v25 = vpack.c.bf16 %v457_v23, %v456_v22  ;;  %v270_v22 = vld [vmem:[%s12950_s1 + $0x7d0] sm:$0xff]  ;;  %v281_v23 = vld [vmem:[%s12950_s1 + $0x828] sm:$0xff] }
  0x21   :  { %6674 = vmatprep.subr.bf16.mxu0 %v7941_v0 }
  0x24   :  { %6676 = vmatpush1.bf16.msra.mxu0 %v6675_v28  ;;  %v459_v28 = vld [vmem:[%s12949_s0 + $0x188] sm:$0xff] }
  0x25   :  { %6677 = vmatprep.subr.bf16.mxu0 %v7941_v0  ;;  %v6723_v30 = vpack.c.bf16 %v459_v28, %v458_v27  ;;  %v301_v27 = vld [vmem:[%s12950_s1 + $0x8c8] sm:$0xff]  ;;  %v300_v28 = vld [vmem:[%s12950_s1 + $0x8c0] sm:$0xff] }
  0x28   :  { %6679 = vmatpush1.bf16.msra.mxu0 %v6678_v31  ;;  %v111_v31 = vld [vmem:[%s12950_s1 + $0x2d8] sm:$0xff] }
  0x29   :  { %6680 = vmatprep.subr.bf16.mxu0 %v7941_v0 }
  0x2c   :  { %6682 = vmatpush1.bf16.msra.mxu0 %v6681_v34  ;;  %v110_v34 = vld [vmem:[%s12950_s1 + $0x2d0] sm:$0xff] }
  0x2d   :  { %6683 = vmatprep.subr.bf16.mxu0 %v7941_v0 }
  0x30   :  { %6685 = vmatpush1.bf16.msra.mxu0 %v6684_v37  ;;  %v462_v37 = vld [vmem:[%s12949_s0 + $0x1a0] sm:$0xff] }
  0x31   :  { %6686 = vmatprep.subr.bf16.mxu0 %v7941_v0 }
  0x34   :  { %6688 = vmatpush1.bf16.msra.mxu0 %v6687_v40  ;;  %v6729_v40 = vpack.c.bf16 %v463_v38, %v462_v37  ;;  %v351_v37 = vld [vmem:[%s12950_s1 + $0xa58] sm:$0xff]  ;;  %v350_v38 = vld [vmem:[%s12950_s1 + $0xa50] sm:$0xff] }
  0x35   :  { %6689 = vmatprep.subr.bf16.mxu0 %v7941_v0 }
  0x38   :  { %6691 = vmatpush1.bf16.msra.mxu0 %v6690_v43  ;;  %v465_v43 = vld [vmem:[%s12949_s0 + $0x1b8] sm:$0xff] }
  0x39   :  { %6692 = vmatprep.subr.bf16.mxu0 %v7941_v0  ;;  %v6732_v45 = vpack.c.bf16 %v465_v43, %v464_v42  ;;  %v370_v42 = vld [vmem:[%s12950_s1 + $0xaf0] sm:$0xff]  ;;  %v381_v43 = vld [vmem:[%s12950_s1 + $0xb48] sm:$0xff] }
  0x3c   :  { %6694 = vmatpush1.bf16.msra.mxu0 %v6693_v46  ;;  %v141_v46 = vld [vmem:[%s12950_s1 + $0x3c8] sm:$0xff] }
  0x3d   :  { %6695 = vmatprep.subr.bf16.mxu0 %v7941_v0 }
  0x40   :  { %6697 = vmatpush1.bf16.msra.mxu0 %v6696_v49  ;;  %v140_v49 = vld [vmem:[%s12950_s1 + $0x3c0] sm:$0xff] }
  0x41   :  { %6698 = vmatprep.subr.bf16.mxu0 %v7941_v0 }
  0x43   :  { %786 = vmatmul.mubr.f32.vlgmr.msra.gmra.mrb[0].mxu0 %v20_v52  ;;  %v468_v52 = vld [vmem:[%s12949_s0 + $0x1d0] sm:$0xff] }
  0x44   :  { %790 = vmatprep.mubr.f32.mxu0 %v31_v54  ;;  %6700 = vmatpush1.bf16.msra.mxu0 %v6699_v53  ;;  %v469_v53 = vld [vmem:[%s12949_s0 + $0x1d8] sm:$0xff]  ;;  %v150_v54 = vld [vmem:[%s12950_s1 + $0x410] sm:$0xff] }
  0x45   :  { %6701 = vmatprep.subr.bf16.mxu0 %v7941_v0  ;;  %v6738_v55 = vpack.c.bf16 %v469_v53, %v468_v52  ;;  %v22_v52 = vld [vmem:[%s12950_s1 + $0x10] sm:$0xff] }
  0x47   :  { %791 = vmatmul.mubr.f32.gmra.mrb[2].mxu0 %v30_v57  ;;  %v470_v57 = vld [vmem:[%s12949_s0 + $0x1e0] sm:$0xff] }
  0x48   :  { %795 = vmatprep.mubr.f32.mxu0 %v41_v59  ;;  %6703 = vmatpush1.bf16.msra.mxu0 %v6702_v58  ;;  %v471_v58 = vld [vmem:[%s12949_s0 + $0x1e8] sm:$0xff]  ;;  %v160_v59 = vld [vmem:[%s12950_s1 + $0x460] sm:$0xff] }
  0x49   :  { %6704 = vmatprep.subr.bf16.mxu0 %v7941_v0  ;;  %v6741_v60 = vpack.c.bf16 %v471_v58, %v470_v57  ;;  %v32_v57 = vld [vmem:[%s12950_s1 + $0x60] sm:$0xff] }
  0x4b   :  { %796 = vmatmul.mubr.f32.gmra.mrb[4].mxu0 %v40_v62  ;;  %v472_v62 = vld [vmem:[%s12949_s0 + $0x1f0] sm:$0xff] }
  0x4c   :  { %800 = vmatprep.mubr.f32.mxu0 %v51_v1  ;;  %6706 = vmatpush1.bf16.msra.mxu0 %v6705_v63  ;;  %v473_v63 = vld [vmem:[%s12949_s0 + $0x1f8] sm:$0xff]  ;;  %v170_v1 = vld [vmem:[%s12950_s1 + $0x4b0] sm:$0xff] }
  0x4d   :  { %6707 = vmatprep.subr.bf16.mxu0 %v7941_v0  ;;  %v6744_v2 = vpack.c.bf16 %v473_v63, %v472_v62  ;;  %v42_v62 = vld [vmem:[%s12950_s1 + $0xb0] sm:$0xff] }
  0x4f   :  { %801 = vmatmul.mubr.f32.gmra.mrb[6].mxu0 %v50_v4  ;;  %v180_v4 = vld [vmem:[%s12950_s1 + $0x500] sm:$0xff] }
  0x50   :  { %805 = vmatprep.mubr.f32.mxu0 %v61_v6  ;;  %6709 = vmatpush1.bf16.msra.mxu0 %v6708_v5  ;;  %v191_v5 = vld [vmem:[%s12950_s1 + $0x558] sm:$0xff]  ;;  %v190_v6 = vld [vmem:[%s12950_s1 + $0x550] sm:$0xff] }
  0x51   :  { %6710 = vmatprep.subr.bf16.mxu0 %v7941_v0 }
  0x53   :  { %806 = vmatmul.mubr.f32.gmra.mrb[8].mxu0 %v60_v9  ;;  %v211_v9 = vld [vmem:[%s12950_s1 + $0x5f8] sm:$0xff] }
  0x54   :  { %810 = vmatprep.mubr.f32.mxu0 %v71_v11  ;;  %6712 = vmatpush1.bf16.msra.mxu0 %v6711_v10  ;;  %v210_v10 = vld [vmem:[%s12950_s1 + $0x5f0] sm:$0xff]  ;;  %v221_v11 = vld [vmem:[%s12950_s1 + $0x648] sm:$0xff] }
  0x55   :  { %6713 = vmatprep.subr.bf16.mxu0 %v7941_v0 }
  0x57   :  { %811 = vmatmul.mubr.f32.gmra.mrb[10].mxu0 %v70_v14  ;;  %v230_v14 = vld [vmem:[%s12950_s1 + $0x690] sm:$0xff] }
  0x58   :  { %815 = vmatprep.mubr.f32.mxu0 %v81_v16  ;;  %6715 = vmatpush1.bf16.msra.mxu0 %v6714_v15  ;;  %v241_v15 = vld [vmem:[%s12950_s1 + $0x6e8] sm:$0xff]  ;;  %v240_v16 = vld [vmem:[%s12950_s1 + $0x6e0] sm:$0xff] }
  0x59   :  { %6716 = vmatprep.subr.bf16.mxu0 %v7941_v0 }
  0x5b   :  { %816 = vmatmul.mubr.f32.gmra.mrb[12].mxu0 %v80_v19  ;;  %v261_v19 = vld [vmem:[%s12950_s1 + $0x788] sm:$0xff] }
  0x5c   :  { %820 = vmatprep.mubr.f32.mxu0 %v91_v21  ;;  %6718 = vmatpush1.bf16.msra.mxu0 %v6717_v20  ;;  %v260_v20 = vld [vmem:[%s12950_s1 + $0x780] sm:$0xff]  ;;  %v271_v21 = vld [vmem:[%s12950_s1 + $0x7d8] sm:$0xff] }
  0x5d   :  { %6719 = vmatprep.subr.bf16.mxu0 %v7941_v0 }
  0x5f   :  { %821 = vmatmul.mubr.f32.gmra.mrb[14].mxu0 %v90_v24  ;;  %v280_v24 = vld [vmem:[%s12950_s1 + $0x820] sm:$0xff] }
  0x60   :  { %825 = vmatprep.mubr.f32.mxu0 %v101_v26  ;;  %6721 = vmatpush1.bf16.msra.mxu0 %v6720_v25  ;;  %v291_v25 = vld [vmem:[%s12950_s1 + $0x878] sm:$0xff]  ;;  %v290_v26 = vld [vmem:[%s12950_s1 + $0x870] sm:$0xff] }
  0x61   :  { %6722 = vmatprep.subr.bf16.mxu0 %v7941_v0 }
  0x63   :  { %826 = vmatmul.mubr.f32.gmra.mrb[16].mxu0 %v100_v29  ;;  %v311_v29 = vld [vmem:[%s12950_s1 + $0x918] sm:$0xff] }
  0x64   :  { %830 = vmatprep.mubr.f32.mxu0 %v111_v31  ;;  %6724 = vmatpush1.bf16.msra.mxu0 %v6723_v30  ;;  %v310_v30 = vld [vmem:[%s12950_s1 + $0x910] sm:$0xff]  ;;  %v321_v31 = vld [vmem:[%s12950_s1 + $0x968] sm:$0xff] }
  0x65   :  { %6725 = vmatprep.subr.bf16.mxu0 %v7941_v0 }
  0x67   :  { %831 = vmatmul.mubr.f32.gmra.mrb[18].mxu0 %v110_v34  ;;  %v330_v34 = vld [vmem:[%s12950_s1 + $0x9b0] sm:$0xff] }
  0x68   :  { %835 = vmatprep.mubr.f32.mxu0 %v121_v36  ;;  %6727 = vmatpush1.bf16.msra.mxu0 %v6726_v35  ;;  %v341_v35 = vld [vmem:[%s12950_s1 + $0xa08] sm:$0xff]  ;;  %v340_v36 = vld [vmem:[%s12950_s1 + $0xa00] sm:$0xff] }
  0x69   :  { %6728 = vmatprep.subr.bf16.mxu0 %v7941_v0 }
  0x6b   :  { %836 = vmatmul.mubr.f32.gmra.mrb[20].mxu0 %v120_v39  ;;  %v361_v39 = vld [vmem:[%s12950_s1 + $0xaa8] sm:$0xff] }
  0x6c   :  { %840 = vmatprep.mubr.f32.mxu0 %v131_v41  ;;  %6730 = vmatpush1.bf16.msra.mxu0 %v6729_v40  ;;  %v360_v40 = vld [vmem:[%s12950_s1 + $0xaa0] sm:$0xff]  ;;  %v371_v41 = vld [vmem:[%s12950_s1 + $0xaf8] sm:$0xff] }
  0x6d   :  { %6731 = vmatprep.subr.bf16.mxu0 %v7941_v0 }
  0x6f   :  { %841 = vmatmul.mubr.f32.gmra.mrb[22].mxu0 %v130_v44  ;;  %v380_v44 = vld [vmem:[%s12950_s1 + $0xb40] sm:$0xff] }
  0x70   :  { %845 = vmatprep.mubr.f32.mxu0 %v141_v46  ;;  %6733 = vmatpush1.bf16.msra.mxu0 %v6732_v45  ;;  %v391_v45 = vld [vmem:[%s12950_s1 + $0xb98] sm:$0xff]  ;;  %v390_v46 = vld [vmem:[%s12950_s1 + $0xb90] sm:$0xff] }
  0x71   :  { %6734 = vmatprep.subr.bf16.mxu0 %v7941_v0 }
  0x73   :  { %846 = vmatmul.mubr.f32.gmra.mrb[24].mxu0 %v140_v49  ;;  %v23_v49 = vld [vmem:[%s12950_s1 + $0x18] sm:$0xff] }
  0x74   :  { %850 = vmatprep.mubr.f32.mxu0 %v151_v51  ;;  %6736 = vmatpush1.bf16.msra.mxu0 %v6735_v50  ;;  %v474_v50 = vld [vmem:[%s12949_s0 + $0x200] sm:$0xff]  ;;  %v475_v51 = vld [vmem:[%s12949_s0 + $0x208] sm:$0xff] }
  0x75   :  { %6737 = vmatprep.subr.bf16.mxu0 %v7941_v0  ;;  %v6747_v53 = vpack.c.bf16 %v475_v51, %v474_v50  ;;  %v153_v51 = vld [vmem:[%s12950_s1 + $0x428] sm:$0xff] }
  0x77   :  { %851 = vmatmul.mubr.f32.gmra.mrb[26].mxu0 %v150_v54  ;;  %v33_v54 = vld [vmem:[%s12950_s1 + $0x68] sm:$0xff] }
  0x78   :  { %855 = vmatprep.mubr.f32.mxu0 %v161_v56  ;;  %6739 = vmatpush1.bf16.msra.mxu0 %v6738_v55  ;;  %v476_v55 = vld [vmem:[%s12949_s0 + $0x210] sm:$0xff]  ;;  %v477_v56 = vld [vmem:[%s12949_s0 + $0x218] sm:$0xff] }
  0x79   :  { %6740 = vmatprep.subr.bf16.mxu0 %v7941_v0  ;;  %v6750_v58 = vpack.c.bf16 %v477_v56, %v476_v55  ;;  %v163_v56 = vld [vmem:[%s12950_s1 + $0x478] sm:$0xff] }
  0x7b   :  { %856 = vmatmul.mubr.f32.gmra.mrb[28].mxu0 %v160_v59  ;;  %v43_v59 = vld [vmem:[%s12950_s1 + $0xb8] sm:$0xff] }
  0x7c   :  { %860 = vmatprep.mubr.f32.mxu0 %v171_v61  ;;  %6742 = vmatpush1.bf16.msra.mxu0 %v6741_v60  ;;  %v478_v60 = vld [vmem:[%s12949_s0 + $0x220] sm:$0xff]  ;;  %v479_v61 = vld [vmem:[%s12949_s0 + $0x228] sm:$0xff] }
  0x7d   :  { %6743 = vmatprep.subr.bf16.mxu0 %v7941_v0  ;;  %v6753_v63 = vpack.c.bf16 %v479_v61, %v478_v60  ;;  %v173_v61 = vld [vmem:[%s12950_s1 + $0x4c8] sm:$0xff] }
  0x7f   :  { %861 = vmatmul.mubr.f32.gmra.mrb[30].mxu0 %v170_v1  ;;  %v53_v1 = vld [vmem:[%s12950_s1 + $0x108] sm:$0xff] }
  0x80   :  { %865 = vmatprep.mubr.f32.mxu0 %v181_v3  ;;  %6745 = vmatpush1.bf16.msra.mxu0 %v6744_v2  ;;  %v480_v2 = vld [vmem:[%s12949_s0 + $0x230] sm:$0xff]  ;;  %v481_v3 = vld [vmem:[%s12949_s0 + $0x238] sm:$0xff] }
  0x81   :  { %6746 = vmatprep.subr.bf16.mxu0 %v7941_v0 }
  0x83   :  { %866 = vmatmul.mubr.f32.gmra.mrb[32].mxu0 %v180_v4  ;;  %v52_v4 = vld [vmem:[%s12950_s1 + $0x100] sm:$0xff] }
  0x84   :  { %870 = vmatprep.mubr.f32.mxu0 %v191_v5  ;;  %v6756_v5 = vpack.c.bf16 %v481_v3, %v480_v2  ;;  %v183_v3 = vld [vmem:[%s12950_s1 + $0x518] sm:$0xff] }
  0x87   :  { %871 = vmatmul.mubr.f32.gmra.mrb[34].mxu0 %v190_v6  ;;  %v63_v6 = vld [vmem:[%s12950_s1 + $0x158] sm:$0xff] }
  0x88   :  { %875 = vmatprep.mubr.f32.mxu0 %v201_v7  ;;  %v482_v7 = vld [vmem:[%s12949_s0 + $0x240] sm:$0xff] }
  0x8b   :  { %876 = vmatmul.mubr.f32.gmra.mrb[36].mxu0 %v200_v8  ;;  %v483_v8 = vld [vmem:[%s12949_s0 + $0x248] sm:$0xff] }
  0x8c   :  { %880 = vmatprep.mubr.f32.mxu0 %v211_v9  ;;  %v62_v9 = vld [vmem:[%s12950_s1 + $0x150] sm:$0xff] }
  0x8f   :  { %881 = vmatmul.mubr.f32.gmra.mrb[38].mxu0 %v210_v10  ;;  %v6759_v10 = vpack.c.bf16 %v483_v8, %v482_v7  ;;  %v203_v7 = vld [vmem:[%s12950_s1 + $0x5b8] sm:$0xff]  ;;  %v202_v8 = vld [vmem:[%s12950_s1 + $0x5b0] sm:$0xff] }
  0x90   :  { %885 = vmatprep.mubr.f32.mxu0 %v221_v11  ;;  %v73_v11 = vld [vmem:[%s12950_s1 + $0x1a8] sm:$0xff] }
  0x93   :  { %886 = vmatmul.mubr.f32.gmra.mrb[40].mxu0 %v220_v12  ;;  %v484_v12 = vld [vmem:[%s12949_s0 + $0x250] sm:$0xff] }
  0x94   :  { %890 = vmatprep.mubr.f32.mxu0 %v231_v13  ;;  %v485_v13 = vld [vmem:[%s12949_s0 + $0x258] sm:$0xff] }
  0x97   :  { %891 = vmatmul.mubr.f32.gmra.mrb[42].mxu0 %v230_v14  ;;  %v72_v14 = vld [vmem:[%s12950_s1 + $0x1a0] sm:$0xff] }
  0x98   :  { %895 = vmatprep.mubr.f32.mxu0 %v241_v15  ;;  %v6762_v15 = vpack.c.bf16 %v485_v13, %v484_v12  ;;  %v222_v12 = vld [vmem:[%s12950_s1 + $0x650] sm:$0xff]  ;;  %v233_v13 = vld [vmem:[%s12950_s1 + $0x6a8] sm:$0xff] }
  0x9b   :  { %896 = vmatmul.mubr.f32.gmra.mrb[44].mxu0 %v240_v16  ;;  %v83_v16 = vld [vmem:[%s12950_s1 + $0x1f8] sm:$0xff] }
  0x9c   :  { %900 = vmatprep.mubr.f32.mxu0 %v251_v17  ;;  %v486_v17 = vld [vmem:[%s12949_s0 + $0x260] sm:$0xff] }
  0x9f   :  { %901 = vmatmul.mubr.f32.gmra.mrb[46].mxu0 %v250_v18  ;;  %v487_v18 = vld [vmem:[%s12949_s0 + $0x268] sm:$0xff] }
  0xa0   :  { %905 = vmatprep.mubr.f32.mxu0 %v261_v19  ;;  %v82_v19 = vld [vmem:[%s12950_s1 + $0x1f0] sm:$0xff] }
  0xa3   :  { %906 = vmatmul.mubr.f32.gmra.mrb[48].mxu0 %v260_v20  ;;  %v6765_v20 = vpack.c.bf16 %v487_v18, %v486_v17  ;;  %v253_v17 = vld [vmem:[%s12950_s1 + $0x748] sm:$0xff]  ;;  %v252_v18 = vld [vmem:[%s12950_s1 + $0x740] sm:$0xff] }
  0xa4   :  { %910 = vmatprep.mubr.f32.mxu0 %v271_v21  ;;  %v93_v21 = vld [vmem:[%s12950_s1 + $0x248] sm:$0xff] }
  0xa7   :  { %911 = vmatmul.mubr.f32.gmra.mrb[50].mxu0 %v270_v22  ;;  %v488_v22 = vld [vmem:[%s12949_s0 + $0x270] sm:$0xff] }
  0xa8   :  { %915 = vmatprep.mubr.f32.mxu0 %v281_v23  ;;  %v489_v23 = vld [vmem:[%s12949_s0 + $0x278] sm:$0xff] }
  0xab   :  { %916 = vmatmul.mubr.f32.gmra.mrb[52].mxu0 %v280_v24  ;;  %v92_v24 = vld [vmem:[%s12950_s1 + $0x240] sm:$0xff] }
  0xac   :  { %920 = vmatprep.mubr.f32.mxu0 %v291_v25  ;;  %v6768_v25 = vpack.c.bf16 %v489_v23, %v488_v22  ;;  %v272_v22 = vld [vmem:[%s12950_s1 + $0x7e0] sm:$0xff]  ;;  %v283_v23 = vld [vmem:[%s12950_s1 + $0x838] sm:$0xff] }
  0xaf   :  { %921 = vmatmul.mubr.f32.gmra.mrb[54].mxu0 %v290_v26  ;;  %v103_v26 = vld [vmem:[%s12950_s1 + $0x298] sm:$0xff] }
  0xb0   :  { %925 = vmatprep.mubr.f32.mxu0 %v301_v27  ;;  %v490_v27 = vld [vmem:[%s12949_s0 + $0x280] sm:$0xff] }
  0xb3   :  { %926 = vmatmul.mubr.f32.gmra.mrb[56].mxu0 %v300_v28  ;;  %v491_v28 = vld [vmem:[%s12949_s0 + $0x288] sm:$0xff] }
  0xb4   :  { %930 = vmatprep.mubr.f32.mxu0 %v311_v29  ;;  %v102_v29 = vld [vmem:[%s12950_s1 + $0x290] sm:$0xff] }
  0xb7   :  { %931 = vmatmul.mubr.f32.gmra.mrb[58].mxu0 %v310_v30  ;;  %v6771_v30 = vpack.c.bf16 %v491_v28, %v490_v27  ;;  %v303_v27 = vld [vmem:[%s12950_s1 + $0x8d8] sm:$0xff]  ;;  %v302_v28 = vld [vmem:[%s12950_s1 + $0x8d0] sm:$0xff] }
  0xb8   :  { %935 = vmatprep.mubr.f32.mxu0 %v321_v31  ;;  %v113_v31 = vld [vmem:[%s12950_s1 + $0x2e8] sm:$0xff] }
  0xbb   :  { %936 = vmatmul.mubr.f32.gmra.mrb[60].mxu0 %v320_v32  ;;  %v492_v32 = vld [vmem:[%s12949_s0 + $0x290] sm:$0xff] }
  0xbc   :  { %940 = vmatprep.mubr.f32.mxu0 %v331_v33  ;;  %v493_v33 = vld [vmem:[%s12949_s0 + $0x298] sm:$0xff] }
  0xbf   :  { %941 = vmatmul.mubr.f32.gmra.mrb[62].mxu0 %v330_v34  ;;  %v112_v34 = vld [vmem:[%s12950_s1 + $0x2e0] sm:$0xff] }
  0xc0   :  { %945 = vmatprep.mubr.f32.mxu0 %v341_v35  ;;  %v6774_v35 = vpack.c.bf16 %v493_v33, %v492_v32  ;;  %v322_v32 = vld [vmem:[%s12950_s1 + $0x970] sm:$0xff]  ;;  %v333_v33 = vld [vmem:[%s12950_s1 + $0x9c8] sm:$0xff] }
  0xc3   :  { %946 = vmatmul.mubr.f32.gmra.mrb[64].mxu0 %v340_v36  ;;  %v123_v36 = vld [vmem:[%s12950_s1 + $0x338] sm:$0xff] }
  0xc4   :  { %950 = vmatprep.mubr.f32.mxu0 %v351_v37  ;;  %v494_v37 = vld [vmem:[%s12949_s0 + $0x2a0] sm:$0xff] }
  0xc7   :  { %951 = vmatmul.mubr.f32.gmra.mrb[66].mxu0 %v350_v38  ;;  %v495_v38 = vld [vmem:[%s12949_s0 + $0x2a8] sm:$0xff] }
  0xc8   :  { %955 = vmatprep.mubr.f32.mxu0 %v361_v39  ;;  %v122_v39 = vld [vmem:[%s12950_s1 + $0x330] sm:$0xff] }
  0xcb   :  { %956 = vmatmul.mubr.f32.gmra.mrb[68].mxu0 %v360_v40  ;;  %v6777_v40 = vpack.c.bf16 %v495_v38, %v494_v37  ;;  %v353_v37 = vld [vmem:[%s12950_s1 + $0xa68] sm:$0xff]  ;;  %v352_v38 = vld [vmem:[%s12950_s1 + $0xa60] sm:$0xff] }
  0xcc   :  { %960 = vmatprep.mubr.f32.mxu0 %v371_v41  ;;  %v133_v41 = vld [vmem:[%s12950_s1 + $0x388] sm:$0xff] }
  0xcf   :  { %961 = vmatmul.mubr.f32.gmra.mrb[70].mxu0 %v370_v42  ;;  %v496_v42 = vld [vmem:[%s12949_s0 + $0x2b0] sm:$0xff] }
  0xd0   :  { %965 = vmatprep.mubr.f32.mxu0 %v381_v43  ;;  %v497_v43 = vld [vmem:[%s12949_s0 + $0x2b8] sm:$0xff] }
  0xd3   :  { %966 = vmatmul.mubr.f32.gmra.mrb[72].mxu0 %v380_v44  ;;  %v132_v44 = vld [vmem:[%s12950_s1 + $0x380] sm:$0xff] }
  0xd4   :  { %970 = vmatprep.mubr.f32.mxu0 %v391_v45  ;;  %v6780_v45 = vpack.c.bf16 %v497_v43, %v496_v42  ;;  %v372_v42 = vld [vmem:[%s12950_s1 + $0xb00] sm:$0xff]  ;;  %v383_v43 = vld [vmem:[%s12950_s1 + $0xb58] sm:$0xff] }
  0xd7   :  { %971 = vmatmul.mubr.f32.gmra.mrb[74].mxu0 %v390_v46  ;;  %v143_v46 = vld [vmem:[%s12950_s1 + $0x3d8] sm:$0xff] }
  0xd8   :  { %975 = vmatprep.mubr.f32.mxu0 %v401_v47  ;;  %v498_v47 = vld [vmem:[%s12949_s0 + $0x2c0] sm:$0xff] }
  0xdb   :  { %976 = vmatmul.mubr.f32.gmra.mrb[76].mxu0 %v400_v48  ;;  %v499_v48 = vld [vmem:[%s12949_s0 + $0x2c8] sm:$0xff] }
  0xdc   :  { %1045 = vmatprep.mubr.f32.mxu0 %v23_v49  ;;  %v142_v49 = vld [vmem:[%s12950_s1 + $0x3d0] sm:$0xff]  ;;  %v6783_v50 = vpack.c.bf16 %v499_v48, %v498_v47  ;;  %v403_v47 = vld [vmem:[%s12950_s1 + $0xbf8] sm:$0xf] }
  0xdd   :  { %v402_v48 = vld [vmem:[%s12950_s1 + $0xbf0] sm:$0xf] }
  0xdf   :  { %1046 = vmatmul.mubr.f32.vlgmr.msra.gmra.mrb[0].mxu0 %v22_v52  ;;  %v500_v52 = vld [vmem:[%s12949_s0 + $0x2d0] sm:$0xff] }
  0xe0   :  { %1050 = vmatprep.mubr.f32.mxu0 %v33_v54  ;;  %6748 = vmatpush1.bf16.msra.mxu0 %v6747_v53  ;;  %v501_v53 = vld [vmem:[%s12949_s0 + $0x2d8] sm:$0xff]  ;;  %v152_v54 = vld [vmem:[%s12950_s1 + $0x420] sm:$0xff] }
  0xe1   :  { %6749 = vmatprep.subr.bf16.mxu0 %v7941_v0  ;;  %v6786_v55 = vpack.c.bf16 %v501_v53, %v500_v52  ;;  %v24_v52 = vld [vmem:[%s12950_s1 + $0x20] sm:$0xff] }
  0xe3   :  { %1051 = vmatmul.mubr.f32.gmra.mrb[2].mxu0 %v32_v57  ;;  %v502_v57 = vld [vmem:[%s12949_s0 + $0x2e0] sm:$0xff] }
  0xe4   :  { %1055 = vmatprep.mubr.f32.mxu0 %v43_v59  ;;  %6751 = vmatpush1.bf16.msra.mxu0 %v6750_v58  ;;  %v503_v58 = vld [vmem:[%s12949_s0 + $0x2e8] sm:$0xff]  ;;  %v162_v59 = vld [vmem:[%s12950_s1 + $0x470] sm:$0xff] }
  0xe5   :  { %6752 = vmatprep.subr.bf16.mxu0 %v7941_v0  ;;  %v6789_v60 = vpack.c.bf16 %v503_v58, %v502_v57  ;;  %v34_v57 = vld [vmem:[%s12950_s1 + $0x70] sm:$0xff] }
  0xe7   :  { %1056 = vmatmul.mubr.f32.gmra.mrb[4].mxu0 %v42_v62  ;;  %v504_v62 = vld [vmem:[%s12949_s0 + $0x2f0] sm:$0xff] }
  0xe8   :  { %1060 = vmatprep.mubr.f32.mxu0 %v53_v1  ;;  %6754 = vmatpush1.bf16.msra.mxu0 %v6753_v63  ;;  %v505_v63 = vld [vmem:[%s12949_s0 + $0x2f8] sm:$0xff]  ;;  %v172_v1 = vld [vmem:[%s12950_s1 + $0x4c0] sm:$0xff] }
  0xe9   :  { %6755 = vmatprep.subr.bf16.mxu0 %v7941_v0  ;;  %v6792_v2 = vpack.c.bf16 %v505_v63, %v504_v62  ;;  %v44_v62 = vld [vmem:[%s12950_s1 + $0xc0] sm:$0xff] }
  0xeb   :  { %1061 = vmatmul.mubr.f32.gmra.mrb[6].mxu0 %v52_v4  ;;  %v182_v4 = vld [vmem:[%s12950_s1 + $0x510] sm:$0xff] }
  0xec   :  { %1065 = vmatprep.mubr.f32.mxu0 %v63_v6  ;;  %6757 = vmatpush1.bf16.msra.mxu0 %v6756_v5  ;;  %v193_v5 = vld [vmem:[%s12950_s1 + $0x568] sm:$0xff]  ;;  %v192_v6 = vld [vmem:[%s12950_s1 + $0x560] sm:$0xff] }
  0xed   :  { %6758 = vmatprep.subr.bf16.mxu0 %v7941_v0 }
  0xef   :  { %1066 = vmatmul.mubr.f32.gmra.mrb[8].mxu0 %v62_v9  ;;  %v213_v9 = vld [vmem:[%s12950_s1 + $0x608] sm:$0xff] }
  0xf0   :  { %1070 = vmatprep.mubr.f32.mxu0 %v73_v11  ;;  %6760 = vmatpush1.bf16.msra.mxu0 %v6759_v10  ;;  %v212_v10 = vld [vmem:[%s12950_s1 + $0x600] sm:$0xff]  ;;  %v223_v11 = vld [vmem:[%s12950_s1 + $0x658] sm:$0xff] }
  0xf1   :  { %6761 = vmatprep.subr.bf16.mxu0 %v7941_v0 }
  0xf3   :  { %1071 = vmatmul.mubr.f32.gmra.mrb[10].mxu0 %v72_v14  ;;  %v232_v14 = vld [vmem:[%s12950_s1 + $0x6a0] sm:$0xff] }
  0xf4   :  { %1075 = vmatprep.mubr.f32.mxu0 %v83_v16  ;;  %6763 = vmatpush1.bf16.msra.mxu0 %v6762_v15  ;;  %v243_v15 = vld [vmem:[%s12950_s1 + $0x6f8] sm:$0xff]  ;;  %v242_v16 = vld [vmem:[%s12950_s1 + $0x6f0] sm:$0xff] }
  0xf5   :  { %6764 = vmatprep.subr.bf16.mxu0 %v7941_v0 }
  0xf7   :  { %1076 = vmatmul.mubr.f32.gmra.mrb[12].mxu0 %v82_v19  ;;  %v263_v19 = vld [vmem:[%s12950_s1 + $0x798] sm:$0xff] }
  0xf8   :  { %1080 = vmatprep.mubr.f32.mxu0 %v93_v21  ;;  %6766 = vmatpush1.bf16.msra.mxu0 %v6765_v20  ;;  %v262_v20 = vld [vmem:[%s12950_s1 + $0x790] sm:$0xff]  ;;  %v273_v21 = vld [vmem:[%s12950_s1 + $0x7e8] sm:$0xff] }
  0xf9   :  { %6767 = vmatprep.subr.bf16.mxu0 %v7941_v0 }
  0xfb   :  { %1081 = vmatmul.mubr.f32.gmra.mrb[14].mxu0 %v92_v24  ;;  %v282_v24 = vld [vmem:[%s12950_s1 + $0x830] sm:$0xff] }
  0xfc   :  { %1085 = vmatprep.mubr.f32.mxu0 %v103_v26  ;;  %6769 = vmatpush1.bf16.msra.mxu0 %v6768_v25  ;;  %v293_v25 = vld [vmem:[%s12950_s1 + $0x888] sm:$0xff]  ;;  %v292_v26 = vld [vmem:[%s12950_s1 + $0x880] sm:$0xff] }
  0xfd   :  { %6770 = vmatprep.subr.bf16.mxu0 %v7941_v0 }
  0xff   :  { %1086 = vmatmul.mubr.f32.gmra.mrb[16].mxu0 %v102_v29  ;;  %v313_v29 = vld [vmem:[%s12950_s1 + $0x928] sm:$0xff] }
 0x100   :  { %1090 = vmatprep.mubr.f32.mxu0 %v113_v31  ;;  %6772 = vmatpush1.bf16.msra.mxu0 %v6771_v30  ;;  %v312_v30 = vld [vmem:[%s12950_s1 + $0x920] sm:$0xff]  ;;  %v323_v31 = vld [vmem:[%s12950_s1 + $0x978] sm:$0xff] }
 0x101   :  { %6773 = vmatprep.subr.bf16.mxu0 %v7941_v0 }
 0x103   :  { %1091 = vmatmul.mubr.f32.gmra.mrb[18].mxu0 %v112_v34  ;;  %v332_v34 = vld [vmem:[%s12950_s1 + $0x9c0] sm:$0xff] }
 0x104   :  { %1095 = vmatprep.mubr.f32.mxu0 %v123_v36  ;;  %6775 = vmatpush1.bf16.msra.mxu0 %v6774_v35  ;;  %v343_v35 = vld [vmem:[%s12950_s1 + $0xa18] sm:$0xff]  ;;  %v342_v36 = vld [vmem:[%s12950_s1 + $0xa10] sm:$0xff] }
 0x105   :  { %6776 = vmatprep.subr.bf16.mxu0 %v7941_v0 }
 0x107   :  { %1096 = vmatmul.mubr.f32.gmra.mrb[20].mxu0 %v122_v39  ;;  %v363_v39 = vld [vmem:[%s12950_s1 + $0xab8] sm:$0xff] }
 0x108   :  { %1100 = vmatprep.mubr.f32.mxu0 %v133_v41  ;;  %6778 = vmatpush1.bf16.msra.mxu0 %v6777_v40  ;;  %v362_v40 = vld [vmem:[%s12950_s1 + $0xab0] sm:$0xff]  ;;  %v373_v41 = vld [vmem:[%s12950_s1 + $0xb08] sm:$0xff] }
 0x109   :  { %6779 = vmatprep.subr.bf16.mxu0 %v7941_v0 }
 0x10b   :  { %1101 = vmatmul.mubr.f32.gmra.mrb[22].mxu0 %v132_v44  ;;  %v382_v44 = vld [vmem:[%s12950_s1 + $0xb50] sm:$0xff] }
 0x10c   :  { %1105 = vmatprep.mubr.f32.mxu0 %v143_v46  ;;  %6781 = vmatpush1.bf16.msra.mxu0 %v6780_v45  ;;  %v393_v45 = vld [vmem:[%s12950_s1 + $0xba8] sm:$0xff]  ;;  %v392_v46 = vld [vmem:[%s12950_s1 + $0xba0] sm:$0xff] }
 0x10d   :  { %6782 = vmatprep.subr.bf16.mxu0 %v7941_v0 }
 0x10f   :  { %1106 = vmatmul.mubr.f32.gmra.mrb[24].mxu0 %v142_v49  ;;  %v25_v49 = vld [vmem:[%s12950_s1 + $0x28] sm:$0xff] }
 0x110   :  { %1110 = vmatprep.mubr.f32.mxu0 %v153_v51  ;;  %6784 = vmatpush1.bf16.msra.mxu0 %v6783_v50  ;;  %v506_v50 = vld [vmem:[%s12949_s0 + $0x300] sm:$0xff]  ;;  %v507_v51 = vld [vmem:[%s12949_s0 + $0x308] sm:$0xff] }
 0x111   :  { %6785 = vmatprep.subr.bf16.mxu0 %v7941_v0  ;;  %v6795_v53 = vpack.c.bf16 %v507_v51, %v506_v50  ;;  %v155_v51 = vld [vmem:[%s12950_s1 + $0x438] sm:$0xff] }
 0x113   :  { %1111 = vmatmul.mubr.f32.gmra.mrb[26].mxu0 %v152_v54  ;;  %v35_v54 = vld [vmem:[%s12950_s1 + $0x78] sm:$0xff] }
 0x114   :  { %1115 = vmatprep.mubr.f32.mxu0 %v163_v56  ;;  %6787 = vmatpush1.bf16.msra.mxu0 %v6786_v55  ;;  %v508_v55 = vld [vmem:[%s12949_s0 + $0x310] sm:$0xff]  ;;  %v509_v56 = vld [vmem:[%s12949_s0 + $0x318] sm:$0xff] }
 0x115   :  { %6788 = vmatprep.subr.bf16.mxu0 %v7941_v0  ;;  %v6798_v58 = vpack.c.bf16 %v509_v56, %v508_v55  ;;  %v165_v56 = vld [vmem:[%s12950_s1 + $0x488] sm:$0xff] }
 0x117   :  { %1116 = vmatmul.mubr.f32.gmra.mrb[28].mxu0 %v162_v59  ;;  %v45_v59 = vld [vmem:[%s12950_s1 + $0xc8] sm:$0xff] }
 0x118   :  { %1120 = vmatprep.mubr.f32.mxu0 %v173_v61  ;;  %6790 = vmatpush1.bf16.msra.mxu0 %v6789_v60  ;;  %v510_v60 = vld [vmem:[%s12949_s0 + $0x320] sm:$0xff]  ;;  %v511_v61 = vld [vmem:[%s12949_s0 + $0x328] sm:$0xff] }
 0x119   :  { %6791 = vmatprep.subr.bf16.mxu0 %v7941_v0  ;;  %v6801_v63 = vpack.c.bf16 %v511_v61, %v510_v60  ;;  %v175_v61 = vld [vmem:[%s12950_s1 + $0x4d8] sm:$0xff] }
 0x11b   :  { %1121 = vmatmul.mubr.f32.gmra.mrb[30].mxu0 %v172_v1  ;;  %v55_v1 = vld [vmem:[%s12950_s1 + $0x118] sm:$0xff] }
 0x11c   :  { %1125 = vmatprep.mubr.f32.mxu0 %v183_v3  ;;  %6793 = vmatpush1.bf16.msra.mxu0 %v6792_v2  ;;  %v512_v2 = vld [vmem:[%s12949_s0 + $0x330] sm:$0xff]  ;;  %v513_v3 = vld [vmem:[%s12949_s0 + $0x338] sm:$0xff] }
 0x11d   :  { %6794 = vmatprep.subr.bf16.mxu0 %v7941_v0 }
 0x11f   :  { %1126 = vmatmul.mubr.f32.gmra.mrb[32].mxu0 %v182_v4  ;;  %v54_v4 = vld [vmem:[%s12950_s1 + $0x110] sm:$0xff] }
 0x120   :  { %1130 = vmatprep.mubr.f32.mxu0 %v193_v5  ;;  %v6804_v5 = vpack.c.bf16 %v513_v3, %v512_v2  ;;  %v185_v3 = vld [vmem:[%s12950_s1 + $0x528] sm:$0xff] }
 0x123   :  { %1131 = vmatmul.mubr.f32.gmra.mrb[34].mxu0 %v192_v6  ;;  %v65_v6 = vld [vmem:[%s12950_s1 + $0x168] sm:$0xff] }
 0x124   :  { %1135 = vmatprep.mubr.f32.mxu0 %v203_v7  ;;  %v514_v7 = vld [vmem:[%s12949_s0 + $0x340] sm:$0xff] }
 0x127   :  { %1136 = vmatmul.mubr.f32.gmra.mrb[36].mxu0 %v202_v8  ;;  %v515_v8 = vld [vmem:[%s12949_s0 + $0x348] sm:$0xff] }
 0x128   :  { %1140 = vmatprep.mubr.f32.mxu0 %v213_v9  ;;  %v64_v9 = vld [vmem:[%s12950_s1 + $0x160] sm:$0xff] }
 0x12b   :  { %1141 = vmatmul.mubr.f32.gmra.mrb[38].mxu0 %v212_v10  ;;  %v6807_v10 = vpack.c.bf16 %v515_v8, %v514_v7  ;;  %v205_v7 = vld [vmem:[%s12950_s1 + $0x5c8] sm:$0xff]  ;;  %v204_v8 = vld [vmem:[%s12950_s1 + $0x5c0] sm:$0xff] }
 0x12c   :  { %1145 = vmatprep.mubr.f32.mxu0 %v223_v11  ;;  %v75_v11 = vld [vmem:[%s12950_s1 + $0x1b8] sm:$0xff] }
 0x12f   :  { %1146 = vmatmul.mubr.f32.gmra.mrb[40].mxu0 %v222_v12  ;;  %v516_v12 = vld [vmem:[%s12949_s0 + $0x350] sm:$0xff] }
 0x130   :  { %1150 = vmatprep.mubr.f32.mxu0 %v233_v13  ;;  %v517_v13 = vld [vmem:[%s12949_s0 + $0x358] sm:$0xff] }
 0x133   :  { %1151 = vmatmul.mubr.f32.gmra.mrb[42].mxu0 %v232_v14  ;;  %v74_v14 = vld [vmem:[%s12950_s1 + $0x1b0] sm:$0xff] }
 0x134   :  { %1155 = vmatprep.mubr.f32.mxu0 %v243_v15  ;;  %v6810_v15 = vpack.c.bf16 %v517_v13, %v516_v12  ;;  %v224_v12 = vld [vmem:[%s12950_s1 + $0x660] sm:$0xff]  ;;  %v235_v13 = vld [vmem:[%s12950_s1 + $0x6b8] sm:$0xff] }
 0x137   :  { %1156 = vmatmul.mubr.f32.gmra.mrb[44].mxu0 %v242_v16  ;;  %v85_v16 = vld [vmem:[%s12950_s1 + $0x208] sm:$0xff] }
 0x138   :  { %1160 = vmatprep.mubr.f32.mxu0 %v253_v17  ;;  %v518_v17 = vld [vmem:[%s12949_s0 + $0x360] sm:$0xff] }
 0x13b   :  { %1161 = vmatmul.mubr.f32.gmra.mrb[46].mxu0 %v252_v18  ;;  %v519_v18 = vld [vmem:[%s12949_s0 + $0x368] sm:$0xff] }
 0x13c   :  { %1165 = vmatprep.mubr.f32.mxu0 %v263_v19  ;;  %v84_v19 = vld [vmem:[%s12950_s1 + $0x200] sm:$0xff] }
 0x13f   :  { %1166 = vmatmul.mubr.f32.gmra.mrb[48].mxu0 %v262_v20  ;;  %v6813_v20 = vpack.c.bf16 %v519_v18, %v518_v17  ;;  %v255_v17 = vld [vmem:[%s12950_s1 + $0x758] sm:$0xff]  ;;  %v254_v18 = vld [vmem:[%s12950_s1 + $0x750] sm:$0xff] }
 0x140   :  { %1170 = vmatprep.mubr.f32.mxu0 %v273_v21  ;;  %v95_v21 = vld [vmem:[%s12950_s1 + $0x258] sm:$0xff] }
 0x143   :  { %1171 = vmatmul.mubr.f32.gmra.mrb[50].mxu0 %v272_v22  ;;  %v520_v22 = vld [vmem:[%s12949_s0 + $0x370] sm:$0xff] }
 0x144   :  { %1175 = vmatprep.mubr.f32.mxu0 %v283_v23  ;;  %v521_v23 = vld [vmem:[%s12949_s0 + $0x378] sm:$0xff] }
 0x147   :  { %1176 = vmatmul.mubr.f32.gmra.mrb[52].mxu0 %v282_v24  ;;  %v94_v24 = vld [vmem:[%s12950_s1 + $0x250] sm:$0xff] }
 0x148   :  { %1180 = vmatprep.mubr.f32.mxu0 %v293_v25  ;;  %v6816_v25 = vpack.c.bf16 %v521_v23, %v520_v22  ;;  %v274_v22 = vld [vmem:[%s12950_s1 + $0x7f0] sm:$0xff]  ;;  %v285_v23 = vld [vmem:[%s12950_s1 + $0x848] sm:$0xff] }
 0x14b   :  { %1181 = vmatmul.mubr.f32.gmra.mrb[54].mxu0 %v292_v26  ;;  %v105_v26 = vld [vmem:[%s12950_s1 + $0x2a8] sm:$0xff] }
 0x14c   :  { %1185 = vmatprep.mubr.f32.mxu0 %v303_v27  ;;  %v522_v27 = vld [vmem:[%s12949_s0 + $0x380] sm:$0xff] }
 0x14f   :  { %1186 = vmatmul.mubr.f32.gmra.mrb[56].mxu0 %v302_v28  ;;  %v523_v28 = vld [vmem:[%s12949_s0 + $0x388] sm:$0xff] }
 0x150   :  { %1190 = vmatprep.mubr.f32.mxu0 %v313_v29  ;;  %v104_v29 = vld [vmem:[%s12950_s1 + $0x2a0] sm:$0xff] }
 0x153   :  { %1191 = vmatmul.mubr.f32.gmra.mrb[58].mxu0 %v312_v30  ;;  %v6819_v30 = vpack.c.bf16 %v523_v28, %v522_v27  ;;  %v305_v27 = vld [vmem:[%s12950_s1 + $0x8e8] sm:$0xff]  ;;  %v304_v28 = vld [vmem:[%s12950_s1 + $0x8e0] sm:$0xff] }
 0x154   :  { %1195 = vmatprep.mubr.f32.mxu0 %v323_v31  ;;  %v115_v31 = vld [vmem:[%s12950_s1 + $0x2f8] sm:$0xff] }
 0x157   :  { %1196 = vmatmul.mubr.f32.gmra.mrb[60].mxu0 %v322_v32  ;;  %v524_v32 = vld [vmem:[%s12949_s0 + $0x390] sm:$0xff] }
 0x158   :  { %1200 = vmatprep.mubr.f32.mxu0 %v333_v33  ;;  %v525_v33 = vld [vmem:[%s12949_s0 + $0x398] sm:$0xff] }
 0x15b   :  { %1201 = vmatmul.mubr.f32.gmra.mrb[62].mxu0 %v332_v34  ;;  %v114_v34 = vld [vmem:[%s12950_s1 + $0x2f0] sm:$0xff] }
 0x15c   :  { %1205 = vmatprep.mubr.f32.mxu0 %v343_v35  ;;  %v6822_v35 = vpack.c.bf16 %v525_v33, %v524_v32  ;;  %v324_v32 = vld [vmem:[%s12950_s1 + $0x980] sm:$0xff]  ;;  %v335_v33 = vld [vmem:[%s12950_s1 + $0x9d8] sm:$0xff] }
 0x15f   :  { %1206 = vmatmul.mubr.f32.gmra.mrb[64].mxu0 %v342_v36  ;;  %v125_v36 = vld [vmem:[%s12950_s1 + $0x348] sm:$0xff] }
 0x160   :  { %1210 = vmatprep.mubr.f32.mxu0 %v353_v37  ;;  %v526_v37 = vld [vmem:[%s12949_s0 + $0x3a0] sm:$0xff] }
 0x163   :  { %1211 = vmatmul.mubr.f32.gmra.mrb[66].mxu0 %v352_v38  ;;  %v527_v38 = vld [vmem:[%s12949_s0 + $0x3a8] sm:$0xff] }
 0x164   :  { %1215 = vmatprep.mubr.f32.mxu0 %v363_v39  ;;  %v124_v39 = vld [vmem:[%s12950_s1 + $0x340] sm:$0xff] }
 0x167   :  { %1216 = vmatmul.mubr.f32.gmra.mrb[68].mxu0 %v362_v40  ;;  %v6825_v40 = vpack.c.bf16 %v527_v38, %v526_v37  ;;  %v355_v37 = vld [vmem:[%s12950_s1 + $0xa78] sm:$0xff]  ;;  %v354_v38 = vld [vmem:[%s12950_s1 + $0xa70] sm:$0xff] }
 0x168   :  { %1220 = vmatprep.mubr.f32.mxu0 %v373_v41  ;;  %v135_v41 = vld [vmem:[%s12950_s1 + $0x398] sm:$0xff] }
 0x16b   :  { %1221 = vmatmul.mubr.f32.gmra.mrb[70].mxu0 %v372_v42  ;;  %v528_v42 = vld [vmem:[%s12949_s0 + $0x3b0] sm:$0xff] }
 0x16c   :  { %1225 = vmatprep.mubr.f32.mxu0 %v383_v43  ;;  %v529_v43 = vld [vmem:[%s12949_s0 + $0x3b8] sm:$0xff] }
 0x16f   :  { %1226 = vmatmul.mubr.f32.gmra.mrb[72].mxu0 %v382_v44  ;;  %v134_v44 = vld [vmem:[%s12950_s1 + $0x390] sm:$0xff] }
 0x170   :  { %1230 = vmatprep.mubr.f32.mxu0 %v393_v45  ;;  %v6828_v45 = vpack.c.bf16 %v529_v43, %v528_v42  ;;  %v374_v42 = vld [vmem:[%s12950_s1 + $0xb10] sm:$0xff]  ;;  %v385_v43 = vld [vmem:[%s12950_s1 + $0xb68] sm:$0xff] }
 0x173   :  { %1231 = vmatmul.mubr.f32.gmra.mrb[74].mxu0 %v392_v46  ;;  %v145_v46 = vld [vmem:[%s12950_s1 + $0x3e8] sm:$0xff] }
 0x174   :  { %1235 = vmatprep.mubr.f32.mxu0 %v403_v47  ;;  %v530_v47 = vld [vmem:[%s12949_s0 + $0x3c0] sm:$0xff] }
 0x177   :  { %1236 = vmatmul.mubr.f32.gmra.mrb[76].mxu0 %v402_v48  ;;  %v531_v48 = vld [vmem:[%s12949_s0 + $0x3c8] sm:$0xff] }
 0x178   :  { %1305 = vmatprep.mubr.f32.mxu0 %v25_v49  ;;  %v144_v49 = vld [vmem:[%s12950_s1 + $0x3e0] sm:$0xff]  ;;  %v6831_v50 = vpack.c.bf16 %v531_v48, %v530_v47  ;;  %v405_v47 = vld [vmem:[%s12950_s1 + $0xc08] sm:$0xf] }
 0x179   :  { %v404_v48 = vld [vmem:[%s12950_s1 + $0xc00] sm:$0xf] }
 0x17b   :  { %1306 = vmatmul.mubr.f32.vlgmr.msra.gmra.mrb[0].mxu0 %v24_v52  ;;  %v532_v52 = vld [vmem:[%s12949_s0 + $0x3d0] sm:$0xff] }
 0x17c   :  { %1310 = vmatprep.mubr.f32.mxu0 %v35_v54  ;;  %6796 = vmatpush1.bf16.msra.mxu0 %v6795_v53  ;;  %v533_v53 = vld [vmem:[%s12949_s0 + $0x3d8] sm:$0xff]  ;;  %v154_v54 = vld [vmem:[%s12950_s1 + $0x430] sm:$0xff] }
 0x17d   :  { %6797 = vmatprep.subr.bf16.mxu0 %v7941_v0  ;;  %v6834_v55 = vpack.c.bf16 %v533_v53, %v532_v52  ;;  %v26_v52 = vld [vmem:[%s12950_s1 + $0x30] sm:$0xff] }
 0x17f   :  { %1311 = vmatmul.mubr.f32.gmra.mrb[2].mxu0 %v34_v57  ;;  %v534_v57 = vld [vmem:[%s12949_s0 + $0x3e0] sm:$0xff] }
 0x180   :  { %1315 = vmatprep.mubr.f32.mxu0 %v45_v59  ;;  %6799 = vmatpush1.bf16.msra.mxu0 %v6798_v58  ;;  %v535_v58 = vld [vmem:[%s12949_s0 + $0x3e8] sm:$0xff]  ;;  %v164_v59 = vld [vmem:[%s12950_s1 + $0x480] sm:$0xff] }
 0x181   :  { %6800 = vmatprep.subr.bf16.mxu0 %v7941_v0  ;;  %v6837_v60 = vpack.c.bf16 %v535_v58, %v534_v57  ;;  %v36_v57 = vld [vmem:[%s12950_s1 + $0x80] sm:$0xff] }
 0x183   :  { %1316 = vmatmul.mubr.f32.gmra.mrb[4].mxu0 %v44_v62  ;;  %v536_v62 = vld [vmem:[%s12949_s0 + $0x3f0] sm:$0xff] }
 0x184   :  { %1320 = vmatprep.mubr.f32.mxu0 %v55_v1  ;;  %6802 = vmatpush1.bf16.msra.mxu0 %v6801_v63  ;;  %v537_v63 = vld [vmem:[%s12949_s0 + $0x3f8] sm:$0xff]  ;;  %v174_v1 = vld [vmem:[%s12950_s1 + $0x4d0] sm:$0xff] }
 0x185   :  { %6803 = vmatprep.subr.bf16.mxu0 %v7941_v0  ;;  %v6840_v2 = vpack.c.bf16 %v537_v63, %v536_v62  ;;  %v46_v62 = vld [vmem:[%s12950_s1 + $0xd0] sm:$0xff] }
 0x187   :  { %1321 = vmatmul.mubr.f32.gmra.mrb[6].mxu0 %v54_v4  ;;  %v184_v4 = vld [vmem:[%s12950_s1 + $0x520] sm:$0xff] }
 0x188   :  { %1325 = vmatprep.mubr.f32.mxu0 %v65_v6  ;;  %6805 = vmatpush1.bf16.msra.mxu0 %v6804_v5  ;;  %v195_v5 = vld [vmem:[%s12950_s1 + $0x578] sm:$0xff]  ;;  %v194_v6 = vld [vmem:[%s12950_s1 + $0x570] sm:$0xff] }
 0x189   :  { %6806 = vmatprep.subr.bf16.mxu0 %v7941_v0 }
 0x18b   :  { %1326 = vmatmul.mubr.f32.gmra.mrb[8].mxu0 %v64_v9  ;;  %v215_v9 = vld [vmem:[%s12950_s1 + $0x618] sm:$0xff] }
 0x18c   :  { %1330 = vmatprep.mubr.f32.mxu0 %v75_v11  ;;  %6808 = vmatpush1.bf16.msra.mxu0 %v6807_v10  ;;  %v214_v10 = vld [vmem:[%s12950_s1 + $0x610] sm:$0xff]  ;;  %v225_v11 = vld [vmem:[%s12950_s1 + $0x668] sm:$0xff] }
 0x18d   :  { %6809 = vmatprep.subr.bf16.mxu0 %v7941_v0 }
 0x18f   :  { %1331 = vmatmul.mubr.f32.gmra.mrb[10].mxu0 %v74_v14  ;;  %v234_v14 = vld [vmem:[%s12950_s1 + $0x6b0] sm:$0xff] }
 0x190   :  { %1335 = vmatprep.mubr.f32.mxu0 %v85_v16  ;;  %6811 = vmatpush1.bf16.msra.mxu0 %v6810_v15  ;;  %v245_v15 = vld [vmem:[%s12950_s1 + $0x708] sm:$0xff]  ;;  %v244_v16 = vld [vmem:[%s12950_s1 + $0x700] sm:$0xff] }
 0x191   :  { %6812 = vmatprep.subr.bf16.mxu0 %v7941_v0 }
 0x193   :  { %1336 = vmatmul.mubr.f32.gmra.mrb[12].mxu0 %v84_v19  ;;  %v265_v19 = vld [vmem:[%s12950_s1 + $0x7a8] sm:$0xff] }
 0x194   :  { %1340 = vmatprep.mubr.f32.mxu0 %v95_v21  ;;  %6814 = vmatpush1.bf16.msra.mxu0 %v6813_v20  ;;  %v264_v20 = vld [vmem:[%s12950_s1 + $0x7a0] sm:$0xff]  ;;  %v275_v21 = vld [vmem:[%s12950_s1 + $0x7f8] sm:$0xff] }
 0x195   :  { %6815 = vmatprep.subr.bf16.mxu0 %v7941_v0 }
 0x197   :  { %1341 = vmatmul.mubr.f32.gmra.mrb[14].mxu0 %v94_v24  ;;  %v284_v24 = vld [vmem:[%s12950_s1 + $0x840] sm:$0xff] }
 0x198   :  { %1345 = vmatprep.mubr.f32.mxu0 %v105_v26  ;;  %6817 = vmatpush1.bf16.msra.mxu0 %v6816_v25  ;;  %v295_v25 = vld [vmem:[%s12950_s1 + $0x898] sm:$0xff]  ;;  %v294_v26 = vld [vmem:[%s12950_s1 + $0x890] sm:$0xff] }
 0x199   :  { %6818 = vmatprep.subr.bf16.mxu0 %v7941_v0 }
 0x19b   :  { %1346 = vmatmul.mubr.f32.gmra.mrb[16].mxu0 %v104_v29  ;;  %v315_v29 = vld [vmem:[%s12950_s1 + $0x938] sm:$0xff] }
 0x19c   :  { %1350 = vmatprep.mubr.f32.mxu0 %v115_v31  ;;  %6820 = vmatpush1.bf16.msra.mxu0 %v6819_v30  ;;  %v314_v30 = vld [vmem:[%s12950_s1 + $0x930] sm:$0xff]  ;;  %v325_v31 = vld [vmem:[%s12950_s1 + $0x988] sm:$0xff] }
 0x19d   :  { %6821 = vmatprep.subr.bf16.mxu0 %v7941_v0 }
 0x19f   :  { %1351 = vmatmul.mubr.f32.gmra.mrb[18].mxu0 %v114_v34  ;;  %v334_v34 = vld [vmem:[%s12950_s1 + $0x9d0] sm:$0xff] }
 0x1a0   :  { %1355 = vmatprep.mubr.f32.mxu0 %v125_v36  ;;  %6823 = vmatpush1.bf16.msra.mxu0 %v6822_v35  ;;  %v345_v35 = vld [vmem:[%s12950_s1 + $0xa28] sm:$0xff]  ;;  %v344_v36 = vld [vmem:[%s12950_s1 + $0xa20] sm:$0xff] }
 0x1a1   :  { %6824 = vmatprep.subr.bf16.mxu0 %v7941_v0 }
 0x1a3   :  { %1356 = vmatmul.mubr.f32.gmra.mrb[20].mxu0 %v124_v39  ;;  %v365_v39 = vld [vmem:[%s12950_s1 + $0xac8] sm:$0xff] }
 0x1a4   :  { %1360 = vmatprep.mubr.f32.mxu0 %v135_v41  ;;  %6826 = vmatpush1.bf16.msra.mxu0 %v6825_v40  ;;  %v364_v40 = vld [vmem:[%s12950_s1 + $0xac0] sm:$0xff]  ;;  %v375_v41 = vld [vmem:[%s12950_s1 + $0xb18] sm:$0xff] }
 0x1a5   :  { %6827 = vmatprep.subr.bf16.mxu0 %v7941_v0 }
 0x1a7   :  { %1361 = vmatmul.mubr.f32.gmra.mrb[22].mxu0 %v134_v44  ;;  %v384_v44 = vld [vmem:[%s12950_s1 + $0xb60] sm:$0xff] }
 0x1a8   :  { %1365 = vmatprep.mubr.f32.mxu0 %v145_v46  ;;  %6829 = vmatpush1.bf16.msra.mxu0 %v6828_v45  ;;  %v395_v45 = vld [vmem:[%s12950_s1 + $0xbb8] sm:$0xff]  ;;  %v394_v46 = vld [vmem:[%s12950_s1 + $0xbb0] sm:$0xff] }
 0x1a9   :  { %6830 = vmatprep.subr.bf16.mxu0 %v7941_v0 }
 0x1ab   :  { %1366 = vmatmul.mubr.f32.gmra.mrb[24].mxu0 %v144_v49  ;;  %v27_v49 = vld [vmem:[%s12950_s1 + $0x38] sm:$0xff] }
 0x1ac   :  { %1370 = vmatprep.mubr.f32.mxu0 %v155_v51  ;;  %6832 = vmatpush1.bf16.msra.mxu0 %v6831_v50  ;;  %v538_v50 = vld [vmem:[%s12949_s0 + $0x400] sm:$0xff]  ;;  %v539_v51 = vld [vmem:[%s12949_s0 + $0x408] sm:$0xff] }
 0x1ad   :  { %6833 = vmatprep.subr.bf16.mxu0 %v7941_v0  ;;  %v6843_v53 = vpack.c.bf16 %v539_v51, %v538_v50  ;;  %v157_v51 = vld [vmem:[%s12950_s1 + $0x448] sm:$0xff] }
 0x1af   :  { %1371 = vmatmul.mubr.f32.gmra.mrb[26].mxu0 %v154_v54  ;;  %v37_v54 = vld [vmem:[%s12950_s1 + $0x88] sm:$0xff] }
 0x1b0   :  { %1375 = vmatprep.mubr.f32.mxu0 %v165_v56  ;;  %6835 = vmatpush1.bf16.msra.mxu0 %v6834_v55  ;;  %v540_v55 = vld [vmem:[%s12949_s0 + $0x410] sm:$0xff]  ;;  %v541_v56 = vld [vmem:[%s12949_s0 + $0x418] sm:$0xff] }
 0x1b1   :  { %6836 = vmatprep.subr.bf16.mxu0 %v7941_v0  ;;  %v6846_v58 = vpack.c.bf16 %v541_v56, %v540_v55  ;;  %v177_v55 = vld [vmem:[%s12950_s1 + $0x4e8] sm:$0xff]  ;;  %v176_v56 = vld [vmem:[%s12950_s1 + $0x4e0] sm:$0xff] }
 0x1b3   :  { %1376 = vmatmul.mubr.f32.gmra.mrb[28].mxu0 %v164_v59  ;;  %v47_v59 = vld [vmem:[%s12950_s1 + $0xd8] sm:$0xff] }
 0x1b4   :  { %1380 = vmatprep.mubr.f32.mxu0 %v175_v61  ;;  %6838 = vmatpush1.bf16.msra.mxu0 %v6837_v60  ;;  %v542_v60 = vld [vmem:[%s12949_s0 + $0x420] sm:$0xff]  ;;  %v543_v61 = vld [vmem:[%s12949_s0 + $0x428] sm:$0xff] }
 0x1b5   :  { %6839 = vmatprep.subr.bf16.mxu0 %v7941_v0  ;;  %v6849_v63 = vpack.c.bf16 %v543_v61, %v542_v60  ;;  %v196_v60 = vld [vmem:[%s12950_s1 + $0x580] sm:$0xff]  ;;  %v207_v61 = vld [vmem:[%s12950_s1 + $0x5d8] sm:$0xff] }
 0x1b7   :  { %1381 = vmatmul.mubr.f32.gmra.mrb[30].mxu0 %v174_v1  ;;  %v57_v1 = vld [vmem:[%s12950_s1 + $0x128] sm:$0xff] }
 0x1b8   :  { %1385 = vmatprep.mubr.f32.mxu0 %v185_v3  ;;  %6841 = vmatpush1.bf16.msra.mxu0 %v6840_v2  ;;  %v544_v2 = vld [vmem:[%s12949_s0 + $0x430] sm:$0xff]  ;;  %v545_v3 = vld [vmem:[%s12949_s0 + $0x438] sm:$0xff] }
 0x1b9   :  { %6842 = vmatprep.subr.bf16.mxu0 %v7941_v0 }
 0x1bb   :  { %1386 = vmatmul.mubr.f32.gmra.mrb[32].mxu0 %v184_v4  ;;  %v56_v4 = vld [vmem:[%s12950_s1 + $0x120] sm:$0xff] }
 0x1bc   :  { %1390 = vmatprep.mubr.f32.mxu0 %v195_v5  ;;  %v6852_v5 = vpack.c.bf16 %v545_v3, %v544_v2  ;;  %v227_v2 = vld [vmem:[%s12950_s1 + $0x678] sm:$0xff]  ;;  %v226_v3 = vld [vmem:[%s12950_s1 + $0x670] sm:$0xff] }
 0x1bf   :  { %1391 = vmatmul.mubr.f32.gmra.mrb[34].mxu0 %v194_v6  ;;  %v67_v6 = vld [vmem:[%s12950_s1 + $0x178] sm:$0xff] }
 0x1c0   :  { %1395 = vmatprep.mubr.f32.mxu0 %v205_v7  ;;  %v546_v7 = vld [vmem:[%s12949_s0 + $0x440] sm:$0xff] }
 0x1c3   :  { %1396 = vmatmul.mubr.f32.gmra.mrb[36].mxu0 %v204_v8  ;;  %v547_v8 = vld [vmem:[%s12949_s0 + $0x448] sm:$0xff] }
 0x1c4   :  { %1400 = vmatprep.mubr.f32.mxu0 %v215_v9  ;;  %v66_v9 = vld [vmem:[%s12950_s1 + $0x170] sm:$0xff] }
 0x1c7   :  { %1401 = vmatmul.mubr.f32.gmra.mrb[38].mxu0 %v214_v10  ;;  %v6855_v10 = vpack.c.bf16 %v547_v8, %v546_v7  ;;  %v246_v7 = vld [vmem:[%s12950_s1 + $0x710] sm:$0xff]  ;;  %v257_v8 = vld [vmem:[%s12950_s1 + $0x768] sm:$0xff] }
 0x1c8   :  { %1405 = vmatprep.mubr.f32.mxu0 %v225_v11  ;;  %v77_v11 = vld [vmem:[%s12950_s1 + $0x1c8] sm:$0xff] }
 0x1cb   :  { %1406 = vmatmul.mubr.f32.gmra.mrb[40].mxu0 %v224_v12  ;;  %v548_v12 = vld [vmem:[%s12949_s0 + $0x450] sm:$0xff] }
 0x1cc   :  { %1410 = vmatprep.mubr.f32.mxu0 %v235_v13  ;;  %v549_v13 = vld [vmem:[%s12949_s0 + $0x458] sm:$0xff] }
 0x1cf   :  { %1411 = vmatmul.mubr.f32.gmra.mrb[42].mxu0 %v234_v14  ;;  %v76_v14 = vld [vmem:[%s12950_s1 + $0x1c0] sm:$0xff] }
 0x1d0   :  { %1415 = vmatprep.mubr.f32.mxu0 %v245_v15  ;;  %v6858_v15 = vpack.c.bf16 %v549_v13, %v548_v12  ;;  %v277_v12 = vld [vmem:[%s12950_s1 + $0x808] sm:$0xff]  ;;  %v276_v13 = vld [vmem:[%s12950_s1 + $0x800] sm:$0xff] }
 0x1d3   :  { %1416 = vmatmul.mubr.f32.gmra.mrb[44].mxu0 %v244_v16  ;;  %v87_v16 = vld [vmem:[%s12950_s1 + $0x218] sm:$0xff] }
 0x1d4   :  { %1420 = vmatprep.mubr.f32.mxu0 %v255_v17  ;;  %v550_v17 = vld [vmem:[%s12949_s0 + $0x460] sm:$0xff] }
 0x1d7   :  { %1421 = vmatmul.mubr.f32.gmra.mrb[46].mxu0 %v254_v18  ;;  %v551_v18 = vld [vmem:[%s12949_s0 + $0x468] sm:$0xff] }
 0x1d8   :  { %1425 = vmatprep.mubr.f32.mxu0 %v265_v19  ;;  %v86_v19 = vld [vmem:[%s12950_s1 + $0x210] sm:$0xff] }
 0x1db   :  { %1426 = vmatmul.mubr.f32.gmra.mrb[48].mxu0 %v264_v20  ;;  %v6861_v20 = vpack.c.bf16 %v551_v18, %v550_v17  ;;  %v296_v17 = vld [vmem:[%s12950_s1 + $0x8a0] sm:$0xff]  ;;  %v307_v18 = vld [vmem:[%s12950_s1 + $0x8f8] sm:$0xff] }
 0x1dc   :  { %1430 = vmatprep.mubr.f32.mxu0 %v275_v21  ;;  %v97_v21 = vld [vmem:[%s12950_s1 + $0x268] sm:$0xff] }
 0x1df   :  { %1431 = vmatmul.mubr.f32.gmra.mrb[50].mxu0 %v274_v22  ;;  %v552_v22 = vld [vmem:[%s12949_s0 + $0x470] sm:$0xff] }
 0x1e0   :  { %1435 = vmatprep.mubr.f32.mxu0 %v285_v23  ;;  %v553_v23 = vld [vmem:[%s12949_s0 + $0x478] sm:$0xff] }
 0x1e3   :  { %1436 = vmatmul.mubr.f32.gmra.mrb[52].mxu0 %v284_v24  ;;  %v96_v24 = vld [vmem:[%s12950_s1 + $0x260] sm:$0xff] }
 0x1e4   :  { %1440 = vmatprep.mubr.f32.mxu0 %v295_v25  ;;  %v6864_v25 = vpack.c.bf16 %v553_v23, %v552_v22  ;;  %v327_v22 = vld [vmem:[%s12950_s1 + $0x998] sm:$0xff]  ;;  %v326_v23 = vld [vmem:[%s12950_s1 + $0x990] sm:$0xff] }
 0x1e7   :  { %1441 = vmatmul.mubr.f32.gmra.mrb[54].mxu0 %v294_v26  ;;  %v107_v26 = vld [vmem:[%s12950_s1 + $0x2b8] sm:$0xff] }
 0x1e8   :  { %1445 = vmatprep.mubr.f32.mxu0 %v305_v27  ;;  %v554_v27 = vld [vmem:[%s12949_s0 + $0x480] sm:$0xff] }
 0x1eb   :  { %1446 = vmatmul.mubr.f32.gmra.mrb[56].mxu0 %v304_v28  ;;  %v555_v28 = vld [vmem:[%s12949_s0 + $0x488] sm:$0xff] }
 0x1ec   :  { %1450 = vmatprep.mubr.f32.mxu0 %v315_v29  ;;  %v106_v29 = vld [vmem:[%s12950_s1 + $0x2b0] sm:$0xff] }
 0x1ef   :  { %1451 = vmatmul.mubr.f32.gmra.mrb[58].mxu0 %v314_v30  ;;  %v6867_v30 = vpack.c.bf16 %v555_v28, %v554_v27  ;;  %v346_v27 = vld [vmem:[%s12950_s1 + $0xa30] sm:$0xff]  ;;  %v357_v28 = vld [vmem:[%s12950_s1 + $0xa88] sm:$0xff] }
 0x1f0   :  { %1455 = vmatprep.mubr.f32.mxu0 %v325_v31  ;;  %v117_v31 = vld [vmem:[%s12950_s1 + $0x308] sm:$0xff] }
 0x1f3   :  { %1456 = vmatmul.mubr.f32.gmra.mrb[60].mxu0 %v324_v32  ;;  %v556_v32 = vld [vmem:[%s12949_s0 + $0x490] sm:$0xff] }
 0x1f4   :  { %1460 = vmatprep.mubr.f32.mxu0 %v335_v33  ;;  %v557_v33 = vld [vmem:[%s12949_s0 + $0x498] sm:$0xff] }
 0x1f7   :  { %1461 = vmatmul.mubr.f32.gmra.mrb[62].mxu0 %v334_v34  ;;  %v116_v34 = vld [vmem:[%s12950_s1 + $0x300] sm:$0xff] }
 0x1f8   :  { %1465 = vmatprep.mubr.f32.mxu0 %v345_v35  ;;  %v6870_v35 = vpack.c.bf16 %v557_v33, %v556_v32  ;;  %v377_v32 = vld [vmem:[%s12950_s1 + $0xb28] sm:$0xff]  ;;  %v376_v33 = vld [vmem:[%s12950_s1 + $0xb20] sm:$0xff] }
 0x1fb   :  { %1466 = vmatmul.mubr.f32.gmra.mrb[64].mxu0 %v344_v36  ;;  %v127_v36 = vld [vmem:[%s12950_s1 + $0x358] sm:$0xff] }
 0x1fc   :  { %1470 = vmatprep.mubr.f32.mxu0 %v355_v37  ;;  %v558_v37 = vld [vmem:[%s12949_s0 + $0x4a0] sm:$0xff] }
 0x1ff   :  { %1471 = vmatmul.mubr.f32.gmra.mrb[66].mxu0 %v354_v38  ;;  %v559_v38 = vld [vmem:[%s12949_s0 + $0x4a8] sm:$0xff] }
 0x200   :  { %1475 = vmatprep.mubr.f32.mxu0 %v365_v39  ;;  %v126_v39 = vld [vmem:[%s12950_s1 + $0x350] sm:$0xff] }
 0x203   :  { %1476 = vmatmul.mubr.f32.gmra.mrb[68].mxu0 %v364_v40  ;;  %v6873_v40 = vpack.c.bf16 %v559_v38, %v558_v37  ;;  %v396_v37 = vld [vmem:[%s12950_s1 + $0xbc0] sm:$0xff]  ;;  %v407_v38 = vld [vmem:[%s12950_s1 + $0xc18] sm:$0xf] }
 0x204   :  { %1480 = vmatprep.mubr.f32.mxu0 %v375_v41  ;;  %v137_v41 = vld [vmem:[%s12950_s1 + $0x3a8] sm:$0xff] }
 0x207   :  { %1481 = vmatmul.mubr.f32.gmra.mrb[70].mxu0 %v374_v42  ;;  %v560_v42 = vld [vmem:[%s12949_s0 + $0x4b0] sm:$0xff] }
 0x208   :  { %1485 = vmatprep.mubr.f32.mxu0 %v385_v43  ;;  %v561_v43 = vld [vmem:[%s12949_s0 + $0x4b8] sm:$0xff] }
 0x20b   :  { %1486 = vmatmul.mubr.f32.gmra.mrb[72].mxu0 %v384_v44  ;;  %v136_v44 = vld [vmem:[%s12950_s1 + $0x3a0] sm:$0xff] }
 0x20c   :  { %1490 = vmatprep.mubr.f32.mxu0 %v395_v45  ;;  %v6876_v45 = vpack.c.bf16 %v561_v43, %v560_v42  ;;  %v39_v42 = vld [vmem:[%s12950_s1 + $0x98] sm:$0xff]  ;;  %v38_v43 = vld [vmem:[%s12950_s1 + $0x90] sm:$0xff] }
 0x20f   :  { %1491 = vmatmul.mubr.f32.gmra.mrb[74].mxu0 %v394_v46  ;;  %v147_v46 = vld [vmem:[%s12950_s1 + $0x3f8] sm:$0xff] }
 0x210   :  { %1495 = vmatprep.mubr.f32.mxu0 %v405_v47  ;;  %v562_v47 = vld [vmem:[%s12949_s0 + $0x4c0] sm:$0xff] }
 0x213   :  { %1496 = vmatmul.mubr.f32.gmra.mrb[76].mxu0 %v404_v48  ;;  %v563_v48 = vld [vmem:[%s12949_s0 + $0x4c8] sm:$0xff] }
 0x214   :  { %1565 = vmatprep.mubr.f32.mxu0 %v27_v49  ;;  %v146_v49 = vld [vmem:[%s12950_s1 + $0x3f0] sm:$0xff]  ;;  %v6879_v50 = vpack.c.bf16 %v563_v48, %v562_v47  ;;  %v69_v48 = vld [vmem:[%s12950_s1 + $0x188] sm:$0xff] }
 0x215   :  { %v58_v47 = vld [vmem:[%s12950_s1 + $0x130] sm:$0xff] }
 0x217   :  { %1566 = vmatmul.mubr.f32.vlgmr.msra.gmra.mrb[0].mxu0 %v26_v52  ;;  %v156_v52 = vld [vmem:[%s12950_s1 + $0x440] sm:$0xff] }
 0x218   :  { %1570 = vmatprep.mubr.f32.mxu0 %v37_v54  ;;  %6844 = vmatpush1.bf16.msra.mxu0 %v6843_v53  ;;  %v167_v53 = vld [vmem:[%s12950_s1 + $0x498] sm:$0xff]  ;;  %v166_v54 = vld [vmem:[%s12950_s1 + $0x490] sm:$0xff] }
 0x219   :  { %6845 = vmatprep.subr.bf16.mxu0 %v7941_v0 }
 0x21b   :  { %1571 = vmatmul.mubr.f32.gmra.mrb[2].mxu0 %v36_v57  ;;  %v187_v57 = vld [vmem:[%s12950_s1 + $0x538] sm:$0xff] }
 0x21c   :  { %1575 = vmatprep.mubr.f32.mxu0 %v47_v59  ;;  %6847 = vmatpush1.bf16.msra.mxu0 %v6846_v58  ;;  %v186_v58 = vld [vmem:[%s12950_s1 + $0x530] sm:$0xff]  ;;  %v197_v59 = vld [vmem:[%s12950_s1 + $0x588] sm:$0xff] }
 0x21d   :  { %6848 = vmatprep.subr.bf16.mxu0 %v7941_v0 }
 0x21f   :  { %1576 = vmatmul.mubr.f32.gmra.mrb[4].mxu0 %v46_v62  ;;  %v206_v62 = vld [vmem:[%s12950_s1 + $0x5d0] sm:$0xff] }
 0x220   :  { %1580 = vmatprep.mubr.f32.mxu0 %v57_v1  ;;  %6850 = vmatpush1.bf16.msra.mxu0 %v6849_v63  ;;  %v217_v63 = vld [vmem:[%s12950_s1 + $0x628] sm:$0xff]  ;;  %v216_v1 = vld [vmem:[%s12950_s1 + $0x620] sm:$0xff] }
 0x221   :  { %6851 = vmatprep.subr.bf16.mxu0 %v7941_v0 }
 0x223   :  { %1581 = vmatmul.mubr.f32.gmra.mrb[6].mxu0 %v56_v4  ;;  %v237_v4 = vld [vmem:[%s12950_s1 + $0x6c8] sm:$0xff] }
 0x224   :  { %1585 = vmatprep.mubr.f32.mxu0 %v67_v6  ;;  %6853 = vmatpush1.bf16.msra.mxu0 %v6852_v5  ;;  %v236_v5 = vld [vmem:[%s12950_s1 + $0x6c0] sm:$0xff]  ;;  %v247_v6 = vld [vmem:[%s12950_s1 + $0x718] sm:$0xff] }
 0x225   :  { %6854 = vmatprep.subr.bf16.mxu0 %v7941_v0 }
 0x227   :  { %1586 = vmatmul.mubr.f32.gmra.mrb[8].mxu0 %v66_v9  ;;  %v256_v9 = vld [vmem:[%s12950_s1 + $0x760] sm:$0xff] }
 0x228   :  { %1590 = vmatprep.mubr.f32.mxu0 %v77_v11  ;;  %6856 = vmatpush1.bf16.msra.mxu0 %v6855_v10  ;;  %v267_v10 = vld [vmem:[%s12950_s1 + $0x7b8] sm:$0xff]  ;;  %v266_v11 = vld [vmem:[%s12950_s1 + $0x7b0] sm:$0xff] }
 0x229   :  { %6857 = vmatprep.subr.bf16.mxu0 %v7941_v0 }
 0x22b   :  { %1591 = vmatmul.mubr.f32.gmra.mrb[10].mxu0 %v76_v14  ;;  %v287_v14 = vld [vmem:[%s12950_s1 + $0x858] sm:$0xff] }
 0x22c   :  { %1595 = vmatprep.mubr.f32.mxu0 %v87_v16  ;;  %6859 = vmatpush1.bf16.msra.mxu0 %v6858_v15  ;;  %v286_v15 = vld [vmem:[%s12950_s1 + $0x850] sm:$0xff]  ;;  %v297_v16 = vld [vmem:[%s12950_s1 + $0x8a8] sm:$0xff] }
 0x22d   :  { %6860 = vmatprep.subr.bf16.mxu0 %v7941_v0 }
 0x22f   :  { %1596 = vmatmul.mubr.f32.gmra.mrb[12].mxu0 %v86_v19  ;;  %v306_v19 = vld [vmem:[%s12950_s1 + $0x8f0] sm:$0xff] }
 0x230   :  { %1600 = vmatprep.mubr.f32.mxu0 %v97_v21  ;;  %6862 = vmatpush1.bf16.msra.mxu0 %v6861_v20  ;;  %v317_v20 = vld [vmem:[%s12950_s1 + $0x948] sm:$0xff]  ;;  %v316_v21 = vld [vmem:[%s12950_s1 + $0x940] sm:$0xff] }
 0x231   :  { %6863 = vmatprep.subr.bf16.mxu0 %v7941_v0 }
 0x233   :  { %1601 = vmatmul.mubr.f32.gmra.mrb[14].mxu0 %v96_v24  ;;  %v337_v24 = vld [vmem:[%s12950_s1 + $0x9e8] sm:$0xff] }
 0x234   :  { %1605 = vmatprep.mubr.f32.mxu0 %v107_v26  ;;  %6865 = vmatpush1.bf16.msra.mxu0 %v6864_v25  ;;  %v336_v25 = vld [vmem:[%s12950_s1 + $0x9e0] sm:$0xff]  ;;  %v347_v26 = vld [vmem:[%s12950_s1 + $0xa38] sm:$0xff] }
 0x235   :  { %6866 = vmatprep.subr.bf16.mxu0 %v7941_v0 }
 0x237   :  { %1606 = vmatmul.mubr.f32.gmra.mrb[16].mxu0 %v106_v29  ;;  %v356_v29 = vld [vmem:[%s12950_s1 + $0xa80] sm:$0xff] }
 0x238   :  { %1610 = vmatprep.mubr.f32.mxu0 %v117_v31  ;;  %6868 = vmatpush1.bf16.msra.mxu0 %v6867_v30  ;;  %v367_v30 = vld [vmem:[%s12950_s1 + $0xad8] sm:$0xff]  ;;  %v366_v31 = vld [vmem:[%s12950_s1 + $0xad0] sm:$0xff] }
 0x239   :  { %6869 = vmatprep.subr.bf16.mxu0 %v7941_v0 }
 0x23b   :  { %1611 = vmatmul.mubr.f32.gmra.mrb[18].mxu0 %v116_v34  ;;  %v387_v34 = vld [vmem:[%s12950_s1 + $0xb78] sm:$0xff] }
 0x23c   :  { %1615 = vmatprep.mubr.f32.mxu0 %v127_v36  ;;  %6871 = vmatpush1.bf16.msra.mxu0 %v6870_v35  ;;  %v386_v35 = vld [vmem:[%s12950_s1 + $0xb70] sm:$0xff]  ;;  %v397_v36 = vld [vmem:[%s12950_s1 + $0xbc8] sm:$0xff] }
 0x23d   :  { %6872 = vmatprep.subr.bf16.mxu0 %v7941_v0 }
 0x23f   :  { %1616 = vmatmul.mubr.f32.gmra.mrb[20].mxu0 %v126_v39  ;;  %v406_v39 = vld [vmem:[%s12950_s1 + $0xc10] sm:$0xf] }
 0x240   :  { %1620 = vmatprep.mubr.f32.mxu0 %v137_v41  ;;  %6874 = vmatpush1.bf16.msra.mxu0 %v6873_v40  ;;  %v29_v40 = vld [vmem:[%s12950_s1 + $0x48] sm:$0xff]  ;;  %v28_v41 = vld [vmem:[%s12950_s1 + $0x40] sm:$0xff] }
 0x241   :  { %6875 = vmatprep.subr.bf16.mxu0 %v7941_v0 }
 0x243   :  { %1621 = vmatmul.mubr.f32.gmra.mrb[22].mxu0 %v136_v44  ;;  %v49_v44 = vld [vmem:[%s12950_s1 + $0xe8] sm:$0xff] }
 0x244   :  { %1625 = vmatprep.mubr.f32.mxu0 %v147_v46  ;;  %6877 = vmatpush1.bf16.msra.mxu0 %v6876_v45  ;;  %v48_v45 = vld [vmem:[%s12950_s1 + $0xe0] sm:$0xff]  ;;  %v59_v46 = vld [vmem:[%s12950_s1 + $0x138] sm:$0xff] }
 0x245   :  { %6878 = vmatprep.subr.bf16.mxu0 %v7941_v0 }
 0x247   :  { %1626 = vmatmul.mubr.f32.gmra.mrb[24].mxu0 %v146_v49  ;;  %v68_v49 = vld [vmem:[%s12950_s1 + $0x180] sm:$0xff] }
 0x248   :  { %1630 = vmatprep.mubr.f32.mxu0 %v157_v51  ;;  %6880 = vmatpush1.bf16.msra.mxu0 %v6879_v50  ;;  %v79_v50 = vld [vmem:[%s12950_s1 + $0x1d8] sm:$0xff]  ;;  %v78_v51 = vld [vmem:[%s12950_s1 + $0x1d0] sm:$0xff] }
 0x249   :  { %6881 = vmatprep.subr.bf16.mxu0 %v7941_v0 }
 0x24b   :  { %1631 = vmatmul.mubr.f32.gmra.mrb[26].mxu0 %v156_v52  ;;  %v89_v52 = vld [vmem:[%s12950_s1 + $0x228] sm:$0xff] }
 0x24c   :  { %1635 = vmatprep.mubr.f32.mxu0 %v167_v53  ;;  %v88_v53 = vld [vmem:[%s12950_s1 + $0x220] sm:$0xff] }
 0x24f   :  { %1636 = vmatmul.mubr.f32.gmra.mrb[28].mxu0 %v166_v54  ;;  %v99_v54 = vld [vmem:[%s12950_s1 + $0x278] sm:$0xff] }
 0x250   :  { %1640 = vmatprep.mubr.f32.mxu0 %v177_v55  ;;  %v98_v55 = vld [vmem:[%s12950_s1 + $0x270] sm:$0xff] }
 0x253   :  { %1641 = vmatmul.mubr.f32.gmra.mrb[30].mxu0 %v176_v56  ;;  %v109_v56 = vld [vmem:[%s12950_s1 + $0x2c8] sm:$0xff] }
 0x254   :  { %1645 = vmatprep.mubr.f32.mxu0 %v187_v57  ;;  %v108_v57 = vld [vmem:[%s12950_s1 + $0x2c0] sm:$0xff] }
 0x257   :  { %1646 = vmatmul.mubr.f32.gmra.mrb[32].mxu0 %v186_v58  ;;  %v119_v58 = vld [vmem:[%s12950_s1 + $0x318] sm:$0xff] }
 0x258   :  { %1650 = vmatprep.mubr.f32.mxu0 %v197_v59  ;;  %v118_v59 = vld [vmem:[%s12950_s1 + $0x310] sm:$0xff] }
 0x25b   :  { %1651 = vmatmul.mubr.f32.gmra.mrb[34].mxu0 %v196_v60  ;;  %v129_v60 = vld [vmem:[%s12950_s1 + $0x368] sm:$0xff] }
 0x25c   :  { %1655 = vmatprep.mubr.f32.mxu0 %v207_v61  ;;  %v128_v61 = vld [vmem:[%s12950_s1 + $0x360] sm:$0xff] }
 0x25f   :  { %1656 = vmatmul.mubr.f32.gmra.mrb[36].mxu0 %v206_v62  ;;  %v139_v62 = vld [vmem:[%s12950_s1 + $0x3b8] sm:$0xff] }
 0x260   :  { %1660 = vmatprep.mubr.f32.mxu0 %v217_v63  ;;  %v138_v63 = vld [vmem:[%s12950_s1 + $0x3b0] sm:$0xff] }
 0x263   :  { %1661 = vmatmul.mubr.f32.gmra.mrb[38].mxu0 %v216_v1  ;;  %v149_v1 = vld [vmem:[%s12950_s1 + $0x408] sm:$0xff] }
 0x264   :  { %1665 = vmatprep.mubr.f32.mxu0 %v227_v2  ;;  %v148_v2 = vld [vmem:[%s12950_s1 + $0x400] sm:$0xff] }
 0x267   :  { %1666 = vmatmul.mubr.f32.gmra.mrb[40].mxu0 %v226_v3  ;;  %v159_v3 = vld [vmem:[%s12950_s1 + $0x458] sm:$0xff] }
 0x268   :  { %1670 = vmatprep.mubr.f32.mxu0 %v237_v4  ;;  %v158_v4 = vld [vmem:[%s12950_s1 + $0x450] sm:$0xff] }
 0x26b   :  { %1671 = vmatmul.mubr.f32.gmra.mrb[42].mxu0 %v236_v5  ;;  %v169_v5 = vld [vmem:[%s12950_s1 + $0x4a8] sm:$0xff] }
 0x26c   :  { %1675 = vmatprep.mubr.f32.mxu0 %v247_v6  ;;  %v168_v6 = vld [vmem:[%s12950_s1 + $0x4a0] sm:$0xff] }
 0x26f   :  { %1676 = vmatmul.mubr.f32.gmra.mrb[44].mxu0 %v246_v7  ;;  %v179_v7 = vld [vmem:[%s12950_s1 + $0x4f8] sm:$0xff] }
 0x270   :  { %1680 = vmatprep.mubr.f32.mxu0 %v257_v8  ;;  %v178_v8 = vld [vmem:[%s12950_s1 + $0x4f0] sm:$0xff] }
 0x273   :  { %1681 = vmatmul.mubr.f32.gmra.mrb[46].mxu0 %v256_v9  ;;  %v189_v9 = vld [vmem:[%s12950_s1 + $0x548] sm:$0xff] }
 0x274   :  { %1685 = vmatprep.mubr.f32.mxu0 %v267_v10  ;;  %v188_v10 = vld [vmem:[%s12950_s1 + $0x540] sm:$0xff] }
 0x277   :  { %1686 = vmatmul.mubr.f32.gmra.mrb[48].mxu0 %v266_v11  ;;  %v199_v11 = vld [vmem:[%s12950_s1 + $0x598] sm:$0xff] }
 0x278   :  { %1690 = vmatprep.mubr.f32.mxu0 %v277_v12  ;;  %v198_v12 = vld [vmem:[%s12950_s1 + $0x590] sm:$0xff] }
 0x27b   :  { %1691 = vmatmul.mubr.f32.gmra.mrb[50].mxu0 %v276_v13  ;;  %v209_v13 = vld [vmem:[%s12950_s1 + $0x5e8] sm:$0xff] }
 0x27c   :  { %1695 = vmatprep.mubr.f32.mxu0 %v287_v14  ;;  %v208_v14 = vld [vmem:[%s12950_s1 + $0x5e0] sm:$0xff] }
 0x27f   :  { %1696 = vmatmul.mubr.f32.gmra.mrb[52].mxu0 %v286_v15  ;;  %v219_v15 = vld [vmem:[%s12950_s1 + $0x638] sm:$0xff] }
 0x280   :  { %1700 = vmatprep.mubr.f32.mxu0 %v297_v16  ;;  %v218_v16 = vld [vmem:[%s12950_s1 + $0x630] sm:$0xff] }
 0x283   :  { %1701 = vmatmul.mubr.f32.gmra.mrb[54].mxu0 %v296_v17  ;;  %v229_v17 = vld [vmem:[%s12950_s1 + $0x688] sm:$0xff] }
 0x284   :  { %1705 = vmatprep.mubr.f32.mxu0 %v307_v18  ;;  %v228_v18 = vld [vmem:[%s12950_s1 + $0x680] sm:$0xff] }
 0x287   :  { %1706 = vmatmul.mubr.f32.gmra.mrb[56].mxu0 %v306_v19  ;;  %v239_v19 = vld [vmem:[%s12950_s1 + $0x6d8] sm:$0xff] }
 0x288   :  { %1710 = vmatprep.mubr.f32.mxu0 %v317_v20  ;;  %v238_v20 = vld [vmem:[%s12950_s1 + $0x6d0] sm:$0xff] }
 0x28b   :  { %1711 = vmatmul.mubr.f32.gmra.mrb[58].mxu0 %v316_v21  ;;  %v249_v21 = vld [vmem:[%s12950_s1 + $0x728] sm:$0xff] }
 0x28c   :  { %1715 = vmatprep.mubr.f32.mxu0 %v327_v22  ;;  %v248_v22 = vld [vmem:[%s12950_s1 + $0x720] sm:$0xff] }
 0x28f   :  { %1716 = vmatmul.mubr.f32.gmra.mrb[60].mxu0 %v326_v23  ;;  %v259_v23 = vld [vmem:[%s12950_s1 + $0x778] sm:$0xff] }
 0x290   :  { %1720 = vmatprep.mubr.f32.mxu0 %v337_v24  ;;  %v258_v24 = vld [vmem:[%s12950_s1 + $0x770] sm:$0xff] }
 0x293   :  { %1721 = vmatmul.mubr.f32.gmra.mrb[62].mxu0 %v336_v25  ;;  %v269_v25 = vld [vmem:[%s12950_s1 + $0x7c8] sm:$0xff] }
 0x294   :  { %1725 = vmatprep.mubr.f32.mxu0 %v347_v26  ;;  %v268_v26 = vld [vmem:[%s12950_s1 + $0x7c0] sm:$0xff] }
 0x297   :  { %1726 = vmatmul.mubr.f32.gmra.mrb[64].mxu0 %v346_v27  ;;  %v279_v27 = vld [vmem:[%s12950_s1 + $0x818] sm:$0xff] }
 0x298   :  { %1730 = vmatprep.mubr.f32.mxu0 %v357_v28  ;;  %v278_v28 = vld [vmem:[%s12950_s1 + $0x810] sm:$0xff] }
 0x29b   :  { %1731 = vmatmul.mubr.f32.gmra.mrb[66].mxu0 %v356_v29  ;;  %v289_v29 = vld [vmem:[%s12950_s1 + $0x868] sm:$0xff] }
 0x29c   :  { %1735 = vmatprep.mubr.f32.mxu0 %v367_v30  ;;  %v288_v30 = vld [vmem:[%s12950_s1 + $0x860] sm:$0xff] }
 0x29f   :  { %1736 = vmatmul.mubr.f32.gmra.mrb[68].mxu0 %v366_v31  ;;  %v299_v31 = vld [vmem:[%s12950_s1 + $0x8b8] sm:$0xff] }
 0x2a0   :  { %1740 = vmatprep.mubr.f32.mxu0 %v377_v32  ;;  %v298_v32 = vld [vmem:[%s12950_s1 + $0x8b0] sm:$0xff] }
 0x2a3   :  { %1741 = vmatmul.mubr.f32.gmra.mrb[70].mxu0 %v376_v33  ;;  %v309_v33 = vld [vmem:[%s12950_s1 + $0x908] sm:$0xff] }
 0x2a4   :  { %1745 = vmatprep.mubr.f32.mxu0 %v387_v34  ;;  %v308_v34 = vld [vmem:[%s12950_s1 + $0x900] sm:$0xff] }
 0x2a7   :  { %1746 = vmatmul.mubr.f32.gmra.mrb[72].mxu0 %v386_v35  ;;  %v319_v35 = vld [vmem:[%s12950_s1 + $0x958] sm:$0xff] }
 0x2a8   :  { %1750 = vmatprep.mubr.f32.mxu0 %v397_v36  ;;  %v318_v36 = vld [vmem:[%s12950_s1 + $0x950] sm:$0xff] }
 0x2ab   :  { %1751 = vmatmul.mubr.f32.gmra.mrb[74].mxu0 %v396_v37  ;;  %v329_v37 = vld [vmem:[%s12950_s1 + $0x9a8] sm:$0xff] }
 0x2ac   :  { %1755 = vmatprep.mubr.f32.mxu0 %v407_v38  ;;  %v328_v38 = vld [vmem:[%s12950_s1 + $0x9a0] sm:$0xff] }
 0x2af   :  { %1756 = vmatmul.mubr.f32.gmra.mrb[76].mxu0 %v406_v39  ;;  %v339_v39 = vld [vmem:[%s12950_s1 + $0x9f8] sm:$0xff] }
 0x2b0   :  { %5896 = vmatprep.mubr.msk.f32.mxu0 %vm603_vm0, %v29_v40  ;;  %v338_v40 = vld [vmem:[%s12950_s1 + $0x9f0] sm:$0xff] }
 0x2b3   :  { %1826 = vmatmul.mubr.f32.vlgmr.msra.gmra.mrb[0].mxu0 %v28_v41  ;;  %v349_v41 = vld [vmem:[%s12950_s1 + $0xa48] sm:$0xff] }
 0x2b4   :  { %5897 = vmatprep.mubr.msk.f32.mxu0 %vm603_vm0, %v39_v42  ;;  %v348_v42 = vld [vmem:[%s12950_s1 + $0xa40] sm:$0xff] }
 0x2b7   :  { %1831 = vmatmul.mubr.f32.gmra.mrb[2].mxu0 %v38_v43  ;;  %v359_v43 = vld [vmem:[%s12950_s1 + $0xa98] sm:$0xff] }
 0x2b8   :  { %5898 = vmatprep.mubr.msk.f32.mxu0 %vm603_vm0, %v49_v44  ;;  %v358_v44 = vld [vmem:[%s12950_s1 + $0xa90] sm:$0xff] }
 0x2bb   :  { %1836 = vmatmul.mubr.f32.gmra.mrb[4].mxu0 %v48_v45  ;;  %v369_v45 = vld [vmem:[%s12950_s1 + $0xae8] sm:$0xff] }
 0x2bc   :  { %5899 = vmatprep.mubr.msk.f32.mxu0 %vm603_vm0, %v59_v46  ;;  %v368_v46 = vld [vmem:[%s12950_s1 + $0xae0] sm:$0xff] }
 0x2bf   :  { %1841 = vmatmul.mubr.f32.gmra.mrb[6].mxu0 %v58_v47  ;;  %v379_v47 = vld [vmem:[%s12950_s1 + $0xb38] sm:$0xff] }
 0x2c0   :  { %5900 = vmatprep.mubr.msk.f32.mxu0 %vm603_vm0, %v69_v48  ;;  %v378_v48 = vld [vmem:[%s12950_s1 + $0xb30] sm:$0xff] }
 0x2c3   :  { %1846 = vmatmul.mubr.f32.gmra.mrb[8].mxu0 %v68_v49  ;;  %v389_v49 = vld [vmem:[%s12950_s1 + $0xb88] sm:$0xff] }
 0x2c4   :  { %5901 = vmatprep.mubr.msk.f32.mxu0 %vm603_vm0, %v79_v50  ;;  %v388_v50 = vld [vmem:[%s12950_s1 + $0xb80] sm:$0xff] }
 0x2c7   :  { %1851 = vmatmul.mubr.f32.gmra.mrb[10].mxu0 %v78_v51  ;;  %v399_v51 = vld [vmem:[%s12950_s1 + $0xbd8] sm:$0xff] }
 0x2c8   :  { %5902 = vmatprep.mubr.msk.f32.mxu0 %vm603_vm0, %v89_v52  ;;  %v398_v52 = vld [vmem:[%s12950_s1 + $0xbd0] sm:$0xff] }
 0x2cb   :  { %1856 = vmatmul.mubr.f32.gmra.mrb[12].mxu0 %v88_v53  ;;  %v409_v53 = vld [vmem:[%s12950_s1 + $0xc28] sm:$0xf] }
 0x2cc   :  { %5903 = vmatprep.mubr.msk.f32.mxu0 %vm603_vm0, %v99_v54  ;;  %v408_v54 = vld [vmem:[%s12950_s1 + $0xc20] sm:$0xf] }
 0x2cf   :  { %1861 = vmatmul.mubr.f32.gmra.mrb[14].mxu0 %v98_v55  ;;  %v564_v55 = vld [vmem:[%s12951_s2] sm:$0xff] }
 0x2d0   :  { %5904 = vmatprep.mubr.msk.f32.mxu0 %vm603_vm0, %v109_v56 }
 0x2d3   :  { %1866 = vmatmul.mubr.f32.gmra.mrb[16].mxu0 %v108_v57 }
 0x2d4   :  { %5905 = vmatprep.mubr.msk.f32.mxu0 %vm603_vm0, %v119_v58  ;;  %v565_v58 = vld [vmem:[%s12951_s2 + $0x8] sm:$0xff] }
 0x2d7   :  { %1871 = vmatmul.mubr.f32.gmra.mrb[18].mxu0 %v118_v59 }
 0x2d8   :  { %5906 = vmatprep.mubr.msk.f32.mxu0 %vm603_vm0, %v129_v60 }
 0x2db   :  { %1876 = vmatmul.mubr.f32.gmra.mrb[20].mxu0 %v128_v61  ;;  %v2115_v61 = vld [vmem:[%s12952_s3 + $0x1b8] sm:$0xff] }
 0x2dc   :  { %5907 = vmatprep.mubr.msk.f32.mxu0 %vm603_vm0, %v139_v62  ;;  %3297 = vmatprep.mubr.f32.mxu1 %v2115_v61 }
 0x2df   :  { %1881 = vmatmul.mubr.f32.gmra.mrb[22].mxu0 %v138_v63 }
 0x2e0   :  { %5908 = vmatprep.mubr.msk.f32.mxu0 %vm603_vm0, %v149_v1 }
 0x2e3   :  { %1886 = vmatmul.mubr.f32.gmra.mrb[24].mxu0 %v148_v2 }
 0x2e4   :  { %5909 = vmatprep.mubr.msk.f32.mxu0 %vm603_vm0, %v159_v3  ;;  %v566_v3 = vld [vmem:[%s12951_s2 + $0x10] sm:$0xff] }
 0x2e7   :  { %1891 = vmatmul.mubr.f32.gmra.mrb[26].mxu0 %v158_v4 }
 0x2e8   :  { %5910 = vmatprep.mubr.msk.f32.mxu0 %vm603_vm0, %v169_v5 }
 0x2eb   :  { %1896 = vmatmul.mubr.f32.gmra.mrb[28].mxu0 %v168_v6 }
 0x2ec   :  { %5911 = vmatprep.mubr.msk.f32.mxu0 %vm603_vm0, %v179_v7  ;;  %v567_v7 = vld [vmem:[%s12951_s2 + $0x18] sm:$0xff] }
 0x2ef   :  { %1901 = vmatmul.mubr.f32.gmra.mrb[30].mxu0 %v178_v8 }
 0x2f0   :  { %5912 = vmatprep.mubr.msk.f32.mxu0 %vm603_vm0, %v189_v9 }
 0x2f3   :  { %1906 = vmatmul.mubr.f32.gmra.mrb[32].mxu0 %v188_v10 }
 0x2f4   :  { %5913 = vmatprep.mubr.msk.f32.mxu0 %vm603_vm0, %v199_v11 }
 0x2f7   :  { %1911 = vmatmul.mubr.f32.gmra.mrb[34].mxu0 %v198_v12 }
 0x2f8   :  { %5914 = vmatprep.mubr.msk.f32.mxu0 %vm603_vm0, %v209_v13 }
 0x2fb   :  { %1916 = vmatmul.mubr.f32.gmra.mrb[36].mxu0 %v208_v14  ;;  %v568_v14 = vld [vmem:[%s12951_s2 + $0x20] sm:$0xff] }
 0x2fc   :  { %5915 = vmatprep.mubr.msk.f32.mxu0 %vm603_vm0, %v219_v15 }
 0x2ff   :  { %1921 = vmatmul.mubr.f32.gmra.mrb[38].mxu0 %v218_v16 }
 0x300   :  { %5916 = vmatprep.mubr.msk.f32.mxu0 %vm603_vm0, %v229_v17 }
 0x303   :  { %1926 = vmatmul.mubr.f32.gmra.mrb[40].mxu0 %v228_v18  ;;  %v569_v18 = vld [vmem:[%s12951_s2 + $0x28] sm:$0xff] }
 0x304   :  { %5917 = vmatprep.mubr.msk.f32.mxu0 %vm603_vm0, %v239_v19 }
 0x307   :  { %1931 = vmatmul.mubr.f32.gmra.mrb[42].mxu0 %v238_v20 }
 0x308   :  { %5918 = vmatprep.mubr.msk.f32.mxu0 %vm603_vm0, %v249_v21 }
 0x30b   :  { %1936 = vmatmul.mubr.f32.gmra.mrb[44].mxu0 %v248_v22 }
 0x30c   :  { %5919 = vmatprep.mubr.msk.f32.mxu0 %vm603_vm0, %v259_v23 }
 0x30f   :  { %1941 = vmatmul.mubr.f32.gmra.mrb[46].mxu0 %v258_v24 }
 0x310   :  { %5920 = vmatprep.mubr.msk.f32.mxu0 %vm603_vm0, %v269_v25  ;;  %v570_v25 = vld [vmem:[%s12951_s2 + $0x30] sm:$0xff] }
 0x313   :  { %1946 = vmatmul.mubr.f32.gmra.mrb[48].mxu0 %v268_v26 }
 0x314   :  { %5921 = vmatprep.mubr.msk.f32.mxu0 %vm603_vm0, %v279_v27 }
 0x317   :  { %1951 = vmatmul.mubr.f32.gmra.mrb[50].mxu0 %v278_v28 }
 0x318   :  { %5922 = vmatprep.mubr.msk.f32.mxu0 %vm603_vm0, %v289_v29  ;;  %v571_v29 = vld [vmem:[%s12951_s2 + $0x38] sm:$0xff] }
 0x31b   :  { %1956 = vmatmul.mubr.f32.gmra.mrb[52].mxu0 %v288_v30 }
 0x31c   :  { %5923 = vmatprep.mubr.msk.f32.mxu0 %vm603_vm0, %v299_v31 }
 0x31f   :  { %1961 = vmatmul.mubr.f32.gmra.mrb[54].mxu0 %v298_v32 }
 0x320   :  { %5924 = vmatprep.mubr.msk.f32.mxu0 %vm603_vm0, %v309_v33 }
 0x323   :  { %1966 = vmatmul.mubr.f32.gmra.mrb[56].mxu0 %v308_v34 }
 0x324   :  { %5925 = vmatprep.mubr.msk.f32.mxu0 %vm603_vm0, %v319_v35 }
 0x327   :  { %1971 = vmatmul.mubr.f32.gmra.mrb[58].mxu0 %v318_v36  ;;  %v572_v36 = vld [vmem:[%s12951_s2 + $0x40] sm:$0xff] }
 0x328   :  { %5926 = vmatprep.mubr.msk.f32.mxu0 %vm603_vm0, %v329_v37 }
 0x32b   :  { %1976 = vmatmul.mubr.f32.gmra.mrb[60].mxu0 %v328_v38 }
 0x32c   :  { %5927 = vmatprep.mubr.msk.f32.mxu0 %vm603_vm0, %v339_v39 }
 0x32f   :  { %1981 = vmatmul.mubr.f32.gmra.mrb[62].mxu0 %v338_v40  ;;  %v573_v40 = vld [vmem:[%s12951_s2 + $0x48] sm:$0xff] }
 0x330   :  { %5928 = vmatprep.mubr.msk.f32.mxu0 %vm603_vm0, %v349_v41 }
 0x333   :  { %1986 = vmatmul.mubr.f32.gmra.mrb[64].mxu0 %v348_v42 }
 0x334   :  { %5929 = vmatprep.mubr.msk.f32.mxu0 %vm603_vm0, %v359_v43 }
 0x337   :  { %1991 = vmatmul.mubr.f32.gmra.mrb[66].mxu0 %v358_v44 }
 0x338   :  { %5930 = vmatprep.mubr.msk.f32.mxu0 %vm603_vm0, %v369_v45 }
 0x33b   :  { %1996 = vmatmul.mubr.f32.gmra.mrb[68].mxu0 %v368_v46 }
 0x33c   :  { %5931 = vmatprep.mubr.msk.f32.mxu0 %vm603_vm0, %v379_v47  ;;  %v574_v47 = vld [vmem:[%s12951_s2 + $0x50] sm:$0xff] }
 0x33f   :  { %2001 = vmatmul.mubr.f32.gmra.mrb[70].mxu0 %v378_v48 }
 0x340   :  { %5932 = vmatprep.mubr.msk.f32.mxu0 %vm603_vm0, %v389_v49 }
 0x343   :  { %2006 = vmatmul.mubr.f32.gmra.mrb[72].mxu0 %v388_v50 }
 0x344   :  { %5933 = vmatprep.mubr.msk.f32.mxu0 %vm603_vm0, %v399_v51  ;;  %v575_v51 = vld [vmem:[%s12951_s2 + $0x58] sm:$0xff] }
 0x347   :  { %2011 = vmatmul.mubr.f32.gmra.mrb[74].mxu0 %v398_v52 }
 0x348   :  { %5934 = vmatprep.mubr.msk.f32.mxu0 %vm603_vm0, %v409_v53 }
 0x34b   :  { %2016 = vmatmul.mubr.f32.gmra.mrb[76].mxu0 %v408_v54 }
 0x386   :  { %v1827_v56 = vpop.f32.mrb[0].mxu0 }
 0x387   :  { %v1829_v57 = vpop.f32.mrb[1].mxu0  ;;  %v6973_v59 = vadd.f32 %v1827_v56, %v564_v55 }
 0x389   :  { %v2021_v1 = vmax.f32 %v6973_v59, 0.0 }
 0x38a   :  { %v1832_v60 = vpop.f32.mrb[2].mxu0 }
 0x38b   :  { %v6974_v62 = vadd.f32 %v1832_v60, %v565_v58  ;;  %v1834_v63 = vpop.f32.mrb[3].mxu0  ;;  %v576_v58 = vld [vmem:[%s12951_s2 + $0x60] sm:$0xff] }
 0x38d   :  { %v2022_v2 = vmax.f32 %v6974_v62, 0.0  ;;  %v577_v62 = vld [vmem:[%s12951_s2 + $0x68] sm:$0xff] }
 0x38e   :  { %v1837_v4 = vpop.f32.mrb[4].mxu0 }
 0x38f   :  { %v6882_v5 = vpack.c.bf16 %v2022_v2, %v2021_v1  ;;  %v1839_v6 = vpop.f32.mrb[5].mxu0  ;;  %v6975_v8 = vadd.f32 %v1837_v4, %v566_v3 }
 0x390   :  { %v578_v6 = vld [vmem:[%s12951_s2 + $0x70] sm:$0xff] }
 0x391   :  { %6883 = vmatpush1.bf16.msra.mxu0 %v6882_v5  ;;  %6957 = vmatpush1.bf16.msra.mxu1 %v6882_v5  ;;  %v2023_v12 = vmax.f32 %v6975_v8, 0.0 }
 0x392   :  { %v1842_v9 = vpop.f32.mrb[6].mxu0  ;;  %6884 = vmatprep.subr.bf16.mxu0 %v7941_v0  ;;  %6942 = vmatprep.subr.bf16.mxu1 %v7941_v0 }
 0x393   :  { %v6976_v10 = vadd.f32 %v1842_v9, %v567_v7  ;;  %v1844_v11 = vpop.f32.mrb[7].mxu0 }
 0x395   :  { %v2024_v13 = vmax.f32 %v6976_v10, 0.0  ;;  %v579_v10 = vld [vmem:[%s12951_s2 + $0x78] sm:$0xff] }
 0x396   :  { %v1847_v15 = vpop.f32.mrb[8].mxu0 }
 0x397   :  { %v6885_v16 = vpack.c.bf16 %v2024_v13, %v2023_v12  ;;  %v1849_v17 = vpop.f32.mrb[9].mxu0  ;;  %v6977_v19 = vadd.f32 %v1847_v15, %v568_v14 }
 0x398   :  { %v580_v17 = vld [vmem:[%s12951_s2 + $0x80] sm:$0xff] }
 0x399   :  { %6886 = vmatpush1.bf16.msra.mxu0 %v6885_v16  ;;  %6958 = vmatpush1.bf16.msra.mxu1 %v6885_v16  ;;  %v2025_v23 = vmax.f32 %v6977_v19, 0.0 }
 0x39a   :  { %v1852_v20 = vpop.f32.mrb[10].mxu0  ;;  %6887 = vmatprep.subr.bf16.mxu0 %v7941_v0  ;;  %6943 = vmatprep.subr.bf16.mxu1 %v7941_v0 }
 0x39b   :  { %v6978_v21 = vadd.f32 %v1852_v20, %v569_v18  ;;  %v1854_v22 = vpop.f32.mrb[11].mxu0 }
 0x39d   :  { %v2026_v24 = vmax.f32 %v6978_v21, 0.0  ;;  %v581_v21 = vld [vmem:[%s12951_s2 + $0x88] sm:$0xff] }
 0x39e   :  { %v1857_v26 = vpop.f32.mrb[12].mxu0 }
 0x39f   :  { %v6888_v27 = vpack.c.bf16 %v2026_v24, %v2025_v23  ;;  %v1859_v28 = vpop.f32.mrb[13].mxu0  ;;  %v6979_v30 = vadd.f32 %v1857_v26, %v570_v25 }
 0x3a0   :  { %v582_v28 = vld [vmem:[%s12951_s2 + $0x90] sm:$0xff] }
 0x3a1   :  { %6889 = vmatpush1.bf16.msra.mxu0 %v6888_v27  ;;  %6959 = vmatpush1.bf16.msra.mxu1 %v6888_v27  ;;  %v2027_v34 = vmax.f32 %v6979_v30, 0.0 }
 0x3a2   :  { %v1862_v31 = vpop.f32.mrb[14].mxu0  ;;  %6890 = vmatprep.subr.bf16.mxu0 %v7941_v0  ;;  %6944 = vmatprep.subr.bf16.mxu1 %v7941_v0 }
 0x3a3   :  { %v6980_v32 = vadd.f32 %v1862_v31, %v571_v29  ;;  %v1864_v33 = vpop.f32.mrb[15].mxu0 }
 0x3a5   :  { %v2028_v35 = vmax.f32 %v6980_v32, 0.0  ;;  %v583_v32 = vld [vmem:[%s12951_s2 + $0x98] sm:$0xff] }
 0x3a6   :  { %v1867_v37 = vpop.f32.mrb[16].mxu0 }
 0x3a7   :  { %v6891_v38 = vpack.c.bf16 %v2028_v35, %v2027_v34  ;;  %v1869_v39 = vpop.f32.mrb[17].mxu0  ;;  %v6981_v41 = vadd.f32 %v1867_v37, %v572_v36 }
 0x3a8   :  { %v584_v39 = vld [vmem:[%s12951_s2 + $0xa0] sm:$0xff] }
 0x3a9   :  { %6892 = vmatpush1.bf16.msra.mxu0 %v6891_v38  ;;  %6960 = vmatpush1.bf16.msra.mxu1 %v6891_v38  ;;  %v2029_v45 = vmax.f32 %v6981_v41, 0.0 }
 0x3aa   :  { %v1872_v42 = vpop.f32.mrb[18].mxu0  ;;  %6893 = vmatprep.subr.bf16.mxu0 %v7941_v0  ;;  %6945 = vmatprep.subr.bf16.mxu1 %v7941_v0 }
 0x3ab   :  { %v6982_v43 = vadd.f32 %v1872_v42, %v573_v40  ;;  %v1874_v44 = vpop.f32.mrb[19].mxu0 }
 0x3ad   :  { %v2030_v46 = vmax.f32 %v6982_v43, 0.0  ;;  %v585_v43 = vld [vmem:[%s12951_s2 + $0xa8] sm:$0xff] }
 0x3ae   :  { %v1877_v48 = vpop.f32.mrb[20].mxu0 }
 0x3af   :  { %v6894_v49 = vpack.c.bf16 %v2030_v46, %v2029_v45  ;;  %v1879_v50 = vpop.f32.mrb[21].mxu0  ;;  %v6983_v52 = vadd.f32 %v1877_v48, %v574_v47 }
 0x3b0   :  { %v586_v50 = vld [vmem:[%s12951_s2 + $0xb0] sm:$0xff] }
 0x3b1   :  { %6895 = vmatpush1.bf16.msra.mxu0 %v6894_v49  ;;  %6961 = vmatpush1.bf16.msra.mxu1 %v6894_v49  ;;  %v2031_v56 = vmax.f32 %v6983_v52, 0.0 }
 0x3b2   :  { %v1882_v53 = vpop.f32.mrb[22].mxu0  ;;  %6896 = vmatprep.subr.bf16.mxu0 %v7941_v0  ;;  %6946 = vmatprep.subr.bf16.mxu1 %v7941_v0 }
 0x3b3   :  { %v6984_v54 = vadd.f32 %v1882_v53, %v575_v51  ;;  %v1884_v55 = vpop.f32.mrb[23].mxu0 }
 0x3b5   :  { %v2032_v57 = vmax.f32 %v6984_v54, 0.0  ;;  %v587_v54 = vld [vmem:[%s12951_s2 + $0xb8] sm:$0xff] }
 0x3b6   :  { %v1887_v59 = vpop.f32.mrb[24].mxu0 }
 0x3b7   :  { %v6897_v60 = vpack.c.bf16 %v2032_v57, %v2031_v56  ;;  %v1889_v61 = vpop.f32.mrb[25].mxu0  ;;  %v6985_v63 = vadd.f32 %v1887_v59, %v576_v58 }
 0x3b8   :  { %v588_v61 = vld [vmem:[%s12951_s2 + $0xc0] sm:$0xff] }
 0x3b9   :  { %6898 = vmatpush1.bf16.msra.mxu0 %v6897_v60  ;;  %6962 = vmatpush1.bf16.msra.mxu1 %v6897_v60  ;;  %v2033_v4 = vmax.f32 %v6985_v63, 0.0 }
 0x3ba   :  { %v1892_v1 = vpop.f32.mrb[26].mxu0  ;;  %6899 = vmatprep.subr.bf16.mxu0 %v7941_v0  ;;  %6947 = vmatprep.subr.bf16.mxu1 %v7941_v0 }
 0x3bb   :  { %v6986_v2 = vadd.f32 %v1892_v1, %v577_v62  ;;  %v1894_v3 = vpop.f32.mrb[27].mxu0 }
 0x3bd   :  { %v2034_v5 = vmax.f32 %v6986_v2, 0.0  ;;  %v589_v2 = vld [vmem:[%s12951_s2 + $0xc8] sm:$0xff] }
 0x3be   :  { %v1897_v7 = vpop.f32.mrb[28].mxu0 }
 0x3bf   :  { %v6900_v8 = vpack.c.bf16 %v2034_v5, %v2033_v4  ;;  %v1899_v9 = vpop.f32.mrb[29].mxu0  ;;  %v6987_v11 = vadd.f32 %v1897_v7, %v578_v6 }
 0x3c0   :  { %v590_v9 = vld [vmem:[%s12951_s2 + $0xd0] sm:$0xff] }
 0x3c1   :  { %6901 = vmatpush1.bf16.msra.mxu0 %v6900_v8  ;;  %6963 = vmatpush1.bf16.msra.mxu1 %v6900_v8  ;;  %v2035_v15 = vmax.f32 %v6987_v11, 0.0 }
 0x3c2   :  { %v1902_v12 = vpop.f32.mrb[30].mxu0  ;;  %6902 = vmatprep.subr.bf16.mxu0 %v7941_v0  ;;  %6948 = vmatprep.subr.bf16.mxu1 %v7941_v0 }
 0x3c3   :  { %v6988_v13 = vadd.f32 %v1902_v12, %v579_v10  ;;  %v1904_v14 = vpop.f32.mrb[31].mxu0 }
 0x3c5   :  { %v2036_v16 = vmax.f32 %v6988_v13, 0.0  ;;  %v591_v13 = vld [vmem:[%s12951_s2 + $0xd8] sm:$0xff] }
 0x3c6   :  { %v1907_v18 = vpop.f32.mrb[32].mxu0 }
 0x3c7   :  { %v6903_v19 = vpack.c.bf16 %v2036_v16, %v2035_v15  ;;  %v1909_v20 = vpop.f32.mrb[33].mxu0  ;;  %v6989_v22 = vadd.f32 %v1907_v18, %v580_v17 }
 0x3c8   :  { %v592_v20 = vld [vmem:[%s12951_s2 + $0xe0] sm:$0xff] }
 0x3c9   :  { %6904 = vmatpush1.bf16.msra.mxu0 %v6903_v19  ;;  %6964 = vmatpush1.bf16.msra.mxu1 %v6903_v19  ;;  %v2037_v26 = vmax.f32 %v6989_v22, 0.0 }
 0x3ca   :  { %v1912_v23 = vpop.f32.mrb[34].mxu0  ;;  %6905 = vmatprep.subr.bf16.mxu0 %v7941_v0  ;;  %6949 = vmatprep.subr.bf16.mxu1 %v7941_v0 }
 0x3cb   :  { %v6990_v24 = vadd.f32 %v1912_v23, %v581_v21  ;;  %v1914_v25 = vpop.f32.mrb[35].mxu0 }
 0x3cd   :  { %v2038_v27 = vmax.f32 %v6990_v24, 0.0  ;;  %v593_v24 = vld [vmem:[%s12951_s2 + $0xe8] sm:$0xff] }
 0x3ce   :  { %v1917_v29 = vpop.f32.mrb[36].mxu0 }
 0x3cf   :  { %v6906_v30 = vpack.c.bf16 %v2038_v27, %v2037_v26  ;;  %v1919_v31 = vpop.f32.mrb[37].mxu0  ;;  %v6991_v33 = vadd.f32 %v1917_v29, %v582_v28 }
 0x3d0   :  { %v594_v31 = vld [vmem:[%s12951_s2 + $0xf0] sm:$0xff] }
 0x3d1   :  { %6907 = vmatpush1.bf16.msra.mxu0 %v6906_v30  ;;  %6965 = vmatpush1.bf16.msra.mxu1 %v6906_v30  ;;  %v2039_v37 = vmax.f32 %v6991_v33, 0.0 }
 0x3d2   :  { %v1922_v34 = vpop.f32.mrb[38].mxu0  ;;  %6908 = vmatprep.subr.bf16.mxu0 %v7941_v0  ;;  %6950 = vmatprep.subr.bf16.mxu1 %v7941_v0 }
 0x3d3   :  { %v6992_v35 = vadd.f32 %v1922_v34, %v583_v32  ;;  %v1924_v36 = vpop.f32.mrb[39].mxu0 }
 0x3d5   :  { %v2040_v38 = vmax.f32 %v6992_v35, 0.0  ;;  %v595_v35 = vld [vmem:[%s12951_s2 + $0xf8] sm:$0xff] }
 0x3d6   :  { %v1927_v40 = vpop.f32.mrb[40].mxu0 }
 0x3d7   :  { %v6909_v41 = vpack.c.bf16 %v2040_v38, %v2039_v37  ;;  %v1929_v42 = vpop.f32.mrb[41].mxu0  ;;  %v6993_v44 = vadd.f32 %v1927_v40, %v584_v39 }
 0x3d8   :  { %v596_v42 = vld [vmem:[%s12951_s2 + $0x100] sm:$0xff] }
 0x3d9   :  { %6910 = vmatpush1.bf16.msra.mxu0 %v6909_v41  ;;  %6966 = vmatpush1.bf16.msra.mxu1 %v6909_v41  ;;  %v2041_v48 = vmax.f32 %v6993_v44, 0.0 }
 0x3da   :  { %v1932_v45 = vpop.f32.mrb[42].mxu0  ;;  %6911 = vmatprep.subr.bf16.mxu0 %v7941_v0  ;;  %6951 = vmatprep.subr.bf16.mxu1 %v7941_v0 }
 0x3db   :  { %v6994_v46 = vadd.f32 %v1932_v45, %v585_v43  ;;  %v1934_v47 = vpop.f32.mrb[43].mxu0 }
 0x3dd   :  { %v2042_v49 = vmax.f32 %v6994_v46, 0.0  ;;  %v597_v46 = vld [vmem:[%s12951_s2 + $0x108] sm:$0xff] }
 0x3de   :  { %v1937_v51 = vpop.f32.mrb[44].mxu0 }
 0x3df   :  { %v6912_v52 = vpack.c.bf16 %v2042_v49, %v2041_v48  ;;  %v1939_v53 = vpop.f32.mrb[45].mxu0  ;;  %v6995_v55 = vadd.f32 %v1937_v51, %v586_v50  ;;  %v2118_v49 = vld [vmem:[%s12952_s3 + $0x1d0] sm:$0xff] }
 0x3e1   :  { %6913 = vmatpush1.bf16.msra.mxu0 %v6912_v52  ;;  %6967 = vmatpush1.bf16.msra.mxu1 %v6912_v52  ;;  %v2043_v59 = vmax.f32 %v6995_v55, 0.0  ;;  %v598_v55 = vld [vmem:[%s12951_s2 + $0x110] sm:$0xff] }
 0x3e2   :  { %v1942_v56 = vpop.f32.mrb[46].mxu0  ;;  %6914 = vmatprep.subr.bf16.mxu0 %v7941_v0  ;;  %6952 = vmatprep.subr.bf16.mxu1 %v7941_v0 }
 0x3e3   :  { %v6996_v57 = vadd.f32 %v1942_v56, %v587_v54  ;;  %v1944_v58 = vpop.f32.mrb[47].mxu0  ;;  %v2117_v54 = vld [vmem:[%s12952_s3 + $0x1c8] sm:$0xff] }
 0x3e5   :  { %v2044_v60 = vmax.f32 %v6996_v57, 0.0  ;;  %v2121_v57 = vld [vmem:[%s12952_s3 + $0x1e8] sm:$0xff] }
 0x3e6   :  { %v1947_v62 = vpop.f32.mrb[48].mxu0 }
 0x3e7   :  { %v6915_v63 = vpack.c.bf16 %v2044_v60, %v2043_v59  ;;  %v1949_v1 = vpop.f32.mrb[49].mxu0  ;;  %v6997_v3 = vadd.f32 %v1947_v62, %v588_v61  ;;  %v599_v60 = vld [vmem:[%s12951_s2 + $0x118] sm:$0xff]  ;;  %v2120_v62 = vld [vmem:[%s12952_s3 + $0x1e0] sm:$0xff] }
 0x3e8   :  { %v2124_v1 = vld [vmem:[%s12952_s3 + $0x200] sm:$0xff] }
 0x3e9   :  { %6916 = vmatpush1.bf16.msra.mxu0 %v6915_v63  ;;  %6968 = vmatpush1.bf16.msra.mxu1 %v6915_v63  ;;  %v2045_v7 = vmax.f32 %v6997_v3, 0.0 }
 0x3ea   :  { %v1952_v4 = vpop.f32.mrb[50].mxu0  ;;  %6917 = vmatprep.subr.bf16.mxu0 %v7941_v0  ;;  %6953 = vmatprep.subr.bf16.mxu1 %v7941_v0 }
 0x3eb   :  { %v6998_v5 = vadd.f32 %v1952_v4, %v589_v2  ;;  %v1954_v6 = vpop.f32.mrb[51].mxu0 }
 0x3ec   :  { %v2123_v6 = vld [vmem:[%s12952_s3 + $0x1f8] sm:$0xff] }
 0x3ed   :  { %v2046_v8 = vmax.f32 %v6998_v5, 0.0 }
 0x3ee   :  { %v1957_v10 = vpop.f32.mrb[52].mxu0 }
 0x3ef   :  { %v6918_v11 = vpack.c.bf16 %v2046_v8, %v2045_v7  ;;  %v1959_v12 = vpop.f32.mrb[53].mxu0  ;;  %v6999_v14 = vadd.f32 %v1957_v10, %v590_v9  ;;  %v600_v7 = vld [vmem:[%s12951_s2 + $0x120] sm:$0xff]  ;;  %v2127_v9 = vld [vmem:[%s12952_s3 + $0x218] sm:$0xff] }
 0x3f0   :  { %v601_v12 = vld [vmem:[%s12951_s2 + $0x128] sm:$0xff] }
 0x3f1   :  { %6919 = vmatpush1.bf16.msra.mxu0 %v6918_v11  ;;  %6969 = vmatpush1.bf16.msra.mxu1 %v6918_v11  ;;  %v2047_v18 = vmax.f32 %v6999_v14, 0.0  ;;  %v2126_v14 = vld [vmem:[%s12952_s3 + $0x210] sm:$0xff] }
 0x3f2   :  { %v1962_v15 = vpop.f32.mrb[54].mxu0  ;;  %6920 = vmatprep.subr.bf16.mxu0 %v7941_v0  ;;  %6954 = vmatprep.subr.bf16.mxu1 %v7941_v0 }
 0x3f3   :  { %v7000_v16 = vadd.f32 %v1962_v15, %v591_v13  ;;  %v1964_v17 = vpop.f32.mrb[55].mxu0 }
 0x3f5   :  { %v2048_v19 = vmax.f32 %v7000_v16, 0.0  ;;  %v2130_v16 = vld [vmem:[%s12952_s3 + $0x230] sm:$0xff] }
 0x3f6   :  { %v1967_v21 = vpop.f32.mrb[56].mxu0 }
 0x3f7   :  { %v6921_v22 = vpack.c.bf16 %v2048_v19, %v2047_v18  ;;  %v1969_v23 = vpop.f32.mrb[57].mxu0  ;;  %v7001_v25 = vadd.f32 %v1967_v21, %v592_v20  ;;  %v602_v19 = vld [vmem:[%s12951_s2 + $0x130] sm:$0xf] }
 0x3f9   :  { %6922 = vmatpush1.bf16.msra.mxu0 %v6921_v22  ;;  %6970 = vmatpush1.bf16.msra.mxu1 %v6921_v22  ;;  %v2049_v29 = vmax.f32 %v7001_v25, 0.0  ;;  %v2129_v22 = vld [vmem:[%s12952_s3 + $0x228] sm:$0xff] }
 0x3fa   :  { %v1972_v26 = vpop.f32.mrb[58].mxu0  ;;  %6923 = vmatprep.subr.bf16.mxu0 %v7941_v0  ;;  %6955 = vmatprep.subr.bf16.mxu1 %v7941_v0 }
 0x3fb   :  { %v7002_v27 = vadd.f32 %v1972_v26, %v593_v24  ;;  %v1974_v28 = vpop.f32.mrb[59].mxu0  ;;  %v2133_v24 = vld [vmem:[%s12952_s3 + $0x248] sm:$0xff] }
 0x3fd   :  { %v2050_v30 = vmax.f32 %v7002_v27, 0.0 }
 0x3fe   :  { %v1977_v32 = vpop.f32.mrb[60].mxu0 }
 0x3ff   :  { %v6924_v33 = vpack.c.bf16 %v2050_v30, %v2049_v29  ;;  %v1979_v34 = vpop.f32.mrb[61].mxu0  ;;  %v7003_v36 = vadd.f32 %v1977_v32, %v594_v31  ;;  %v2132_v29 = vld [vmem:[%s12952_s3 + $0x240] sm:$0xff]  ;;  %v2135_v31 = vld [vmem:[%s12952_s3 + $0x258] sm:$0xff] }
 0x400   :  { %v2136_v30 = vld [vmem:[%s12952_s3 + $0x260] sm:$0xff]  ;;  %v2139_v32 = vld [vmem:[%s12952_s3 + $0x278] sm:$0xff]  ;;  %v2142_v34 = vld [vmem:[%s12952_s3 + $0x290] sm:$0xff] }
 0x401   :  { %6925 = vmatpush1.bf16.msra.mxu0 %v6924_v33  ;;  %6971 = vmatpush1.bf16.msra.mxu1 %v6924_v33  ;;  %v2051_v40 = vmax.f32 %v7003_v36, 0.0  ;;  %v2138_v33 = vld [vmem:[%s12952_s3 + $0x270] sm:$0xff]  ;;  %v2145_v36 = vld [vmem:[%s12952_s3 + $0x2a8] sm:$0xff] }
 0x402   :  { %v1982_v37 = vpop.f32.mrb[62].mxu0  ;;  %6926 = vmatprep.subr.bf16.mxu0 %v7941_v0  ;;  %6956 = vmatprep.subr.bf16.mxu1 %v7941_v0  ;;  %v2114_v0 = vld [vmem:[%s12952_s3 + $0x1b0] sm:$0xff] }
 0x403   :  { %v7004_v38 = vadd.f32 %v1982_v37, %v595_v35  ;;  %v1984_v39 = vpop.f32.mrb[63].mxu0  ;;  %v2141_v35 = vld [vmem:[%s12952_s3 + $0x288] sm:$0xff]  ;;  %v2144_v37 = vld [vmem:[%s12952_s3 + $0x2a0] sm:$0xff] }
 0x404   :  { %v2147_v39 = vld [vmem:[%s12952_s3 + $0x2b8] sm:$0xff] }
 0x405   :  { %v2052_v41 = vmax.f32 %v7004_v38, 0.0  ;;  %v2148_v38 = vld [vmem:[%s12952_s3 + $0x2c0] sm:$0xff] }
 0x406   :  { %v1987_v43 = vpop.f32.mrb[64].mxu0 }
 0x407   :  { %v6927_v44 = vpack.c.bf16 %v2052_v41, %v2051_v40  ;;  %v1989_v45 = vpop.f32.mrb[65].mxu0  ;;  %v7005_v47 = vadd.f32 %v1987_v43, %v596_v42  ;;  %v2151_v40 = vld [vmem:[%s12952_s3 + $0x2d8] sm:$0xff]  ;;  %v2150_v41 = vld [vmem:[%s12952_s3 + $0x2d0] sm:$0xff]  ;;  %v2153_v43 = vld [vmem:[%s12952_s3 + $0x2e8] sm:$0xff] }
 0x408   :  { %v2154_v42 = vld [vmem:[%s12952_s3 + $0x2f0] sm:$0xff]  ;;  %v2156_v45 = vld [vmem:[%s12952_s3 + $0x300] sm:$0xff] }
 0x409   :  { %6928 = vmatpush1.bf16.msra.mxu0 %v6927_v44  ;;  %6972 = vmatpush1.bf16.msra.mxu1 %v6927_v44  ;;  %v2053_v52 = vmax.f32 %v7005_v47, 0.0  ;;  %v2157_v44 = vld [vmem:[%s12952_s3 + $0x308] sm:$0xff]  ;;  %v2159_v47 = vld [vmem:[%s12952_s3 + $0x318] sm:$0xff] }
 0x40a   :  { %v1992_v48 = vpop.f32.mrb[66].mxu0 }
 0x40b   :  { %v7006_v50 = vadd.f32 %v1992_v48, %v597_v46  ;;  %v1994_v51 = vpop.f32.mrb[67].mxu0  ;;  %v2160_v46 = vld [vmem:[%s12952_s3 + $0x320] sm:$0xff]  ;;  %v2162_v48 = vld [vmem:[%s12952_s3 + $0x330] sm:$0xff] }
 0x40c   :  { %3298 = vmatmul.mubr.f32.vlgmr.msra.gmra.mrb[0].mxu1 %v2114_v0  ;;  %v2163_v0 = vld [vmem:[%s12952_s3 + $0x338] sm:$0xff]  ;;  %v2169_v51 = vld [vmem:[%s12952_s3 + $0x368] sm:$0xff] }
 0x40d   :  { %v2054_v53 = vmax.f32 %v7006_v50, 0.0  ;;  %3302 = vmatprep.mubr.f32.mxu1 %v2118_v49  ;;  %v2166_v49 = vld [vmem:[%s12952_s3 + $0x350] sm:$0xff]  ;;  %v2165_v50 = vld [vmem:[%s12952_s3 + $0x348] sm:$0xff] }
 0x40e   :  { %v1997_v56 = vpop.f32.mrb[68].mxu0 }
 0x40f   :  { %v6929_v58 = vpack.c.bf16 %v2054_v53, %v2053_v52  ;;  %v1999_v59 = vpop.f32.mrb[69].mxu0  ;;  %v7007_v61 = vadd.f32 %v1997_v56, %v598_v55  ;;  %v2168_v52 = vld [vmem:[%s12952_s3 + $0x360] sm:$0xff]  ;;  %v2175_v55 = vld [vmem:[%s12952_s3 + $0x398] sm:$0xff]  ;;  %v2174_v56 = vld [vmem:[%s12952_s3 + $0x390] sm:$0xff] }
 0x410   :  { %3303 = vmatmul.mubr.f32.gmra.mrb[2].mxu1 %v2117_v54  ;;  %v2172_v53 = vld [vmem:[%s12952_s3 + $0x380] sm:$0xff]  ;;  %v2171_v54 = vld [vmem:[%s12952_s3 + $0x378] sm:$0xff]  ;;  %v2181_v59 = vld [vmem:[%s12952_s3 + $0x3c8] sm:$0xff] }
 0x411   :  { %6930 = vmatprep.subr.bf16.mxu1 %v6929_v58  ;;  %3307 = vmatprep.mubr.f32.mxu1 %v2121_v57  ;;  %v2055_v4 = vmax.f32 %v7007_v61, 0.0  ;;  %v2178_v57 = vld [vmem:[%s12952_s3 + $0x3b0] sm:$0xff]  ;;  %v2184_v61 = vld [vmem:[%s12952_s3 + $0x3e0] sm:$0xff] }
 0x412   :  { %v2002_v63 = vpop.f32.mrb[70].mxu0  ;;  %6932 = vmatpush3.bf16.msra.mxu1 %v6929_v58  ;;  %v2177_v58 = vld [vmem:[%s12952_s3 + $0x3a8] sm:$0xff] }
 0x413   :  { %v7008_v2 = vadd.f32 %v2002_v63, %v599_v60  ;;  %v2004_v3 = vpop.f32.mrb[71].mxu0  ;;  %v2180_v60 = vld [vmem:[%s12952_s3 + $0x3c0] sm:$0xff]  ;;  %v2187_v63 = vld [vmem:[%s12952_s3 + $0x3f8] sm:$0xff] }
 0x414   :  { %3308 = vmatmul.mubr.f32.gmra.mrb[4].mxu1 %v2120_v62  ;;  %v2183_v62 = vld [vmem:[%s12952_s3 + $0x3d8] sm:$0xff]  ;;  %v2189_v3 = vld [vmem:[%s12952_s3 + $0x408] sm:$0xff] }
 0x415   :  { %v2056_v5 = vmax.f32 %v7008_v2, 0.0  ;;  %3312 = vmatprep.mubr.f32.mxu1 %v2124_v1  ;;  %v2186_v1 = vld [vmem:[%s12952_s3 + $0x3f0] sm:$0xff] }
 0x416   :  { %v2007_v8 = vpop.f32.mrb[72].mxu0  ;;  %v2190_v2 = vld [vmem:[%s12952_s3 + $0x410] sm:$0xff] }
 0x417   :  { %v6933_v10 = vpack.c.bf16 %v2056_v5, %v2055_v4  ;;  %v2009_v11 = vpop.f32.mrb[73].mxu0  ;;  %v7009_v13 = vadd.f32 %v2007_v8, %v600_v7  ;;  %v2193_v4 = vld [vmem:[%s12952_s3 + $0x428] sm:$0xff]  ;;  %v2192_v5 = vld [vmem:[%s12952_s3 + $0x420] sm:$0xff]  ;;  %v2195_v7 = vld [vmem:[%s12952_s3 + $0x438] sm:$0xff] }
 0x418   :  { %3313 = vmatmul.mubr.f32.gmra.mrb[6].mxu1 %v2123_v6  ;;  %v2196_v6 = vld [vmem:[%s12952_s3 + $0x440] sm:$0xff]  ;;  %v2199_v8 = vld [vmem:[%s12952_s3 + $0x458] sm:$0xff]  ;;  %v2201_v11 = vld [vmem:[%s12952_s3 + $0x468] sm:$0xff] }
 0x419   :  { %6934 = vmatprep.subr.bf16.mxu1 %v6933_v10  ;;  %3317 = vmatprep.mubr.f32.mxu1 %v2127_v9  ;;  %v2057_v20 = vmax.f32 %v7009_v13, 0.0  ;;  %v2198_v9 = vld [vmem:[%s12952_s3 + $0x450] sm:$0xff]  ;;  %v2204_v13 = vld [vmem:[%s12952_s3 + $0x480] sm:$0xff] }
 0x41a   :  { %v2012_v15 = vpop.f32.mrb[74].mxu0  ;;  %6936 = vmatpush3.bf16.msra.mxu1 %v6933_v10  ;;  %v2202_v10 = vld [vmem:[%s12952_s3 + $0x470] sm:$0xff] }
 0x41b   :  { %v7010_v17 = vadd.f32 %v2012_v15, %v601_v12  ;;  %v2014_v18 = vpop.f32.mrb[75].mxu0  ;;  %v2205_v12 = vld [vmem:[%s12952_s3 + $0x488] sm:$0xff]  ;;  %v2207_v15 = vld [vmem:[%s12952_s3 + $0x498] sm:$0xff] }
 0x41c   :  { %3318 = vmatmul.mubr.f32.gmra.mrb[8].mxu1 %v2126_v14  ;;  %v2208_v14 = vld [vmem:[%s12952_s3 + $0x4a0] sm:$0xff]  ;;  %v2214_v18 = vld [vmem:[%s12952_s3 + $0x4d0] sm:$0xff] }
 0x41d   :  { %v2058_v21 = vmax.f32 %v7010_v17, 0.0  ;;  %3322 = vmatprep.mubr.f32.mxu1 %v2130_v16  ;;  %v2211_v16 = vld [vmem:[%s12952_s3 + $0x4b8] sm:$0xff]  ;;  %v2210_v17 = vld [vmem:[%s12952_s3 + $0x4b0] sm:$0xff] }
 0x41e   :  { %v2017_v23 = vpop.f32.mrb[76].mxu0 }
 0x41f   :  { %v6937_v25 = vpack.c.bf16 %v2058_v21, %v2057_v20  ;;  %v7011_v26 = vadd.f32 %v2017_v23, %v602_v19  ;;  %v2019_v27 = vpop.f32.mrb[77].mxu0  ;;  %v2213_v19 = vld [vmem:[%s12952_s3 + $0x4c8] sm:$0xff]  ;;  %v2216_v21 = vld [vmem:[%s12952_s3 + $0x4e0] sm:$0xff]  ;;  %v2219_v23 = vld [vmem:[%s12952_s3 + $0x4f8] sm:$0xff] }
 0x420   :  { %3323 = vmatmul.mubr.f32.gmra.mrb[10].mxu1 %v2129_v22  ;;  %v2217_v20 = vld [vmem:[%s12952_s3 + $0x4e8] sm:$0xff]  ;;  %v2220_v22 = vld [vmem:[%s12952_s3 + $0x500] sm:$0xff] }
 0x421   :  { %v2059_v28 = vmax.f32 %v7011_v26, 0.0  ;;  %6938 = vmatprep.subr.bf16.mxu1 %v6937_v25  ;;  %3327 = vmatprep.mubr.f32.mxu1 %v2133_v24  ;;  %v2223_v24 = vld [vmem:[%s12952_s3 + $0x518] sm:$0xff]  ;;  %v2226_v26 = vld [vmem:[%s12952_s3 + $0x530] sm:$0xff]  ;;  %v2225_v27 = vld [vmem:[%s12952_s3 + $0x528] sm:$0xff] }
 0x422   :  { %6940 = vmatpush3.bf16.msra.mxu1 %v6937_v25  ;;  %v2222_v25 = vld [vmem:[%s12952_s3 + $0x510] sm:$0xff] }
 0x423   :  { %6417 = vmatprep.subr.msk.mxu1 %vm3139_vm1, %v2059_v28 }
 0x424   :  { %3328 = vmatmul.mubr.f32.gmra.mrb[12].mxu1 %v2132_v29  ;;  %v2228_v29 = vld [vmem:[%s12952_s3 + $0x540] sm:$0xff] }
 0x425   :  { %3332 = vmatprep.mubr.f32.mxu1 %v2136_v30  ;;  %v2232_v30 = vld [vmem:[%s12952_s3 + $0x560] sm:$0xff] }
 0x426   :  { %6418 = vmatpush3.msk.msra.mxu1 %vm3139_vm1, %v2059_v28  ;;  %v2229_v28 = vld [vmem:[%s12952_s3 + $0x548] sm:$0xff] }
 0x428   :  { %3333 = vmatmul.mubr.f32.gmra.mrb[14].mxu1 %v2135_v31  ;;  %v2231_v31 = vld [vmem:[%s12952_s3 + $0x558] sm:$0xff] }
 0x429   :  { %3337 = vmatprep.mubr.f32.mxu1 %v2139_v32  ;;  %v2235_v32 = vld [vmem:[%s12952_s3 + $0x578] sm:$0xff] }
 0x42c   :  { %3338 = vmatmul.mubr.f32.gmra.mrb[16].mxu1 %v2138_v33  ;;  %v2234_v33 = vld [vmem:[%s12952_s3 + $0x570] sm:$0xff] }
 0x42d   :  { %3342 = vmatprep.mubr.f32.mxu1 %v2142_v34  ;;  %v2238_v34 = vld [vmem:[%s12952_s3 + $0x590] sm:$0xff] }
 0x430   :  { %3343 = vmatmul.mubr.f32.gmra.mrb[18].mxu1 %v2141_v35  ;;  %v2237_v35 = vld [vmem:[%s12952_s3 + $0x588] sm:$0xff] }
 0x431   :  { %3347 = vmatprep.mubr.f32.mxu1 %v2145_v36  ;;  %v2241_v36 = vld [vmem:[%s12952_s3 + $0x5a8] sm:$0xff] }
 0x434   :  { %3348 = vmatmul.mubr.f32.gmra.mrb[20].mxu1 %v2144_v37  ;;  %v2240_v37 = vld [vmem:[%s12952_s3 + $0x5a0] sm:$0xff] }
 0x435   :  { %3352 = vmatprep.mubr.f32.mxu1 %v2148_v38  ;;  %v2244_v38 = vld [vmem:[%s12952_s3 + $0x5c0] sm:$0xff] }
 0x438   :  { %3353 = vmatmul.mubr.f32.gmra.mrb[22].mxu1 %v2147_v39  ;;  %v2243_v39 = vld [vmem:[%s12952_s3 + $0x5b8] sm:$0xff] }
 0x439   :  { %3357 = vmatprep.mubr.f32.mxu1 %v2151_v40  ;;  %v2247_v40 = vld [vmem:[%s12952_s3 + $0x5d8] sm:$0xff] }
 0x43c   :  { %3358 = vmatmul.mubr.f32.gmra.mrb[24].mxu1 %v2150_v41  ;;  %v2246_v41 = vld [vmem:[%s12952_s3 + $0x5d0] sm:$0xff] }
 0x43d   :  { %3362 = vmatprep.mubr.f32.mxu1 %v2154_v42  ;;  %v2250_v42 = vld [vmem:[%s12952_s3 + $0x5f0] sm:$0xff] }
 0x440   :  { %3363 = vmatmul.mubr.f32.gmra.mrb[26].mxu1 %v2153_v43  ;;  %v2249_v43 = vld [vmem:[%s12952_s3 + $0x5e8] sm:$0xff] }
 0x441   :  { %3367 = vmatprep.mubr.f32.mxu1 %v2157_v44  ;;  %v2253_v44 = vld [vmem:[%s12952_s3 + $0x608] sm:$0xff] }
 0x444   :  { %3368 = vmatmul.mubr.f32.gmra.mrb[28].mxu1 %v2156_v45  ;;  %v2252_v45 = vld [vmem:[%s12952_s3 + $0x600] sm:$0xff] }
 0x445   :  { %3372 = vmatprep.mubr.f32.mxu1 %v2160_v46  ;;  %v2256_v46 = vld [vmem:[%s12952_s3 + $0x620] sm:$0xff] }
 0x448   :  { %3373 = vmatmul.mubr.f32.gmra.mrb[30].mxu1 %v2159_v47  ;;  %v2255_v47 = vld [vmem:[%s12952_s3 + $0x618] sm:$0xff] }
 0x449   :  { %3377 = vmatprep.mubr.f32.mxu1 %v2163_v0  ;;  %v2259_v0 = vld [vmem:[%s12952_s3 + $0x638] sm:$0xff] }
 0x44c   :  { %3378 = vmatmul.mubr.f32.gmra.mrb[32].mxu1 %v2162_v48  ;;  %v2258_v48 = vld [vmem:[%s12952_s3 + $0x630] sm:$0xff] }
 0x44d   :  { %3382 = vmatprep.mubr.f32.mxu1 %v2166_v49  ;;  %v2262_v49 = vld [vmem:[%s12952_s3 + $0x650] sm:$0xff] }
 0x450   :  { %3383 = vmatmul.mubr.f32.gmra.mrb[34].mxu1 %v2165_v50  ;;  %v2261_v50 = vld [vmem:[%s12952_s3 + $0x648] sm:$0xff] }
 0x451   :  { %3387 = vmatprep.mubr.f32.mxu1 %v2169_v51  ;;  %v2265_v51 = vld [vmem:[%s12952_s3 + $0x668] sm:$0xff] }
 0x454   :  { %3388 = vmatmul.mubr.f32.gmra.mrb[36].mxu1 %v2168_v52  ;;  %v2264_v52 = vld [vmem:[%s12952_s3 + $0x660] sm:$0xff] }
 0x455   :  { %3392 = vmatprep.mubr.f32.mxu1 %v2172_v53  ;;  %v2268_v53 = vld [vmem:[%s12952_s3 + $0x680] sm:$0xff] }
 0x458   :  { %3393 = vmatmul.mubr.f32.gmra.mrb[38].mxu1 %v2171_v54  ;;  %v2267_v54 = vld [vmem:[%s12952_s3 + $0x678] sm:$0xff] }
 0x459   :  { %3397 = vmatprep.mubr.f32.mxu1 %v2175_v55  ;;  %v2271_v55 = vld [vmem:[%s12952_s3 + $0x698] sm:$0xff] }
 0x45c   :  { %3398 = vmatmul.mubr.f32.gmra.mrb[40].mxu1 %v2174_v56  ;;  %v2270_v56 = vld [vmem:[%s12952_s3 + $0x690] sm:$0xff] }
 0x45d   :  { %3402 = vmatprep.mubr.f32.mxu1 %v2178_v57  ;;  %v2274_v57 = vld [vmem:[%s12952_s3 + $0x6b0] sm:$0xff] }
 0x460   :  { %3403 = vmatmul.mubr.f32.gmra.mrb[42].mxu1 %v2177_v58  ;;  %v2273_v58 = vld [vmem:[%s12952_s3 + $0x6a8] sm:$0xff] }
 0x461   :  { %3407 = vmatprep.mubr.f32.mxu1 %v2181_v59  ;;  %v2277_v59 = vld [vmem:[%s12952_s3 + $0x6c8] sm:$0xff] }
 0x464   :  { %3408 = vmatmul.mubr.f32.gmra.mrb[44].mxu1 %v2180_v60 }
 0x465   :  { %3412 = vmatprep.mubr.f32.mxu1 %v2184_v61 }
 0x468   :  { %3413 = vmatmul.mubr.f32.gmra.mrb[46].mxu1 %v2183_v62  ;;  %v2276_v62 = vld [vmem:[%s12952_s3 + $0x6c0] sm:$0xff] }
 0x469   :  { %3417 = vmatprep.mubr.f32.mxu1 %v2187_v63  ;;  %v2280_v63 = vld [vmem:[%s12952_s3 + $0x6e0] sm:$0xff] }
 0x46c   :  { %3418 = vmatmul.mubr.f32.gmra.mrb[48].mxu1 %v2186_v1 }
 0x46d   :  { %3422 = vmatprep.mubr.f32.mxu1 %v2190_v2 }
 0x470   :  { %3423 = vmatmul.mubr.f32.gmra.mrb[50].mxu1 %v2189_v3  ;;  %v2279_v3 = vld [vmem:[%s12952_s3 + $0x6d8] sm:$0xff] }
 0x471   :  { %3427 = vmatprep.mubr.f32.mxu1 %v2193_v4  ;;  %v2283_v4 = vld [vmem:[%s12952_s3 + $0x6f8] sm:$0xff] }
 0x474   :  { %3428 = vmatmul.mubr.f32.gmra.mrb[52].mxu1 %v2192_v5 }
 0x475   :  { %3432 = vmatprep.mubr.f32.mxu1 %v2196_v6 }
 0x478   :  { %3433 = vmatmul.mubr.f32.gmra.mrb[54].mxu1 %v2195_v7  ;;  %v2282_v7 = vld [vmem:[%s12952_s3 + $0x6f0] sm:$0xff] }
 0x479   :  { %3437 = vmatprep.mubr.f32.mxu1 %v2199_v8  ;;  %v2286_v8 = vld [vmem:[%s12952_s3 + $0x710] sm:$0xff] }
 0x47c   :  { %3438 = vmatmul.mubr.f32.gmra.mrb[56].mxu1 %v2198_v9 }
 0x47d   :  { %3442 = vmatprep.mubr.f32.mxu1 %v2202_v10 }
 0x480   :  { %3443 = vmatmul.mubr.f32.gmra.mrb[58].mxu1 %v2201_v11  ;;  %v2285_v11 = vld [vmem:[%s12952_s3 + $0x708] sm:$0xff] }
 0x481   :  { %3447 = vmatprep.mubr.f32.mxu1 %v2205_v12  ;;  %v2289_v12 = vld [vmem:[%s12952_s3 + $0x728] sm:$0xff] }
 0x484   :  { %3448 = vmatmul.mubr.f32.gmra.mrb[60].mxu1 %v2204_v13 }
 0x485   :  { %3452 = vmatprep.mubr.f32.mxu1 %v2208_v14 }
 0x488   :  { %3453 = vmatmul.mubr.f32.gmra.mrb[62].mxu1 %v2207_v15  ;;  %v2288_v15 = vld [vmem:[%s12952_s3 + $0x720] sm:$0xff] }
 0x489   :  { %3457 = vmatprep.mubr.f32.mxu1 %v2211_v16  ;;  %v2292_v16 = vld [vmem:[%s12952_s3 + $0x740] sm:$0xff] }
 0x48c   :  { %3458 = vmatmul.mubr.f32.gmra.mrb[64].mxu1 %v2210_v17 }
 0x48d   :  { %3462 = vmatprep.mubr.f32.mxu1 %v2214_v18 }
 0x490   :  { %3463 = vmatmul.mubr.f32.gmra.mrb[66].mxu1 %v2213_v19  ;;  %v2291_v19 = vld [vmem:[%s12952_s3 + $0x738] sm:$0xff] }
 0x491   :  { %3467 = vmatprep.mubr.f32.mxu1 %v2217_v20  ;;  %v2295_v20 = vld [vmem:[%s12952_s3 + $0x758] sm:$0xff] }
 0x494   :  { %3468 = vmatmul.mubr.f32.gmra.mrb[68].mxu1 %v2216_v21 }
 0x495   :  { %3472 = vmatprep.mubr.f32.mxu1 %v2220_v22 }
 0x498   :  { %3473 = vmatmul.mubr.f32.gmra.mrb[70].mxu1 %v2219_v23  ;;  %v2294_v23 = vld [vmem:[%s12952_s3 + $0x750] sm:$0xff] }
 0x499   :  { %3477 = vmatprep.mubr.f32.mxu1 %v2223_v24  ;;  %v2298_v24 = vld [vmem:[%s12952_s3 + $0x770] sm:$0xff] }
 0x49c   :  { %3478 = vmatmul.mubr.f32.gmra.mrb[72].mxu1 %v2222_v25 }
 0x49d   :  { %3482 = vmatprep.mubr.f32.mxu1 %v2226_v26 }
 0x4a0   :  { %3483 = vmatmul.mubr.f32.gmra.mrb[74].mxu1 %v2225_v27  ;;  %v2297_v27 = vld [vmem:[%s12952_s3 + $0x768] sm:$0xff] }
 0x4a1   :  { %3487 = vmatprep.mubr.f32.mxu1 %v2229_v28  ;;  %v2301_v28 = vld [vmem:[%s12952_s3 + $0x788] sm:$0xff] }
 0x4a4   :  { %3488 = vmatmul.mubr.f32.gmra.mrb[76].mxu1 %v2228_v29 }
 0x4a5   :  { %3492 = vmatprep.mubr.f32.mxu1 %v2232_v30 }
 0x4a8   :  { %3493 = vmatmul.mubr.f32.gmra.mrb[78].mxu1 %v2231_v31  ;;  %v2300_v31 = vld [vmem:[%s12952_s3 + $0x780] sm:$0xff] }
 0x4a9   :  { %3497 = vmatprep.mubr.f32.mxu1 %v2235_v32  ;;  %v2304_v32 = vld [vmem:[%s12952_s3 + $0x7a0] sm:$0xff] }
 0x4ac   :  { %3498 = vmatmul.mubr.f32.gmra.mrb[80].mxu1 %v2234_v33 }
 0x4ad   :  { %3502 = vmatprep.mubr.f32.mxu1 %v2238_v34 }
 0x4b0   :  { %3503 = vmatmul.mubr.f32.gmra.mrb[82].mxu1 %v2237_v35  ;;  %v2303_v35 = vld [vmem:[%s12952_s3 + $0x798] sm:$0xff] }
 0x4b1   :  { %3507 = vmatprep.mubr.f32.mxu1 %v2241_v36  ;;  %v2307_v36 = vld [vmem:[%s12952_s3 + $0x7b8] sm:$0xff] }
 0x4b4   :  { %3508 = vmatmul.mubr.f32.gmra.mrb[84].mxu1 %v2240_v37 }
 0x4b5   :  { %3512 = vmatprep.mubr.f32.mxu1 %v2244_v38 }
 0x4b8   :  { %3513 = vmatmul.mubr.f32.gmra.mrb[86].mxu1 %v2243_v39  ;;  %v2306_v39 = vld [vmem:[%s12952_s3 + $0x7b0] sm:$0xff] }
 0x4b9   :  { %3517 = vmatprep.mubr.f32.mxu1 %v2247_v40  ;;  %v2310_v40 = vld [vmem:[%s12952_s3 + $0x7d0] sm:$0xff] }
 0x4bc   :  { %3518 = vmatmul.mubr.f32.gmra.mrb[88].mxu1 %v2246_v41 }
 0x4bd   :  { %3522 = vmatprep.mubr.f32.mxu1 %v2250_v42 }
 0x4c0   :  { %3523 = vmatmul.mubr.f32.gmra.mrb[90].mxu1 %v2249_v43  ;;  %v2309_v43 = vld [vmem:[%s12952_s3 + $0x7c8] sm:$0xff] }
 0x4c1   :  { %3527 = vmatprep.mubr.f32.mxu1 %v2253_v44  ;;  %v2313_v44 = vld [vmem:[%s12952_s3 + $0x7e8] sm:$0xff] }
 0x4c4   :  { %3528 = vmatmul.mubr.f32.gmra.mrb[92].mxu1 %v2252_v45 }
 0x4c5   :  { %3532 = vmatprep.mubr.f32.mxu1 %v2256_v46 }
 0x4c8   :  { %3533 = vmatmul.mubr.f32.gmra.mrb[94].mxu1 %v2255_v47  ;;  %v2312_v47 = vld [vmem:[%s12952_s3 + $0x7e0] sm:$0xff] }
 0x4c9   :  { %3537 = vmatprep.mubr.f32.mxu1 %v2259_v0  ;;  %v2316_v0 = vld [vmem:[%s12952_s3 + $0x800] sm:$0xff] }
 0x4cc   :  { %3538 = vmatmul.mubr.f32.gmra.mrb[96].mxu1 %v2258_v48 }
 0x4cd   :  { %3542 = vmatprep.mubr.f32.mxu1 %v2262_v49 }
 0x4d0   :  { %3543 = vmatmul.mubr.f32.gmra.mrb[98].mxu1 %v2261_v50  ;;  %v2315_v50 = vld [vmem:[%s12952_s3 + $0x7f8] sm:$0xff] }
 0x4d1   :  { %3547 = vmatprep.mubr.f32.mxu1 %v2265_v51  ;;  %v2319_v51 = vld [vmem:[%s12952_s3 + $0x818] sm:$0xff] }
 0x4d4   :  { %3548 = vmatmul.mubr.f32.gmra.mrb[100].mxu1 %v2264_v52 }
 0x4d5   :  { %3552 = vmatprep.mubr.f32.mxu1 %v2268_v53 }
 0x4d8   :  { %3553 = vmatmul.mubr.f32.gmra.mrb[102].mxu1 %v2267_v54  ;;  %v2318_v54 = vld [vmem:[%s12952_s3 + $0x810] sm:$0xff] }
 0x4d9   :  { %3557 = vmatprep.mubr.f32.mxu1 %v2271_v55  ;;  %v2322_v55 = vld [vmem:[%s12952_s3 + $0x830] sm:$0xff] }
 0x4dc   :  { %3558 = vmatmul.mubr.f32.gmra.mrb[104].mxu1 %v2270_v56 }
 0x4dd   :  { %3562 = vmatprep.mubr.f32.mxu1 %v2274_v57 }
 0x4df   :  { %v10196_v60 = vpop.f32.mrb[0].mxu1 }
 0x4e0   :  { %3563 = vmatmul.mubr.f32.gmra.mrb[106].mxu1 %v2273_v58  ;;  %v3301_v61 = vpop.f32.mrb[1].mxu1  ;;  %v2321_v58 = vld [vmem:[%s12952_s3 + $0x828] sm:$0xff] }
 0x4e1   :  { %3567 = vmatprep.mubr.f32.mxu1 %v2277_v59  ;;  %v2325_v59 = vld [vmem:[%s12952_s3 + $0x848] sm:$0xff] }
 0x4e3   :  { %v10204_v1 = vpop.f32.mrb[2].mxu1 }
 0x4e4   :  { %3568 = vmatmul.mubr.f32.gmra.mrb[108].mxu1 %v2276_v62  ;;  %v3306_v2 = vpop.f32.mrb[3].mxu1 }
 0x4e5   :  { %3572 = vmatprep.mubr.f32.mxu1 %v2280_v63  ;;  %v2324_v63 = vld [vmem:[%s12952_s3 + $0x840] sm:$0xff] }
 0x4e6   :  { %v2328_v2 = vld [vmem:[%s12952_s3 + $0x860] sm:$0xff] }
 0x4e7   :  { %v10212_v5 = vpop.f32.mrb[4].mxu1 }
 0x4e8   :  { %3573 = vmatmul.mubr.f32.gmra.mrb[110].mxu1 %v2279_v3  ;;  %v3311_v6 = vpop.f32.mrb[5].mxu1 }
 0x4e9   :  { %3577 = vmatprep.mubr.f32.mxu1 %v2283_v4  ;;  %v2327_v6 = vld [vmem:[%s12952_s3 + $0x858] sm:$0xff] }
 0x4eb   :  { %v10220_v9 = vpop.f32.mrb[6].mxu1 }
 0x4ec   :  { %3578 = vmatmul.mubr.f32.gmra.mrb[112].mxu1 %v2282_v7  ;;  %v3316_v10 = vpop.f32.mrb[7].mxu1  ;;  %v2331_v7 = vld [vmem:[%s12952_s3 + $0x878] sm:$0xff] }
 0x4ed   :  { %3582 = vmatprep.mubr.f32.mxu1 %v2286_v8 }
 0x4ef   :  { %v10228_v13 = vpop.f32.mrb[8].mxu1 }
 0x4f0   :  { %3583 = vmatmul.mubr.f32.gmra.mrb[114].mxu1 %v2285_v11  ;;  %v3321_v14 = vpop.f32.mrb[9].mxu1  ;;  %v2330_v11 = vld [vmem:[%s12952_s3 + $0x870] sm:$0xff] }
 0x4f1   :  { %3587 = vmatprep.mubr.f32.mxu1 %v2289_v12  ;;  %v2334_v12 = vld [vmem:[%s12952_s3 + $0x890] sm:$0xff] }
 0x4f3   :  { %v10236_v17 = vpop.f32.mrb[10].mxu1 }
 0x4f4   :  { %3588 = vmatmul.mubr.f32.gmra.mrb[116].mxu1 %v2288_v15  ;;  %v3326_v18 = vpop.f32.mrb[11].mxu1 }
 0x4f5   :  { %3592 = vmatprep.mubr.f32.mxu1 %v2292_v16  ;;  %v2333_v16 = vld [vmem:[%s12952_s3 + $0x888] sm:$0xff] }
 0x4f6   :  { %v2337_v18 = vld [vmem:[%s12952_s3 + $0x8a8] sm:$0xff] }
 0x4f7   :  { %v10244_v21 = vpop.f32.mrb[12].mxu1 }
 0x4f8   :  { %3593 = vmatmul.mubr.f32.gmra.mrb[118].mxu1 %v2291_v19  ;;  %v3331_v22 = vpop.f32.mrb[13].mxu1 }
 0x4f9   :  { %3597 = vmatprep.mubr.f32.mxu1 %v2295_v20  ;;  %v2336_v22 = vld [vmem:[%s12952_s3 + $0x8a0] sm:$0xff] }
 0x4fb   :  { %v10252_v25 = vpop.f32.mrb[14].mxu1 }
 0x4fc   :  { %3598 = vmatmul.mubr.f32.gmra.mrb[120].mxu1 %v2294_v23  ;;  %v3336_v26 = vpop.f32.mrb[15].mxu1  ;;  %v2340_v23 = vld [vmem:[%s12952_s3 + $0x8c0] sm:$0xff] }
 0x4fd   :  { %3602 = vmatprep.mubr.f32.mxu1 %v2298_v24 }
 0x4ff   :  { %v10260_v29 = vpop.f32.mrb[16].mxu1 }
 0x500   :  { %3603 = vmatmul.mubr.f32.gmra.mrb[122].mxu1 %v2297_v27  ;;  %v3341_v30 = vpop.f32.mrb[17].mxu1  ;;  %v2339_v27 = vld [vmem:[%s12952_s3 + $0x8b8] sm:$0xff] }
 0x501   :  { %3607 = vmatprep.mubr.f32.mxu1 %v2301_v28  ;;  %v2343_v28 = vld [vmem:[%s12952_s3 + $0x8d8] sm:$0xff] }
 0x503   :  { %v10268_v33 = vpop.f32.mrb[18].mxu1 }
 0x504   :  { %3608 = vmatmul.mubr.f32.gmra.mrb[124].mxu1 %v2300_v31  ;;  %v3346_v34 = vpop.f32.mrb[19].mxu1 }
 0x505   :  { %3612 = vmatprep.mubr.f32.mxu1 %v2304_v32  ;;  %v2342_v32 = vld [vmem:[%s12952_s3 + $0x8d0] sm:$0xff] }
 0x506   :  { %v2346_v34 = vld [vmem:[%s12952_s3 + $0x8f0] sm:$0xff] }
 0x507   :  { %v10276_v37 = vpop.f32.mrb[20].mxu1 }
 0x508   :  { %3613 = vmatmul.mubr.f32.gmra.mrb[126].mxu1 %v2303_v35  ;;  %v3351_v38 = vpop.f32.mrb[21].mxu1 }
 0x509   :  { %3617 = vmatprep.mubr.f32.mxu1 %v2307_v36  ;;  %v2345_v38 = vld [vmem:[%s12952_s3 + $0x8e8] sm:$0xff] }
 0x50b   :  { %v10284_v41 = vpop.f32.mrb[22].mxu1 }
 0x50c   :  { %3618 = vmatmul.mubr.f32.gmra.mrb[128].mxu1 %v2306_v39  ;;  %v3356_v42 = vpop.f32.mrb[23].mxu1  ;;  %v2349_v39 = vld [vmem:[%s12952_s3 + $0x908] sm:$0xff] }
 0x50d   :  { %3622 = vmatprep.mubr.f32.mxu1 %v2310_v40 }
 0x50f   :  { %v10292_v45 = vpop.f32.mrb[24].mxu1 }
 0x510   :  { %3623 = vmatmul.mubr.f32.gmra.mrb[130].mxu1 %v2309_v43  ;;  %v3361_v46 = vpop.f32.mrb[25].mxu1  ;;  %v2348_v43 = vld [vmem:[%s12952_s3 + $0x900] sm:$0xff] }
 0x511   :  { %3627 = vmatprep.mubr.f32.mxu1 %v2313_v44  ;;  %v2352_v44 = vld [vmem:[%s12952_s3 + $0x920] sm:$0xff] }
 0x513   :  { %v10300_v48 = vpop.f32.mrb[26].mxu1 }
 0x514   :  { %3628 = vmatmul.mubr.f32.gmra.mrb[132].mxu1 %v2312_v47  ;;  %v3366_v49 = vpop.f32.mrb[27].mxu1 }
 0x515   :  { %3632 = vmatprep.mubr.f32.mxu1 %v2316_v0  ;;  %v2351_v0 = vld [vmem:[%s12952_s3 + $0x918] sm:$0xff] }
 0x516   :  { %v2355_v49 = vld [vmem:[%s12952_s3 + $0x938] sm:$0xff] }
 0x517   :  { %v10308_v52 = vpop.f32.mrb[28].mxu1 }
 0x518   :  { %3633 = vmatmul.mubr.f32.gmra.mrb[134].mxu1 %v2315_v50  ;;  %v3371_v53 = vpop.f32.mrb[29].mxu1 }
 0x519   :  { %3637 = vmatprep.mubr.f32.mxu1 %v2319_v51  ;;  %v2354_v53 = vld [vmem:[%s12952_s3 + $0x930] sm:$0xff] }
 0x51b   :  { %v10316_v56 = vpop.f32.mrb[30].mxu1 }
 0x51c   :  { %3638 = vmatmul.mubr.f32.gmra.mrb[136].mxu1 %v2318_v54  ;;  %v3376_v57 = vpop.f32.mrb[31].mxu1  ;;  %v2358_v54 = vld [vmem:[%s12952_s3 + $0x950] sm:$0xff] }
 0x51d   :  { %3642 = vmatprep.mubr.f32.mxu1 %v2322_v55 }
 0x51f   :  { %v10324_v61 = vpop.f32.mrb[32].mxu1 }
 0x520   :  { %3643 = vmatmul.mubr.f32.gmra.mrb[138].mxu1 %v2321_v58  ;;  %v3381_v62 = vpop.f32.mrb[33].mxu1  ;;  %v2357_v58 = vld [vmem:[%s12952_s3 + $0x948] sm:$0xff] }
 0x521   :  { %3647 = vmatprep.mubr.f32.mxu1 %v2325_v59  ;;  %v2361_v59 = vld [vmem:[%s12952_s3 + $0x968] sm:$0xff] }
 0x523   :  { %v10332_v3 = vpop.f32.mrb[34].mxu1 }
 0x524   :  { %3648 = vmatmul.mubr.f32.gmra.mrb[140].mxu1 %v2324_v63  ;;  %v3386_v4 = vpop.f32.mrb[35].mxu1 }
 0x525   :  { %3652 = vmatprep.mubr.f32.mxu1 %v2328_v2  ;;  %v2360_v2 = vld [vmem:[%s12952_s3 + $0x960] sm:$0xff] }
 0x526   :  { %v2364_v4 = vld [vmem:[%s12952_s3 + $0x980] sm:$0xff] }
 0x527   :  { %v10340_v8 = vpop.f32.mrb[36].mxu1 }
 0x528   :  { %3653 = vmatmul.mubr.f32.gmra.mrb[142].mxu1 %v2327_v6  ;;  %v3391_v10 = vpop.f32.mrb[37].mxu1 }
 0x529   :  { %3657 = vmatprep.mubr.f32.mxu1 %v2331_v7  ;;  %v2363_v10 = vld [vmem:[%s12952_s3 + $0x978] sm:$0xff] }
 0x52b   :  { %v10348_v14 = vpop.f32.mrb[38].mxu1 }
 0x52c   :  { %3658 = vmatmul.mubr.f32.gmra.mrb[144].mxu1 %v2330_v11  ;;  %v3396_v15 = vpop.f32.mrb[39].mxu1  ;;  %v2367_v11 = vld [vmem:[%s12952_s3 + $0x998] sm:$0xff] }
 0x52d   :  { %3662 = vmatprep.mubr.f32.mxu1 %v2334_v12 }
 0x52f   :  { %v10356_v19 = vpop.f32.mrb[40].mxu1 }
 0x530   :  { %3663 = vmatmul.mubr.f32.gmra.mrb[146].mxu1 %v2333_v16  ;;  %v3401_v20 = vpop.f32.mrb[41].mxu1  ;;  %v2366_v16 = vld [vmem:[%s12952_s3 + $0x990] sm:$0xff] }
 0x531   :  { %3667 = vmatprep.mubr.f32.mxu1 %v2337_v18  ;;  %v2370_v18 = vld [vmem:[%s12952_s3 + $0x9b0] sm:$0xff] }
 0x533   :  { %v10364_v24 = vpop.f32.mrb[42].mxu1 }
 0x534   :  { %3668 = vmatmul.mubr.f32.gmra.mrb[148].mxu1 %v2336_v22  ;;  %v3406_v26 = vpop.f32.mrb[43].mxu1 }
 0x535   :  { %3672 = vmatprep.mubr.f32.mxu1 %v2340_v23  ;;  %v2369_v23 = vld [vmem:[%s12952_s3 + $0x9a8] sm:$0xff] }
 0x536   :  { %v2373_v26 = vld [vmem:[%s12952_s3 + $0x9c8] sm:$0xff] }
 0x537   :  { %v10372_v30 = vpop.f32.mrb[44].mxu1 }
 0x538   :  { %3673 = vmatmul.mubr.f32.gmra.mrb[150].mxu1 %v2339_v27  ;;  %v3411_v31 = vpop.f32.mrb[45].mxu1 }
 0x539   :  { %3677 = vmatprep.mubr.f32.mxu1 %v2343_v28  ;;  %v2372_v31 = vld [vmem:[%s12952_s3 + $0x9c0] sm:$0xff] }
 0x53b   :  { %v10380_v35 = vpop.f32.mrb[46].mxu1 }
 0x53c   :  { %3678 = vmatmul.mubr.f32.gmra.mrb[152].mxu1 %v2342_v32  ;;  %v3416_v36 = vpop.f32.mrb[47].mxu1  ;;  %v2376_v32 = vld [vmem:[%s12952_s3 + $0x9e0] sm:$0xff] }
 0x53d   :  { %3682 = vmatprep.mubr.f32.mxu1 %v2346_v34 }
 0x53f   :  { %v10388_v40 = vpop.f32.mrb[48].mxu1 }
 0x540   :  { %3683 = vmatmul.mubr.f32.gmra.mrb[154].mxu1 %v2345_v38  ;;  %v3421_v42 = vpop.f32.mrb[49].mxu1  ;;  %v2375_v38 = vld [vmem:[%s12952_s3 + $0x9d8] sm:$0xff] }
 0x541   :  { %3687 = vmatprep.mubr.f32.mxu1 %v2349_v39  ;;  %v2379_v39 = vld [vmem:[%s12952_s3 + $0x9f8] sm:$0xff] }
 0x543   :  { %v10396_v46 = vpop.f32.mrb[50].mxu1 }
 0x544   :  { %3688 = vmatmul.mubr.f32.gmra.mrb[156].mxu1 %v2348_v43  ;;  %v3426_v47 = vpop.f32.mrb[51].mxu1 }
 0x545   :  { %3692 = vmatprep.mubr.f32.mxu1 %v2352_v44  ;;  %v2378_v44 = vld [vmem:[%s12952_s3 + $0x9f0] sm:$0xff] }
 0x546   :  { %v2382_v47 = vld [vmem:[%s12952_s3 + $0xa10] sm:$0xff] }
 0x547   :  { %v10404_v50 = vpop.f32.mrb[52].mxu1 }
 0x548   :  { %3693 = vmatmul.mubr.f32.gmra.mrb[158].mxu1 %v2351_v0  ;;  %v3431_v51 = vpop.f32.mrb[53].mxu1 }
 0x549   :  { %3697 = vmatprep.mubr.f32.mxu1 %v2355_v49  ;;  %v2381_v51 = vld [vmem:[%s12952_s3 + $0xa08] sm:$0xff] }
 0x54b   :  { %v10412_v55 = vpop.f32.mrb[54].mxu1 }
 0x54c   :  { %3698 = vmatmul.mubr.f32.gmra.mrb[160].mxu1 %v2354_v53  ;;  %v3436_v57 = vpop.f32.mrb[55].mxu1  ;;  %v2385_v53 = vld [vmem:[%s12952_s3 + $0xa28] sm:$0xff] }
 0x54d   :  { %3702 = vmatprep.mubr.f32.mxu1 %v2358_v54 }
 0x54f   :  { %v10420_v62 = vpop.f32.mrb[56].mxu1 }
 0x550   :  { %3703 = vmatmul.mubr.f32.gmra.mrb[162].mxu1 %v2357_v58  ;;  %v3441_v63 = vpop.f32.mrb[57].mxu1  ;;  %v2384_v58 = vld [vmem:[%s12952_s3 + $0xa20] sm:$0xff] }
 0x551   :  { %3707 = vmatprep.mubr.f32.mxu1 %v2361_v59  ;;  %v2388_v59 = vld [vmem:[%s12952_s3 + $0xa40] sm:$0xff] }
 0x553   :  { %v10428_v6 = vpop.f32.mrb[58].mxu1 }
 0x554   :  { %3708 = vmatmul.mubr.f32.gmra.mrb[164].mxu1 %v2360_v2  ;;  %v3446_v7 = vpop.f32.mrb[59].mxu1 }
 0x555   :  { %3712 = vmatprep.mubr.f32.mxu1 %v2364_v4  ;;  %v2387_v4 = vld [vmem:[%s12952_s3 + $0xa38] sm:$0xff] }
 0x556   :  { %v2391_v7 = vld [vmem:[%s12952_s3 + $0xa58] sm:$0xff] }
 0x557   :  { %v10436_v12 = vpop.f32.mrb[60].mxu1 }
 0x558   :  { %3713 = vmatmul.mubr.f32.gmra.mrb[166].mxu1 %v2363_v10  ;;  %v3451_v15 = vpop.f32.mrb[61].mxu1 }
 0x559   :  { %3717 = vmatprep.mubr.f32.mxu1 %v2367_v11  ;;  %v2390_v15 = vld [vmem:[%s12952_s3 + $0xa50] sm:$0xff] }
 0x55b   :  { %v10444_v20 = vpop.f32.mrb[62].mxu1 }
 0x55c   :  { %3718 = vmatmul.mubr.f32.gmra.mrb[168].mxu1 %v2366_v16  ;;  %v3456_v22 = vpop.f32.mrb[63].mxu1  ;;  %v2394_v16 = vld [vmem:[%s12952_s3 + $0xa70] sm:$0xff] }
 0x55d   :  { %3722 = vmatprep.mubr.f32.mxu1 %v2370_v18 }
 0x55f   :  { %v10452_v27 = vpop.f32.mrb[64].mxu1 }
 0x560   :  { %12955 = vst [vmem:[#allocation2_spill] sm:$0xff] %v10452_v27  ;;  %3723 = vmatmul.mubr.f32.gmra.mrb[170].mxu1 %v2369_v23  ;;  %v3461_v28 = vpop.f32.mrb[65].mxu1  ;;  %v2393_v23 = vld [vmem:[%s12952_s3 + $0xa68] sm:$0xff] }
 0x561   :  { %3727 = vmatprep.mubr.f32.mxu1 %v2373_v26  ;;  %v2397_v26 = vld [vmem:[%s12952_s3 + $0xa88] sm:$0xff] }
 0x563   :  { %v10460_v34 = vpop.f32.mrb[66].mxu1 }
 0x564   :  { %3728 = vmatmul.mubr.f32.gmra.mrb[172].mxu1 %v2372_v31  ;;  %v3466_v36 = vpop.f32.mrb[67].mxu1 }
 0x565   :  { %3732 = vmatprep.mubr.f32.mxu1 %v2376_v32  ;;  %v2396_v32 = vld [vmem:[%s12952_s3 + $0xa80] sm:$0xff] }
 0x566   :  { %v2400_v36 = vld [vmem:[%s12952_s3 + $0xaa0] sm:$0xff] }
 0x567   :  { %v10468_v42 = vpop.f32.mrb[68].mxu1 }
 0x568   :  { %12956 = vst [vmem:[#allocation3_spill] sm:$0xff] %v10468_v42  ;;  %3733 = vmatmul.mubr.f32.gmra.mrb[174].mxu1 %v2375_v38  ;;  %v3471_v43 = vpop.f32.mrb[69].mxu1 }
 0x569   :  { %3737 = vmatprep.mubr.f32.mxu1 %v2379_v39  ;;  %v2061_v43 = vld [vmem:[%s12952_s3 + $0x8] sm:$0xff] }
 0x56a   :  { %3207 = vmatprep.mubr.f32.mxu0 %v2061_v43 }
 0x56b   :  { %v10476_v0 = vpop.f32.mrb[70].mxu1 }
 0x56c   :  { %12957 = vst [vmem:[#allocation4_spill] sm:$0xff] %v10476_v0  ;;  %3738 = vmatmul.mubr.f32.gmra.mrb[176].mxu1 %v2378_v44  ;;  %v3476_v49 = vpop.f32.mrb[71].mxu1  ;;  %v2399_v44 = vld [vmem:[%s12952_s3 + $0xa98] sm:$0xff]  ;;  %v2527_v0 = vld [vmem:[%s12953_s4 + $0x28] sm:$0xff] }
 0x56d   :  { %3742 = vmatprep.mubr.f32.mxu1 %v2382_v47  ;;  %v2060_v47 = vld [vmem:[%s12952_s3] sm:$0xff]  ;;  %v2403_v49 = vld [vmem:[%s12952_s3 + $0xab8] sm:$0xff] }
 0x56e   :  { %3208 = vmatmul.mubr.f32.vlgmr.msra.gmra.mrb[78].mxu0 %v2060_v47  ;;  %v2073_v47 = vld [vmem:[%s12952_s3 + $0x68] sm:$0xff] }
 0x56f   :  { %v10484_v54 = vpop.f32.mrb[72].mxu1 }
 0x570   :  { %12958 = vst [vmem:[#allocation5_spill] sm:$0xff] %v10484_v54  ;;  %3743 = vmatmul.mubr.f32.gmra.mrb[178].mxu1 %v2381_v51  ;;  %v3481_v57 = vpop.f32.mrb[73].mxu1 }
 0x571   :  { %3747 = vmatprep.mubr.f32.mxu1 %v2385_v53  ;;  %v2064_v57 = vld [vmem:[%s12952_s3 + $0x20] sm:$0xff] }
 0x572   :  { %3212 = vmatprep.mubr.f32.mxu0 %v2064_v57  ;;  %v2415_v57 = vld [vmem:[%s12952_s3 + $0xb18] sm:$0xff] }
 0x573   :  { %v10492_v63 = vpop.f32.mrb[74].mxu1 }
 0x574   :  { %12959 = vst [vmem:[#allocation6_spill] sm:$0xff] %v10492_v63  ;;  %3748 = vmatmul.mubr.f32.gmra.mrb[180].mxu1 %v2384_v58  ;;  %v3486_v2 = vpop.f32.mrb[75].mxu1  ;;  %v2402_v58 = vld [vmem:[%s12952_s3 + $0xab0] sm:$0xff]  ;;  %v2525_v63 = vld [vmem:[%s12953_s4 + $0x18] sm:$0xff] }
 0x575   :  { %3752 = vmatprep.mubr.f32.mxu1 %v2388_v59  ;;  %v2063_v59 = vld [vmem:[%s12952_s3 + $0x18] sm:$0xff]  ;;  %v2406_v2 = vld [vmem:[%s12952_s3 + $0xad0] sm:$0xff] }
 0x576   :  { %3213 = vmatmul.mubr.f32.gmra.mrb[80].mxu0 %v2063_v59 }
 0x577   :  { %v10500_v10 = vpop.f32.mrb[76].mxu1 }
 0x578   :  { %12960 = vst [vmem:[#allocation7_spill] sm:$0xff] %v10500_v10  ;;  %3753 = vmatmul.mubr.f32.gmra.mrb[182].mxu1 %v2387_v4  ;;  %v3491_v11 = vpop.f32.mrb[77].mxu1 }
 0x579   :  { %3757 = vmatprep.mubr.f32.mxu1 %v2391_v7  ;;  %v2067_v11 = vld [vmem:[%s12952_s3 + $0x38] sm:$0xff] }
 0x57a   :  { %3217 = vmatprep.mubr.f32.mxu0 %v2067_v11  ;;  %v2075_v11 = vld [vmem:[%s12952_s3 + $0x78] sm:$0xff] }
 0x57b   :  { %v10508_v18 = vpop.f32.mrb[78].mxu1 }
 0x57c   :  { %12961 = vst [vmem:[#allocation8_spill] sm:$0xff] %v10508_v18  ;;  %3758 = vmatmul.mubr.f32.gmra.mrb[184].mxu1 %v2390_v15  ;;  %v3496_v22 = vpop.f32.mrb[79].mxu1  ;;  %v2405_v15 = vld [vmem:[%s12952_s3 + $0xac8] sm:$0xff] }
 0x57d   :  { %3762 = vmatprep.mubr.f32.mxu1 %v2394_v16  ;;  %v2066_v16 = vld [vmem:[%s12952_s3 + $0x30] sm:$0xff]  ;;  %v2409_v22 = vld [vmem:[%s12952_s3 + $0xae8] sm:$0xff] }
 0x57e   :  { %3218 = vmatmul.mubr.f32.gmra.mrb[82].mxu0 %v2066_v16 }
 0x57f   :  { %v10516_v28 = vpop.f32.mrb[80].mxu1 }
 0x580   :  { %12962 = vst [vmem:[#allocation9_spill] sm:$0xff] %v10516_v28  ;;  %3763 = vmatmul.mubr.f32.gmra.mrb[186].mxu1 %v2393_v23  ;;  %v3501_v31 = vpop.f32.mrb[81].mxu1 }
 0x581   :  { %3767 = vmatprep.mubr.f32.mxu1 %v2397_v26  ;;  %v2070_v31 = vld [vmem:[%s12952_s3 + $0x50] sm:$0xff] }
 0x582   :  { %3222 = vmatprep.mubr.f32.mxu0 %v2070_v31  ;;  %v2417_v31 = vld [vmem:[%s12952_s3 + $0xb28] sm:$0xff] }
 0x583   :  { %v10524_v38 = vpop.f32.mrb[82].mxu1 }
 0x584   :  { %12963 = vst [vmem:[#allocation10_spill] sm:$0xff] %v10524_v38  ;;  %3768 = vmatmul.mubr.f32.gmra.mrb[188].mxu1 %v2396_v32  ;;  %v3506_v39 = vpop.f32.mrb[83].mxu1  ;;  %v2408_v32 = vld [vmem:[%s12952_s3 + $0xae0] sm:$0xff] }
 0x585   :  { %3772 = vmatprep.mubr.f32.mxu1 %v2400_v36  ;;  %v2069_v36 = vld [vmem:[%s12952_s3 + $0x48] sm:$0xff]  ;;  %v2412_v39 = vld [vmem:[%s12952_s3 + $0xb00] sm:$0xff] }
 0x586   :  { %3223 = vmatmul.mubr.f32.gmra.mrb[84].mxu0 %v2069_v36  ;;  %v2421_v36 = vld [vmem:[%s12952_s3 + $0xb48] sm:$0xff] }
 0x587   :  { %v10538_v51 = vpop.f32.mrb[84].mxu1  ;;  %3227 = vmatprep.mubr.f32.mxu0 %v2073_v47  ;;  %v2082_v47 = vld [vmem:[%s12952_s3 + $0xb0] sm:$0xff] }
 0x588   :  { %12964 = vst [vmem:[#allocation11_spill] sm:$0xff] %v10538_v51  ;;  %3773 = vmatmul.mubr.f32.gmra.mrb[190].mxu1 %v2399_v44  ;;  %v3511_v53 = vpop.f32.mrb[85].mxu1 }
 0x589   :  { %3777 = vmatprep.mubr.f32.mxu1 %v2403_v49  ;;  %v2411_v49 = vld [vmem:[%s12952_s3 + $0xaf8] sm:$0xff]  ;;  %v2072_v53 = vld [vmem:[%s12952_s3 + $0x60] sm:$0xff] }
 0x58a   :  { %3228 = vmatmul.mubr.f32.gmra.mrb[86].mxu0 %v2072_v53  ;;  %v2081_v53 = vld [vmem:[%s12952_s3 + $0xa8] sm:$0xff] }
 0x58b   :  { %v10552_v4 = vpop.f32.mrb[86].mxu1 }
 0x58c   :  { %12965 = vst [vmem:[#allocation12_spill] sm:$0xff] %v10552_v4  ;;  %3778 = vmatmul.mubr.f32.gmra.mrb[192].mxu1 %v2402_v58  ;;  %v3516_v7 = vpop.f32.mrb[87].mxu1 }
 0x58d   :  { %3782 = vmatprep.mubr.f32.mxu1 %v2406_v2  ;;  %v2076_v2 = vld [vmem:[%s12952_s3 + $0x80] sm:$0xff]  ;;  %v2414_v7 = vld [vmem:[%s12952_s3 + $0xb10] sm:$0xff] }
 0x58e   :  { %3232 = vmatprep.mubr.f32.mxu0 %v2076_v2 }
 0x58f   :  { %v10566_v23 = vpop.f32.mrb[88].mxu1  ;;  %3233 = vmatmul.mubr.f32.gmra.mrb[88].mxu0 %v2075_v11  ;;  %v2423_v11 = vld [vmem:[%s12952_s3 + $0xb58] sm:$0xff] }
 0x590   :  { %12966 = vst [vmem:[#allocation13_spill] sm:$0xff] %v10566_v23  ;;  %3783 = vmatmul.mubr.f32.gmra.mrb[194].mxu1 %v2405_v15  ;;  %v3521_v26 = vpop.f32.mrb[89].mxu1  ;;  %v2418_v15 = vld [vmem:[%s12952_s3 + $0xb30] sm:$0xff] }
 0x591   :  { %3787 = vmatprep.mubr.f32.mxu1 %v2409_v22  ;;  %v2079_v26 = vld [vmem:[%s12952_s3 + $0x98] sm:$0xff] }
 0x592   :  { %3237 = vmatprep.mubr.f32.mxu0 %v2079_v26 }
 0x593   :  { %v10580_v43 = vpop.f32.mrb[90].mxu1 }
 0x594   :  { %12967 = vst [vmem:[#allocation14_spill] sm:$0xff] %v10580_v43  ;;  %3788 = vmatmul.mubr.f32.gmra.mrb[196].mxu1 %v2408_v32  ;;  %v3526_v44 = vpop.f32.mrb[91].mxu1  ;;  %v2078_v32 = vld [vmem:[%s12952_s3 + $0x90] sm:$0xff] }
 0x595   :  { %3792 = vmatprep.mubr.f32.mxu1 %v2412_v39  ;;  %3238 = vmatmul.mubr.f32.gmra.mrb[90].mxu0 %v2078_v32  ;;  %v2088_v32 = vld [vmem:[%s12952_s3 + $0xe0] sm:$0xff] }
 0x596   :  { %3242 = vmatprep.mubr.f32.mxu0 %v2082_v47  ;;  %v2430_v47 = vld [vmem:[%s12952_s3 + $0xb90] sm:$0xff] }
 0x597   :  { %v10594_v58 = vpop.f32.mrb[92].mxu1 }
 0x598   :  { %12968 = vst [vmem:[#allocation15_spill] sm:$0xff] %v10594_v58  ;;  %3793 = vmatmul.mubr.f32.gmra.mrb[198].mxu1 %v2411_v49  ;;  %v3531_v59 = vpop.f32.mrb[93].mxu1  ;;  %v2420_v49 = vld [vmem:[%s12952_s3 + $0xb40] sm:$0xff] }
 0x599   :  { %3797 = vmatprep.mubr.f32.mxu1 %v2415_v57  ;;  %v2424_v57 = vld [vmem:[%s12952_s3 + $0xb60] sm:$0xff]  ;;  %3243 = vmatmul.mubr.f32.gmra.mrb[92].mxu0 %v2081_v53 }
 0x59b   :  { %v10608_v16 = vpop.f32.mrb[94].mxu1 }
 0x59c   :  { %12969 = vst [vmem:[#allocation16_spill] sm:$0xff] %v10608_v16  ;;  %3798 = vmatmul.mubr.f32.gmra.mrb[200].mxu1 %v2414_v7  ;;  %v3536_v22 = vpop.f32.mrb[95].mxu1  ;;  %v2085_v7 = vld [vmem:[%s12952_s3 + $0xc8] sm:$0xff] }
 0x59d   :  { %3802 = vmatprep.mubr.f32.mxu1 %v2418_v15  ;;  %3247 = vmatprep.mubr.f32.mxu0 %v2085_v7  ;;  %v2084_v15 = vld [vmem:[%s12952_s3 + $0xc0] sm:$0xff]  ;;  %v2427_v22 = vld [vmem:[%s12952_s3 + $0xb78] sm:$0xff]  ;;  %v2090_v7 = vld [vmem:[%s12952_s3 + $0xf0] sm:$0xff] }
 0x59e   :  { %3248 = vmatmul.mubr.f32.gmra.mrb[94].mxu0 %v2084_v15 }
 0x59f   :  { %v10622_v39 = vpop.f32.mrb[96].mxu1  ;;  %3252 = vmatprep.mubr.f32.mxu0 %v2088_v32  ;;  %v2432_v32 = vld [vmem:[%s12952_s3 + $0xba0] sm:$0xff] }
 0x5a0   :  { %12970 = vst [vmem:[#allocation17_spill] sm:$0xff] %v10622_v39  ;;  %3803 = vmatmul.mubr.f32.gmra.mrb[202].mxu1 %v2417_v31  ;;  %v3541_v44 = vpop.f32.mrb[97].mxu1 }
 0x5a1   :  { %3807 = vmatprep.mubr.f32.mxu1 %v2421_v36  ;;  %v2426_v36 = vld [vmem:[%s12952_s3 + $0xb70] sm:$0xff]  ;;  %v2087_v44 = vld [vmem:[%s12952_s3 + $0xd8] sm:$0xff] }
 0x5a2   :  { %3253 = vmatmul.mubr.f32.gmra.mrb[96].mxu0 %v2087_v44  ;;  %v2436_v44 = vld [vmem:[%s12952_s3 + $0xbc0] sm:$0xff] }
 0x5a3   :  { %v10636_v59 = vpop.f32.mrb[98].mxu1 }
 0x5a4   :  { %12971 = vst [vmem:[#allocation18_spill] sm:$0xff] %v10636_v59  ;;  %3808 = vmatmul.mubr.f32.gmra.mrb[204].mxu1 %v2420_v49  ;;  %v3546_v2 = vpop.f32.mrb[99].mxu1 }
 0x5a5   :  { %3812 = vmatprep.mubr.f32.mxu1 %v2424_v57  ;;  %v2091_v57 = vld [vmem:[%s12952_s3 + $0xf8] sm:$0xff]  ;;  %v2429_v2 = vld [vmem:[%s12952_s3 + $0xb88] sm:$0xff] }
 0x5a6   :  { %3257 = vmatprep.mubr.f32.mxu0 %v2091_v57  ;;  %v2097_v57 = vld [vmem:[%s12952_s3 + $0x128] sm:$0xff] }
 0x5a7   :  { %v10650_v26 = vpop.f32.mrb[100].mxu1  ;;  %3258 = vmatmul.mubr.f32.gmra.mrb[98].mxu0 %v2090_v7  ;;  %v2096_v7 = vld [vmem:[%s12952_s3 + $0x120] sm:$0xff] }
 0x5a8   :  { %12972 = vst [vmem:[#allocation19_spill] sm:$0xff] %v10650_v26  ;;  %3813 = vmatmul.mubr.f32.gmra.mrb[206].mxu1 %v2423_v11  ;;  %v3551_v31 = vpop.f32.mrb[101].mxu1  ;;  %v2433_v11 = vld [vmem:[%s12952_s3 + $0xba8] sm:$0xff] }
 0x5a9   :  { %3817 = vmatprep.mubr.f32.mxu1 %v2427_v22  ;;  %v2094_v31 = vld [vmem:[%s12952_s3 + $0x110] sm:$0xff] }
 0x5aa   :  { %3262 = vmatprep.mubr.f32.mxu0 %v2094_v31 }
 0x5ab   :  { %v10664_v49 = vpop.f32.mrb[102].mxu1 }
 0x5ac   :  { %12973 = vst [vmem:[#allocation20_spill] sm:$0xff] %v10664_v49  ;;  %3818 = vmatmul.mubr.f32.gmra.mrb[208].mxu1 %v2426_v36  ;;  %v3556_v53 = vpop.f32.mrb[103].mxu1  ;;  %v2093_v36 = vld [vmem:[%s12952_s3 + $0x108] sm:$0xff] }
 0x5ad   :  { %3822 = vmatprep.mubr.f32.mxu1 %v2430_v47  ;;  %3263 = vmatmul.mubr.f32.gmra.mrb[100].mxu0 %v2093_v36  ;;  %v2438_v36 = vld [vmem:[%s12952_s3 + $0xbd0] sm:$0xff] }
 0x5ae   :  { %3267 = vmatprep.mubr.f32.mxu0 %v2097_v57 }
 0x5af   :  { %v10678_v15 = vpop.f32.mrb[104].mxu1 }
 0x5b0   :  { %12974 = vst [vmem:[#allocation21_spill] sm:$0xff] %v10678_v15  ;;  %3823 = vmatmul.mubr.f32.gmra.mrb[210].mxu1 %v2429_v2  ;;  %v3561_v22 = vpop.f32.mrb[105].mxu1  ;;  %v2435_v2 = vld [vmem:[%s12952_s3 + $0xbb8] sm:$0xff] }
 0x5b1   :  { %3827 = vmatprep.mubr.f32.mxu1 %v2433_v11  ;;  %v2439_v11 = vld [vmem:[%s12952_s3 + $0xbd8] sm:$0xff]  ;;  %3268 = vmatmul.mubr.f32.gmra.mrb[102].mxu0 %v2096_v7 }
 0x5b2   :  { %v2103_v7 = vld [vmem:[%s12952_s3 + $0x158] sm:$0xff] }
 0x5b3   :  { %v10692_v47 = vpop.f32.mrb[106].mxu1 }
 0x5b4   :  { %12975 = vst [vmem:[#allocation22_spill] sm:$0xff] %v10692_v47  ;;  %3828 = vmatmul.mubr.f32.gmra.mrb[212].mxu1 %v2432_v32  ;;  %v3566_v53 = vpop.f32.mrb[107].mxu1  ;;  %v2100_v32 = vld [vmem:[%s12952_s3 + $0x140] sm:$0xff] }
 0x5b5   :  { %3832 = vmatprep.mubr.f32.mxu1 %v2436_v44  ;;  %3272 = vmatprep.mubr.f32.mxu0 %v2100_v32  ;;  %v2099_v44 = vld [vmem:[%s12952_s3 + $0x138] sm:$0xff]  ;;  %v2442_v53 = vld [vmem:[%s12952_s3 + $0xbf0] sm:$0xff]  ;;  %v2445_v32 = vld [vmem:[%s12952_s3 + $0xc08] sm:$0xff] }
 0x5b6   :  { %3273 = vmatmul.mubr.f32.gmra.mrb[104].mxu0 %v2099_v44 }
 0x5b7   :  { %v10706_v22 = vpop.f32.mrb[108].mxu1  ;;  %3277 = vmatprep.mubr.f32.mxu0 %v2103_v7  ;;  %v2105_v7 = vld [vmem:[%s12952_s3 + $0x168] sm:$0xff] }
 0x5b8   :  { %12976 = vst [vmem:[#allocation23_spill] sm:$0xff] %v10706_v22  ;;  %3833 = vmatmul.mubr.f32.gmra.mrb[214].mxu1 %v2435_v2  ;;  %v3571_v31 = vpop.f32.mrb[109].mxu1 }
 0x5b9   :  { %3837 = vmatprep.mubr.f32.mxu1 %v2439_v11  ;;  %v2441_v11 = vld [vmem:[%s12952_s3 + $0xbe8] sm:$0xff]  ;;  %v2102_v31 = vld [vmem:[%s12952_s3 + $0x150] sm:$0xff] }
 0x5ba   :  { %3278 = vmatmul.mubr.f32.gmra.mrb[106].mxu0 %v2102_v31  ;;  %v2448_v31 = vld [vmem:[%s12952_s3 + $0xc20] sm:$0xff] }
 0x5bb   :  { %v10720_v57 = vpop.f32.mrb[110].mxu1 }
 0x5bc   :  { %12977 = vst [vmem:[#allocation24_spill] sm:$0xff] %v10720_v57  ;;  %3838 = vmatmul.mubr.f32.gmra.mrb[216].mxu1 %v2438_v36  ;;  %v3576_v2 = vpop.f32.mrb[111].mxu1 }
 0x5bd   :  { %3842 = vmatprep.mubr.f32.mxu1 %v2442_v53  ;;  %v2106_v53 = vld [vmem:[%s12952_s3 + $0x170] sm:$0xff]  ;;  %v2444_v2 = vld [vmem:[%s12952_s3 + $0xc00] sm:$0xff] }
 0x5be   :  { %3282 = vmatprep.mubr.f32.mxu0 %v2106_v53  ;;  %v2447_v53 = vld [vmem:[%s12952_s3 + $0xc18] sm:$0xff] }
 0x5bf   :  { %v10734_v36 = vpop.f32.mrb[112].mxu1  ;;  %3283 = vmatmul.mubr.f32.gmra.mrb[108].mxu0 %v2105_v7  ;;  %v2451_v7 = vld [vmem:[%s12952_s3 + $0xc38] sm:$0xff] }
 0x5c0   :  { %12978 = vst [vmem:[#allocation25_spill] sm:$0xff] %v10734_v36  ;;  %3843 = vmatmul.mubr.f32.gmra.mrb[218].mxu1 %v2441_v11  ;;  %v3581_v44 = vpop.f32.mrb[113].mxu1  ;;  %v2108_v36 = vld [vmem:[%s12952_s3 + $0x180] sm:$0xff] }
 0x5c1   :  { %3847 = vmatprep.mubr.f32.mxu1 %v2445_v32  ;;  %v2109_v32 = vld [vmem:[%s12952_s3 + $0x188] sm:$0xff] }
 0x5c2   :  { %3287 = vmatprep.mubr.f32.mxu0 %v2109_v32  ;;  %v2450_v32 = vld [vmem:[%s12952_s3 + $0xc30] sm:$0xff] }
 0x5c3   :  { %v10748_v11 = vpop.f32.mrb[114].mxu1  ;;  %3288 = vmatmul.mubr.f32.gmra.mrb[110].mxu0 %v2108_v36  ;;  %v2454_v36 = vld [vmem:[%s12952_s3 + $0xc50] sm:$0xff] }
 0x5c4   :  { %12979 = vst [vmem:[#allocation26_spill] sm:$0xff] %v10748_v11  ;;  %3848 = vmatmul.mubr.f32.gmra.mrb[220].mxu1 %v2444_v2  ;;  %v3586_v44 = vpop.f32.mrb[115].mxu1  ;;  %v2111_v11 = vld [vmem:[%s12952_s3 + $0x198] sm:$0xff] }
 0x5c5   :  { %3852 = vmatprep.mubr.f32.mxu1 %v2448_v31  ;;  %v2112_v31 = vld [vmem:[%s12952_s3 + $0x1a0] sm:$0xff] }
 0x5c6   :  { %3292 = vmatprep.mubr.f32.mxu0 %v2112_v31  ;;  %v2457_v31 = vld [vmem:[%s12952_s3 + $0xc68] sm:$0xff] }
 0x5c7   :  { %v10762_v2 = vpop.f32.mrb[116].mxu1  ;;  %3293 = vmatmul.mubr.f32.gmra.mrb[112].mxu0 %v2111_v11  ;;  %v2456_v11 = vld [vmem:[%s12952_s3 + $0xc60] sm:$0xff] }
 0x5c8   :  { %12980 = vst [vmem:[#allocation27_spill] sm:$0xff] %v10762_v2  ;;  %3853 = vmatmul.mubr.f32.gmra.mrb[222].mxu1 %v2447_v53  ;;  %v3591_v44 = vpop.f32.mrb[117].mxu1 }
 0x5c9   :  { %3857 = vmatprep.mubr.f32.mxu1 %v2451_v7  ;;  %v2453_v7 = vld [vmem:[%s12952_s3 + $0xc48] sm:$0xff] }
 0x5cb   :  { %v10776_v53 = vpop.f32.mrb[118].mxu1 }
 0x5cc   :  { %12981 = vst [vmem:[#allocation28_spill] sm:$0xff] %v10776_v53  ;;  %3858 = vmatmul.mubr.f32.gmra.mrb[224].mxu1 %v2450_v32  ;;  %v3596_v44 = vpop.f32.mrb[119].mxu1  ;;  %v2460_v32 = vld [vmem:[%s12952_s3 + $0xc80] sm:$0xff] }
 0x5cd   :  { %3862 = vmatprep.mubr.f32.mxu1 %v2454_v36 }
 0x5cf   :  { %v10784_v2 = vpop.f32.mrb[120].mxu1 }
 0x5d0   :  { %12982 = vst [vmem:[#allocation29_spill] sm:$0xff] %v10784_v2  ;;  %3863 = vmatmul.mubr.f32.gmra.mrb[226].mxu1 %v2453_v7  ;;  %v3601_v22 = vpop.f32.mrb[121].mxu1  ;;  %v2459_v2 = vld [vmem:[%s12952_s3 + $0xc78] sm:$0xff] }
 0x5d1   :  { %3867 = vmatprep.mubr.f32.mxu1 %v2457_v31  ;;  %v2463_v22 = vld [vmem:[%s12952_s3 + $0xc98] sm:$0xff] }
 0x5d3   :  { %v10792_v36 = vpop.f32.mrb[122].mxu1 }
 0x5d4   :  { %12983 = vst [vmem:[#allocation30_spill] sm:$0xff] %v10792_v36  ;;  %3868 = vmatmul.mubr.f32.gmra.mrb[228].mxu1 %v2456_v11  ;;  %v3606_v44 = vpop.f32.mrb[123].mxu1  ;;  %v2462_v36 = vld [vmem:[%s12952_s3 + $0xc90] sm:$0xff] }
 0x5d5   :  { %3872 = vmatprep.mubr.f32.mxu1 %v2460_v32  ;;  %v2466_v11 = vld [vmem:[%s12952_s3 + $0xcb0] sm:$0xff] }
 0x5d7   :  { %v10800_v7 = vpop.f32.mrb[124].mxu1 }
 0x5d8   :  { %12984 = vst [vmem:[#allocation31_spill] sm:$0xff] %v10800_v7  ;;  %3873 = vmatmul.mubr.f32.gmra.mrb[230].mxu1 %v2459_v2  ;;  %v3611_v31 = vpop.f32.mrb[125].mxu1  ;;  %v2465_v7 = vld [vmem:[%s12952_s3 + $0xca8] sm:$0xff] }
 0x5d9   :  { %3877 = vmatprep.mubr.f32.mxu1 %v2463_v22  ;;  %v2469_v2 = vld [vmem:[%s12952_s3 + $0xcc8] sm:$0xff] }
 0x5db   :  { %v10808_v32 = vpop.f32.mrb[126].mxu1 }
 0x5dc   :  { %12985 = vst [vmem:[#allocation32_spill] sm:$0xff] %v10808_v32  ;;  %3878 = vmatmul.mubr.f32.gmra.mrb[232].mxu1 %v2462_v36  ;;  %v3616_v44 = vpop.f32.mrb[127].mxu1  ;;  %v2468_v32 = vld [vmem:[%s12952_s3 + $0xcc0] sm:$0xff] }
 0x5dd   :  { %3882 = vmatprep.mubr.f32.mxu1 %v2466_v11  ;;  %v2472_v36 = vld [vmem:[%s12952_s3 + $0xce0] sm:$0xff] }
 0x5df   :  { %v10816_v22 = vpop.f32.mrb[128].mxu1 }
 0x5e0   :  { %12986 = vst [vmem:[#allocation33_spill] sm:$0xff] %v10816_v22  ;;  %3883 = vmatmul.mubr.f32.gmra.mrb[234].mxu1 %v2465_v7  ;;  %v3621_v31 = vpop.f32.mrb[129].mxu1  ;;  %v2471_v22 = vld [vmem:[%s12952_s3 + $0xcd8] sm:$0xff] }
 0x5e1   :  { %3887 = vmatprep.mubr.f32.mxu1 %v2469_v2  ;;  %v2475_v7 = vld [vmem:[%s12952_s3 + $0xcf8] sm:$0xff] }
 0x5e3   :  { %v10824_v11 = vpop.f32.mrb[130].mxu1 }
 0x5e4   :  { %12987 = vst [vmem:[#allocation34_spill] sm:$0xff] %v10824_v11  ;;  %3888 = vmatmul.mubr.f32.gmra.mrb[236].mxu1 %v2468_v32  ;;  %v3626_v44 = vpop.f32.mrb[131].mxu1  ;;  %v2474_v11 = vld [vmem:[%s12952_s3 + $0xcf0] sm:$0xff] }
 0x5e5   :  { %3892 = vmatprep.mubr.f32.mxu1 %v2472_v36  ;;  %v2478_v32 = vld [vmem:[%s12952_s3 + $0xd10] sm:$0xff] }
 0x5e7   :  { %v10832_v2 = vpop.f32.mrb[132].mxu1 }
 0x5e8   :  { %12988 = vst [vmem:[#allocation35_spill] sm:$0xff] %v10832_v2  ;;  %3893 = vmatmul.mubr.f32.gmra.mrb[238].mxu1 %v2471_v22  ;;  %v3631_v31 = vpop.f32.mrb[133].mxu1  ;;  %v2477_v2 = vld [vmem:[%s12952_s3 + $0xd08] sm:$0xff] }
 0x5e9   :  { %3897 = vmatprep.mubr.f32.mxu1 %v2475_v7  ;;  %v2481_v22 = vld [vmem:[%s12952_s3 + $0xd28] sm:$0xff] }
 0x5eb   :  { %v10840_v36 = vpop.f32.mrb[134].mxu1 }
 0x5ec   :  { %12989 = vst [vmem:[#allocation36_spill] sm:$0xff] %v10840_v36  ;;  %3898 = vmatmul.mubr.f32.gmra.mrb[240].mxu1 %v2474_v11  ;;  %v3636_v44 = vpop.f32.mrb[135].mxu1  ;;  %v2480_v36 = vld [vmem:[%s12952_s3 + $0xd20] sm:$0xff] }
 0x5ed   :  { %3902 = vmatprep.mubr.f32.mxu1 %v2478_v32  ;;  %v2484_v11 = vld [vmem:[%s12952_s3 + $0xd40] sm:$0xff] }
 0x5ef   :  { %v10848_v7 = vpop.f32.mrb[136].mxu1 }
 0x5f0   :  { %12990 = vst [vmem:[#allocation37_spill] sm:$0xff] %v10848_v7  ;;  %3903 = vmatmul.mubr.f32.gmra.mrb[242].mxu1 %v2477_v2  ;;  %v3641_v31 = vpop.f32.mrb[137].mxu1  ;;  %v2483_v7 = vld [vmem:[%s12952_s3 + $0xd38] sm:$0xff] }
 0x5f1   :  { %3907 = vmatprep.mubr.f32.mxu1 %v2481_v22  ;;  %v2487_v2 = vld [vmem:[%s12952_s3 + $0xd58] sm:$0xff] }
 0x5f3   :  { %v10856_v32 = vpop.f32.mrb[138].mxu1 }
 0x5f4   :  { %12991 = vst [vmem:[#allocation38_spill] sm:$0xff] %v10856_v32  ;;  %3908 = vmatmul.mubr.f32.gmra.mrb[244].mxu1 %v2480_v36  ;;  %v3646_v44 = vpop.f32.mrb[139].mxu1  ;;  %v2486_v32 = vld [vmem:[%s12952_s3 + $0xd50] sm:$0xff] }
 0x5f5   :  { %3912 = vmatprep.mubr.f32.mxu1 %v2484_v11  ;;  %v2490_v36 = vld [vmem:[%s12952_s3 + $0xd70] sm:$0xff] }
 0x5f7   :  { %v10864_v22 = vpop.f32.mrb[140].mxu1 }
 0x5f8   :  { %12992 = vst [vmem:[#allocation39_spill] sm:$0xff] %v10864_v22  ;;  %3913 = vmatmul.mubr.f32.gmra.mrb[246].mxu1 %v2483_v7  ;;  %v3651_v31 = vpop.f32.mrb[141].mxu1  ;;  %v2489_v22 = vld [vmem:[%s12952_s3 + $0xd68] sm:$0xff] }
 0x5f9   :  { %3917 = vmatprep.mubr.f32.mxu1 %v2487_v2  ;;  %v2493_v7 = vld [vmem:[%s12952_s3 + $0xd88] sm:$0xff] }
 0x5fb   :  { %v10872_v11 = vpop.f32.mrb[142].mxu1 }
 0x5fc   :  { %12993 = vst [vmem:[#allocation40_spill] sm:$0xff] %v10872_v11  ;;  %3918 = vmatmul.mubr.f32.gmra.mrb[248].mxu1 %v2486_v32  ;;  %v3656_v44 = vpop.f32.mrb[143].mxu1  ;;  %v2492_v11 = vld [vmem:[%s12952_s3 + $0xd80] sm:$0xff] }
 0x5fd   :  { %3922 = vmatprep.mubr.f32.mxu1 %v2490_v36  ;;  %v2496_v32 = vld [vmem:[%s12952_s3 + $0xda0] sm:$0xff] }
 0x5ff   :  { %v10880_v2 = vpop.f32.mrb[144].mxu1 }
 0x600   :  { %12994 = vst [vmem:[#allocation41_spill] sm:$0xff] %v10880_v2  ;;  %3923 = vmatmul.mubr.f32.gmra.mrb[250].mxu1 %v2489_v22  ;;  %v3661_v31 = vpop.f32.mrb[145].mxu1  ;;  %v2495_v2 = vld [vmem:[%s12952_s3 + $0xd98] sm:$0xff] }
 0x601   :  { %3927 = vmatprep.mubr.f32.mxu1 %v2493_v7  ;;  %v2499_v22 = vld [vmem:[%s12952_s3 + $0xdb8] sm:$0xff] }
 0x603   :  { %v10888_v36 = vpop.f32.mrb[146].mxu1 }
 0x604   :  { %12995 = vst [vmem:[#allocation42_spill] sm:$0xff] %v10888_v36  ;;  %3928 = vmatmul.mubr.f32.gmra.mrb[252].mxu1 %v2492_v11  ;;  %v3666_v44 = vpop.f32.mrb[147].mxu1  ;;  %v2498_v36 = vld [vmem:[%s12952_s3 + $0xdb0] sm:$0xff] }
 0x605   :  { %3932 = vmatprep.mubr.f32.mxu1 %v2496_v32  ;;  %v2502_v11 = vld [vmem:[%s12952_s3 + $0xdd0] sm:$0xff] }
 0x607   :  { %v10896_v7 = vpop.f32.mrb[148].mxu1 }
 0x608   :  { %12996 = vst [vmem:[#allocation43_spill] sm:$0xff] %v10896_v7  ;;  %3933 = vmatmul.mubr.f32.gmra.mrb[254].mxu1 %v2495_v2  ;;  %v3671_v31 = vpop.f32.mrb[149].mxu1  ;;  %v2501_v7 = vld [vmem:[%s12952_s3 + $0xdc8] sm:$0xff] }
 0x609   :  { %3937 = vmatprep.mubr.f32.mxu1 %v2499_v22  ;;  %v2505_v2 = vld [vmem:[%s12952_s3 + $0xde8] sm:$0xff] }
 0x60b   :  { %v10904_v32 = vpop.f32.mrb[150].mxu1 }
 0x60c   :  { %12997 = vst [vmem:[#allocation44_spill] sm:$0xff] %v10904_v32  ;;  %3938 = vmatmul.mubr.f32.gmra.mrb[0].mxu1 %v2498_v36  ;;  %v3676_v44 = vpop.f32.mrb[151].mxu1  ;;  %v2504_v32 = vld [vmem:[%s12952_s3 + $0xde0] sm:$0xff] }
 0x60d   :  { %3942 = vmatprep.mubr.f32.mxu1 %v2502_v11  ;;  %v2508_v36 = vld [vmem:[%s12952_s3 + $0xe00] sm:$0xff] }
 0x60f   :  { %v10912_v22 = vpop.f32.mrb[152].mxu1 }
 0x610   :  { %12998 = vst [vmem:[#allocation45_spill] sm:$0xff] %v10912_v22  ;;  %3943 = vmatmul.mubr.f32.gmra.mrb[2].mxu1 %v2501_v7  ;;  %v3681_v31 = vpop.f32.mrb[153].mxu1  ;;  %v2507_v22 = vld [vmem:[%s12952_s3 + $0xdf8] sm:$0xff] }
 0x611   :  { %3947 = vmatprep.mubr.f32.mxu1 %v2505_v2  ;;  %v2511_v7 = vld [vmem:[%s12952_s3 + $0xe18] sm:$0xff] }
 0x613   :  { %v10920_v11 = vpop.f32.mrb[154].mxu1 }
 0x614   :  { %12999 = vst [vmem:[#allocation46_spill] sm:$0xff] %v10920_v11  ;;  %3948 = vmatmul.mubr.f32.gmra.mrb[4].mxu1 %v2504_v32  ;;  %v3686_v44 = vpop.f32.mrb[155].mxu1  ;;  %v2510_v11 = vld [vmem:[%s12952_s3 + $0xe10] sm:$0xff] }
 0x615   :  { %3952 = vmatprep.mubr.f32.mxu1 %v2508_v36  ;;  %v2514_v32 = vld [vmem:[%s12952_s3 + $0xe30] sm:$0xff] }
 0x617   :  { %v10928_v2 = vpop.f32.mrb[156].mxu1 }
 0x618   :  { %13000 = vst [vmem:[#allocation47_spill] sm:$0xff] %v10928_v2  ;;  %3953 = vmatmul.mubr.f32.gmra.mrb[6].mxu1 %v2507_v22  ;;  %v3691_v31 = vpop.f32.mrb[157].mxu1  ;;  %v2513_v2 = vld [vmem:[%s12952_s3 + $0xe28] sm:$0xff] }
 0x619   :  { %3957 = vmatprep.mubr.f32.mxu1 %v2511_v7  ;;  %v2517_v22 = vld [vmem:[%s12952_s3 + $0xe48] sm:$0xff] }
 0x61b   :  { %v10936_v36 = vpop.f32.mrb[158].mxu1 }
 0x61c   :  { %13001 = vst [vmem:[#allocation48_spill] sm:$0xff] %v10936_v36  ;;  %3958 = vmatmul.mubr.f32.gmra.mrb[8].mxu1 %v2510_v11  ;;  %v3696_v44 = vpop.f32.mrb[159].mxu1  ;;  %v2516_v36 = vld [vmem:[%s12952_s3 + $0xe40] sm:$0xff] }
 0x61d   :  { %3962 = vmatprep.mubr.f32.mxu1 %v2514_v32  ;;  %v2520_v11 = vld [vmem:[%s12952_s3 + $0xe60] sm:$0xff] }
 0x61f   :  { %v10944_v7 = vpop.f32.mrb[160].mxu1 }
 0x620   :  { %13002 = vst [vmem:[#allocation49_spill] sm:$0xff] %v10944_v7  ;;  %3963 = vmatmul.mubr.f32.gmra.mrb[10].mxu1 %v2513_v2  ;;  %v3701_v31 = vpop.f32.mrb[161].mxu1  ;;  %v2519_v7 = vld [vmem:[%s12952_s3 + $0xe58] sm:$0xff]  ;;  %v2062_v2 = vld [vmem:[%s12952_s3 + $0x10] sm:$0xff] }
 0x621   :  { %3967 = vmatprep.mubr.f32.mxu1 %v2517_v22 }
 0x623   :  { %v10952_v32 = vpop.f32.mrb[162].mxu1 }
 0x624   :  { %13003 = vst [vmem:[#allocation50_spill] sm:$0xff] %v10952_v32  ;;  %3968 = vmatmul.mubr.f32.gmra.mrb[12].mxu1 %v2516_v36  ;;  %v3706_v44 = vpop.f32.mrb[163].mxu1  ;;  %v2065_v36 = vld [vmem:[%s12952_s3 + $0x28] sm:$0xff] }
 0x625   :  { %3972 = vmatprep.mubr.f32.mxu1 %v2520_v11  ;;  %v2068_v11 = vld [vmem:[%s12952_s3 + $0x40] sm:$0xff] }
 0x627   :  { %v10960_v22 = vpop.f32.mrb[164].mxu1 }
 0x628   :  { %13004 = vst [vmem:[#allocation51_spill] sm:$0xff] %v10960_v22  ;;  %3973 = vmatmul.mubr.f32.gmra.mrb[14].mxu1 %v2519_v7  ;;  %v3711_v31 = vpop.f32.mrb[165].mxu1  ;;  %v2071_v7 = vld [vmem:[%s12952_s3 + $0x58] sm:$0xff] }
 0x629   :  { %6419 = vmatprep.mubr.msk.f32.mxu1 %vm2676_vm2, %v2062_v2  ;;  %v2074_v2 = vld [vmem:[%s12952_s3 + $0x70] sm:$0xff] }
 0x62b   :  { %v10969_v44 = vpop.f32.mrb[166].mxu1 }
 0x62c   :  { %13005 = vst [vmem:[#allocation52_spill] sm:$0xff] %v10969_v44  ;;  %6420 = vmatmul.mubr.msk.f32.vlgmr.msra.gmra.mrb[16].mxu1 %vm2676_vm2, %v2065_v36  ;;  %v3716_v32 = vpop.f32.mrb[167].mxu1  ;;  %v2080_v36 = vld [vmem:[%s12952_s3 + $0xa0] sm:$0xff] }
 0x62d   :  { %6422 = vmatprep.mubr.msk.f32.mxu1 %vm2676_vm2, %v2068_v11  ;;  %v2077_v32 = vld [vmem:[%s12952_s3 + $0x88] sm:$0xff] }
 0x62f   :  { %v10979_v31 = vpop.f32.mrb[168].mxu1 }
 0x630   :  { %13006 = vst [vmem:[#allocation53_spill] sm:$0xff] %v10979_v31  ;;  %6423 = vmatmul.mubr.msk.f32.gmra.mrb[18].mxu1 %vm2676_vm2, %v2071_v7  ;;  %v3721_v22 = vpop.f32.mrb[169].mxu1  ;;  %v2086_v7 = vld [vmem:[%s12952_s3 + $0xd0] sm:$0xff] }
 0x631   :  { %6425 = vmatprep.mubr.msk.f32.mxu1 %vm2676_vm2, %v2074_v2  ;;  %v2083_v22 = vld [vmem:[%s12952_s3 + $0xb8] sm:$0xff] }
 0x633   :  { %v10989_v11 = vpop.f32.mrb[170].mxu1 }
 0x634   :  { %13007 = vst [vmem:[#allocation54_spill] sm:$0xff] %v10989_v11  ;;  %6426 = vmatmul.mubr.msk.f32.gmra.mrb[20].mxu1 %vm2676_vm2, %v2077_v32  ;;  %v3726_v44 = vpop.f32.mrb[171].mxu1  ;;  %v2092_v32 = vld [vmem:[%s12952_s3 + $0x100] sm:$0xff] }
 0x635   :  { %6428 = vmatprep.mubr.msk.f32.mxu1 %vm2676_vm2, %v2080_v36  ;;  %v2089_v44 = vld [vmem:[%s12952_s3 + $0xe8] sm:$0xff] }
 0x637   :  { %v10999_v2 = vpop.f32.mrb[172].mxu1 }
 0x638   :  { %13008 = vst [vmem:[#allocation55_spill] sm:$0xff] %v10999_v2  ;;  %6429 = vmatmul.mubr.msk.f32.gmra.mrb[22].mxu1 %vm2676_vm2, %v2083_v22  ;;  %v3731_v31 = vpop.f32.mrb[173].mxu1  ;;  %v2098_v22 = vld [vmem:[%s12952_s3 + $0x130] sm:$0xff] }
 0x639   :  { %6431 = vmatprep.mubr.msk.f32.mxu1 %vm2676_vm2, %v2086_v7  ;;  %v2095_v31 = vld [vmem:[%s12952_s3 + $0x118] sm:$0xff] }
 0x63b   :  { %v11009_v36 = vpop.f32.mrb[174].mxu1 }
 0x63c   :  { %13009 = vst [vmem:[#allocation56_spill] sm:$0xff] %v11009_v36  ;;  %6432 = vmatmul.mubr.msk.f32.gmra.mrb[24].mxu1 %vm2676_vm2, %v2089_v44  ;;  %v3736_v11 = vpop.f32.mrb[175].mxu1  ;;  %v2104_v44 = vld [vmem:[%s12952_s3 + $0x160] sm:$0xff] }
 0x63d   :  { %6434 = vmatprep.mubr.msk.f32.mxu1 %vm2676_vm2, %v2092_v32  ;;  %v2101_v11 = vld [vmem:[%s12952_s3 + $0x148] sm:$0xff] }
 0x63f   :  { %v11019_v7 = vpop.f32.mrb[176].mxu1 }
 0x640   :  { %13010 = vst [vmem:[#allocation57_spill] sm:$0xff] %v11019_v7  ;;  %6435 = vmatmul.mubr.msk.f32.gmra.mrb[26].mxu1 %vm2676_vm2, %v2095_v31  ;;  %v3741_v2 = vpop.f32.mrb[177].mxu1  ;;  %v2110_v31 = vld [vmem:[%s12952_s3 + $0x190] sm:$0xff] }
 0x641   :  { %6437 = vmatprep.mubr.msk.f32.mxu1 %vm2676_vm2, %v2098_v22  ;;  %v2107_v2 = vld [vmem:[%s12952_s3 + $0x178] sm:$0xff] }
 0x643   :  { %v11029_v32 = vpop.f32.mrb[178].mxu1 }
 0x644   :  { %13011 = vst [vmem:[#allocation58_spill] sm:$0xff] %v11029_v32  ;;  %6438 = vmatmul.mubr.msk.f32.gmra.mrb[28].mxu1 %vm2676_vm2, %v2101_v11  ;;  %v3746_v36 = vpop.f32.mrb[179].mxu1  ;;  %v2116_v11 = vld [vmem:[%s12952_s3 + $0x1c0] sm:$0xff] }
 0x645   :  { %6440 = vmatprep.mubr.msk.f32.mxu1 %vm2676_vm2, %v2104_v44  ;;  %v2113_v36 = vld [vmem:[%s12952_s3 + $0x1a8] sm:$0xff] }
 0x647   :  { %v11039_v22 = vpop.f32.mrb[180].mxu1 }
 0x648   :  { %13012 = vst [vmem:[#allocation59_spill] sm:$0xff] %v11039_v22  ;;  %6441 = vmatmul.mubr.msk.f32.gmra.mrb[30].mxu1 %vm2676_vm2, %v2107_v2  ;;  %v3751_v7 = vpop.f32.mrb[181].mxu1  ;;  %v2122_v2 = vld [vmem:[%s12952_s3 + $0x1f0] sm:$0xff] }
 0x649   :  { %6443 = vmatprep.mubr.msk.f32.mxu1 %vm2676_vm2, %v2110_v31  ;;  %v2119_v7 = vld [vmem:[%s12952_s3 + $0x1d8] sm:$0xff] }
 0x64b   :  { %v11049_v44 = vpop.f32.mrb[182].mxu1 }
 0x64c   :  { %13013 = vst [vmem:[#allocation60_spill] sm:$0xff] %v11049_v44  ;;  %6444 = vmatmul.mubr.msk.f32.gmra.mrb[32].mxu1 %vm2676_vm2, %v2113_v36  ;;  %v3756_v32 = vpop.f32.mrb[183].mxu1  ;;  %v2128_v36 = vld [vmem:[%s12952_s3 + $0x220] sm:$0xff] }
 0x64d   :  { %6446 = vmatprep.mubr.msk.f32.mxu1 %vm2676_vm2, %v2116_v11  ;;  %v2125_v32 = vld [vmem:[%s12952_s3 + $0x208] sm:$0xff] }
 0x64f   :  { %v11059_v31 = vpop.f32.mrb[184].mxu1 }
 0x650   :  { %13014 = vst [vmem:[#allocation61_spill] sm:$0xff] %v11059_v31  ;;  %6447 = vmatmul.mubr.msk.f32.gmra.mrb[34].mxu1 %vm2676_vm2, %v2119_v7  ;;  %v3761_v22 = vpop.f32.mrb[185].mxu1  ;;  %v2134_v7 = vld [vmem:[%s12952_s3 + $0x250] sm:$0xff] }
 0x651   :  { %6449 = vmatprep.mubr.msk.f32.mxu1 %vm2676_vm2, %v2122_v2  ;;  %v2131_v22 = vld [vmem:[%s12952_s3 + $0x238] sm:$0xff] }
 0x653   :  { %v11069_v11 = vpop.f32.mrb[186].mxu1 }
 0x654   :  { %13015 = vst [vmem:[#allocation62_spill] sm:$0xff] %v11069_v11  ;;  %6450 = vmatmul.mubr.msk.f32.gmra.mrb[36].mxu1 %vm2676_vm2, %v2125_v32  ;;  %v3766_v44 = vpop.f32.mrb[187].mxu1  ;;  %v2140_v32 = vld [vmem:[%s12952_s3 + $0x280] sm:$0xff] }
 0x655   :  { %6452 = vmatprep.mubr.msk.f32.mxu1 %vm2676_vm2, %v2128_v36  ;;  %v2137_v44 = vld [vmem:[%s12952_s3 + $0x268] sm:$0xff] }
 0x657   :  { %v11079_v2 = vpop.f32.mrb[188].mxu1 }
 0x658   :  { %13016 = vst [vmem:[#allocation63_spill] sm:$0xff] %v11079_v2  ;;  %6453 = vmatmul.mubr.msk.f32.gmra.mrb[38].mxu1 %vm2676_vm2, %v2131_v22  ;;  %v3771_v31 = vpop.f32.mrb[189].mxu1  ;;  %v2146_v22 = vld [vmem:[%s12952_s3 + $0x2b0] sm:$0xff] }
 0x659   :  { %6455 = vmatprep.mubr.msk.f32.mxu1 %vm2676_vm2, %v2134_v7  ;;  %v2143_v31 = vld [vmem:[%s12952_s3 + $0x298] sm:$0xff] }
 0x65b   :  { %v11089_v36 = vpop.f32.mrb[190].mxu1 }
 0x65c   :  { %13017 = vst [vmem:[#allocation64_spill] sm:$0xff] %v11089_v36  ;;  %6456 = vmatmul.mubr.msk.f32.gmra.mrb[40].mxu1 %vm2676_vm2, %v2137_v44  ;;  %v3776_v11 = vpop.f32.mrb[191].mxu1  ;;  %v2152_v44 = vld [vmem:[%s12952_s3 + $0x2e0] sm:$0xff] }
 0x65d   :  { %6458 = vmatprep.mubr.msk.f32.mxu1 %vm2676_vm2, %v2140_v32  ;;  %v2149_v11 = vld [vmem:[%s12952_s3 + $0x2c8] sm:$0xff] }
 0x65f   :  { %v11099_v7 = vpop.f32.mrb[192].mxu1 }
 0x660   :  { %13018 = vst [vmem:[#allocation65_spill] sm:$0xff] %v11099_v7  ;;  %6459 = vmatmul.mubr.msk.f32.gmra.mrb[42].mxu1 %vm2676_vm2, %v2143_v31  ;;  %v3781_v2 = vpop.f32.mrb[193].mxu1  ;;  %v2158_v31 = vld [vmem:[%s12952_s3 + $0x310] sm:$0xff] }
 0x661   :  { %6461 = vmatprep.mubr.msk.f32.mxu1 %vm2676_vm2, %v2146_v22  ;;  %v2155_v2 = vld [vmem:[%s12952_s3 + $0x2f8] sm:$0xff] }
 0x663   :  { %v11109_v32 = vpop.f32.mrb[194].mxu1 }
 0x664   :  { %13019 = vst [vmem:[#allocation66_spill] sm:$0xff] %v11109_v32  ;;  %6462 = vmatmul.mubr.msk.f32.gmra.mrb[44].mxu1 %vm2676_vm2, %v2149_v11  ;;  %v3786_v36 = vpop.f32.mrb[195].mxu1  ;;  %v2164_v11 = vld [vmem:[%s12952_s3 + $0x340] sm:$0xff] }
 0x665   :  { %6464 = vmatprep.mubr.msk.f32.mxu1 %vm2676_vm2, %v2152_v44  ;;  %v2161_v36 = vld [vmem:[%s12952_s3 + $0x328] sm:$0xff] }
 0x667   :  { %v11119_v22 = vpop.f32.mrb[196].mxu1 }
 0x668   :  { %13020 = vst [vmem:[#allocation67_spill] sm:$0xff] %v11119_v22  ;;  %6465 = vmatmul.mubr.msk.f32.gmra.mrb[46].mxu1 %vm2676_vm2, %v2155_v2  ;;  %v3791_v7 = vpop.f32.mrb[197].mxu1  ;;  %v2170_v2 = vld [vmem:[%s12952_s3 + $0x370] sm:$0xff] }
 0x669   :  { %6467 = vmatprep.mubr.msk.f32.mxu1 %vm2676_vm2, %v2158_v31  ;;  %v2167_v7 = vld [vmem:[%s12952_s3 + $0x358] sm:$0xff] }
 0x66b   :  { %v11129_v44 = vpop.f32.mrb[198].mxu1 }
 0x66c   :  { %13021 = vst [vmem:[#allocation68_spill] sm:$0xff] %v11129_v44  ;;  %6468 = vmatmul.mubr.msk.f32.gmra.mrb[48].mxu1 %vm2676_vm2, %v2161_v36  ;;  %v3796_v32 = vpop.f32.mrb[199].mxu1  ;;  %v2176_v36 = vld [vmem:[%s12952_s3 + $0x3a0] sm:$0xff] }
 0x66d   :  { %6470 = vmatprep.mubr.msk.f32.mxu1 %vm2676_vm2, %v2164_v11  ;;  %v2173_v32 = vld [vmem:[%s12952_s3 + $0x388] sm:$0xff] }
 0x66f   :  { %v11139_v31 = vpop.f32.mrb[200].mxu1 }
 0x670   :  { %13022 = vst [vmem:[#allocation69_spill] sm:$0xff] %v11139_v31  ;;  %6471 = vmatmul.mubr.msk.f32.gmra.mrb[50].mxu1 %vm2676_vm2, %v2167_v7  ;;  %v3801_v22 = vpop.f32.mrb[201].mxu1  ;;  %v2182_v7 = vld [vmem:[%s12952_s3 + $0x3d0] sm:$0xff] }
 0x671   :  { %6473 = vmatprep.mubr.msk.f32.mxu1 %vm2676_vm2, %v2170_v2  ;;  %v2179_v22 = vld [vmem:[%s12952_s3 + $0x3b8] sm:$0xff] }
 0x673   :  { %v11149_v11 = vpop.f32.mrb[202].mxu1 }
 0x674   :  { %13023 = vst [vmem:[#allocation70_spill] sm:$0xff] %v11149_v11  ;;  %6474 = vmatmul.mubr.msk.f32.gmra.mrb[52].mxu1 %vm2676_vm2, %v2173_v32  ;;  %v3806_v44 = vpop.f32.mrb[203].mxu1  ;;  %v2188_v32 = vld [vmem:[%s12952_s3 + $0x400] sm:$0xff]  ;;  %v11171_v11 = vpop.f32.mrb[78].mxu0 }
 0x675   :  { %6476 = vmatprep.mubr.msk.f32.mxu1 %vm2676_vm2, %v2176_v36  ;;  %v2185_v44 = vld [vmem:[%s12952_s3 + $0x3e8] sm:$0xff]  ;;  %v3211_v53 = vpop.f32.mrb[79].mxu0 }
 0x677   :  { %v11159_v2 = vpop.f32.mrb[204].mxu1 }
 0x678   :  { %13024 = vst [vmem:[#allocation71_spill] sm:$0xff] %v11159_v2  ;;  %6477 = vmatmul.mubr.msk.f32.gmra.mrb[54].mxu1 %vm2676_vm2, %v2179_v22  ;;  %v3811_v31 = vpop.f32.mrb[205].mxu1  ;;  %v11178_v22 = vpop.f32.mrb[80].mxu0 }
 0x679   :  { %6479 = vmatprep.mubr.msk.f32.mxu1 %vm2676_vm2, %v2182_v7  ;;  %v2191_v31 = vld [vmem:[%s12952_s3 + $0x418] sm:$0xff]  ;;  %v2194_v7 = vld [vmem:[%s12952_s3 + $0x430] sm:$0xff]  ;;  %v3216_v57 = vpop.f32.mrb[81].mxu0 }
 0x67a   :  { %v11185_v15 = vpop.f32.mrb[82].mxu0  ;;  %v2200_v57 = vld [vmem:[%s12952_s3 + $0x460] sm:$0xff] }
 0x67b   :  { %v11169_v36 = vpop.f32.mrb[206].mxu1 }
 0x67c   :  { %13025 = vst [vmem:[#allocation72_spill] sm:$0xff] %v11169_v36  ;;  %6480 = vmatmul.mubr.msk.f32.gmra.mrb[56].mxu1 %vm2676_vm2, %v2185_v44  ;;  %v3816_v2 = vpop.f32.mrb[207].mxu1  ;;  %v2197_v44 = vld [vmem:[%s12952_s3 + $0x448] sm:$0xff] }
 0x67d   :  { %6482 = vmatprep.mubr.msk.f32.mxu1 %vm2676_vm2, %v2188_v32  ;;  %v3221_v2 = vpop.f32.mrb[83].mxu0 }
 0x67e   :  { %v11192_v32 = vpop.f32.mrb[84].mxu0 }
 0x67f   :  { %v11183_v36 = vpop.f32.mrb[208].mxu1  ;;  %v3226_v47 = vpop.f32.mrb[85].mxu0 }
 0x680   :  { %13026 = vst [vmem:[#allocation73_spill] sm:$0xff] %v11183_v36  ;;  %6483 = vmatmul.mubr.msk.f32.gmra.mrb[58].mxu1 %vm2676_vm2, %v2191_v31  ;;  %v3821_v53 = vpop.f32.mrb[209].mxu1  ;;  %v11199_v26 = vpop.f32.mrb[86].mxu0  ;;  %v2206_v47 = vld [vmem:[%s12952_s3 + $0x490] sm:$0xff] }
 0x681   :  { %6485 = vmatprep.mubr.msk.f32.mxu1 %vm2676_vm2, %v2194_v7  ;;  %v3231_v53 = vpop.f32.mrb[87].mxu0  ;;  %v2203_v7 = vld [vmem:[%s12952_s3 + $0x478] sm:$0xff] }
 0x682   :  { %v11206_v2 = vpop.f32.mrb[88].mxu0 }
 0x683   :  { %v11197_v36 = vpop.f32.mrb[210].mxu1  ;;  %v3236_v49 = vpop.f32.mrb[89].mxu0 }
 0x684   :  { %13027 = vst [vmem:[#allocation74_spill] sm:$0xff] %v11197_v36  ;;  %6486 = vmatmul.mubr.msk.f32.gmra.mrb[60].mxu1 %vm2676_vm2, %v2197_v44  ;;  %v3826_v31 = vpop.f32.mrb[211].mxu1  ;;  %v11213_v39 = vpop.f32.mrb[90].mxu0  ;;  %v2212_v49 = vld [vmem:[%s12952_s3 + $0x4c0] sm:$0xff] }
 0x685   :  { %6488 = vmatprep.mubr.msk.f32.mxu1 %vm2676_vm2, %v2200_v57  ;;  %v3241_v31 = vpop.f32.mrb[91].mxu0  ;;  %v2209_v57 = vld [vmem:[%s12952_s3 + $0x4a8] sm:$0xff] }
 0x686   :  { %v11220_v53 = vpop.f32.mrb[92].mxu0  ;;  %v2218_v31 = vld [vmem:[%s12952_s3 + $0x4f0] sm:$0xff] }
 0x687   :  { %v11211_v36 = vpop.f32.mrb[212].mxu1  ;;  %v3246_v59 = vpop.f32.mrb[93].mxu0 }
 0x688   :  { %13028 = vst [vmem:[#allocation75_spill] sm:$0xff] %v11211_v36  ;;  %6489 = vmatmul.mubr.msk.f32.gmra.mrb[62].mxu1 %vm2676_vm2, %v2203_v7  ;;  %v3831_v44 = vpop.f32.mrb[213].mxu1  ;;  %v11227_v58 = vpop.f32.mrb[94].mxu0 }
 0x689   :  { %6491 = vmatprep.mubr.msk.f32.mxu1 %vm2676_vm2, %v2206_v47  ;;  %v3251_v44 = vpop.f32.mrb[95].mxu0  ;;  %v2215_v47 = vld [vmem:[%s12952_s3 + $0x4d8] sm:$0xff] }
 0x68a   :  { %v11239_v59 = vpop.f32.mrb[96].mxu0  ;;  %v2224_v44 = vld [vmem:[%s12952_s3 + $0x520] sm:$0xff] }
 0x68b   :  { %v11225_v36 = vpop.f32.mrb[214].mxu1 }
 0x68c   :  { %13029 = vst [vmem:[#allocation76_spill] sm:$0xff] %v11225_v36  ;;  %6492 = vmatmul.mubr.msk.f32.gmra.mrb[64].mxu1 %vm2676_vm2, %v2209_v57  ;;  %v3836_v7 = vpop.f32.mrb[215].mxu1  ;;  %v3256_v57 = vpop.f32.mrb[97].mxu0 }
 0x68d   :  { %6494 = vmatprep.mubr.msk.f32.mxu1 %vm2676_vm2, %v2212_v49  ;;  %v2221_v49 = vld [vmem:[%s12952_s3 + $0x508] sm:$0xff]  ;;  %v11246_v7 = vpop.f32.mrb[98].mxu0 }
 0x68e   :  { %v3261_v23 = vpop.f32.mrb[99].mxu0 }
 0x68f   :  { %v11237_v16 = vpop.f32.mrb[216].mxu1  ;;  %v11253_v43 = vpop.f32.mrb[100].mxu0  ;;  %v2230_v23 = vld [vmem:[%s12952_s3 + $0x550] sm:$0xff] }
 0x690   :  { %13030 = vst [vmem:[#allocation77_spill] sm:$0xff] %v11237_v16  ;;  %6495 = vmatmul.mubr.msk.f32.gmra.mrb[66].mxu1 %vm2676_vm2, %v2215_v47  ;;  %v3841_v36 = vpop.f32.mrb[217].mxu1  ;;  %v3266_v47 = vpop.f32.mrb[101].mxu0 }
 0x691   :  { %6497 = vmatprep.mubr.msk.f32.mxu1 %vm2676_vm2, %v2218_v31  ;;  %v2227_v31 = vld [vmem:[%s12952_s3 + $0x538] sm:$0xff]  ;;  %v11260_v57 = vpop.f32.mrb[102].mxu0 }
 0x692   :  { %v3271_v51 = vpop.f32.mrb[103].mxu0 }
 0x693   :  { %v11251_v16 = vpop.f32.mrb[218].mxu1  ;;  %v11267_v4 = vpop.f32.mrb[104].mxu0  ;;  %v2236_v51 = vld [vmem:[%s12952_s3 + $0x580] sm:$0xff] }
 0x694   :  { %13031 = vst [vmem:[#allocation78_spill] sm:$0xff] %v11251_v16  ;;  %6498 = vmatmul.mubr.msk.f32.gmra.mrb[68].mxu1 %vm2676_vm2, %v2221_v49  ;;  %v3846_v36 = vpop.f32.mrb[219].mxu1 }
 0x695   :  { %6500 = vmatprep.mubr.msk.f32.mxu1 %vm2676_vm2, %v2224_v44  ;;  %v3276_v36 = vpop.f32.mrb[105].mxu0  ;;  %v2233_v44 = vld [vmem:[%s12952_s3 + $0x568] sm:$0xff] }
 0x696   :  { %v11274_v47 = vpop.f32.mrb[106].mxu0 }
 0x697   :  { %v11265_v16 = vpop.f32.mrb[220].mxu1  ;;  %v3281_v28 = vpop.f32.mrb[107].mxu0 }
 0x698   :  { %13032 = vst [vmem:[#allocation79_spill] sm:$0xff] %v11265_v16  ;;  %6501 = vmatmul.mubr.msk.f32.gmra.mrb[70].mxu1 %vm2676_vm2, %v2227_v31  ;;  %v3851_v49 = vpop.f32.mrb[221].mxu1  ;;  %v11281_v38 = vpop.f32.mrb[108].mxu0  ;;  %v2242_v28 = vld [vmem:[%s12952_s3 + $0x5b0] sm:$0xff] }
 0x699   :  { %6503 = vmatprep.mubr.msk.f32.mxu1 %vm2676_vm2, %v2230_v23  ;;  %v3286_v49 = vpop.f32.mrb[109].mxu0  ;;  %v2239_v23 = vld [vmem:[%s12952_s3 + $0x598] sm:$0xff] }
 0x69a   :  { %v11288_v36 = vpop.f32.mrb[110].mxu0  ;;  %v2248_v49 = vld [vmem:[%s12952_s3 + $0x5e0] sm:$0xff] }
 0x69b   :  { %v11279_v16 = vpop.f32.mrb[222].mxu1  ;;  %v3291_v10 = vpop.f32.mrb[111].mxu0 }
 0x69c   :  { %13033 = vst [vmem:[#allocation80_spill] sm:$0xff] %v11279_v16  ;;  %6504 = vmatmul.mubr.msk.f32.gmra.mrb[72].mxu1 %vm2676_vm2, %v2233_v44  ;;  %v3856_v31 = vpop.f32.mrb[223].mxu1  ;;  %v11295_v18 = vpop.f32.mrb[112].mxu0 }
 0x69d   :  { %6506 = vmatprep.mubr.msk.f32.mxu1 %vm2676_vm2, %v2236_v51  ;;  %v3296_v31 = vpop.f32.mrb[113].mxu0  ;;  %v2245_v51 = vld [vmem:[%s12952_s3 + $0x5c8] sm:$0xff] }
 0x69f   :  { %v11293_v16 = vpop.f32.mrb[224].mxu1 }
 0x6a0   :  { %13034 = vst [vmem:[#allocation81_spill] sm:$0xff] %v11293_v16  ;;  %6507 = vmatmul.mubr.msk.f32.gmra.mrb[74].mxu1 %vm2676_vm2, %v2239_v23  ;;  %v3861_v44 = vpop.f32.mrb[225].mxu1  ;;  %v2251_v23 = vld [vmem:[%s12952_s3 + $0x5f8] sm:$0xff] }
 0x6a1   :  { %6509 = vmatprep.mubr.msk.f32.mxu1 %vm2676_vm2, %v2242_v28  ;;  %v2254_v28 = vld [vmem:[%s12952_s3 + $0x610] sm:$0xff] }
 0x6a3   :  { %v11305_v54 = vpop.f32.mrb[226].mxu1 }
 0x6a4   :  { %13035 = vst [vmem:[#allocation82_spill] sm:$0xff] %v11305_v54  ;;  %6510 = vmatmul.mubr.msk.f32.gmra.mrb[76].mxu1 %vm2676_vm2, %v2245_v51  ;;  %v3866_v10 = vpop.f32.mrb[227].mxu1  ;;  %v2257_v51 = vld [vmem:[%s12952_s3 + $0x628] sm:$0xff] }
 0x6a5   :  { %6512 = vmatprep.mubr.msk.f32.mxu1 %vm2676_vm2, %v2248_v49  ;;  %v2260_v49 = vld [vmem:[%s12952_s3 + $0x640] sm:$0xff] }
 0x6a7   :  { %v11315_v44 = vpop.f32.mrb[228].mxu1 }
 0x6a8   :  { %13036 = vst [vmem:[#allocation83_spill] sm:$0xff] %v11315_v44  ;;  %6513 = vmatmul.mubr.msk.f32.gmra.mrb[78].mxu1 %vm2676_vm2, %v2251_v23  ;;  %v3871_v31 = vpop.f32.mrb[229].mxu1  ;;  %v2263_v23 = vld [vmem:[%s12952_s3 + $0x658] sm:$0xff] }
 0x6a9   :  { %6515 = vmatprep.mubr.msk.f32.mxu1 %vm2676_vm2, %v2254_v28  ;;  %v2266_v28 = vld [vmem:[%s12952_s3 + $0x670] sm:$0xff] }
 0x6ab   :  { %v11325_v10 = vpop.f32.mrb[230].mxu1 }
 0x6ac   :  { %13037 = vst [vmem:[#allocation84_spill] sm:$0xff] %v11325_v10  ;;  %6516 = vmatmul.mubr.msk.f32.gmra.mrb[80].mxu1 %vm2676_vm2, %v2257_v51  ;;  %v3876_v16 = vpop.f32.mrb[231].mxu1  ;;  %v2272_v51 = vld [vmem:[%s12952_s3 + $0x6a0] sm:$0xff] }
 0x6ad   :  { %6518 = vmatprep.mubr.msk.f32.mxu1 %vm2676_vm2, %v2260_v49  ;;  %v2269_v16 = vld [vmem:[%s12952_s3 + $0x688] sm:$0xff] }
 0x6af   :  { %v11335_v31 = vpop.f32.mrb[232].mxu1 }
 0x6b0   :  { %13038 = vst [vmem:[#allocation85_spill] sm:$0xff] %v11335_v31  ;;  %6519 = vmatmul.mubr.msk.f32.gmra.mrb[82].mxu1 %vm2676_vm2, %v2263_v23  ;;  %v3881_v44 = vpop.f32.mrb[233].mxu1  ;;  %v2278_v23 = vld [vmem:[%s12952_s3 + $0x6d0] sm:$0xff] }
 0x6b1   :  { %6521 = vmatprep.mubr.msk.f32.mxu1 %vm2676_vm2, %v2266_v28  ;;  %v2275_v44 = vld [vmem:[%s12952_s3 + $0x6b8] sm:$0xff] }
 0x6b3   :  { %v11345_v49 = vpop.f32.mrb[234].mxu1 }
 0x6b4   :  { %13039 = vst [vmem:[#allocation86_spill] sm:$0xff] %v11345_v49  ;;  %6522 = vmatmul.mubr.msk.f32.gmra.mrb[84].mxu1 %vm2676_vm2, %v2269_v16  ;;  %v3886_v10 = vpop.f32.mrb[235].mxu1  ;;  %v2284_v16 = vld [vmem:[%s12952_s3 + $0x700] sm:$0xff] }
 0x6b5   :  { %6524 = vmatprep.mubr.msk.f32.mxu1 %vm2676_vm2, %v2272_v51  ;;  %v2281_v10 = vld [vmem:[%s12952_s3 + $0x6e8] sm:$0xff] }
 0x6b7   :  { %v11355_v28 = vpop.f32.mrb[236].mxu1 }
 0x6b8   :  { %13040 = vst [vmem:[#allocation87_spill] sm:$0xff] %v11355_v28  ;;  %6525 = vmatmul.mubr.msk.f32.gmra.mrb[86].mxu1 %vm2676_vm2, %v2275_v44  ;;  %v3891_v31 = vpop.f32.mrb[237].mxu1  ;;  %v2290_v44 = vld [vmem:[%s12952_s3 + $0x730] sm:$0xff] }
 0x6b9   :  { %6527 = vmatprep.mubr.msk.f32.mxu1 %vm2676_vm2, %v2278_v23  ;;  %v2287_v31 = vld [vmem:[%s12952_s3 + $0x718] sm:$0xff] }
 0x6bb   :  { %v11365_v51 = vpop.f32.mrb[238].mxu1 }
 0x6bc   :  { %13041 = vst [vmem:[#allocation88_spill] sm:$0xff] %v11365_v51  ;;  %6528 = vmatmul.mubr.msk.f32.gmra.mrb[88].mxu1 %vm2676_vm2, %v2281_v10  ;;  %v3896_v49 = vpop.f32.mrb[239].mxu1  ;;  %v2296_v10 = vld [vmem:[%s12952_s3 + $0x760] sm:$0xff] }
 0x6bd   :  { %6530 = vmatprep.mubr.msk.f32.mxu1 %vm2676_vm2, %v2284_v16  ;;  %v2293_v49 = vld [vmem:[%s12952_s3 + $0x748] sm:$0xff] }
 0x6bf   :  { %v11375_v23 = vpop.f32.mrb[240].mxu1 }
 0x6c0   :  { %13042 = vst [vmem:[#allocation89_spill] sm:$0xff] %v11375_v23  ;;  %6531 = vmatmul.mubr.msk.f32.gmra.mrb[90].mxu1 %vm2676_vm2, %v2287_v31  ;;  %v3901_v28 = vpop.f32.mrb[241].mxu1  ;;  %v2302_v31 = vld [vmem:[%s12952_s3 + $0x790] sm:$0xff] }
 0x6c1   :  { %6533 = vmatprep.mubr.msk.f32.mxu1 %vm2676_vm2, %v2290_v44  ;;  %v2299_v28 = vld [vmem:[%s12952_s3 + $0x778] sm:$0xff] }
 0x6c3   :  { %v11385_v16 = vpop.f32.mrb[242].mxu1 }
 0x6c4   :  { %13043 = vst [vmem:[#allocation90_spill] sm:$0xff] %v11385_v16  ;;  %6534 = vmatmul.mubr.msk.f32.gmra.mrb[92].mxu1 %vm2676_vm2, %v2293_v49  ;;  %v3906_v51 = vpop.f32.mrb[243].mxu1  ;;  %v2308_v49 = vld [vmem:[%s12952_s3 + $0x7c0] sm:$0xff] }
 0x6c5   :  { %6536 = vmatprep.mubr.msk.f32.mxu1 %vm2676_vm2, %v2296_v10  ;;  %v2305_v51 = vld [vmem:[%s12952_s3 + $0x7a8] sm:$0xff] }
 0x6c7   :  { %v11395_v44 = vpop.f32.mrb[244].mxu1 }
 0x6c8   :  { %13044 = vst [vmem:[#allocation91_spill] sm:$0xff] %v11395_v44  ;;  %6537 = vmatmul.mubr.msk.f32.gmra.mrb[94].mxu1 %vm2676_vm2, %v2299_v28  ;;  %v3911_v23 = vpop.f32.mrb[245].mxu1  ;;  %v2314_v28 = vld [vmem:[%s12952_s3 + $0x7f0] sm:$0xff] }
 0x6c9   :  { %6539 = vmatprep.mubr.msk.f32.mxu1 %vm2676_vm2, %v2302_v31  ;;  %v2311_v23 = vld [vmem:[%s12952_s3 + $0x7d8] sm:$0xff] }
 0x6cb   :  { %v11405_v10 = vpop.f32.mrb[246].mxu1 }
 0x6cc   :  { %13045 = vst [vmem:[#allocation92_spill] sm:$0xff] %v11405_v10  ;;  %6540 = vmatmul.mubr.msk.f32.gmra.mrb[96].mxu1 %vm2676_vm2, %v2305_v51  ;;  %v3916_v16 = vpop.f32.mrb[247].mxu1  ;;  %v2320_v51 = vld [vmem:[%s12952_s3 + $0x820] sm:$0xff] }
 0x6cd   :  { %6542 = vmatprep.mubr.msk.f32.mxu1 %vm2676_vm2, %v2308_v49  ;;  %v2317_v16 = vld [vmem:[%s12952_s3 + $0x808] sm:$0xff] }
 0x6cf   :  { %v11415_v31 = vpop.f32.mrb[248].mxu1 }
 0x6d0   :  { %13046 = vst [vmem:[#allocation93_spill] sm:$0xff] %v11415_v31  ;;  %6543 = vmatmul.mubr.msk.f32.gmra.mrb[98].mxu1 %vm2676_vm2, %v2311_v23  ;;  %v3921_v44 = vpop.f32.mrb[249].mxu1  ;;  %v2326_v23 = vld [vmem:[%s12952_s3 + $0x850] sm:$0xff] }
 0x6d1   :  { %6545 = vmatprep.mubr.msk.f32.mxu1 %vm2676_vm2, %v2314_v28  ;;  %v2323_v44 = vld [vmem:[%s12952_s3 + $0x838] sm:$0xff] }
 0x6d3   :  { %v11425_v49 = vpop.f32.mrb[250].mxu1 }
 0x6d4   :  { %13047 = vst [vmem:[#allocation94_spill] sm:$0xff] %v11425_v49  ;;  %6546 = vmatmul.mubr.msk.f32.gmra.mrb[100].mxu1 %vm2676_vm2, %v2317_v16  ;;  %v3926_v10 = vpop.f32.mrb[251].mxu1  ;;  %v2332_v16 = vld [vmem:[%s12952_s3 + $0x880] sm:$0xff] }
 0x6d5   :  { %6548 = vmatprep.mubr.msk.f32.mxu1 %vm2676_vm2, %v2320_v51  ;;  %v2329_v10 = vld [vmem:[%s12952_s3 + $0x868] sm:$0xff] }
 0x6d7   :  { %v11435_v28 = vpop.f32.mrb[252].mxu1 }
 0x6d8   :  { %13048 = vst [vmem:[#allocation95_spill] sm:$0xff] %v11435_v28  ;;  %6549 = vmatmul.mubr.msk.f32.gmra.mrb[102].mxu1 %vm2676_vm2, %v2323_v44  ;;  %v3931_v31 = vpop.f32.mrb[253].mxu1  ;;  %v2338_v44 = vld [vmem:[%s12952_s3 + $0x8b0] sm:$0xff] }
 0x6d9   :  { %6551 = vmatprep.mubr.msk.f32.mxu1 %vm2676_vm2, %v2326_v23  ;;  %v2335_v31 = vld [vmem:[%s12952_s3 + $0x898] sm:$0xff] }
 0x6db   :  { %v11445_v51 = vpop.f32.mrb[254].mxu1 }
 0x6dc   :  { %13049 = vst [vmem:[#allocation96_spill] sm:$0xff] %v11445_v51  ;;  %6552 = vmatmul.mubr.msk.f32.gmra.mrb[104].mxu1 %vm2676_vm2, %v2329_v10  ;;  %v3936_v49 = vpop.f32.mrb[255].mxu1  ;;  %v2344_v10 = vld [vmem:[%s12952_s3 + $0x8e0] sm:$0xff] }
 0x6dd   :  { %6554 = vmatprep.mubr.msk.f32.mxu1 %vm2676_vm2, %v2332_v16  ;;  %v2341_v49 = vld [vmem:[%s12952_s3 + $0x8c8] sm:$0xff] }
 0x6df   :  { %v11455_v23 = vpop.f32.mrb[0].mxu1 }
 0x6e0   :  { %13050 = vst [vmem:[#allocation97_spill] sm:$0xff] %v11455_v23  ;;  %6555 = vmatmul.mubr.msk.f32.gmra.mrb[106].mxu1 %vm2676_vm2, %v2335_v31  ;;  %v3941_v28 = vpop.f32.mrb[1].mxu1  ;;  %v2350_v31 = vld [vmem:[%s12952_s3 + $0x910] sm:$0xff] }
 0x6e1   :  { %6557 = vmatprep.mubr.msk.f32.mxu1 %vm2676_vm2, %v2338_v44  ;;  %v2347_v28 = vld [vmem:[%s12952_s3 + $0x8f8] sm:$0xff] }
 0x6e3   :  { %v11465_v16 = vpop.f32.mrb[2].mxu1 }
 0x6e4   :  { %13051 = vst [vmem:[#allocation98_spill] sm:$0xff] %v11465_v16  ;;  %6558 = vmatmul.mubr.msk.f32.gmra.mrb[108].mxu1 %vm2676_vm2, %v2341_v49  ;;  %v3946_v51 = vpop.f32.mrb[3].mxu1  ;;  %v2356_v49 = vld [vmem:[%s12952_s3 + $0x940] sm:$0xff] }
 0x6e5   :  { %6560 = vmatprep.mubr.msk.f32.mxu1 %vm2676_vm2, %v2344_v10  ;;  %v2353_v51 = vld [vmem:[%s12952_s3 + $0x928] sm:$0xff] }
 0x6e7   :  { %v11475_v44 = vpop.f32.mrb[4].mxu1 }
 0x6e8   :  { %13052 = vst [vmem:[#allocation99_spill] sm:$0xff] %v11475_v44  ;;  %6561 = vmatmul.mubr.msk.f32.gmra.mrb[110].mxu1 %vm2676_vm2, %v2347_v28  ;;  %v3951_v23 = vpop.f32.mrb[5].mxu1  ;;  %v2362_v28 = vld [vmem:[%s12952_s3 + $0x970] sm:$0xff] }
 0x6e9   :  { %6563 = vmatprep.mubr.msk.f32.mxu1 %vm2676_vm2, %v2350_v31  ;;  %v2359_v23 = vld [vmem:[%s12952_s3 + $0x958] sm:$0xff] }
 0x6eb   :  { %v11485_v10 = vpop.f32.mrb[6].mxu1 }
 0x6ec   :  { %13053 = vst [vmem:[#allocation100_spill] sm:$0xff] %v11485_v10  ;;  %6564 = vmatmul.mubr.msk.f32.gmra.mrb[112].mxu1 %vm2676_vm2, %v2353_v51  ;;  %v3956_v16 = vpop.f32.mrb[7].mxu1  ;;  %v2368_v51 = vld [vmem:[%s12952_s3 + $0x9a0] sm:$0xff] }
 0x6ed   :  { %6566 = vmatprep.mubr.msk.f32.mxu1 %vm2676_vm2, %v2356_v49  ;;  %v2365_v16 = vld [vmem:[%s12952_s3 + $0x988] sm:$0xff] }
 0x6ef   :  { %v11495_v31 = vpop.f32.mrb[8].mxu1 }
 0x6f0   :  { %13054 = vst [vmem:[#allocation101_spill] sm:$0xff] %v11495_v31  ;;  %6567 = vmatmul.mubr.msk.f32.gmra.mrb[114].mxu1 %vm2676_vm2, %v2359_v23  ;;  %v3961_v44 = vpop.f32.mrb[9].mxu1  ;;  %v2374_v23 = vld [vmem:[%s12952_s3 + $0x9d0] sm:$0xff] }
 0x6f1   :  { %6569 = vmatprep.mubr.msk.f32.mxu1 %vm2676_vm2, %v2362_v28  ;;  %v2371_v44 = vld [vmem:[%s12952_s3 + $0x9b8] sm:$0xff] }
 0x6f3   :  { %v11505_v49 = vpop.f32.mrb[10].mxu1 }
 0x6f4   :  { %13055 = vst [vmem:[#allocation102_spill] sm:$0xff] %v11505_v49  ;;  %6570 = vmatmul.mubr.msk.f32.gmra.mrb[116].mxu1 %vm2676_vm2, %v2365_v16  ;;  %v3966_v10 = vpop.f32.mrb[11].mxu1  ;;  %v2523_v16 = vld [vmem:[%s12953_s4 + $0x8] sm:$0xff]  ;;  %v2383_v49 = vld [vmem:[%s12952_s3 + $0xa18] sm:$0xff] }
 0x6f5   :  { %6572 = vmatprep.mubr.msk.f32.mxu1 %vm2676_vm2, %v2368_v51  ;;  %v2377_v10 = vld [vmem:[%s12952_s3 + $0x9e8] sm:$0xff]  ;;  %v2380_v51 = vld [vmem:[%s12952_s3 + $0xa00] sm:$0xff] }
 0x6f7   :  { %v11515_v28 = vpop.f32.mrb[12].mxu1 }
 0x6f8   :  { %13056 = vst [vmem:[#allocation103_spill] sm:$0xff] %v11515_v28  ;;  %6573 = vmatmul.mubr.msk.f32.gmra.mrb[118].mxu1 %vm2676_vm2, %v2371_v44  ;;  %v3971_v31 = vpop.f32.mrb[13].mxu1  ;;  %v2522_v28 = vld [vmem:[%s12953_s4] sm:$0xff] }
 0x6f9   :  { %6575 = vmatprep.mubr.msk.f32.mxu1 %vm2676_vm2, %v2374_v23  ;;  %v3215_v23 = vadd.f32 %v11178_v22, %v2523_v16  ;;  %v3210_v54 = vadd.f32 %v11171_v11, %v2522_v28  ;;  %v2524_v22 = vld [vmem:[%s12953_s4 + $0x10] sm:$0xff]  ;;  %v2389_v11 = vld [vmem:[%s12952_s3 + $0xa48] sm:$0xff] }
 0x6fa   :  { %v3220_v28 = vadd.f32 %v11185_v15, %v2524_v22  ;;  %v2395_v22 = vld [vmem:[%s12952_s3 + $0xa78] sm:$0xff] }
 0x6fb   :  { %v11531_v44 = vpop.f32.mrb[14].mxu1 }
 0x6fc   :  { %13057 = vst [vmem:[#allocation104_spill] sm:$0xff] %v11531_v44  ;;  %6576 = vmatmul.mubr.msk.f32.gmra.mrb[120].mxu1 %vm2676_vm2, %v2377_v10  ;;  %v3976_v31 = vpop.f32.mrb[15].mxu1  ;;  %v2386_v44 = vld [vmem:[%s12952_s3 + $0xa30] sm:$0xff] }
 0x6fd   :  { %6578 = vmatprep.mubr.msk.f32.mxu1 %vm2676_vm2, %v2380_v51  ;;  %v3225_v31 = vadd.f32 %v11192_v32, %v2525_v63  ;;  %v2526_v63 = vld [vmem:[%s12953_s4 + $0x20] sm:$0xff] }
 0x6ff   :  { %v6421_v10 = vpop.f32.mrb[16].mxu1 }
 0x700   :  { %6579 = vmatmul.mubr.msk.f32.gmra.mrb[122].mxu1 %vm2676_vm2, %v2383_v49  ;;  %v4050_v16 = vadd.f32 %v6421_v10, %v3215_v23  ;;  %v4044_v51 = vpop.f32.mrb[17].mxu1  ;;  %v2392_v49 = vld [vmem:[%s12952_s3 + $0xa60] sm:$0xff]  ;;  %v3235_v23 = vadd.f32 %v11206_v2, %v2527_v0  ;;  %v3230_v10 = vadd.f32 %v11199_v26, %v2526_v63  ;;  %v2528_v0 = vld [vmem:[%s12953_s4 + $0x30] sm:$0xff] }
 0x701   :  { %6581 = vmatprep.mubr.msk.f32.mxu1 %vm2676_vm2, %v2386_v44  ;;  %v4045_v42 = vadd.f32 %v4044_v51, %v3210_v54  ;;  %v2398_v51 = vld [vmem:[%s12952_s3 + $0xa90] sm:$0xff]  ;;  %v3240_v63 = vadd.f32 %v11213_v39, %v2528_v0  ;;  %v2533_v0 = vld [vmem:[%s12953_s4 + $0x58] sm:$0xff] }
 0x702   :  { %v6091_v27 = vmul.f32 -1.442695, %v4050_v16 }
 0x703   :  { %v6090_v32 = vmul.f32 -1.442695, %v4045_v42  ;;  %v6424_v44 = vpop.f32.mrb[18].mxu1 }
 0x704   :  { %7325 = vpow2.f32 %v6091_v27  ;;  %6582 = vmatmul.mubr.msk.f32.gmra.mrb[124].mxu1 %vm2676_vm2, %v2389_v11  ;;  %v4060_v15 = vadd.f32 %v6424_v44, %v3225_v31  ;;  %v4054_v54 = vpop.f32.mrb[19].mxu1  ;;  %v2529_v27 = vld [vmem:[%s12953_s4 + $0x38] sm:$0xff]  ;;  %v2531_v44 = vld [vmem:[%s12953_s4 + $0x48] sm:$0xff] }
 0x705   :  { %7327 = vpow2.f32 %v6090_v32  ;;  %6584 = vmatprep.mubr.msk.f32.mxu1 %vm2676_vm2, %v2392_v49  ;;  %v4055_v16 = vadd.f32 %v4054_v54, %v3220_v28  ;;  %v3245_v28 = vadd.f32 %v11220_v53, %v2529_v27  ;;  %v2401_v49 = vld [vmem:[%s12952_s3 + $0xaa8] sm:$0xff]  ;;  %v2404_v54 = vld [vmem:[%s12952_s3 + $0xac0] sm:$0xff]  ;;  %v2407_v27 = vld [vmem:[%s12952_s3 + $0xad8] sm:$0xff] }
 0x706   :  { %v6093_v42 = vmul.f32 -1.442695, %v4060_v15  ;;  %v2530_v53 = vld [vmem:[%s12953_s4 + $0x40] sm:$0xff] }
 0x707   :  { %v6092_v2 = vmul.f32 -1.442695, %v4055_v16  ;;  %v6427_v31 = vpop.f32.mrb[20].mxu1  ;;  %v3255_v16 = vadd.f32 %v11239_v59, %v2531_v44  ;;  %v2410_v59 = vld [vmem:[%s12952_s3 + $0xaf0] sm:$0xff] }
 0x708   :  { %7329 = vpow2.f32 %v6093_v42  ;;  %6585 = vmatmul.mubr.msk.f32.gmra.mrb[126].mxu1 %vm2676_vm2, %v2395_v22  ;;  %v4070_v26 = vadd.f32 %v6427_v31, %v3235_v23  ;;  %v4064_v11 = vpop.f32.mrb[21].mxu1  ;;  %v3250_v42 = vadd.f32 %v11227_v58, %v2530_v53 }
 0x709   :  { %7331 = vpow2.f32 %v6092_v2  ;;  %6587 = vmatprep.mubr.msk.f32.mxu1 %vm2676_vm2, %v2398_v51  ;;  %v4065_v32 = vadd.f32 %v4064_v11, %v3230_v10 }
 0x70a   :  { %v6095_v15 = vmul.f32 -1.442695, %v4070_v26  ;;  %v2532_v26 = vld [vmem:[%s12953_s4 + $0x50] sm:$0xff] }
 0x70b   :  { %v6094_v23 = vmul.f32 -1.442695, %v4065_v32  ;;  %v6430_v22 = vpop.f32.mrb[22].mxu1  ;;  %v3260_v53 = vadd.f32 %v11246_v7, %v2532_v26  ;;  %v2419_v26 = vld [vmem:[%s12952_s3 + $0xb38] sm:$0xff] }
 0x70c   :  { %7333 = vpow2.f32 %v6095_v15  ;;  %6588 = vmatmul.mubr.msk.f32.gmra.mrb[128].mxu1 %vm2676_vm2, %v2401_v49  ;;  %v4080_v39 = vadd.f32 %v6430_v22, %v3245_v28  ;;  %v4074_v10 = vpop.f32.mrb[23].mxu1  ;;  %v3265_v15 = vadd.f32 %v11253_v43, %v2533_v0  ;;  %v2535_v22 = vld [vmem:[%s12953_s4 + $0x68] sm:$0xff]  ;;  %v2416_v43 = vld [vmem:[%s12952_s3 + $0xb20] sm:$0xff] }
 0x70d   :  { %7335 = vpow2.f32 %v6094_v23  ;;  %6590 = vmatprep.mubr.msk.f32.mxu1 %vm2676_vm2, %v2404_v54  ;;  %v4075_v51 = vadd.f32 %v4074_v10, %v3240_v63  ;;  %v2413_v54 = vld [vmem:[%s12952_s3 + $0xb08] sm:$0xff] }
 0x70e   :  { %v7326_v2 = vpop.eup %7325  ;;  %v6097_v31 = vmul.f32 -1.442695, %v4080_v39 }
 0x70f   :  { %v7328_v11 = vpop.eup %7327  ;;  %v5276_v28 = vadd.f32 1.0, %v7326_v2  ;;  %v6096_v49 = vmul.f32 -1.442695, %v4075_v51  ;;  %v6433_v32 = vpop.f32.mrb[24].mxu1 }
 0x710   :  { %v5275_v58 = vadd.f32 1.0, %v7328_v11  ;;  %7337 = vpow2.f32 %v6097_v31  ;;  %6591 = vmatmul.mubr.msk.f32.gmra.mrb[130].mxu1 %vm2676_vm2, %v2407_v27  ;;  %v4090_v63 = vadd.f32 %v6433_v32, %v3255_v16  ;;  %v4084_v44 = vpop.f32.mrb[25].mxu1  ;;  %v2534_v16 = vld [vmem:[%s12953_s4 + $0x60] sm:$0xff] }
 0x711   :  { %7339 = vrcp.f32 %v5276_v28  ;;  %6593 = vmatprep.mubr.msk.f32.mxu1 %vm2676_vm2, %v2410_v59  ;;  %v4085_v23 = vadd.f32 %v4084_v44, %v3250_v42  ;;  %v3275_v59 = vadd.f32 %v11267_v4, %v2535_v22  ;;  %v3270_v11 = vadd.f32 %v11260_v57, %v2534_v16  ;;  %v2422_v4 = vld [vmem:[%s12952_s3 + $0xb50] sm:$0xff] }
 0x712   :  { %v7330_v39 = vpop.eup %7329  ;;  %7341 = vrcp.f32 %v5275_v58  ;;  %v6099_v10 = vmul.f32 -1.442695, %v4090_v63  ;;  %v2536_v63 = vld [vmem:[%s12953_s4 + $0x70] sm:$0xff] }
 0x713   :  { %v7332_v27 = vpop.eup %7331  ;;  %v5278_v51 = vadd.f32 1.0, %v7330_v39  ;;  %7343 = vpow2.f32 %v6096_v49  ;;  %v6098_v7 = vmul.f32 -1.442695, %v4085_v23  ;;  %v6436_v42 = vpop.f32.mrb[26].mxu1  ;;  %v2537_v49 = vld [vmem:[%s12953_s4 + $0x78] sm:$0xff] }
 0x714   :  { %v5277_v0 = vadd.f32 1.0, %v7332_v27  ;;  %7345 = vpow2.f32 %v6099_v10  ;;  %6594 = vmatmul.mubr.msk.f32.gmra.mrb[132].mxu1 %vm2676_vm2, %v2413_v54  ;;  %v4100_v2 = vadd.f32 %v6436_v42, %v3265_v15  ;;  %v4094_v31 = vpop.f32.mrb[27].mxu1  ;;  %v3285_v39 = vadd.f32 %v11281_v38, %v2537_v49  ;;  %v2425_v10 = vld [vmem:[%s12952_s3 + $0xb68] sm:$0xff]  ;;  %v2428_v38 = vld [vmem:[%s12952_s3 + $0xb80] sm:$0xff] }
 0x715   :  { %7347 = vrcp.f32 %v5278_v51  ;;  %6596 = vmatprep.mubr.msk.f32.mxu1 %vm2676_vm2, %v2416_v43  ;;  %v4095_v28 = vadd.f32 %v4094_v31, %v3260_v53  ;;  %v3280_v43 = vadd.f32 %v11274_v47, %v2536_v63  ;;  %v2539_v27 = vld [vmem:[%s12953_s4 + $0x88] sm:$0xff]  ;;  %v2538_v42 = vld [vmem:[%s12953_s4 + $0x80] sm:$0xff] }
 0x716   :  { %v7334_v32 = vpop.eup %7333  ;;  %7349 = vrcp.f32 %v5277_v0  ;;  %v6101_v58 = vmul.f32 -1.442695, %v4100_v2 }
 0x717   :  { %v7336_v44 = vpop.eup %7335  ;;  %v5280_v15 = vadd.f32 1.0, %v7334_v32  ;;  %7351 = vpow2.f32 %v6098_v7  ;;  %v6100_v57 = vmul.f32 -1.442695, %v4095_v28  ;;  %v6439_v54 = vpop.f32.mrb[28].mxu1  ;;  %v3295_v28 = vadd.f32 %v11295_v18, %v2539_v27 }
 0x718   :  { %v5279_v53 = vadd.f32 1.0, %v7336_v44  ;;  %7353 = vpow2.f32 %v6101_v58  ;;  %6597 = vmatmul.mubr.msk.f32.gmra.mrb[134].mxu1 %vm2676_vm2, %v2419_v26  ;;  %v4110_v23 = vadd.f32 %v6439_v54, %v3275_v59  ;;  %v4104_v22 = vpop.f32.mrb[29].mxu1  ;;  %v2431_v58 = vld [vmem:[%s12952_s3 + $0xb98] sm:$0xff] }
 0x719   :  { %7355 = vrcp.f32 %v5280_v15  ;;  %6599 = vmatprep.mubr.msk.f32.mxu1 %vm2676_vm2, %v2422_v4  ;;  %v4105_v16 = vadd.f32 %v4104_v22, %v3270_v11  ;;  %v3290_v4 = vadd.f32 %v11288_v36, %v2538_v42  ;;  %v2434_v15 = vld [vmem:[%s12952_s3 + $0xbb0] sm:$0xff]  ;;  %v2541_v22 = vld [vmem:[%s12953_s4 + $0x98] sm:$0xff] }
 0x71a   :  { %v7338_v51 = vpop.eup %7337  ;;  %7357 = vrcp.f32 %v5279_v53  ;;  %v6103_v7 = vmul.f32 -1.442695, %v4110_v23  ;;  %v2540_v36 = vld [vmem:[%s12953_s4 + $0x90] sm:$0xff]  ;;  %v3305_v42 = vadd.f32 %v10204_v1, %v2541_v22 }
 0x71b   :  { %v7340_v0 = vpop.eup %7339  ;;  %v5282_v2 = vadd.f32 1.0, %v7338_v51  ;;  %7359 = vpow2.f32 %v6100_v57  ;;  %v6102_v47 = vmul.f32 -1.442695, %v4105_v16  ;;  %v6442_v31 = vpop.f32.mrb[30].mxu1  ;;  %v2437_v51 = vld [vmem:[%s12952_s3 + $0xbc8] sm:$0xff] }
 0x71c   :  { %v7342_v59 = vpop.eup %7341  ;;  %5739 = vst.msk [vmem:[%s12954_s5 + $0x8] sm:$0xff] %vm5737_vm3, %v7340_v0  ;;  %7361 = vpow2.f32 %v6103_v7  ;;  %6600 = vmatmul.mubr.msk.f32.gmra.mrb[136].mxu1 %vm2676_vm2, %v2425_v10  ;;  %v4120_v26 = vadd.f32 %v6442_v31, %v3285_v39  ;;  %v4114_v11 = vpop.f32.mrb[31].mxu1  ;;  %v3300_v0 = vadd.f32 %v10196_v60, %v2540_v36 }
 0x71d   :  { %v7344_v49 = vpop.eup %7343  ;;  %5738 = vst.msk [vmem:[%s12954_s5] sm:$0xff] %vm5737_vm3, %v7342_v59  ;;  %7363 = vrcp.f32 %v5282_v2  ;;  %6602 = vmatprep.mubr.msk.f32.mxu1 %vm2676_vm2, %v2428_v38  ;;  %v4115_v32 = vadd.f32 %v4114_v11, %v3280_v43  ;;  %v2543_v2 = vld [vmem:[%s12953_s4 + $0xa8] sm:$0xff] }
 0x71e   :  { %v7346_v63 = vpop.eup %7345  ;;  %v5281_v44 = vadd.f32 1.0, %v7344_v49  ;;  %7365 = vpow2.f32 %v6102_v47  ;;  %v6105_v18 = vmul.f32 -1.442695, %v4120_v26  ;;  %v2440_v47 = vld [vmem:[%s12952_s3 + $0xbe0] sm:$0xff] }
 0x71f   :  { %v7348_v57 = vpop.eup %7347  ;;  %v5284_v54 = vadd.f32 1.0, %v7346_v63  ;;  %v6104_v53 = vmul.f32 -1.442695, %v4115_v32  ;;  %v6445_v23 = vpop.f32.mrb[32].mxu1  ;;  %v2542_v32 = vld [vmem:[%s12953_s4 + $0xa0] sm:$0xff]  ;;  %v2443_v63 = vld [vmem:[%s12952_s3 + $0xbf8] sm:$0xff] }
 0x720   :  { %v7350_v39 = vpop.eup %7349  ;;  %5741 = vst.msk [vmem:[%s12954_s5 + $0x18] sm:$0xff] %vm5737_vm3, %v7348_v57  ;;  %7367 = vrcp.f32 %v5281_v44  ;;  %6603 = vmatmul.mubr.msk.f32.gmra.mrb[138].mxu1 %vm2676_vm2, %v2431_v58  ;;  %v4124_v10 = vpop.f32.mrb[33].mxu1  ;;  %v4130_v43 = vadd.f32 %v6445_v23, %v3295_v28  ;;  %v3315_v57 = vadd.f32 %v10220_v9, %v2543_v2  ;;  %v3310_v36 = vadd.f32 %v10212_v5, %v2542_v32  ;;  %v2544_v5 = vld [vmem:[%s12953_s4 + $0xb0] sm:$0xff]  ;;  %v2452_v2 = vld [vmem:[%s12952_s3 + $0xc40] sm:$0xff] }
 0x721   :  { %v7352_v16 = vpop.eup %7351  ;;  %5740 = vst.msk [vmem:[%s12954_s5 + $0x10] sm:$0xff] %vm5737_vm3, %v7350_v39  ;;  %7369 = vrcp.f32 %v5284_v54  ;;  %v4125_v27 = vadd.f32 %v4124_v10, %v3290_v4  ;;  %6605 = vmatprep.mubr.msk.f32.mxu1 %vm2676_vm2, %v2434_v15  ;;  %v2446_v54 = vld [vmem:[%s12952_s3 + $0xc10] sm:$0xff]  ;;  %v2545_v39 = vld [vmem:[%s12953_s4 + $0xb8] sm:$0xff] }
 0x722   :  { %v7354_v7 = vpop.eup %7353  ;;  %v5283_v38 = vadd.f32 1.0, %v7352_v16  ;;  %7371 = vpow2.f32 %v6105_v18  ;;  %v6107_v11 = vmul.f32 -1.442695, %v4130_v43 }
 0x723   :  { %v7356_v31 = vpop.eup %7355  ;;  %v5286_v59 = vadd.f32 1.0, %v7354_v7  ;;  %7373 = vpow2.f32 %v6104_v53  ;;  %v6106_v26 = vmul.f32 -1.442695, %v4125_v27  ;;  %v6448_v28 = vpop.f32.mrb[34].mxu1  ;;  %v2449_v7 = vld [vmem:[%s12952_s3 + $0xc28] sm:$0xff] }
 0x724   :  { %v7358_v49 = vpop.eup %7357  ;;  %5743 = vst.msk [vmem:[%s12954_s5 + $0x28] sm:$0xff] %vm5737_vm3, %v7356_v31  ;;  %7375 = vrcp.f32 %v5283_v38  ;;  %v4140_v60 = vadd.f32 %v6448_v28, %v3305_v42  ;;  %v4134_v1 = vpop.f32.mrb[35].mxu1  ;;  %6606 = vmatmul.mubr.msk.f32.gmra.mrb[140].mxu1 %vm2676_vm2, %v2437_v51 }
 0x725   :  { %v7360_v58 = vpop.eup %7359  ;;  %5742 = vst.msk [vmem:[%s12954_s5 + $0x20] sm:$0xff] %vm5737_vm3, %v7358_v49  ;;  %7377 = vrcp.f32 %v5286_v59  ;;  %v4135_v4 = vadd.f32 %v4134_v1, %v3300_v0  ;;  %6608 = vmatprep.mubr.msk.f32.mxu1 %vm2676_vm2, %v2440_v47  ;;  %v3325_v0 = vadd.f32 %v10236_v17, %v2545_v39 }
 0x726   :  { %v7362_v44 = vpop.eup %7361  ;;  %v5285_v18 = vadd.f32 1.0, %v7360_v58  ;;  %7379 = vpow2.f32 %v6106_v26  ;;  %v6109_v15 = vmul.f32 -1.442695, %v4140_v60  ;;  %v3320_v26 = vadd.f32 %v10228_v13, %v2544_v5  ;;  %v2546_v60 = vld [vmem:[%s12953_s4 + $0xc0] sm:$0xff]  ;;  %v2455_v58 = vld [vmem:[%s12952_s3 + $0xc58] sm:$0xff] }
 0x727   :  { %v7364_v53 = vpop.eup %7363  ;;  %v5288_v23 = vadd.f32 1.0, %v7362_v44  ;;  %7381 = vpow2.f32 %v6107_v11  ;;  %v6451_v22 = vpop.f32.mrb[36].mxu1  ;;  %v6108_v9 = vmul.f32 -1.442695, %v4135_v4  ;;  %v2547_v11 = vld [vmem:[%s12953_s4 + $0xc8] sm:$0xff] }
 0x728   :  { %v7366_v10 = vpop.eup %7365  ;;  %5745 = vst.msk [vmem:[%s12954_s5 + $0x38] sm:$0xff] %vm5737_vm3, %v7364_v53  ;;  %7383 = vrcp.f32 %v5285_v18  ;;  %v4150_v43 = vadd.f32 %v6451_v22, %v3315_v57  ;;  %v4144_v16 = vpop.f32.mrb[37].mxu1  ;;  %6609 = vmatmul.mubr.msk.f32.gmra.mrb[142].mxu1 %vm2676_vm2, %v2443_v63  ;;  %v3335_v18 = vadd.f32 %v10252_v25, %v2547_v11  ;;  %v2549_v22 = vld [vmem:[%s12953_s4 + $0xd8] sm:$0xff]  ;;  %v2550_v11 = vld [vmem:[%s12953_s4 + $0xe0] sm:$0xff] }
 0x729   :  { %7385 = vrcp.f32 %v5288_v23  ;;  %v5287_v27 = vadd.f32 1.0, %v7366_v10  ;;  %v4145_v51 = vadd.f32 %v4144_v16, %v3310_v36  ;;  %6611 = vmatprep.mubr.msk.f32.mxu1 %vm2676_vm2, %v2446_v54  ;;  %v3330_v23 = vadd.f32 %v10244_v21, %v2546_v60  ;;  %v2548_v10 = vld [vmem:[%s12953_s4 + $0xd0] sm:$0xff]  ;;  %v2461_v16 = vld [vmem:[%s12952_s3 + $0xc88] sm:$0xff] }
 0x72a   :  { %v7368_v38 = vpop.eup %7367  ;;  %7387 = vpow2.f32 %v6109_v15  ;;  %v6111_v42 = vmul.f32 -1.442695, %v4150_v43  ;;  %v2458_v15 = vld [vmem:[%s12952_s3 + $0xc70] sm:$0xff] }
 0x72b   :  { %v7370_v47 = vpop.eup %7369  ;;  %5744 = vst.msk [vmem:[%s12954_s5 + $0x30] sm:$0xff] %vm5737_vm3, %v7368_v38  ;;  %7389 = vrcp.f32 %v5287_v27  ;;  %v6110_v31 = vmul.f32 -1.442695, %v4145_v51  ;;  %v6454_v59 = vpop.f32.mrb[38].mxu1  ;;  %v2464_v38 = vld [vmem:[%s12952_s3 + $0xca0] sm:$0xff] }
 0x72c   :  { %v7372_v17 = vpop.eup %7371  ;;  %5747 = vst.msk [vmem:[%s12954_s5 + $0x48] sm:$0xff] %vm5737_vm3, %v7370_v47  ;;  %7391 = vpow2.f32 %v6108_v9  ;;  %v4160_v28 = vadd.f32 %v6454_v59, %v3325_v0  ;;  %v4154_v49 = vpop.f32.mrb[39].mxu1  ;;  %6612 = vmatmul.mubr.msk.f32.gmra.mrb[144].mxu1 %vm2676_vm2, %v2449_v7  ;;  %v3345_v7 = vadd.f32 %v10268_v33, %v2549_v22  ;;  %v3340_v47 = vadd.f32 %v10260_v29, %v2548_v10 }
 0x72d   :  { %v7374_v13 = vpop.eup %7373  ;;  %v5290_v1 = vadd.f32 1.0, %v7372_v17  ;;  %7393 = vpow2.f32 %v6111_v42  ;;  %v4155_v32 = vadd.f32 %v4154_v49, %v3320_v26  ;;  %6614 = vmatprep.mubr.msk.f32.mxu1 %vm2676_vm2, %v2452_v2  ;;  %v2467_v49 = vld [vmem:[%s12952_s3 + $0xcb8] sm:$0xff] }
 0x72e   :  { %v7376_v4 = vpop.eup %7375  ;;  %v5289_v63 = vadd.f32 1.0, %v7374_v13  ;;  %7395 = vpow2.f32 %v6110_v31  ;;  %v6113_v44 = vmul.f32 -1.442695, %v4160_v28  ;;  %v2551_v31 = vld [vmem:[%s12953_s4 + $0xe8] sm:$0xff] }
 0x72f   :  { %v7378_v57 = vpop.eup %7377  ;;  %5746 = vst.msk [vmem:[%s12954_s5 + $0x40] sm:$0xff] %vm5737_vm3, %v7376_v4  ;;  %7397 = vrcp.f32 %v5290_v1  ;;  %v6112_v54 = vmul.f32 -1.442695, %v4155_v32  ;;  %v6457_v53 = vpop.f32.mrb[40].mxu1  ;;  %v3355_v1 = vadd.f32 %v10284_v41, %v2551_v31  ;;  %v2470_v32 = vld [vmem:[%s12952_s3 + $0xcd0] sm:$0xff]  ;;  %v2479_v31 = vld [vmem:[%s12952_s3 + $0xd18] sm:$0xff] }
 0x730   :  { %v7380_v25 = vpop.eup %7379  ;;  %5749 = vst.msk [vmem:[%s12954_s5 + $0x58] sm:$0xff] %vm5737_vm3, %v7378_v57  ;;  %7399 = vrcp.f32 %v5289_v63  ;;  %v4170_v36 = vadd.f32 %v6457_v53, %v3335_v18  ;;  %v4164_v39 = vpop.f32.mrb[41].mxu1  ;;  %6615 = vmatmul.mubr.msk.f32.gmra.mrb[146].mxu1 %vm2676_vm2, %v2455_v58  ;;  %v2553_v18 = vld [vmem:[%s12953_s4 + $0xf8] sm:$0xff] }
 0x731   :  { %v7382_v21 = vpop.eup %7381  ;;  %v5291_v9 = vadd.f32 1.0, %v7380_v25  ;;  %7401 = vpow2.f32 %v6113_v44  ;;  %v4165_v43 = vadd.f32 %v4164_v39, %v3330_v23  ;;  %6617 = vmatprep.mubr.msk.f32.mxu1 %vm2676_vm2, %v2458_v15  ;;  %v3350_v44 = vadd.f32 %v10276_v37, %v2550_v11  ;;  %v2552_v23 = vld [vmem:[%s12953_s4 + $0xf0] sm:$0xff] }
 0x732   :  { %v7384_v5 = vpop.eup %7383  ;;  %v5292_v27 = vadd.f32 1.0, %v7382_v21  ;;  %7403 = vpow2.f32 %v6112_v54  ;;  %v6115_v51 = vmul.f32 -1.442695, %v4170_v36  ;;  %v2473_v36 = vld [vmem:[%s12952_s3 + $0xce8] sm:$0xff]  ;;  %v3365_v21 = vadd.f32 %v10300_v48, %v2553_v18  ;;  %v2482_v11 = vld [vmem:[%s12952_s3 + $0xd30] sm:$0xff] }
 0x733   :  { %v7386_v42 = vpop.eup %7385  ;;  %5748 = vst.msk [vmem:[%s12954_s5 + $0x50] sm:$0xff] %vm5737_vm3, %v7384_v5  ;;  %7405 = vrcp.f32 %v5291_v9  ;;  %v6114_v0 = vmul.f32 -1.442695, %v4165_v43  ;;  %v6460_v2 = vpop.f32.mrb[42].mxu1  ;;  %v2476_v9 = vld [vmem:[%s12952_s3 + $0xd00] sm:$0xff]  ;;  %v3360_v5 = vadd.f32 %v10292_v45, %v2552_v23 }
 0x734   :  { %v7388_v33 = vpop.eup %7387  ;;  %5751 = vst.msk [vmem:[%s12954_s5 + $0x68] sm:$0xff] %vm5737_vm3, %v7386_v42  ;;  %7407 = vrcp.f32 %v5292_v27  ;;  %v4180_v59 = vadd.f32 %v6460_v2, %v3345_v7  ;;  %v4174_v26 = vpop.f32.mrb[43].mxu1  ;;  %6618 = vmatmul.mubr.msk.f32.gmra.mrb[148].mxu1 %vm2676_vm2, %v2461_v16  ;;  %v2555_v27 = vld [vmem:[%s12953_s4 + $0x108] sm:$0xff] }
 0x735   :  { %v7390_v29 = vpop.eup %7389  ;;  %v5294_v17 = vadd.f32 1.0, %v7388_v33  ;;  %7409 = vpow2.f32 %v6115_v51  ;;  %v4175_v28 = vadd.f32 %v4174_v26, %v3340_v47  ;;  %6620 = vmatprep.mubr.msk.f32.mxu1 %vm2676_vm2, %v2464_v38  ;;  %v3375_v26 = vadd.f32 %v10316_v56, %v2555_v27  ;;  %v2494_v27 = vld [vmem:[%s12952_s3 + $0xd90] sm:$0xff] }
 0x736   :  { %v7392_v60 = vpop.eup %7391  ;;  %5750 = vst.msk [vmem:[%s12954_s5 + $0x60] sm:$0xff] %vm5737_vm3, %v7390_v29  ;;  %7411 = vpow2.f32 %v6114_v0  ;;  %v6117_v13 = vmul.f32 -1.442695, %v4180_v59  ;;  %v2554_v0 = vld [vmem:[%s12953_s4 + $0x100] sm:$0xff] }
 0x737   :  { %v7394_v58 = vpop.eup %7393  ;;  %7413 = vrcp.f32 %v5294_v17  ;;  %v5293_v4 = vadd.f32 1.0, %v7392_v60  ;;  %v6463_v63 = vpop.f32.mrb[44].mxu1  ;;  %v6116_v54 = vmul.f32 -1.442695, %v4175_v28  ;;  %v3370_v28 = vadd.f32 %v10308_v52, %v2554_v0  ;;  %v2561_v0 = vld [vmem:[%s12953_s4 + $0x138] sm:$0xff] }
 0x738   :  { %v7396_v15 = vpop.eup %7395  ;;  %v5296_v57 = vadd.f32 1.0, %v7394_v58  ;;  %7415 = vpow2.f32 %v6117_v13  ;;  %v4190_v53 = vadd.f32 %v6463_v63, %v3355_v1  ;;  %v4184_v41 = vpop.f32.mrb[45].mxu1  ;;  %6621 = vmatmul.mubr.msk.f32.gmra.mrb[150].mxu1 %vm2676_vm2, %v2467_v49  ;;  %v2557_v49 = vld [vmem:[%s12953_s4 + $0x118] sm:$0xff]  ;;  %v2556_v58 = vld [vmem:[%s12953_s4 + $0x110] sm:$0xff] }
 0x739   :  { %v7398_v22 = vpop.eup %7397  ;;  %7417 = vrcp.f32 %v5293_v4  ;;  %v5295_v25 = vadd.f32 1.0, %v7396_v15  ;;  %v4185_v37 = vadd.f32 %v4184_v41, %v3350_v44  ;;  %6623 = vmatprep.mubr.msk.f32.mxu1 %vm2676_vm2, %v2470_v32  ;;  %v2485_v44 = vld [vmem:[%s12952_s3 + $0xd48] sm:$0xff] }
 0x73a   :  { %v7400_v39 = vpop.eup %7399  ;;  %5753 = vst.msk [vmem:[%s12954_s5 + $0x78] sm:$0xff] %vm5737_vm3, %v7398_v22  ;;  %7419 = vrcp.f32 %v5296_v57  ;;  %v6119_v10 = vmul.f32 -1.442695, %v4190_v53  ;;  %v3385_v57 = vadd.f32 %v10332_v3, %v2557_v49 }
 0x73b   :  { %v7402_v43 = vpop.eup %7401  ;;  %5752 = vst.msk [vmem:[%s12954_s5 + $0x70] sm:$0xff] %vm5737_vm3, %v7400_v39  ;;  %7421 = vrcp.f32 %v5295_v25  ;;  %v6466_v16 = vpop.f32.mrb[46].mxu1  ;;  %v6118_v7 = vmul.f32 -1.442695, %v4185_v37  ;;  %v3380_v25 = vadd.f32 %v10324_v61, %v2556_v58  ;;  %v2559_v37 = vld [vmem:[%s12953_s4 + $0x128] sm:$0xff] }
 0x73c   :  { %v7404_v51 = vpop.eup %7403  ;;  %v5298_v48 = vadd.f32 1.0, %v7402_v43  ;;  %7423 = vpow2.f32 %v6116_v54  ;;  %v4200_v38 = vadd.f32 %v6466_v16, %v3365_v21  ;;  %v4194_v42 = vpop.f32.mrb[47].mxu1  ;;  %6624 = vmatmul.mubr.msk.f32.gmra.mrb[152].mxu1 %vm2676_vm2, %v2473_v36  ;;  %v2488_v54 = vld [vmem:[%s12952_s3 + $0xd60] sm:$0xff] }
 0x73d   :  { %v7406_v2 = vpop.eup %7405  ;;  %v5297_v47 = vadd.f32 1.0, %v7404_v51  ;;  %7425 = vpow2.f32 %v6119_v10  ;;  %v4195_v45 = vadd.f32 %v4194_v42, %v3360_v5  ;;  %6626 = vmatprep.mubr.msk.f32.mxu1 %vm2676_vm2, %v2476_v9  ;;  %v2558_v10 = vld [vmem:[%s12953_s4 + $0x120] sm:$0xff]  ;;  %v2491_v9 = vld [vmem:[%s12952_s3 + $0xd78] sm:$0xff]  ;;  %v3395_v5 = vadd.f32 %v10348_v14, %v2559_v37 }
 0x73e   :  { %v7408_v33 = vpop.eup %7407  ;;  %5754 = vst.msk [vmem:[%s12954_s5 + $0x80] sm:$0xff] %vm5737_vm3, %v7406_v2  ;;  %7427 = vrcp.f32 %v5298_v48  ;;  %v6121_v59 = vmul.f32 -1.442695, %v4200_v38  ;;  %v3390_v42 = vadd.f32 %v10340_v8, %v2558_v10  ;;  %v2565_v37 = vld [vmem:[%s12953_s4 + $0x158] sm:$0xff] }
 0x73f   :  { %v7410_v29 = vpop.eup %7409  ;;  %5755 = vst.msk [vmem:[%s12954_s5 + $0x88] sm:$0xff] %vm5737_vm3, %v7408_v33  ;;  %7429 = vrcp.f32 %v5297_v47  ;;  %v6469_v17 = vpop.f32.mrb[48].mxu1  ;;  %v6120_v13 = vmul.f32 -1.442695, %v4195_v45 }
 0x740   :  { %v7412_v60 = vpop.eup %7411  ;;  %v5300_v56 = vadd.f32 1.0, %v7410_v29  ;;  %7431 = vpow2.f32 %v6118_v7  ;;  %v4210_v1 = vadd.f32 %v6469_v17, %v3375_v26  ;;  %v4204_v32 = vpop.f32.mrb[49].mxu1  ;;  %6627 = vmatmul.mubr.msk.f32.gmra.mrb[154].mxu1 %vm2676_vm2, %v2479_v31  ;;  %v2560_v31 = vld [vmem:[%s12953_s4 + $0x130] sm:$0xff]  ;;  %v3405_v29 = vadd.f32 %v10364_v24, %v2561_v0  ;;  %v2500_v17 = vld [vmem:[%s12952_s3 + $0xdc0] sm:$0xff]  ;;  %v2567_v0 = vld [vmem:[%s12953_s4 + $0x168] sm:$0xff] }
 0x741   :  { %v7414_v4 = vpop.eup %7413  ;;  %v5299_v63 = vadd.f32 1.0, %v7412_v60  ;;  %7433 = vpow2.f32 %v6121_v59  ;;  %v4205_v52 = vadd.f32 %v4204_v32, %v3370_v28  ;;  %6629 = vmatprep.mubr.msk.f32.mxu1 %vm2676_vm2, %v2482_v11  ;;  %v2497_v59 = vld [vmem:[%s12952_s3 + $0xda8] sm:$0xff] }
 0x742   :  { %v7416_v18 = vpop.eup %7415  ;;  %5757 = vst.msk [vmem:[%s12954_s5 + $0x98] sm:$0xff] %vm5737_vm3, %v7414_v4  ;;  %7435 = vrcp.f32 %v5300_v56  ;;  %v6123_v15 = vmul.f32 -1.442695, %v4210_v1  ;;  %v2563_v1 = vld [vmem:[%s12953_s4 + $0x148] sm:$0xff] }
 0x743   :  { %v7418_v53 = vpop.eup %7417  ;;  %7437 = vrcp.f32 %v5299_v63  ;;  %v5302_v41 = vadd.f32 1.0, %v7416_v18  ;;  %v6122_v23 = vmul.f32 -1.442695, %v4205_v52  ;;  %v6472_v22 = vpop.f32.mrb[50].mxu1  ;;  %v2562_v63 = vld [vmem:[%s12953_s4 + $0x140] sm:$0xff] }
 0x744   :  { %v7420_v36 = vpop.eup %7419  ;;  %5756 = vst.msk [vmem:[%s12954_s5 + $0x90] sm:$0xff] %vm5737_vm3, %v7418_v53  ;;  %7439 = vpow2.f32 %v6120_v13  ;;  %v4220_v3 = vadd.f32 %v6472_v22, %v3385_v57  ;;  %v4214_v39 = vpop.f32.mrb[51].mxu1  ;;  %6630 = vmatmul.mubr.msk.f32.gmra.mrb[156].mxu1 %vm2676_vm2, %v2485_v44  ;;  %v3400_v13 = vadd.f32 %v10356_v19, %v2560_v31  ;;  %v2503_v44 = vld [vmem:[%s12952_s3 + $0xdd8] sm:$0xff]  ;;  %v3415_v57 = vadd.f32 %v10380_v35, %v2563_v1 }
 0x745   :  { %v7422_v61 = vpop.eup %7421  ;;  %5759 = vst.msk [vmem:[%s12954_s5 + $0xa8] sm:$0xff] %vm5737_vm3, %v7420_v36  ;;  %7441 = vrcp.f32 %v5302_v41  ;;  %v4215_v21 = vadd.f32 %v4214_v39, %v3380_v25  ;;  %6632 = vmatprep.mubr.msk.f32.mxu1 %vm2676_vm2, %v2488_v54  ;;  %v2506_v54 = vld [vmem:[%s12952_s3 + $0xdf0] sm:$0xff]  ;;  %v3410_v25 = vadd.f32 %v10372_v30, %v2562_v63  ;;  %v2515_v31 = vld [vmem:[%s12952_s3 + $0xe38] sm:$0xff] }
 0x746   :  { %v7424_v43 = vpop.eup %7423  ;;  %5758 = vst.msk [vmem:[%s12954_s5 + $0xa0] sm:$0xff] %vm5737_vm3, %v7422_v61  ;;  %7443 = vpow2.f32 %v6123_v15  ;;  %v6125_v16 = vmul.f32 -1.442695, %v4220_v3  ;;  %v2564_v39 = vld [vmem:[%s12953_s4 + $0x150] sm:$0xff] }
 0x747   :  { %v7426_v51 = vpop.eup %7425  ;;  %v5301_v48 = vadd.f32 1.0, %v7424_v43  ;;  %7445 = vpow2.f32 %v6122_v23  ;;  %v6124_v7 = vmul.f32 -1.442695, %v4215_v21  ;;  %v6475_v38 = vpop.f32.mrb[52].mxu1  ;;  %v2509_v21 = vld [vmem:[%s12952_s3 + $0xe08] sm:$0xff] }
 0x748   :  { %v7428_v2 = vpop.eup %7427  ;;  %v5304_v47 = vadd.f32 1.0, %v7426_v51  ;;  %7447 = vpow2.f32 %v6125_v16  ;;  %v4230_v45 = vadd.f32 %v6475_v38, %v3395_v5  ;;  %v4224_v14 = vpop.f32.mrb[53].mxu1  ;;  %6633 = vmatmul.mubr.msk.f32.gmra.mrb[158].mxu1 %vm2676_vm2, %v2491_v9  ;;  %v3425_v5 = vadd.f32 %v10396_v46, %v2565_v37 }
 0x749   :  { %v7430_v33 = vpop.eup %7429  ;;  %5761 = vst.msk [vmem:[%s12954_s5 + $0xb8] sm:$0xff] %vm5737_vm3, %v7428_v2  ;;  %7449 = vrcp.f32 %v5301_v48  ;;  %v4225_v8 = vadd.f32 %v4224_v14, %v3390_v42  ;;  %6635 = vmatprep.mubr.msk.f32.mxu1 %vm2676_vm2, %v2494_v27  ;;  %v2512_v27 = vld [vmem:[%s12952_s3 + $0xe20] sm:$0xff]  ;;  %v3420_v42 = vadd.f32 %v10388_v40, %v2564_v39 }
 0x74a   :  { %v7432_v26 = vpop.eup %7431  ;;  %5760 = vst.msk [vmem:[%s12954_s5 + $0xb0] sm:$0xff] %vm5737_vm3, %v7430_v33  ;;  %7451 = vrcp.f32 %v5304_v47  ;;  %v6127_v11 = vmul.f32 -1.442695, %v4230_v45  ;;  %v2566_v45 = vld [vmem:[%s12953_s4 + $0x160] sm:$0xff] }
 0x74b   :  { %v7434_v28 = vpop.eup %7433  ;;  %v5303_v49 = vadd.f32 1.0, %v7432_v26  ;;  %7453 = vpow2.f32 %v6124_v7  ;;  %v6126_v60 = vmul.f32 -1.442695, %v4225_v8  ;;  %v6478_v56 = vpop.f32.mrb[54].mxu1  ;;  %v3435_v26 = vadd.f32 %v10412_v55, %v2567_v0 }
 0x74c   :  { %v7436_v32 = vpop.eup %7435  ;;  %v5306_v58 = vadd.f32 1.0, %v7434_v28  ;;  %7455 = vpow2.f32 %v6127_v11  ;;  %v4240_v4 = vadd.f32 %v6478_v56, %v3405_v29  ;;  %v4234_v24 = vpop.f32.mrb[55].mxu1  ;;  %6636 = vmatmul.mubr.msk.f32.gmra.mrb[160].mxu1 %vm2676_vm2, %v2497_v59  ;;  %v2518_v11 = vld [vmem:[%s12952_s3 + $0xe50] sm:$0xff]  ;;  %v2569_v56 = vld [vmem:[%s12953_s4 + $0x178] sm:$0xff] }
 0x74d   :  { %v7438_v52 = vpop.eup %7437  ;;  %5763 = vst.msk [vmem:[%s12954_s5 + $0xc8] sm:$0xff] %vm5737_vm3, %v7436_v32  ;;  %7457 = vrcp.f32 %v5303_v49  ;;  %v4235_v19 = vadd.f32 %v4234_v24, %v3400_v13  ;;  %6638 = vmatprep.mubr.msk.f32.mxu1 %vm2676_vm2, %v2500_v17  ;;  %v2568_v32 = vld [vmem:[%s12953_s4 + $0x170] sm:$0xff] }
 0x74e   :  { %v7440_v18 = vpop.eup %7439  ;;  %5762 = vst.msk [vmem:[%s12954_s5 + $0xc0] sm:$0xff] %vm5737_vm3, %v7438_v52  ;;  %7459 = vrcp.f32 %v5306_v58  ;;  %v6129_v15 = vmul.f32 -1.442695, %v4240_v4  ;;  %v2521_v4 = vld [vmem:[%s12952_s3 + $0xe68] sm:$0xff] }
 0x74f   :  { %v7442_v53 = vpop.eup %7441  ;;  %v5305_v41 = vadd.f32 1.0, %v7440_v18  ;;  %7461 = vpow2.f32 %v6126_v60  ;;  %v6128_v23 = vmul.f32 -1.442695, %v4235_v19  ;;  %v6481_v22 = vpop.f32.mrb[56].mxu1  ;;  %v3430_v60 = vadd.f32 %v10404_v50, %v2566_v45  ;;  %v2575_v45 = vld [vmem:[%s12953_s4 + $0x1a8] sm:$0xff] }
 0x750   :  { %v7444_v36 = vpop.eup %7443  ;;  %5765 = vst.msk [vmem:[%s12954_s5 + $0xd8] sm:$0xff] %vm5737_vm3, %v7442_v53  ;;  %7463 = vpow2.f32 %v6129_v15  ;;  %v4250_v35 = vadd.f32 %v6481_v22, %v3415_v57  ;;  %v4244_v3 = vpop.f32.mrb[57].mxu1  ;;  %6639 = vmatmul.mubr.msk.f32.gmra.mrb[162].mxu1 %vm2676_vm2, %v2503_v44  ;;  %v3445_v19 = vadd.f32 %v10428_v6, %v2569_v56  ;;  %v3440_v57 = vadd.f32 %v10420_v62, %v2568_v32  ;;  %v2570_v62 = vld [vmem:[%s12953_s4 + $0x180] sm:$0xff] }
 0x751   :  { %v7446_v30 = vpop.eup %7445  ;;  %7465 = vrcp.f32 %v5305_v41  ;;  %v5308_v10 = vadd.f32 1.0, %v7444_v36  ;;  %v4245_v61 = vadd.f32 %v4244_v3, %v3410_v25  ;;  %6641 = vmatprep.mubr.msk.f32.mxu1 %vm2676_vm2, %v2506_v54  ;;  %v2571_v54 = vld [vmem:[%s12953_s4 + $0x188] sm:$0xff] }
 0x752   :  { %v7448_v9 = vpop.eup %7447  ;;  %v5307_v43 = vadd.f32 1.0, %v7446_v30  ;;  %7467 = vpow2.f32 %v6128_v23  ;;  %v6131_v16 = vmul.f32 -1.442695, %v4250_v35  ;;  %v3455_v3 = vadd.f32 %v10444_v20, %v2571_v54 }
 0x753   :  { %v7450_v51 = vpop.eup %7449  ;;  %7469 = vrcp.f32 %v5308_v10  ;;  %v5310_v48 = vadd.f32 1.0, %v7448_v9  ;;  %v6130_v7 = vmul.f32 -1.442695, %v4245_v61  ;;  %v6484_v38 = vpop.f32.mrb[58].mxu1  ;;  %v3450_v61 = vadd.f32 %v10436_v12, %v2570_v62 }
 0x754   :  { %v7452_v2 = vpop.eup %7451  ;;  %5764 = vst.msk [vmem:[%s12954_s5 + $0xd0] sm:$0xff] %vm5737_vm3, %v7450_v51  ;;  %7471 = vrcp.f32 %v5307_v43  ;;  %v4260_v46 = vadd.f32 %v6484_v38, %v3425_v5  ;;  %v4254_v47 = vpop.f32.mrb[59].mxu1  ;;  %6642 = vmatmul.mubr.msk.f32.gmra.mrb[164].mxu1 %vm2676_vm2, %v2509_v21  ;;  %v2573_v21 = vld [vmem:[%s12953_s4 + $0x198] sm:$0xff] }
 0x755   :  { %v7454_v40 = vpop.eup %7453  ;;  %5767 = vst.msk [vmem:[%s12954_s5 + $0xe8] sm:$0xff] %vm5737_vm3, %v7452_v2  ;;  %7473 = vrcp.f32 %v5310_v48  ;;  %v4255_v14 = vadd.f32 %v4254_v47, %v3420_v42  ;;  %6644 = vmatprep.mubr.msk.f32.mxu1 %vm2676_vm2, %v2512_v27  ;;  %v3465_v38 = vadd.f32 %v10460_v34, %v2573_v21  ;;  %v13063_v21 = vld [vmem:[#allocation8_spill] sm:$0xff] }
 0x756   :  { %v7456_v33 = vpop.eup %7455  ;;  %v5309_v8 = vadd.f32 1.0, %v7454_v40  ;;  %7475 = vpow2.f32 %v6131_v16  ;;  %v6133_v59 = vmul.f32 -1.442695, %v4260_v46  ;;  %v2572_v16 = vld [vmem:[%s12953_s4 + $0x190] sm:$0xff]  ;;  %v13058_v46 = vld [vmem:[#allocation2_spill] sm:$0xff] }
 0x757   :  { %v7458_v29 = vpop.eup %7457  ;;  %v5312_v17 = vadd.f32 1.0, %v7456_v33  ;;  %7477 = vpow2.f32 %v6130_v7  ;;  %v6132_v28 = vmul.f32 -1.442695, %v4255_v14  ;;  %v6487_v49 = vpop.f32.mrb[60].mxu1  ;;  %v3460_v47 = vadd.f32 %v13058_v46, %v2572_v16  ;;  %v13064_v16 = vld [vmem:[#allocation7_spill] sm:$0xff] }
 0x758   :  { %v7460_v13 = vpop.eup %7459  ;;  %5766 = vst.msk [vmem:[%s12954_s5 + $0xe0] sm:$0xff] %vm5737_vm3, %v7458_v29  ;;  %7479 = vrcp.f32 %v5309_v8  ;;  %v4270_v55 = vadd.f32 %v6487_v49, %v3435_v26  ;;  %v4264_v1 = vpop.f32.mrb[61].mxu1  ;;  %6645 = vmatmul.mubr.msk.f32.gmra.mrb[166].mxu1 %vm2676_vm2, %v2515_v31  ;;  %v2574_v31 = vld [vmem:[%s12953_s4 + $0x1a0] sm:$0xff] }
 0x759   :  { %v7462_v50 = vpop.eup %7461  ;;  %5769 = vst.msk [vmem:[%s12954_s5 + $0xf8] sm:$0xff] %vm5737_vm3, %v7460_v13  ;;  %7481 = vrcp.f32 %v5312_v17  ;;  %v4265_v58 = vadd.f32 %v4264_v1, %v3430_v60  ;;  %6647 = vmatprep.mubr.msk.f32.mxu1 %vm2676_vm2, %v2518_v11  ;;  %v13059_v17 = vld [vmem:[#allocation4_spill] sm:$0xff]  ;;  %v13060_v13 = vld [vmem:[#allocation3_spill] sm:$0xff]  ;;  %v2577_v1 = vld [vmem:[%s12953_s4 + $0x1b8] sm:$0xff] }
 0x75a   :  { %v7464_v24 = vpop.eup %7463  ;;  %v5311_v63 = vadd.f32 1.0, %v7462_v50  ;;  %7483 = vpow2.f32 %v6133_v59  ;;  %v6135_v52 = vmul.f32 -1.442695, %v4270_v55  ;;  %v3470_v55 = vadd.f32 %v13060_v13, %v2574_v31 }
 0x75b   :  { %v7466_v44 = vpop.eup %7465  ;;  %v5314_v18 = vadd.f32 1.0, %v7464_v24  ;;  %7485 = vpow2.f32 %v6132_v28  ;;  %v6490_v15 = vpop.f32.mrb[62].mxu1  ;;  %v6134_v41 = vmul.f32 -1.442695, %v4265_v58  ;;  %v3475_v28 = vadd.f32 %v13059_v17, %v2575_v45 }
 0x75c   :  { %v7468_v53 = vpop.eup %7467  ;;  %5768 = vst.msk [vmem:[%s12954_s5 + $0xf0] sm:$0xff] %vm5737_vm3, %v7466_v44  ;;  %7487 = vrcp.f32 %v5311_v63  ;;  %v4280_v23 = vadd.f32 %v6490_v15, %v3445_v19  ;;  %v4274_v6 = vpop.f32.mrb[63].mxu1  ;;  %6648 = vmatmul.mubr.msk.f32.gmra.mrb[168].mxu1 %vm2676_vm2, %v2521_v4  ;;  %v2576_v4 = vld [vmem:[%s12953_s4 + $0x1b0] sm:$0xff] }
 0x75d   :  { %v7470_v22 = vpop.eup %7469  ;;  %7489 = vrcp.f32 %v5314_v18  ;;  %v5313_v25 = vadd.f32 1.0, %v7468_v53  ;;  %v4275_v37 = vadd.f32 %v4274_v6, %v3440_v57  ;;  %v13061_v18 = vld [vmem:[#allocation6_spill] sm:$0xff]  ;;  %v2579_v6 = vld [vmem:[%s12953_s4 + $0x1c8] sm:$0xff] }
 0x75e   :  { %v7472_v36 = vpop.eup %7471  ;;  %5771 = vst.msk [vmem:[%s12954_s5 + $0x108] sm:$0xff] %vm5737_vm3, %v7470_v22  ;;  %7491 = vpow2.f32 %v6135_v52  ;;  %v6137_v35 = vmul.f32 -1.442695, %v4280_v23  ;;  %v3485_v15 = vadd.f32 %v13061_v18, %v2577_v1 }
 0x75f   :  { %v7474_v39 = vpop.eup %7473  ;;  %5770 = vst.msk [vmem:[%s12954_s5 + $0x100] sm:$0xff] %vm5737_vm3, %v7472_v36  ;;  %7493 = vrcp.f32 %v5313_v25  ;;  %v6136_v30 = vmul.f32 -1.442695, %v4275_v37  ;;  %v6493_v10 = vpop.f32.mrb[64].mxu1 }
 0x760   :  { %v7476_v9 = vpop.eup %7475  ;;  %5773 = vst.msk [vmem:[%s12954_s5 + $0x118] sm:$0xff] %vm5737_vm3, %v7474_v39  ;;  %7495 = vpow2.f32 %v6134_v41  ;;  %v4290_v20 = vadd.f32 %v6493_v10, %v3455_v3  ;;  %v4284_v43 = vpop.f32.mrb[65].mxu1  ;;  %v13062_v41 = vld [vmem:[#allocation5_spill] sm:$0xff] }
 0x761   :  { %v7478_v5 = vpop.eup %7477  ;;  %v5316_v27 = vadd.f32 1.0, %v7476_v9  ;;  %7497 = vpow2.f32 %v6137_v35  ;;  %v4285_v12 = vadd.f32 %v4284_v43, %v3450_v61  ;;  %v3480_v23 = vadd.f32 %v13062_v41, %v2576_v4  ;;  %v2578_v35 = vld [vmem:[%s12953_s4 + $0x1c0] sm:$0xff] }
 0x762   :  { %v7480_v51 = vpop.eup %7479  ;;  %v5315_v48 = vadd.f32 1.0, %v7478_v5  ;;  %7499 = vpow2.f32 %v6136_v30  ;;  %v6139_v7 = vmul.f32 -1.442695, %v4290_v20  ;;  %v3495_v9 = vadd.f32 %v13063_v21, %v2579_v6 }
 0x763   :  { %v7482_v42 = vpop.eup %7481  ;;  %5772 = vst.msk [vmem:[%s12954_s5 + $0x110] sm:$0xff] %vm5737_vm3, %v7480_v51  ;;  %7501 = vrcp.f32 %v5316_v27  ;;  %v6138_v0 = vmul.f32 -1.442695, %v4285_v12  ;;  %v6496_v2 = vpop.f32.mrb[66].mxu1  ;;  %v3490_v5 = vadd.f32 %v13064_v16, %v2578_v35  ;;  %v2581_v27 = vld [vmem:[%s12953_s4 + $0x1d8] sm:$0xff] }
 0x764   :  { %v7484_v40 = vpop.eup %7483  ;;  %5775 = vst.msk [vmem:[%s12954_s5 + $0x128] sm:$0xff] %vm5737_vm3, %v7482_v42  ;;  %7503 = vrcp.f32 %v5315_v48  ;;  %v4300_v34 = vadd.f32 %v6496_v2, %v3465_v38  ;;  %v4294_v14 = vpop.f32.mrb[67].mxu1  ;;  %v2580_v42 = vld [vmem:[%s12953_s4 + $0x1d0] sm:$0xff] }
 0x765   :  { %v7486_v33 = vpop.eup %7485  ;;  %v5318_v8 = vadd.f32 1.0, %v7484_v40  ;;  %7505 = vpow2.f32 %v6139_v7  ;;  %v4295_v59 = vadd.f32 %v4294_v14, %v3460_v47  ;;  %v13065_v40 = vld [vmem:[#allocation10_spill] sm:$0xff] }
 0x766   :  { %v7488_v26 = vpop.eup %7487  ;;  %v5317_v11 = vadd.f32 1.0, %v7486_v33  ;;  %7507 = vpow2.f32 %v6138_v0  ;;  %v6141_v29 = vmul.f32 -1.442695, %v4300_v34  ;;  %v3505_v34 = vadd.f32 %v13065_v40, %v2581_v27  ;;  %v13066_v33 = vld [vmem:[#allocation9_spill] sm:$0xff] }
 0x767   :  { %v7490_v49 = vpop.eup %7489  ;;  %5774 = vst.msk [vmem:[%s12954_s5 + $0x120] sm:$0xff] %vm5737_vm3, %v7488_v26  ;;  %7509 = vrcp.f32 %v5318_v8  ;;  %v6140_v60 = vmul.f32 -1.442695, %v4295_v59  ;;  %v6499_v56 = vpop.f32.mrb[68].mxu1  ;;  %v3500_v8 = vadd.f32 %v13066_v33, %v2580_v42  ;;  %v2583_v59 = vld [vmem:[%s12953_s4 + $0x1e8] sm:$0xff] }
 0x768   :  { %v7492_v32 = vpop.eup %7491  ;;  %5777 = vst.msk [vmem:[%s12954_s5 + $0x138] sm:$0xff] %vm5737_vm3, %v7490_v49  ;;  %7511 = vrcp.f32 %v5317_v11  ;;  %v4310_v50 = vadd.f32 %v6499_v56, %v3475_v28  ;;  %v4304_v58 = vpop.f32.mrb[69].mxu1  ;;  %v2582_v49 = vld [vmem:[%s12953_s4 + $0x1e0] sm:$0xff] }
 0x769   :  { %v7494_v24 = vpop.eup %7493  ;;  %v5320_v63 = vadd.f32 1.0, %v7492_v32  ;;  %7513 = vpow2.f32 %v6141_v29  ;;  %v4305_v52 = vadd.f32 %v4304_v58, %v3470_v55  ;;  %v13067_v32 = vld [vmem:[#allocation12_spill] sm:$0xff] }
 0x76a   :  { %v7496_v19 = vpop.eup %7495  ;;  %5776 = vst.msk [vmem:[%s12954_s5 + $0x130] sm:$0xff] %vm5737_vm3, %v7494_v24  ;;  %7515 = vpow2.f32 %v6140_v60  ;;  %v6143_v44 = vmul.f32 -1.442695, %v4310_v50  ;;  %v3515_v50 = vadd.f32 %v13067_v32, %v2583_v59 }
 0x76b   :  { %v7498_v57 = vpop.eup %7497  ;;  %7517 = vrcp.f32 %v5320_v63  ;;  %v5319_v54 = vadd.f32 1.0, %v7496_v19  ;;  %v6502_v53 = vpop.f32.mrb[70].mxu1  ;;  %v6142_v25 = vmul.f32 -1.442695, %v4305_v52  ;;  %v13068_v52 = vld [vmem:[#allocation11_spill] sm:$0xff] }
 0x76c   :  { %v7500_v62 = vpop.eup %7499  ;;  %v5322_v22 = vadd.f32 1.0, %v7498_v57  ;;  %7519 = vpow2.f32 %v6143_v44  ;;  %v4320_v37 = vadd.f32 %v6502_v53, %v3485_v15  ;;  %v4314_v36 = vpop.f32.mrb[71].mxu1  ;;  %v3510_v19 = vadd.f32 %v13068_v52, %v2582_v49  ;;  %v2585_v44 = vld [vmem:[%s12953_s4 + $0x1f8] sm:$0xff] }
 0x76d   :  { %v7502_v3 = vpop.eup %7501  ;;  %7521 = vrcp.f32 %v5319_v54  ;;  %v5321_v39 = vadd.f32 1.0, %v7500_v62  ;;  %v4315_v30 = vadd.f32 %v4314_v36, %v3480_v23  ;;  %v2584_v54 = vld [vmem:[%s12953_s4 + $0x1f0] sm:$0xff]  ;;  %v13069_v62 = vld [vmem:[#allocation14_spill] sm:$0xff] }
 0x76e   :  { %v7504_v10 = vpop.eup %7503  ;;  %5779 = vst.msk [vmem:[%s12954_s5 + $0x148] sm:$0xff] %vm5737_vm3, %v7502_v3  ;;  %7523 = vrcp.f32 %v5322_v22  ;;  %v6145_v61 = vmul.f32 -1.442695, %v4320_v37  ;;  %v3525_v22 = vadd.f32 %v13069_v62, %v2585_v44  ;;  %v13070_v3 = vld [vmem:[#allocation13_spill] sm:$0xff]  ;;  %v13075_v44 = vld [vmem:[#allocation20_spill] sm:$0xff] }
 0x76f   :  { %v7506_v20 = vpop.eup %7505  ;;  %5778 = vst.msk [vmem:[%s12954_s5 + $0x140] sm:$0xff] %vm5737_vm3, %v7504_v10  ;;  %7525 = vrcp.f32 %v5321_v39  ;;  %v6505_v43 = vpop.f32.mrb[72].mxu1  ;;  %v6144_v48 = vmul.f32 -1.442695, %v4315_v30  ;;  %v3520_v39 = vadd.f32 %v13070_v3, %v2584_v54  ;;  %v2587_v30 = vld [vmem:[%s12953_s4 + $0x208] sm:$0xff] }
 0x770   :  { %v7508_v12 = vpop.eup %7507  ;;  %v5324_v51 = vadd.f32 1.0, %v7506_v20  ;;  %7527 = vpow2.f32 %v6142_v25  ;;  %v4330_v7 = vadd.f32 %v6505_v43, %v3495_v9  ;;  %v4324_v38 = vpop.f32.mrb[73].mxu1  ;;  %v2586_v20 = vld [vmem:[%s12953_s4 + $0x200] sm:$0xff] }
 0x771   :  { %v7510_v0 = vpop.eup %7509  ;;  %v5323_v2 = vadd.f32 1.0, %v7508_v12  ;;  %7529 = vpow2.f32 %v6145_v61  ;;  %v4325_v46 = vadd.f32 %v4324_v38, %v3490_v5  ;;  %v13071_v12 = vld [vmem:[#allocation16_spill] sm:$0xff] }
 0x772   :  { %v7512_v47 = vpop.eup %7511  ;;  %5781 = vst.msk [vmem:[%s12954_s5 + $0x158] sm:$0xff] %vm5737_vm3, %v7510_v0  ;;  %7531 = vrcp.f32 %v5324_v51  ;;  %v6147_v45 = vmul.f32 -1.442695, %v4330_v7  ;;  %v3535_v51 = vadd.f32 %v13071_v12, %v2587_v30  ;;  %v13072_v0 = vld [vmem:[#allocation15_spill] sm:$0xff] }
 0x773   :  { %v7514_v14 = vpop.eup %7513  ;;  %5780 = vst.msk [vmem:[%s12954_s5 + $0x150] sm:$0xff] %vm5737_vm3, %v7512_v47  ;;  %7533 = vrcp.f32 %v5323_v2  ;;  %v6508_v31 = vpop.f32.mrb[74].mxu1  ;;  %v6146_v29 = vmul.f32 -1.442695, %v4325_v46  ;;  %v3530_v2 = vadd.f32 %v13072_v0, %v2586_v20  ;;  %v2589_v46 = vld [vmem:[%s12953_s4 + $0x218] sm:$0xff] }
 0x774   :  { %v7516_v26 = vpop.eup %7515  ;;  %v5326_v11 = vadd.f32 1.0, %v7514_v14  ;;  %7535 = vpow2.f32 %v6144_v48  ;;  %v4340_v17 = vadd.f32 %v6508_v31, %v3505_v34  ;;  %v4334_v28 = vpop.f32.mrb[75].mxu1  ;;  %v2588_v14 = vld [vmem:[%s12953_s4 + $0x210] sm:$0xff] }
 0x775   :  { %v7518_v60 = vpop.eup %7517  ;;  %v5325_v56 = vadd.f32 1.0, %v7516_v26  ;;  %7537 = vpow2.f32 %v6147_v45  ;;  %v4335_v13 = vadd.f32 %v4334_v28, %v3500_v8  ;;  %v13073_v26 = vld [vmem:[#allocation18_spill] sm:$0xff] }
 0x776   :  { %v7520_v55 = vpop.eup %7519  ;;  %5783 = vst.msk [vmem:[%s12954_s5 + $0x168] sm:$0xff] %vm5737_vm3, %v7518_v60  ;;  %7539 = vrcp.f32 %v5326_v11  ;;  %v6149_v1 = vmul.f32 -1.442695, %v4340_v17  ;;  %v3545_v11 = vadd.f32 %v13073_v26, %v2589_v46  ;;  %v13074_v60 = vld [vmem:[#allocation17_spill] sm:$0xff] }
 0x777   :  { %v7522_v58 = vpop.eup %7521  ;;  %7541 = vrcp.f32 %v5325_v56  ;;  %v5328_v4 = vadd.f32 1.0, %v7520_v55  ;;  %v6148_v24 = vmul.f32 -1.442695, %v4335_v13  ;;  %v6511_v63 = vpop.f32.mrb[76].mxu1  ;;  %v3540_v56 = vadd.f32 %v13074_v60, %v2588_v14  ;;  %v2591_v13 = vld [vmem:[%s12953_s4 + $0x228] sm:$0xff] }
 0x778   :  { %v7524_v18 = vpop.eup %7523  ;;  %5782 = vst.msk [vmem:[%s12954_s5 + $0x160] sm:$0xff] %vm5737_vm3, %v7522_v58  ;;  %7543 = vpow2.f32 %v6146_v29  ;;  %v4350_v15 = vadd.f32 %v6511_v63, %v3515_v50  ;;  %v4344_v57 = vpop.f32.mrb[77].mxu1  ;;  %v2590_v50 = vld [vmem:[%s12953_s4 + $0x220] sm:$0xff] }
 0x779   :  { %v7526_v53 = vpop.eup %7525  ;;  %5785 = vst.msk [vmem:[%s12954_s5 + $0x178] sm:$0xff] %vm5737_vm3, %v7524_v18  ;;  %7545 = vrcp.f32 %v5328_v4  ;;  %v4345_v41 = vadd.f32 %v4344_v57, %v3510_v19  ;;  %v3555_v18 = vadd.f32 %v13075_v44, %v2591_v13 }
 0x77a   :  { %v7528_v23 = vpop.eup %7527  ;;  %5784 = vst.msk [vmem:[%s12954_s5 + $0x170] sm:$0xff] %vm5737_vm3, %v7526_v53  ;;  %7547 = vpow2.f32 %v6149_v1  ;;  %v6151_v6 = vmul.f32 -1.442695, %v4350_v15 }
 0x77b   :  { %v7530_v25 = vpop.eup %7529  ;;  %v5327_v37 = vadd.f32 1.0, %v7528_v23  ;;  %7549 = vpow2.f32 %v6148_v24  ;;  %v6150_v36 = vmul.f32 -1.442695, %v4345_v41  ;;  %v6514_v35 = vpop.f32.mrb[78].mxu1  ;;  %v13076_v41 = vld [vmem:[#allocation19_spill] sm:$0xff] }
 0x77c   :  { %v7532_v10 = vpop.eup %7531  ;;  %v5330_v61 = vadd.f32 1.0, %v7530_v25  ;;  %7551 = vpow2.f32 %v6151_v6  ;;  %v4360_v21 = vadd.f32 %v6514_v35, %v3525_v22  ;;  %v4354_v9 = vpop.f32.mrb[79].mxu1  ;;  %v3550_v23 = vadd.f32 %v13076_v41, %v2590_v50  ;;  %v2593_v6 = vld [vmem:[%s12953_s4 + $0x238] sm:$0xff] }
 0x77d   :  { %v7534_v43 = vpop.eup %7533  ;;  %5787 = vst.msk [vmem:[%s12954_s5 + $0x188] sm:$0xff] %vm5737_vm3, %v7532_v10  ;;  %7553 = vrcp.f32 %v5327_v37  ;;  %v4355_v16 = vadd.f32 %v4354_v9, %v3520_v39  ;;  %v2592_v37 = vld [vmem:[%s12953_s4 + $0x230] sm:$0xff]  ;;  %v13077_v10 = vld [vmem:[#allocation22_spill] sm:$0xff] }
 0x77e   :  { %v7536_v5 = vpop.eup %7535  ;;  %5786 = vst.msk [vmem:[%s12954_s5 + $0x180] sm:$0xff] %vm5737_vm3, %v7534_v43  ;;  %7555 = vrcp.f32 %v5330_v61  ;;  %v6153_v27 = vmul.f32 -1.442695, %v4360_v21  ;;  %v3565_v61 = vadd.f32 %v13077_v10, %v2593_v6  ;;  %v13083_v6 = vld [vmem:[#allocation28_spill] sm:$0xff] }
 0x77f   :  { %v7538_v48 = vpop.eup %7537  ;;  %v5329_v7 = vadd.f32 1.0, %v7536_v5  ;;  %7557 = vpow2.f32 %v6150_v36  ;;  %v6152_v38 = vmul.f32 -1.442695, %v4355_v16  ;;  %v6517_v42 = vpop.f32.mrb[80].mxu1  ;;  %v13078_v16 = vld [vmem:[#allocation21_spill] sm:$0xff] }
 0x780   :  { %v7540_v47 = vpop.eup %7539  ;;  %v5332_v45 = vadd.f32 1.0, %v7538_v48  ;;  %7559 = vpow2.f32 %v6153_v27  ;;  %v4370_v40 = vadd.f32 %v6517_v42, %v3535_v51  ;;  %v4364_v34 = vpop.f32.mrb[81].mxu1  ;;  %v3560_v5 = vadd.f32 %v13078_v16, %v2592_v37  ;;  %v2595_v27 = vld [vmem:[%s12953_s4 + $0x248] sm:$0xff] }
 0x781   :  { %v7542_v31 = vpop.eup %7541  ;;  %5789 = vst.msk [vmem:[%s12954_s5 + $0x198] sm:$0xff] %vm5737_vm3, %v7540_v47  ;;  %7561 = vrcp.f32 %v5329_v7  ;;  %v4365_v33 = vadd.f32 %v4364_v34, %v3530_v2  ;;  %v2594_v7 = vld [vmem:[%s12953_s4 + $0x240] sm:$0xff]  ;;  %v13079_v47 = vld [vmem:[#allocation24_spill] sm:$0xff] }
 0x782   :  { %v7544_v8 = vpop.eup %7543  ;;  %5788 = vst.msk [vmem:[%s12954_s5 + $0x190] sm:$0xff] %vm5737_vm3, %v7542_v31  ;;  %7563 = vrcp.f32 %v5332_v45  ;;  %v6155_v59 = vmul.f32 -1.442695, %v4370_v40  ;;  %v3575_v45 = vadd.f32 %v13079_v47, %v2595_v27  ;;  %v13080_v31 = vld [vmem:[#allocation23_spill] sm:$0xff]  ;;  %v13085_v27 = vld [vmem:[#allocation30_spill] sm:$0xff] }
 0x783   :  { %v7546_v29 = vpop.eup %7545  ;;  %v5331_v17 = vadd.f32 1.0, %v7544_v8  ;;  %7565 = vpow2.f32 %v6152_v38  ;;  %v6154_v28 = vmul.f32 -1.442695, %v4365_v33  ;;  %v6520_v49 = vpop.f32.mrb[82].mxu1  ;;  %v3570_v33 = vadd.f32 %v13080_v31, %v2594_v7  ;;  %v2597_v8 = vld [vmem:[%s12953_s4 + $0x258] sm:$0xff] }
 0x784   :  { %v7548_v55 = vpop.eup %7547  ;;  %5791 = vst.msk [vmem:[%s12954_s5 + $0x1a8] sm:$0xff] %vm5737_vm3, %v7546_v29  ;;  %7567 = vpow2.f32 %v6155_v59  ;;  %v4380_v1 = vadd.f32 %v6520_v49, %v3545_v11  ;;  %v4374_v32 = vpop.f32.mrb[83].mxu1 }
 0x785   :  { %v7550_v58 = vpop.eup %7549  ;;  %7569 = vrcp.f32 %v5331_v17  ;;  %v5334_v4 = vadd.f32 1.0, %v7548_v55  ;;  %v4375_v24 = vadd.f32 %v4374_v32, %v3540_v56  ;;  %v2596_v17 = vld [vmem:[%s12953_s4 + $0x250] sm:$0xff]  ;;  %v13081_v55 = vld [vmem:[#allocation26_spill] sm:$0xff] }
 0x786   :  { %v7552_v63 = vpop.eup %7551  ;;  %v5333_v52 = vadd.f32 1.0, %v7550_v58  ;;  %7571 = vpow2.f32 %v6154_v28  ;;  %v6157_v19 = vmul.f32 -1.442695, %v4380_v1  ;;  %v3585_v1 = vadd.f32 %v13081_v55, %v2597_v8  ;;  %v13087_v8 = vld [vmem:[#allocation32_spill] sm:$0xff] }
 0x787   :  { %v7554_v15 = vpop.eup %7553  ;;  %7573 = vrcp.f32 %v5334_v4  ;;  %v5336_v57 = vadd.f32 1.0, %v7552_v63  ;;  %v6156_v54 = vmul.f32 -1.442695, %v4375_v24  ;;  %v6523_v53 = vpop.f32.mrb[84].mxu1  ;;  %v13082_v4 = vld [vmem:[#allocation25_spill] sm:$0xff]  ;;  %v2599_v63 = vld [vmem:[%s12953_s4 + $0x268] sm:$0xff] }
 0x788   :  { %v7556_v62 = vpop.eup %7555  ;;  %5790 = vst.msk [vmem:[%s12954_s5 + $0x1a0] sm:$0xff] %vm5737_vm3, %v7554_v15  ;;  %7575 = vrcp.f32 %v5333_v52  ;;  %v4390_v22 = vadd.f32 %v6523_v53, %v3555_v18  ;;  %v4384_v25 = vpop.f32.mrb[85].mxu1  ;;  %v3580_v24 = vadd.f32 %v13082_v4, %v2596_v17  ;;  %v2598_v18 = vld [vmem:[%s12953_s4 + $0x260] sm:$0xff]  ;;  %v13088_v17 = vld [vmem:[#allocation31_spill] sm:$0xff] }
 0x789   :  { %v7558_v36 = vpop.eup %7557  ;;  %5793 = vst.msk [vmem:[%s12954_s5 + $0x1b8] sm:$0xff] %vm5737_vm3, %v7556_v62  ;;  %7577 = vrcp.f32 %v5336_v57  ;;  %v4385_v35 = vadd.f32 %v4384_v25, %v3550_v23  ;;  %v3595_v62 = vadd.f32 %v13083_v6, %v2599_v63 }
 0x78a   :  { %v7560_v3 = vpop.eup %7559  ;;  %v5335_v39 = vadd.f32 1.0, %v7558_v36  ;;  %7579 = vpow2.f32 %v6157_v19  ;;  %v6159_v30 = vmul.f32 -1.442695, %v4390_v22  ;;  %v13084_v36 = vld [vmem:[#allocation27_spill] sm:$0xff] }
 0x78b   :  { %v7562_v21 = vpop.eup %7561  ;;  %v5338_v9 = vadd.f32 1.0, %v7560_v3  ;;  %7581 = vpow2.f32 %v6156_v54  ;;  %v6158_v20 = vmul.f32 -1.442695, %v4385_v35  ;;  %v6526_v43 = vpop.f32.mrb[86].mxu1  ;;  %v3590_v35 = vadd.f32 %v13084_v36, %v2598_v18  ;;  %v2601_v3 = vld [vmem:[%s12953_s4 + $0x278] sm:$0xff] }
 0x78c   :  { %v7564_v12 = vpop.eup %7563  ;;  %5792 = vst.msk [vmem:[%s12954_s5 + $0x1b0] sm:$0xff] %vm5737_vm3, %v7562_v21  ;;  %7583 = vrcp.f32 %v5335_v39  ;;  %v4400_v51 = vadd.f32 %v6526_v43, %v3565_v61  ;;  %v4394_v48 = vpop.f32.mrb[87].mxu1  ;;  %v2600_v61 = vld [vmem:[%s12953_s4 + $0x270] sm:$0xff] }
 0x78d   :  { %v7566_v38 = vpop.eup %7565  ;;  %5795 = vst.msk [vmem:[%s12954_s5 + $0x1c8] sm:$0xff] %vm5737_vm3, %v7564_v12  ;;  %7585 = vrcp.f32 %v5338_v9  ;;  %v4395_v42 = vadd.f32 %v4394_v48, %v3560_v5  ;;  %v3605_v12 = vadd.f32 %v13085_v27, %v2601_v3 }
 0x78e   :  { %v7568_v0 = vpop.eup %7567  ;;  %v5337_v2 = vadd.f32 1.0, %v7566_v38  ;;  %7587 = vpow2.f32 %v6159_v30  ;;  %v6161_v46 = vmul.f32 -1.442695, %v4400_v51  ;;  %v13086_v38 = vld [vmem:[#allocation29_spill] sm:$0xff] }
 0x78f   :  { %v7570_v40 = vpop.eup %7569  ;;  %v5340_v34 = vadd.f32 1.0, %v7568_v0  ;;  %7589 = vpow2.f32 %v6158_v20  ;;  %v6529_v14 = vpop.f32.mrb[88].mxu1  ;;  %v6160_v26 = vmul.f32 -1.442695, %v4395_v42  ;;  %v3600_v42 = vadd.f32 %v13086_v38, %v2600_v61  ;;  %v2603_v0 = vld [vmem:[%s12953_s4 + $0x288] sm:$0xff] }
 0x790   :  { %v7572_v59 = vpop.eup %7571  ;;  %5794 = vst.msk [vmem:[%s12954_s5 + $0x1c0] sm:$0xff] %vm5737_vm3, %v7570_v40  ;;  %7591 = vrcp.f32 %v5337_v2  ;;  %v4410_v11 = vadd.f32 %v6529_v14, %v3575_v45  ;;  %v4404_v29 = vpop.f32.mrb[89].mxu1  ;;  %v2602_v45 = vld [vmem:[%s12953_s4 + $0x280] sm:$0xff] }
 0x791   :  { %v7574_v28 = vpop.eup %7573  ;;  %7593 = vrcp.f32 %v5340_v34  ;;  %v5339_v49 = vadd.f32 1.0, %v7572_v59  ;;  %v4405_v60 = vadd.f32 %v4404_v29, %v3570_v33  ;;  %v3615_v59 = vadd.f32 %v13087_v8, %v2603_v0 }
 0x792   :  { %v7576_v56 = vpop.eup %7575  ;;  %5797 = vst.msk [vmem:[%s12954_s5 + $0x1d8] sm:$0xff] %vm5737_vm3, %v7574_v28  ;;  %7595 = vpow2.f32 %v6161_v46  ;;  %v6163_v13 = vmul.f32 -1.442695, %v4410_v11  ;;  %v3610_v28 = vadd.f32 %v13088_v17, %v2602_v45 }
 0x793   :  { %v7578_v32 = vpop.eup %7577  ;;  %5796 = vst.msk [vmem:[%s12954_s5 + $0x1d0] sm:$0xff] %vm5737_vm3, %v7576_v56  ;;  %7597 = vrcp.f32 %v5339_v49  ;;  %v6162_v50 = vmul.f32 -1.442695, %v4405_v60  ;;  %v6532_v58 = vpop.f32.mrb[90].mxu1  ;;  %v2605_v49 = vld [vmem:[%s12953_s4 + $0x298] sm:$0xff] }
 0x794   :  { %v7580_v52 = vpop.eup %7579  ;;  %5799 = vst.msk [vmem:[%s12954_s5 + $0x1e8] sm:$0xff] %vm5737_vm3, %v7578_v32  ;;  %7599 = vpow2.f32 %v6160_v26  ;;  %v4420_v19 = vadd.f32 %v6532_v58, %v3585_v1  ;;  %v4414_v44 = vpop.f32.mrb[91].mxu1  ;;  %v2604_v32 = vld [vmem:[%s12953_s4 + $0x290] sm:$0xff] }
 0x795   :  { %v7582_v15 = vpop.eup %7581  ;;  %v5342_v57 = vadd.f32 1.0, %v7580_v52  ;;  %7601 = vpow2.f32 %v6163_v13  ;;  %v4415_v54 = vadd.f32 %v4414_v44, %v3580_v24  ;;  %v13089_v52 = vld [vmem:[#allocation34_spill] sm:$0xff] }
 0x796   :  { %v7584_v53 = vpop.eup %7583  ;;  %v5341_v41 = vadd.f32 1.0, %v7582_v15  ;;  %7603 = vpow2.f32 %v6162_v50  ;;  %v6165_v23 = vmul.f32 -1.442695, %v4420_v19  ;;  %v3625_v19 = vadd.f32 %v13089_v52, %v2605_v49  ;;  %v13090_v15 = vld [vmem:[#allocation33_spill] sm:$0xff] }
 0x797   :  { %v7586_v22 = vpop.eup %7585  ;;  %5798 = vst.msk [vmem:[%s12954_s5 + $0x1e0] sm:$0xff] %vm5737_vm3, %v7584_v53  ;;  %7605 = vrcp.f32 %v5342_v57  ;;  %v6164_v25 = vmul.f32 -1.442695, %v4415_v54  ;;  %v6535_v37 = vpop.f32.mrb[92].mxu1  ;;  %v3620_v57 = vadd.f32 %v13090_v15, %v2604_v32  ;;  %v2607_v54 = vld [vmem:[%s12953_s4 + $0x2a8] sm:$0xff] }
 0x798   :  { %v7588_v39 = vpop.eup %7587  ;;  %5801 = vst.msk [vmem:[%s12954_s5 + $0x1f8] sm:$0xff] %vm5737_vm3, %v7586_v22  ;;  %7607 = vrcp.f32 %v5341_v41  ;;  %v4430_v30 = vadd.f32 %v6535_v37, %v3595_v62  ;;  %v4424_v10 = vpop.f32.mrb[93].mxu1  ;;  %v2606_v22 = vld [vmem:[%s12953_s4 + $0x2a0] sm:$0xff] }
 0x799   :  { %v7590_v21 = vpop.eup %7589  ;;  %v5344_v9 = vadd.f32 1.0, %v7588_v39  ;;  %7609 = vpow2.f32 %v6165_v23  ;;  %v4425_v20 = vadd.f32 %v4424_v10, %v3590_v35  ;;  %v13091_v39 = vld [vmem:[#allocation36_spill] sm:$0xff] }
 0x79a   :  { %v7592_v43 = vpop.eup %7591  ;;  %v5343_v16 = vadd.f32 1.0, %v7590_v21  ;;  %7611 = vpow2.f32 %v6164_v25  ;;  %v6167_v5 = vmul.f32 -1.442695, %v4430_v30  ;;  %v3635_v30 = vadd.f32 %v13091_v39, %v2607_v54  ;;  %v13092_v21 = vld [vmem:[#allocation35_spill] sm:$0xff] }
 0x79b   :  { %v7594_v51 = vpop.eup %7593  ;;  %5800 = vst.msk [vmem:[%s12954_s5 + $0x1f0] sm:$0xff] %vm5737_vm3, %v7592_v43  ;;  %7613 = vrcp.f32 %v5344_v9  ;;  %v6166_v48 = vmul.f32 -1.442695, %v4425_v20  ;;  %v6538_v7 = vpop.f32.mrb[94].mxu1  ;;  %v3630_v9 = vadd.f32 %v13092_v21, %v2606_v22  ;;  %v2609_v20 = vld [vmem:[%s12953_s4 + $0x2b8] sm:$0xff] }
 0x79c   :  { %v7596_v2 = vpop.eup %7595  ;;  %5803 = vst.msk [vmem:[%s12954_s5 + $0x208] sm:$0xff] %vm5737_vm3, %v7594_v51  ;;  %7615 = vrcp.f32 %v5343_v16  ;;  %v4440_v46 = vadd.f32 %v6538_v7, %v3605_v12  ;;  %v4434_v47 = vpop.f32.mrb[95].mxu1  ;;  %v2608_v51 = vld [vmem:[%s12953_s4 + $0x2b0] sm:$0xff] }
 0x79d   :  { %v7598_v40 = vpop.eup %7597  ;;  %v5346_v34 = vadd.f32 1.0, %v7596_v2  ;;  %7617 = vpow2.f32 %v6167_v5  ;;  %v4435_v14 = vadd.f32 %v4434_v47, %v3600_v42  ;;  %v13093_v2 = vld [vmem:[#allocation38_spill] sm:$0xff] }
 0x79e   :  { %v7600_v31 = vpop.eup %7599  ;;  %5802 = vst.msk [vmem:[%s12954_s5 + $0x200] sm:$0xff] %vm5737_vm3, %v7598_v40  ;;  %7619 = vpow2.f32 %v6166_v48  ;;  %v6169_v33 = vmul.f32 -1.442695, %v4440_v46  ;;  %v3645_v46 = vadd.f32 %v13093_v2, %v2609_v20 }
 0x79f   :  { %v7602_v26 = vpop.eup %7601  ;;  %7621 = vrcp.f32 %v5346_v34  ;;  %v5345_v11 = vadd.f32 1.0, %v7600_v31  ;;  %v6541_v29 = vpop.f32.mrb[96].mxu1  ;;  %v6168_v13 = vmul.f32 -1.442695, %v4435_v14  ;;  %v13094_v14 = vld [vmem:[#allocation37_spill] sm:$0xff] }
 0x7a0   :  { %v7604_v60 = vpop.eup %7603  ;;  %v5348_v56 = vadd.f32 1.0, %v7602_v26  ;;  %7623 = vpow2.f32 %v6169_v33  ;;  %v4450_v55 = vadd.f32 %v6541_v29, %v3615_v59  ;;  %v4444_v1 = vpop.f32.mrb[97].mxu1  ;;  %v3640_v31 = vadd.f32 %v13094_v14, %v2608_v51  ;;  %v2611_v33 = vld [vmem:[%s12953_s4 + $0x2c8] sm:$0xff] }
 0x7a1   :  { %v7606_v50 = vpop.eup %7605  ;;  %7625 = vrcp.f32 %v5345_v11  ;;  %v5347_v58 = vadd.f32 1.0, %v7604_v60  ;;  %v4445_v4 = vadd.f32 %v4444_v1, %v3610_v28  ;;  %v2610_v11 = vld [vmem:[%s12953_s4 + $0x2c0] sm:$0xff]  ;;  %v13095_v60 = vld [vmem:[#allocation40_spill] sm:$0xff] }
 0x7a2   :  { %v7608_v24 = vpop.eup %7607  ;;  %5805 = vst.msk [vmem:[%s12954_s5 + $0x218] sm:$0xff] %vm5737_vm3, %v7606_v50  ;;  %7627 = vrcp.f32 %v5348_v56  ;;  %v6171_v63 = vmul.f32 -1.442695, %v4450_v55  ;;  %v3655_v56 = vadd.f32 %v13095_v60, %v2611_v33  ;;  %v13096_v50 = vld [vmem:[#allocation39_spill] sm:$0xff]  ;;  %v13101_v33 = vld [vmem:[#allocation46_spill] sm:$0xff] }
 0x7a3   :  { %v7610_v44 = vpop.eup %7609  ;;  %5804 = vst.msk [vmem:[%s12954_s5 + $0x210] sm:$0xff] %vm5737_vm3, %v7608_v24  ;;  %7629 = vrcp.f32 %v5347_v58  ;;  %v6544_v18 = vpop.f32.mrb[98].mxu1  ;;  %v6170_v23 = vmul.f32 -1.442695, %v4445_v4  ;;  %v3650_v58 = vadd.f32 %v13096_v50, %v2610_v11  ;;  %v2613_v4 = vld [vmem:[%s12953_s4 + $0x2d8] sm:$0xff] }
 0x7a4   :  { %v7612_v53 = vpop.eup %7611  ;;  %v5350_v41 = vadd.f32 1.0, %v7610_v44  ;;  %7631 = vpow2.f32 %v6168_v13  ;;  %v4460_v6 = vadd.f32 %v6544_v18, %v3625_v19  ;;  %v4454_v62 = vpop.f32.mrb[99].mxu1  ;;  %v2612_v44 = vld [vmem:[%s12953_s4 + $0x2d0] sm:$0xff] }
 0x7a5   :  { %v7614_v25 = vpop.eup %7613  ;;  %v5349_v37 = vadd.f32 1.0, %v7612_v53  ;;  %7633 = vpow2.f32 %v6171_v63  ;;  %v4455_v36 = vadd.f32 %v4454_v62, %v3620_v57  ;;  %v13097_v53 = vld [vmem:[#allocation42_spill] sm:$0xff] }
 0x7a6   :  { %v7616_v35 = vpop.eup %7615  ;;  %5807 = vst.msk [vmem:[%s12954_s5 + $0x228] sm:$0xff] %vm5737_vm3, %v7614_v25  ;;  %7635 = vrcp.f32 %v5350_v41  ;;  %v6173_v3 = vmul.f32 -1.442695, %v4460_v6  ;;  %v3665_v41 = vadd.f32 %v13097_v53, %v2613_v4  ;;  %v13098_v25 = vld [vmem:[#allocation41_spill] sm:$0xff] }
 0x7a7   :  { %v7618_v10 = vpop.eup %7617  ;;  %5806 = vst.msk [vmem:[%s12954_s5 + $0x220] sm:$0xff] %vm5737_vm3, %v7616_v35  ;;  %7637 = vrcp.f32 %v5349_v37  ;;  %v6547_v61 = vpop.f32.mrb[100].mxu1  ;;  %v6172_v5 = vmul.f32 -1.442695, %v4455_v36  ;;  %v3660_v37 = vadd.f32 %v13098_v25, %v2612_v44  ;;  %v2615_v36 = vld [vmem:[%s12953_s4 + $0x2e8] sm:$0xff] }
 0x7a8   :  { %v7620_v43 = vpop.eup %7619  ;;  %v5352_v16 = vadd.f32 1.0, %v7618_v10  ;;  %7639 = vpow2.f32 %v6170_v23  ;;  %v4470_v27 = vadd.f32 %v6547_v61, %v3635_v30  ;;  %v4464_v12 = vpop.f32.mrb[101].mxu1  ;;  %v2614_v10 = vld [vmem:[%s12953_s4 + $0x2e0] sm:$0xff] }
 0x7a9   :  { %v7622_v48 = vpop.eup %7621  ;;  %v5351_v7 = vadd.f32 1.0, %v7620_v43  ;;  %7641 = vpow2.f32 %v6173_v3  ;;  %v4465_v38 = vadd.f32 %v4464_v12, %v3630_v9  ;;  %v13099_v43 = vld [vmem:[#allocation44_spill] sm:$0xff] }
 0x7aa   :  { %v7624_v42 = vpop.eup %7623  ;;  %5809 = vst.msk [vmem:[%s12954_s5 + $0x238] sm:$0xff] %vm5737_vm3, %v7622_v48  ;;  %7643 = vrcp.f32 %v5352_v16  ;;  %v6175_v0 = vmul.f32 -1.442695, %v4470_v27  ;;  %v3675_v16 = vadd.f32 %v13099_v43, %v2615_v36  ;;  %v13100_v48 = vld [vmem:[#allocation43_spill] sm:$0xff] }
 0x7ab   :  { %v7626_v47 = vpop.eup %7625  ;;  %7645 = vrcp.f32 %v5351_v7  ;;  %v5354_v45 = vadd.f32 1.0, %v7624_v42  ;;  %v6174_v40 = vmul.f32 -1.442695, %v4465_v38  ;;  %v6550_v34 = vpop.f32.mrb[102].mxu1  ;;  %v3670_v7 = vadd.f32 %v13100_v48, %v2614_v10  ;;  %v2617_v38 = vld [vmem:[%s12953_s4 + $0x2f8] sm:$0xff] }
 0x7ac   :  { %v7628_v8 = vpop.eup %7627  ;;  %5808 = vst.msk [vmem:[%s12954_s5 + $0x230] sm:$0xff] %vm5737_vm3, %v7626_v47  ;;  %7647 = vpow2.f32 %v6172_v5  ;;  %v4480_v59 = vadd.f32 %v6550_v34, %v3645_v46  ;;  %v4474_v26 = vpop.f32.mrb[103].mxu1  ;;  %v2616_v46 = vld [vmem:[%s12953_s4 + $0x2f0] sm:$0xff] }
 0x7ad   :  { %v7630_v29 = vpop.eup %7629  ;;  %5811 = vst.msk [vmem:[%s12954_s5 + $0x248] sm:$0xff] %vm5737_vm3, %v7628_v8  ;;  %7649 = vrcp.f32 %v5354_v45  ;;  %v4475_v17 = vadd.f32 %v4474_v26, %v3640_v31  ;;  %v3685_v8 = vadd.f32 %v13101_v33, %v2617_v38 }
 0x7ae   :  { %v7632_v28 = vpop.eup %7631  ;;  %5810 = vst.msk [vmem:[%s12954_s5 + $0x240] sm:$0xff] %vm5737_vm3, %v7630_v29  ;;  %7651 = vpow2.f32 %v6175_v0  ;;  %v6177_v49 = vmul.f32 -1.442695, %v4480_v59 }
 0x7af   :  { %v7634_v13 = vpop.eup %7633  ;;  %v5353_v55 = vadd.f32 1.0, %v7632_v28  ;;  %7653 = vpow2.f32 %v6174_v40  ;;  %v6176_v1 = vmul.f32 -1.442695, %v4475_v17  ;;  %v6553_v32 = vpop.f32.mrb[104].mxu1  ;;  %v13102_v17 = vld [vmem:[#allocation45_spill] sm:$0xff] }
 0x7b0   :  { %v7636_v24 = vpop.eup %7635  ;;  %v5356_v63 = vadd.f32 1.0, %v7634_v13  ;;  %7655 = vpow2.f32 %v6177_v49  ;;  %v4490_v52 = vadd.f32 %v6553_v32, %v3655_v56  ;;  %v4484_v19 = vpop.f32.mrb[105].mxu1  ;;  %v3680_v28 = vadd.f32 %v13102_v17, %v2616_v46  ;;  %v2619_v49 = vld [vmem:[%s12953_s4 + $0x308] sm:$0xff]  ;;  %v2625_v46 = vld [vmem:[%s12953_s4 + $0x338] sm:$0xff]  ;;  %v13109_v17 = vld [vmem:[#allocation54_spill] sm:$0xff] }
 0x7b1   :  { %v7638_v18 = vpop.eup %7637  ;;  %5813 = vst.msk [vmem:[%s12954_s5 + $0x258] sm:$0xff] %vm5737_vm3, %v7636_v24  ;;  %7657 = vrcp.f32 %v5353_v55  ;;  %v4485_v15 = vadd.f32 %v4484_v19, %v3650_v58  ;;  %v2618_v55 = vld [vmem:[%s12953_s4 + $0x300] sm:$0xff]  ;;  %v13103_v24 = vld [vmem:[#allocation48_spill] sm:$0xff] }
 0x7b2   :  { %v7640_v57 = vpop.eup %7639  ;;  %5812 = vst.msk [vmem:[%s12954_s5 + $0x250] sm:$0xff] %vm5737_vm3, %v7638_v18  ;;  %7659 = vrcp.f32 %v5356_v63  ;;  %v6179_v54 = vmul.f32 -1.442695, %v4490_v52  ;;  %v3695_v63 = vadd.f32 %v13103_v24, %v2619_v49 }
 0x7b3   :  { %v7642_v23 = vpop.eup %7641  ;;  %v5355_v6 = vadd.f32 1.0, %v7640_v57  ;;  %7661 = vpow2.f32 %v6176_v1  ;;  %v6178_v62 = vmul.f32 -1.442695, %v4485_v15  ;;  %v6556_v22 = vpop.f32.mrb[106].mxu1  ;;  %v13104_v15 = vld [vmem:[#allocation47_spill] sm:$0xff] }
 0x7b4   :  { %v7644_v35 = vpop.eup %7643  ;;  %v5358_v3 = vadd.f32 1.0, %v7642_v23  ;;  %7663 = vpow2.f32 %v6179_v54  ;;  %v4500_v39 = vadd.f32 %v6556_v22, %v3665_v41  ;;  %v4494_v30 = vpop.f32.mrb[107].mxu1  ;;  %v3690_v57 = vadd.f32 %v13104_v15, %v2618_v55  ;;  %v2621_v54 = vld [vmem:[%s12953_s4 + $0x318] sm:$0xff]  ;;  %v13111_v15 = vld [vmem:[#allocation56_spill] sm:$0xff] }
 0x7b5   :  { %v7646_v61 = vpop.eup %7645  ;;  %5815 = vst.msk [vmem:[%s12954_s5 + $0x268] sm:$0xff] %vm5737_vm3, %v7644_v35  ;;  %7665 = vrcp.f32 %v5355_v6  ;;  %v4495_v21 = vadd.f32 %v4494_v30, %v3660_v37  ;;  %v2620_v6 = vld [vmem:[%s12953_s4 + $0x310] sm:$0xff]  ;;  %v13105_v35 = vld [vmem:[#allocation50_spill] sm:$0xff] }
 0x7b6   :  { %v7648_v9 = vpop.eup %7647  ;;  %5814 = vst.msk [vmem:[%s12954_s5 + $0x260] sm:$0xff] %vm5737_vm3, %v7646_v61  ;;  %7667 = vrcp.f32 %v5358_v3  ;;  %v6181_v20 = vmul.f32 -1.442695, %v4500_v39  ;;  %v3705_v3 = vadd.f32 %v13105_v35, %v2621_v54  ;;  %v13106_v61 = vld [vmem:[#allocation49_spill] sm:$0xff] }
 0x7b7   :  { %v7650_v5 = vpop.eup %7649  ;;  %v5357_v27 = vadd.f32 1.0, %v7648_v9  ;;  %7669 = vpow2.f32 %v6178_v62  ;;  %v6180_v12 = vmul.f32 -1.442695, %v4495_v21  ;;  %v6559_v51 = vpop.f32.mrb[108].mxu1  ;;  %v3700_v21 = vadd.f32 %v13106_v61, %v2620_v6  ;;  %v2623_v9 = vld [vmem:[%s12953_s4 + $0x328] sm:$0xff] }
 0x7b8   :  { %v7652_v42 = vpop.eup %7651  ;;  %5817 = vst.msk [vmem:[%s12954_s5 + $0x278] sm:$0xff] %vm5737_vm3, %v7650_v5  ;;  %7671 = vpow2.f32 %v6181_v20  ;;  %v4510_v0 = vadd.f32 %v6559_v51, %v3675_v16  ;;  %v4504_v2 = vpop.f32.mrb[109].mxu1 }
 0x7b9   :  { %v7654_v47 = vpop.eup %7653  ;;  %7673 = vrcp.f32 %v5357_v27  ;;  %v5360_v45 = vadd.f32 1.0, %v7652_v42  ;;  %v4505_v40 = vadd.f32 %v4504_v2, %v3670_v7  ;;  %v2622_v27 = vld [vmem:[%s12953_s4 + $0x320] sm:$0xff]  ;;  %v13107_v42 = vld [vmem:[#allocation52_spill] sm:$0xff] }
 0x7ba   :  { %v7656_v34 = vpop.eup %7655  ;;  %v5359_v14 = vadd.f32 1.0, %v7654_v47  ;;  %7675 = vpow2.f32 %v6180_v12  ;;  %v6183_v31 = vmul.f32 -1.442695, %v4510_v0  ;;  %v3715_v0 = vadd.f32 %v13107_v42, %v2623_v9 }
 0x7bb   :  { %v7658_v59 = vpop.eup %7657  ;;  %7677 = vrcp.f32 %v5360_v45  ;;  %v5362_v26 = vadd.f32 1.0, %v7656_v34  ;;  %v6182_v11 = vmul.f32 -1.442695, %v4505_v40  ;;  %v6562_v29 = vpop.f32.mrb[110].mxu1  ;;  %v13108_v40 = vld [vmem:[#allocation51_spill] sm:$0xff] }
 0x7bc   :  { %v7660_v60 = vpop.eup %7659  ;;  %5816 = vst.msk [vmem:[%s12954_s5 + $0x270] sm:$0xff] %vm5737_vm3, %v7658_v59  ;;  %7679 = vrcp.f32 %v5359_v14  ;;  %v4520_v56 = vadd.f32 %v6562_v29, %v3685_v8  ;;  %v4514_v13 = vpop.f32.mrb[111].mxu1  ;;  %v3710_v34 = vadd.f32 %v13108_v40, %v2622_v27  ;;  %v2624_v8 = vld [vmem:[%s12953_s4 + $0x330] sm:$0xff]  ;;  %v2631_v27 = vld [vmem:[%s12953_s4 + $0x368] sm:$0xff] }
 0x7bd   :  { %v7662_v1 = vpop.eup %7661  ;;  %5819 = vst.msk [vmem:[%s12954_s5 + $0x288] sm:$0xff] %vm5737_vm3, %v7660_v60  ;;  %7681 = vrcp.f32 %v5362_v26  ;;  %v4515_v32 = vadd.f32 %v4514_v13, %v3680_v28  ;;  %v3725_v28 = vadd.f32 %v13109_v17, %v2625_v46  ;;  %v2627_v13 = vld [vmem:[%s12953_s4 + $0x348] sm:$0xff]  ;;  %v2632_v17 = vld [vmem:[%s12953_s4 + $0x370] sm:$0xff] }
 0x7be   :  { %v7664_v50 = vpop.eup %7663  ;;  %v5361_v58 = vadd.f32 1.0, %v7662_v1  ;;  %7683 = vpow2.f32 %v6183_v31  ;;  %v6185_v4 = vmul.f32 -1.442695, %v4520_v56 }
 0x7bf   :  { %v7666_v52 = vpop.eup %7665  ;;  %v5364_v19 = vadd.f32 1.0, %v7664_v50  ;;  %7685 = vpow2.f32 %v6182_v11  ;;  %v6184_v44 = vmul.f32 -1.442695, %v4515_v32  ;;  %v6565_v18 = vpop.f32.mrb[112].mxu1  ;;  %v13110_v32 = vld [vmem:[#allocation53_spill] sm:$0xff] }
 0x7c0   :  { %v7668_v53 = vpop.eup %7667  ;;  %5818 = vst.msk [vmem:[%s12954_s5 + $0x280] sm:$0xff] %vm5737_vm3, %v7666_v52  ;;  %7687 = vrcp.f32 %v5361_v58  ;;  %v4530_v41 = vadd.f32 %v6565_v18, %v3695_v63  ;;  %v4524_v23 = vpop.f32.mrb[113].mxu1  ;;  %v3720_v50 = vadd.f32 %v13110_v32, %v2624_v8  ;;  %v13116_v8 = vld [vmem:[#allocation59_spill] sm:$0xff] }
 0x7c1   :  { %v7670_v62 = vpop.eup %7669  ;;  %5821 = vst.msk [vmem:[%s12954_s5 + $0x298] sm:$0xff] %vm5737_vm3, %v7668_v53  ;;  %7689 = vrcp.f32 %v5364_v19  ;;  %v4525_v22 = vadd.f32 %v4524_v23, %v3690_v57  ;;  %v3735_v57 = vadd.f32 %v13111_v15, %v2627_v13  ;;  %v13112_v23 = vld [vmem:[#allocation55_spill] sm:$0xff]  ;;  %v2634_v15 = vld [vmem:[%s12953_s4 + $0x380] sm:$0xff] }
 0x7c2   :  { %v7672_v25 = vpop.eup %7671  ;;  %v5363_v37 = vadd.f32 1.0, %v7670_v62  ;;  %7691 = vpow2.f32 %v6185_v4  ;;  %v6187_v36 = vmul.f32 -1.442695, %v4530_v41  ;;  %v2626_v4 = vld [vmem:[%s12953_s4 + $0x340] sm:$0xff]  ;;  %v2629_v62 = vld [vmem:[%s12953_s4 + $0x358] sm:$0xff] }
 0x7c3   :  { %v7674_v39 = vpop.eup %7673  ;;  %v5366_v30 = vadd.f32 1.0, %v7672_v25  ;;  %7693 = vpow2.f32 %v6184_v44  ;;  %v6568_v10 = vpop.f32.mrb[114].mxu1  ;;  %v6186_v43 = vmul.f32 -1.442695, %v4525_v22  ;;  %v3730_v6 = vadd.f32 %v13112_v23, %v2626_v4 }
 0x7c4   :  { %v7676_v20 = vpop.eup %7675  ;;  %5820 = vst.msk [vmem:[%s12954_s5 + $0x290] sm:$0xff] %vm5737_vm3, %v7674_v39  ;;  %7695 = vrcp.f32 %v5363_v37  ;;  %v4540_v16 = vadd.f32 %v6568_v10, %v3705_v3  ;;  %v4534_v5 = vpop.f32.mrb[115].mxu1 }
 0x7c5   :  { %v7678_v12 = vpop.eup %7677  ;;  %7697 = vrcp.f32 %v5366_v30  ;;  %v5365_v51 = vadd.f32 1.0, %v7676_v20  ;;  %v4535_v48 = vadd.f32 %v4534_v5, %v3700_v21  ;;  %v13113_v21 = vld [vmem:[#allocation58_spill] sm:$0xff] }
 0x7c6   :  { %v7680_v7 = vpop.eup %7679  ;;  %5823 = vst.msk [vmem:[%s12954_s5 + $0x2a8] sm:$0xff] %vm5737_vm3, %v7678_v12  ;;  %7699 = vpow2.f32 %v6187_v36  ;;  %v6189_v38 = vmul.f32 -1.442695, %v4540_v16  ;;  %v2628_v36 = vld [vmem:[%s12953_s4 + $0x350] sm:$0xff]  ;;  %v3745_v9 = vadd.f32 %v13113_v21, %v2629_v62  ;;  %v13114_v16 = vld [vmem:[#allocation57_spill] sm:$0xff] }
 0x7c7   :  { %v7682_v2 = vpop.eup %7681  ;;  %5822 = vst.msk [vmem:[%s12954_s5 + $0x2a0] sm:$0xff] %vm5737_vm3, %v7680_v7  ;;  %7701 = vrcp.f32 %v5365_v51  ;;  %v6188_v47 = vmul.f32 -1.442695, %v4535_v48  ;;  %v6571_v45 = vpop.f32.mrb[116].mxu1  ;;  %v3740_v5 = vadd.f32 %v13114_v16, %v2628_v36  ;;  %v2630_v7 = vld [vmem:[%s12953_s4 + $0x360] sm:$0xff] }
 0x7c8   :  { %v7684_v14 = vpop.eup %7683  ;;  %5825 = vst.msk [vmem:[%s12954_s5 + $0x2b8] sm:$0xff] %vm5737_vm3, %v7682_v2  ;;  %7703 = vpow2.f32 %v6186_v43  ;;  %v4550_v31 = vadd.f32 %v6571_v45, %v3715_v0  ;;  %v4544_v33 = vpop.f32.mrb[117].mxu1 }
 0x7c9   :  { %v7686_v59 = vpop.eup %7685  ;;  %v5368_v26 = vadd.f32 1.0, %v7684_v14  ;;  %7705 = vpow2.f32 %v6189_v38  ;;  %v4545_v11 = vadd.f32 %v4544_v33, %v3710_v34  ;;  %v13115_v34 = vld [vmem:[#allocation60_spill] sm:$0xff] }
 0x7ca   :  { %v7688_v29 = vpop.eup %7687  ;;  %v5367_v49 = vadd.f32 1.0, %v7686_v59  ;;  %7707 = vpow2.f32 %v6188_v47  ;;  %v6191_v60 = vmul.f32 -1.442695, %v4550_v31  ;;  %v3755_v14 = vadd.f32 %v13115_v34, %v2631_v27  ;;  %v2638_v34 = vld [vmem:[%s12953_s4 + $0x3a0] sm:$0xff] }
 0x7cb   :  { %v7690_v56 = vpop.eup %7689  ;;  %5824 = vst.msk [vmem:[%s12954_s5 + $0x2b0] sm:$0xff] %vm5737_vm3, %v7688_v29  ;;  %7709 = vrcp.f32 %v5368_v26  ;;  %v6190_v55 = vmul.f32 -1.442695, %v4545_v11  ;;  %v6574_v1 = vpop.f32.mrb[118].mxu1  ;;  %v3750_v59 = vadd.f32 %v13116_v8, %v2630_v7  ;;  %v2633_v26 = vld [vmem:[%s12953_s4 + $0x378] sm:$0xff] }
 0x7cc   :  { %v7692_v58 = vpop.eup %7691  ;;  %5827 = vst.msk [vmem:[%s12954_s5 + $0x2c8] sm:$0xff] %vm5737_vm3, %v7690_v56  ;;  %7711 = vrcp.f32 %v5367_v49  ;;  %v4560_v24 = vadd.f32 %v6574_v1, %v3725_v28  ;;  %v4554_v63 = vpop.f32.mrb[119].mxu1 }
 0x7cd   :  { %v7694_v52 = vpop.eup %7693  ;;  %v5370_v19 = vadd.f32 1.0, %v7692_v58  ;;  %7713 = vpow2.f32 %v6191_v60  ;;  %v4555_v44 = vadd.f32 %v4554_v63, %v3720_v50  ;;  %v13117_v50 = vld [vmem:[#allocation62_spill] sm:$0xff]  ;;  %v13118_v63 = vld [vmem:[#allocation61_spill] sm:$0xff] }
 0x7ce   :  { %v7696_v18 = vpop.eup %7695  ;;  %v5369_v54 = vadd.f32 1.0, %v7694_v52  ;;  %7715 = vpow2.f32 %v6190_v55  ;;  %v6193_v53 = vmul.f32 -1.442695, %v4560_v24  ;;  %v3765_v58 = vadd.f32 %v13117_v50, %v2633_v26  ;;  %v2640_v50 = vld [vmem:[%s12953_s4 + $0x3b0] sm:$0xff] }
 0x7cf   :  { %v7698_v41 = vpop.eup %7697  ;;  %5826 = vst.msk [vmem:[%s12954_s5 + $0x2c0] sm:$0xff] %vm5737_vm3, %v7696_v18  ;;  %7717 = vrcp.f32 %v5370_v19  ;;  %v6192_v22 = vmul.f32 -1.442695, %v4555_v44  ;;  %v6577_v25 = vpop.f32.mrb[120].mxu1  ;;  %v3760_v52 = vadd.f32 %v13118_v63, %v2632_v17  ;;  %v2635_v19 = vld [vmem:[%s12953_s4 + $0x388] sm:$0xff] }
 0x7d0   :  { %v7700_v37 = vpop.eup %7699  ;;  %5829 = vst.msk [vmem:[%s12954_s5 + $0x2d8] sm:$0xff] %vm5737_vm3, %v7698_v41  ;;  %7719 = vrcp.f32 %v5369_v54  ;;  %v4570_v35 = vadd.f32 %v6577_v25, %v3735_v57  ;;  %v4564_v3 = vpop.f32.mrb[121].mxu1  ;;  %v13119_v25 = vld [vmem:[#allocation64_spill] sm:$0xff] }
 0x7d1   :  { %v7702_v39 = vpop.eup %7701  ;;  %v5372_v30 = vadd.f32 1.0, %v7700_v37  ;;  %7721 = vpow2.f32 %v6193_v53  ;;  %v4565_v10 = vadd.f32 %v4564_v3, %v3730_v6  ;;  %v3775_v37 = vadd.f32 %v13119_v25, %v2635_v19  ;;  %v13120_v3 = vld [vmem:[#allocation63_spill] sm:$0xff]  ;;  %v2642_v25 = vld [vmem:[%s12953_s4 + $0x3c0] sm:$0xff] }
 0x7d2   :  { %v7704_v61 = vpop.eup %7703  ;;  %5828 = vst.msk [vmem:[%s12954_s5 + $0x2d0] sm:$0xff] %vm5737_vm3, %v7702_v39  ;;  %7723 = vpow2.f32 %v6192_v22  ;;  %v6195_v20 = vmul.f32 -1.442695, %v4570_v35  ;;  %v3770_v39 = vadd.f32 %v13120_v3, %v2634_v15 }
 0x7d3   :  { %v7706_v43 = vpop.eup %7705  ;;  %7725 = vrcp.f32 %v5372_v30  ;;  %v5371_v12 = vadd.f32 1.0, %v7704_v61  ;;  %v6580_v51 = vpop.f32.mrb[122].mxu1  ;;  %v6194_v42 = vmul.f32 -1.442695, %v4565_v10  ;;  %v2637_v30 = vld [vmem:[%s12953_s4 + $0x398] sm:$0xff] }
 0x7d4   :  { %v7708_v48 = vpop.eup %7707  ;;  %v5374_v38 = vadd.f32 1.0, %v7706_v43  ;;  %7727 = vpow2.f32 %v6195_v20  ;;  %v4580_v0 = vadd.f32 %v6580_v51, %v3745_v9  ;;  %v4574_v2 = vpop.f32.mrb[123].mxu1  ;;  %v2636_v20 = vld [vmem:[%s12953_s4 + $0x390] sm:$0xff]  ;;  %v13121_v51 = vld [vmem:[#allocation66_spill] sm:$0xff] }
 0x7d5   :  { %v7710_v46 = vpop.eup %7709  ;;  %7729 = vrcp.f32 %v5371_v12  ;;  %v5373_v47 = vadd.f32 1.0, %v7708_v48  ;;  %v4575_v45 = vadd.f32 %v4574_v2, %v3740_v5  ;;  %v3785_v48 = vadd.f32 %v13121_v51, %v2637_v30  ;;  %v2639_v2 = vld [vmem:[%s12953_s4 + $0x3a8] sm:$0xff] }
 0x7d6   :  { %v7712_v40 = vpop.eup %7711  ;;  %5831 = vst.msk [vmem:[%s12954_s5 + $0x2e8] sm:$0xff] %vm5737_vm3, %v7710_v46  ;;  %7731 = vrcp.f32 %v5374_v38  ;;  %v6197_v31 = vmul.f32 -1.442695, %v4580_v0 }
 0x7d7   :  { %v7714_v33 = vpop.eup %7713  ;;  %5830 = vst.msk [vmem:[%s12954_s5 + $0x2e0] sm:$0xff] %vm5737_vm3, %v7712_v40  ;;  %7733 = vrcp.f32 %v5373_v47  ;;  %v6583_v11 = vpop.f32.mrb[124].mxu1  ;;  %v6196_v49 = vmul.f32 -1.442695, %v4575_v45 }
 0x7d8   :  { %v7716_v29 = vpop.eup %7715  ;;  %v5376_v28 = vadd.f32 1.0, %v7714_v33  ;;  %7735 = vpow2.f32 %v6194_v42  ;;  %v4590_v60 = vadd.f32 %v6583_v11, %v3755_v14  ;;  %v4584_v56 = vpop.f32.mrb[125].mxu1  ;;  %v13122_v42 = vld [vmem:[#allocation65_spill] sm:$0xff]  ;;  %v13123_v11 = vld [vmem:[#allocation68_spill] sm:$0xff] }
 0x7d9   :  { %v7718_v13 = vpop.eup %7717  ;;  %v5375_v55 = vadd.f32 1.0, %v7716_v29  ;;  %7737 = vpow2.f32 %v6197_v31  ;;  %v4585_v1 = vadd.f32 %v4584_v56, %v3750_v59  ;;  %v3780_v0 = vadd.f32 %v13122_v42, %v2636_v20  ;;  %v2641_v56 = vld [vmem:[%s12953_s4 + $0x3b8] sm:$0xff] }
 0x7da   :  { %v7720_v32 = vpop.eup %7719  ;;  %5833 = vst.msk [vmem:[%s12954_s5 + $0x2f8] sm:$0xff] %vm5737_vm3, %v7718_v13  ;;  %7739 = vrcp.f32 %v5376_v28  ;;  %v6199_v4 = vmul.f32 -1.442695, %v4590_v60  ;;  %v3795_v29 = vadd.f32 %v13123_v11, %v2639_v2 }
 0x7db   :  { %v7722_v24 = vpop.eup %7721  ;;  %5832 = vst.msk [vmem:[%s12954_s5 + $0x2f0] sm:$0xff] %vm5737_vm3, %v7720_v32  ;;  %7741 = vrcp.f32 %v5375_v55  ;;  %v6586_v44 = vpop.f32.mrb[126].mxu1  ;;  %v6198_v54 = vmul.f32 -1.442695, %v4585_v1 }
 0x7dc   :  { %v7724_v18 = vpop.eup %7723  ;;  %v5378_v57 = vadd.f32 1.0, %v7722_v24  ;;  %7743 = vpow2.f32 %v6196_v49  ;;  %v4600_v53 = vadd.f32 %v6586_v44, %v3765_v58  ;;  %v4594_v41 = vpop.f32.mrb[127].mxu1  ;;  %v13124_v49 = vld [vmem:[#allocation67_spill] sm:$0xff]  ;;  %v13125_v44 = vld [vmem:[#allocation70_spill] sm:$0xff] }
 0x7dd   :  { %v7726_v23 = vpop.eup %7725  ;;  %v5377_v6 = vadd.f32 1.0, %v7724_v18  ;;  %7745 = vpow2.f32 %v6199_v4  ;;  %v4595_v62 = vadd.f32 %v4594_v41, %v3760_v52  ;;  %v3790_v60 = vadd.f32 %v13124_v49, %v2638_v34  ;;  %v2643_v41 = vld [vmem:[%s12953_s4 + $0x3c8] sm:$0xff] }
 0x7de   :  { %v7728_v22 = vpop.eup %7727  ;;  %5835 = vst.msk [vmem:[%s12954_s5 + $0x308] sm:$0xff] %vm5737_vm3, %v7726_v23  ;;  %7747 = vrcp.f32 %v5378_v57  ;;  %v6201_v36 = vmul.f32 -1.442695, %v4600_v53  ;;  %v3805_v18 = vadd.f32 %v13125_v44, %v2641_v56 }
 0x7df   :  { %v7730_v35 = vpop.eup %7729  ;;  %7749 = vrcp.f32 %v5377_v6  ;;  %v5380_v10 = vadd.f32 1.0, %v7728_v22  ;;  %v6200_v61 = vmul.f32 -1.442695, %v4595_v62  ;;  %v6589_v21 = vpop.f32.mrb[128].mxu1 }
 0x7e0   :  { %v7732_v9 = vpop.eup %7731  ;;  %5834 = vst.msk [vmem:[%s12954_s5 + $0x300] sm:$0xff] %vm5737_vm3, %v7730_v35  ;;  %7751 = vpow2.f32 %v6198_v54  ;;  %v4610_v43 = vadd.f32 %v6589_v21, %v3775_v37  ;;  %v4604_v16 = vpop.f32.mrb[129].mxu1  ;;  %v13126_v54 = vld [vmem:[#allocation69_spill] sm:$0xff] }
 0x7e1   :  { %v7734_v5 = vpop.eup %7733  ;;  %5837 = vst.msk [vmem:[%s12954_s5 + $0x318] sm:$0xff] %vm5737_vm3, %v7732_v9  ;;  %7753 = vrcp.f32 %v5380_v10  ;;  %v4605_v27 = vadd.f32 %v4604_v16, %v3770_v39  ;;  %v3800_v53 = vadd.f32 %v13126_v54, %v2640_v50  ;;  %v13127_v10 = vld [vmem:[#allocation72_spill] sm:$0xff] }
 0x7e2   :  { %v7736_v12 = vpop.eup %7735  ;;  %5836 = vst.msk [vmem:[%s12954_s5 + $0x310] sm:$0xff] %vm5737_vm3, %v7734_v5  ;;  %7755 = vpow2.f32 %v6201_v36  ;;  %v6203_v7 = vmul.f32 -1.442695, %v4610_v43  ;;  %v13128_v43 = vld [vmem:[#allocation71_spill] sm:$0xff]  ;;  %v2645_v5 = vld [vmem:[%s12953_s4 + $0x3d8] sm:$0xff] }
 0x7e3   :  { %v7738_v38 = vpop.eup %7737  ;;  %v5379_v46 = vadd.f32 1.0, %v7736_v12  ;;  %7757 = vpow2.f32 %v6200_v61  ;;  %v6202_v47 = vmul.f32 -1.442695, %v4605_v27  ;;  %v6592_v45 = vpop.f32.mrb[130].mxu1  ;;  %v3815_v61 = vadd.f32 %v13127_v10, %v2643_v41 }
 0x7e4   :  { %v7740_v40 = vpop.eup %7739  ;;  %v5382_v14 = vadd.f32 1.0, %v7738_v38  ;;  %7759 = vpow2.f32 %v6203_v7  ;;  %v4620_v31 = vadd.f32 %v6592_v45, %v3785_v48  ;;  %v4614_v33 = vpop.f32.mrb[131].mxu1  ;;  %v3810_v16 = vadd.f32 %v13128_v43, %v2642_v25  ;;  %v2644_v7 = vld [vmem:[%s12953_s4 + $0x3d0] sm:$0xff] }
 0x7e5   :  { %v7742_v8 = vpop.eup %7741  ;;  %5839 = vst.msk [vmem:[%s12954_s5 + $0x328] sm:$0xff] %vm5737_vm3, %v7740_v40  ;;  %7761 = vrcp.f32 %v5379_v46  ;;  %v4615_v59 = vadd.f32 %v4614_v33, %v3780_v0 }
 0x7e6   :  { %v7744_v26 = vpop.eup %7743  ;;  %5838 = vst.msk [vmem:[%s12954_s5 + $0x320] sm:$0xff] %vm5737_vm3, %v7742_v8  ;;  %7763 = vrcp.f32 %v5382_v14  ;;  %v6205_v17 = vmul.f32 -1.442695, %v4620_v31  ;;  %v13130_v31 = vld [vmem:[#allocation73_spill] sm:$0xff]  ;;  %v2647_v8 = vld [vmem:[%s12953_s4 + $0x3e8] sm:$0xff] }
 0x7e7   :  { %v7746_v28 = vpop.eup %7745  ;;  %v5381_v13 = vadd.f32 1.0, %v7744_v26  ;;  %7765 = vpow2.f32 %v6202_v47  ;;  %v6204_v55 = vmul.f32 -1.442695, %v4615_v59  ;;  %v6595_v1 = vpop.f32.mrb[132].mxu1  ;;  %v13129_v47 = vld [vmem:[#allocation74_spill] sm:$0xff]  ;;  %v3820_v33 = vadd.f32 %v13130_v31, %v2644_v7 }
 0x7e8   :  { %v7748_v32 = vpop.eup %7747  ;;  %v5384_v58 = vadd.f32 1.0, %v7746_v28  ;;  %7767 = vpow2.f32 %v6205_v17  ;;  %v4630_v4 = vadd.f32 %v6595_v1, %v3795_v29  ;;  %v4624_v24 = vpop.f32.mrb[133].mxu1  ;;  %v3825_v45 = vadd.f32 %v13129_v47, %v2645_v5  ;;  %v2646_v17 = vld [vmem:[%s12953_s4 + $0x3e0] sm:$0xff] }
 0x7e9   :  { %v7750_v63 = vpop.eup %7749  ;;  %5841 = vst.msk [vmem:[%s12954_s5 + $0x338] sm:$0xff] %vm5737_vm3, %v7748_v32  ;;  %7769 = vrcp.f32 %v5381_v13  ;;  %v4625_v52 = vadd.f32 %v4624_v24, %v3790_v60 }
 0x7ea   :  { %v7752_v19 = vpop.eup %7751  ;;  %5840 = vst.msk [vmem:[%s12954_s5 + $0x330] sm:$0xff] %vm5737_vm3, %v7750_v63  ;;  %7771 = vrcp.f32 %v5384_v58  ;;  %v6207_v15 = vmul.f32 -1.442695, %v4630_v4  ;;  %v13132_v4 = vld [vmem:[#allocation75_spill] sm:$0xff]  ;;  %v2649_v63 = vld [vmem:[%s12953_s4 + $0x3f8] sm:$0xff] }
 0x7eb   :  { %v7754_v57 = vpop.eup %7753  ;;  %v5383_v23 = vadd.f32 1.0, %v7752_v19  ;;  %7773 = vpow2.f32 %v6204_v55  ;;  %v6206_v6 = vmul.f32 -1.442695, %v4625_v52  ;;  %v6598_v62 = vpop.f32.mrb[134].mxu1  ;;  %v13131_v55 = vld [vmem:[#allocation76_spill] sm:$0xff]  ;;  %v3830_v24 = vadd.f32 %v13132_v4, %v2646_v17 }
 0x7ec   :  { %v7756_v22 = vpop.eup %7755  ;;  %5843 = vst.msk [vmem:[%s12954_s5 + $0x348] sm:$0xff] %vm5737_vm3, %v7754_v57  ;;  %7775 = vpow2.f32 %v6207_v15  ;;  %v4640_v37 = vadd.f32 %v6598_v62, %v3805_v18  ;;  %v4634_v36 = vpop.f32.mrb[135].mxu1  ;;  %v3835_v1 = vadd.f32 %v13131_v55, %v2647_v8  ;;  %v2648_v18 = vld [vmem:[%s12953_s4 + $0x3f0] sm:$0xff]  ;;  %v13133_v62 = vld [vmem:[#allocation78_spill] sm:$0xff] }
 0x7ed   :  { %v7758_v35 = vpop.eup %7757  ;;  %7777 = vrcp.f32 %v5383_v23  ;;  %v5386_v3 = vadd.f32 1.0, %v7756_v22  ;;  %v4635_v39 = vadd.f32 %v4634_v36, %v3800_v53  ;;  %v3845_v22 = vadd.f32 %v13133_v62, %v2649_v63  ;;  %v13134_v36 = vld [vmem:[#allocation77_spill] sm:$0xff] }
 0x7ee   :  { %v7760_v30 = vpop.eup %7759  ;;  %v5385_v21 = vadd.f32 1.0, %v7758_v35  ;;  %7779 = vpow2.f32 %v6206_v6  ;;  %v6209_v9 = vmul.f32 -1.442695, %v4640_v37  ;;  %v3840_v35 = vadd.f32 %v13134_v36, %v2648_v18 }
 0x7ef   :  { %v7762_v20 = vpop.eup %7761  ;;  %7781 = vrcp.f32 %v5386_v3  ;;  %v5388_v27 = vadd.f32 1.0, %v7760_v30  ;;  %v6208_v12 = vmul.f32 -1.442695, %v4635_v39  ;;  %v6601_v51 = vpop.f32.mrb[136].mxu1  ;;  %v2651_v3 = vld [vmem:[%s12953_s4 + $0x408] sm:$0xff] }
 0x7f0   :  { %v7764_v48 = vpop.eup %7763  ;;  %5842 = vst.msk [vmem:[%s12954_s5 + $0x340] sm:$0xff] %vm5737_vm3, %v7762_v20  ;;  %7783 = vrcp.f32 %v5385_v21  ;;  %v4650_v38 = vadd.f32 %v6601_v51, %v3815_v61  ;;  %v4644_v42 = vpop.f32.mrb[137].mxu1  ;;  %v2650_v61 = vld [vmem:[%s12953_s4 + $0x400] sm:$0xff] }
 0x7f1   :  { %v7766_v0 = vpop.eup %7765  ;;  %5845 = vst.msk [vmem:[%s12954_s5 + $0x358] sm:$0xff] %vm5737_vm3, %v7764_v48  ;;  %7785 = vrcp.f32 %v5388_v27  ;;  %v4645_v2 = vadd.f32 %v4644_v42, %v3810_v16  ;;  %v13135_v27 = vld [vmem:[#allocation80_spill] sm:$0xff] }
 0x7f2   :  { %v7768_v46 = vpop.eup %7767  ;;  %v5387_v40 = vadd.f32 1.0, %v7766_v0  ;;  %7787 = vpow2.f32 %v6209_v9  ;;  %v6211_v34 = vmul.f32 -1.442695, %v4650_v38  ;;  %v13136_v38 = vld [vmem:[#allocation79_spill] sm:$0xff]  ;;  %v2653_v0 = vld [vmem:[%s12953_s4 + $0x418] sm:$0xff] }
 0x7f3   :  { %v7770_v14 = vpop.eup %7769  ;;  %v5390_v59 = vadd.f32 1.0, %v7768_v46  ;;  %7789 = vpow2.f32 %v6208_v12  ;;  %v6210_v26 = vmul.f32 -1.442695, %v4645_v2  ;;  %v6604_v11 = vpop.f32.mrb[138].mxu1  ;;  %v3855_v12 = vadd.f32 %v13135_v27, %v2651_v3  ;;  %v2658_v27 = vld [vmem:[%s12953_s4 + $0x440] sm:$0xff] }
 0x7f4   :  { %v7772_v29 = vpop.eup %7771  ;;  %5844 = vst.msk [vmem:[%s12954_s5 + $0x350] sm:$0xff] %vm5737_vm3, %v7770_v14  ;;  %7791 = vrcp.f32 %v5387_v40  ;;  %v4660_v28 = vadd.f32 %v6604_v11, %v3825_v45  ;;  %v4654_v49 = vpop.f32.mrb[139].mxu1  ;;  %v3850_v42 = vadd.f32 %v13136_v38, %v2650_v61  ;;  %v2652_v45 = vld [vmem:[%s12953_s4 + $0x410] sm:$0xff] }
 0x7f5   :  { %v7774_v60 = vpop.eup %7773  ;;  %5847 = vst.msk [vmem:[%s12954_s5 + $0x368] sm:$0xff] %vm5737_vm3, %v7772_v29  ;;  %7793 = vrcp.f32 %v5390_v59  ;;  %v4655_v56 = vadd.f32 %v4654_v49, %v3820_v33  ;;  %v13137_v59 = vld [vmem:[#allocation82_spill] sm:$0xff] }
 0x7f6   :  { %v7776_v13 = vpop.eup %7775  ;;  %v5389_v32 = vadd.f32 1.0, %v7774_v60  ;;  %7795 = vpow2.f32 %v6211_v34  ;;  %v6213_v50 = vmul.f32 -1.442695, %v4660_v28  ;;  %v13138_v28 = vld [vmem:[#allocation81_spill] sm:$0xff]  ;;  %v2655_v60 = vld [vmem:[%s12953_s4 + $0x428] sm:$0xff] }
 0x7f7   :  { %v7778_v58 = vpop.eup %7777  ;;  %v5392_v52 = vadd.f32 1.0, %v7776_v13  ;;  %7797 = vpow2.f32 %v6210_v26  ;;  %v6607_v19 = vpop.f32.mrb[140].mxu1  ;;  %v6212_v15 = vmul.f32 -1.442695, %v4655_v56  ;;  %v3865_v26 = vadd.f32 %v13137_v59, %v2653_v0  ;;  %v2660_v59 = vld [vmem:[%s12953_s4 + $0x450] sm:$0xff] }
 0x7f8   :  { %v7780_v44 = vpop.eup %7779  ;;  %5846 = vst.msk [vmem:[%s12954_s5 + $0x360] sm:$0xff] %vm5737_vm3, %v7778_v58  ;;  %7799 = vrcp.f32 %v5389_v32  ;;  %v4670_v57 = vadd.f32 %v6607_v19, %v3835_v1  ;;  %v4664_v54 = vpop.f32.mrb[141].mxu1  ;;  %v3860_v49 = vadd.f32 %v13138_v28, %v2652_v45  ;;  %v2654_v1 = vld [vmem:[%s12953_s4 + $0x420] sm:$0xff] }
 0x7f9   :  { %v7782_v53 = vpop.eup %7781  ;;  %7801 = vrcp.f32 %v5392_v52  ;;  %v5391_v41 = vadd.f32 1.0, %v7780_v44  ;;  %v4665_v23 = vadd.f32 %v4664_v54, %v3830_v24  ;;  %v13139_v52 = vld [vmem:[#allocation84_spill] sm:$0xff]  ;;  %v2657_v54 = vld [vmem:[%s12953_s4 + $0x438] sm:$0xff] }
 0x7fa   :  { %v7784_v6 = vpop.eup %7783  ;;  %5849 = vst.msk [vmem:[%s12954_s5 + $0x378] sm:$0xff] %vm5737_vm3, %v7782_v53  ;;  %7803 = vpow2.f32 %v6213_v50  ;;  %v6215_v25 = vmul.f32 -1.442695, %v4670_v57  ;;  %v3875_v19 = vadd.f32 %v13139_v52, %v2655_v60 }
 0x7fb   :  { %v7786_v37 = vpop.eup %7785  ;;  %5848 = vst.msk [vmem:[%s12954_s5 + $0x370] sm:$0xff] %vm5737_vm3, %v7784_v6  ;;  %7805 = vrcp.f32 %v5391_v41  ;;  %v6214_v39 = vmul.f32 -1.442695, %v4665_v23  ;;  %v6610_v30 = vpop.f32.mrb[142].mxu1  ;;  %v2656_v6 = vld [vmem:[%s12953_s4 + $0x430] sm:$0xff] }
 0x7fc   :  { %v7788_v10 = vpop.eup %7787  ;;  %5851 = vst.msk [vmem:[%s12954_s5 + $0x388] sm:$0xff] %vm5737_vm3, %v7786_v37  ;;  %7807 = vpow2.f32 %v6212_v15  ;;  %v4680_v21 = vadd.f32 %v6610_v30, %v3845_v22  ;;  %v4674_v9 = vpop.f32.mrb[143].mxu1  ;;  %v13140_v15 = vld [vmem:[#allocation83_spill] sm:$0xff]  ;;  %v13141_v30 = vld [vmem:[#allocation86_spill] sm:$0xff] }
 0x7fd   :  { %v7790_v20 = vpop.eup %7789  ;;  %v5394_v43 = vadd.f32 1.0, %v7788_v10  ;;  %7809 = vpow2.f32 %v6215_v25  ;;  %v4675_v16 = vadd.f32 %v4674_v9, %v3840_v35  ;;  %v3870_v57 = vadd.f32 %v13140_v15, %v2654_v1  ;;  %v13142_v9 = vld [vmem:[#allocation85_spill] sm:$0xff] }
 0x7fe   :  { %v7792_v5 = vpop.eup %7791  ;;  %v5393_v51 = vadd.f32 1.0, %v7790_v20  ;;  %7811 = vpow2.f32 %v6214_v39  ;;  %v6217_v48 = vmul.f32 -1.442695, %v4680_v21  ;;  %v3885_v10 = vadd.f32 %v13141_v30, %v2657_v54  ;;  %v2664_v30 = vld [vmem:[%s12953_s4 + $0x470] sm:$0xff] }
 0x7ff   :  { %v7794_v7 = vpop.eup %7793  ;;  %5850 = vst.msk [vmem:[%s12954_s5 + $0x380] sm:$0xff] %vm5737_vm3, %v7792_v5  ;;  %7813 = vrcp.f32 %v5394_v43  ;;  %v6216_v2 = vmul.f32 -1.442695, %v4675_v16  ;;  %v6613_v46 = vpop.f32.mrb[144].mxu1  ;;  %v3880_v20 = vadd.f32 %v13142_v9, %v2656_v6  ;;  %v2659_v43 = vld [vmem:[%s12953_s4 + $0x448] sm:$0xff] }
 0x800   :  { %v7796_v47 = vpop.eup %7795  ;;  %5853 = vst.msk [vmem:[%s12954_s5 + $0x398] sm:$0xff] %vm5737_vm3, %v7794_v7  ;;  %7815 = vrcp.f32 %v5393_v51  ;;  %v4690_v40 = vadd.f32 %v6613_v46, %v3855_v12  ;;  %v4684_v34 = vpop.f32.mrb[145].mxu1  ;;  %v13143_v46 = vld [vmem:[#allocation88_spill] sm:$0xff] }
 0x801   :  { %v7798_v14 = vpop.eup %7797  ;;  %v5396_v31 = vadd.f32 1.0, %v7796_v47  ;;  %7817 = vpow2.f32 %v6217_v48  ;;  %v4685_v33 = vadd.f32 %v4684_v34, %v3850_v42  ;;  %v3895_v47 = vadd.f32 %v13143_v46, %v2659_v43  ;;  %v13144_v34 = vld [vmem:[#allocation87_spill] sm:$0xff]  ;;  %v2666_v46 = vld [vmem:[%s12953_s4 + $0x480] sm:$0xff] }
 0x802   :  { %v7800_v8 = vpop.eup %7799  ;;  %v5395_v11 = vadd.f32 1.0, %v7798_v14  ;;  %7819 = vpow2.f32 %v6216_v2  ;;  %v6219_v29 = vmul.f32 -1.442695, %v4690_v40  ;;  %v3890_v14 = vadd.f32 %v13144_v34, %v2658_v27 }
 0x803   :  { %v7802_v17 = vpop.eup %7801  ;;  %5852 = vst.msk [vmem:[%s12954_s5 + $0x390] sm:$0xff] %vm5737_vm3, %v7800_v8  ;;  %7821 = vrcp.f32 %v5396_v31  ;;  %v6218_v56 = vmul.f32 -1.442695, %v4685_v33  ;;  %v6616_v13 = vpop.f32.mrb[146].mxu1  ;;  %v2661_v31 = vld [vmem:[%s12953_s4 + $0x458] sm:$0xff] }
 0x804   :  { %v7804_v55 = vpop.eup %7803  ;;  %5855 = vst.msk [vmem:[%s12954_s5 + $0x3a8] sm:$0xff] %vm5737_vm3, %v7802_v17  ;;  %7823 = vrcp.f32 %v5395_v11  ;;  %v4700_v32 = vadd.f32 %v6616_v13, %v3865_v26  ;;  %v4694_v50 = vpop.f32.mrb[147].mxu1  ;;  %v13145_v13 = vld [vmem:[#allocation90_spill] sm:$0xff] }
 0x805   :  { %v7806_v58 = vpop.eup %7805  ;;  %v5398_v4 = vadd.f32 1.0, %v7804_v55  ;;  %7825 = vpow2.f32 %v6219_v29  ;;  %v4695_v24 = vadd.f32 %v4694_v50, %v3860_v49  ;;  %v3905_v55 = vadd.f32 %v13145_v13, %v2661_v31  ;;  %v13146_v50 = vld [vmem:[#allocation89_spill] sm:$0xff]  ;;  %v2668_v13 = vld [vmem:[%s12953_s4 + $0x490] sm:$0xff] }
 0x806   :  { %v7808_v63 = vpop.eup %7807  ;;  %5854 = vst.msk [vmem:[%s12954_s5 + $0x3a0] sm:$0xff] %vm5737_vm3, %v7806_v58  ;;  %7827 = vpow2.f32 %v6218_v56  ;;  %v6221_v44 = vmul.f32 -1.442695, %v4700_v32  ;;  %v3900_v58 = vadd.f32 %v13146_v50, %v2660_v59 }
 0x807   :  { %v7810_v18 = vpop.eup %7809  ;;  %7829 = vrcp.f32 %v5398_v4  ;;  %v5397_v53 = vadd.f32 1.0, %v7808_v63  ;;  %v6619_v41 = vpop.f32.mrb[148].mxu1  ;;  %v6220_v22 = vmul.f32 -1.442695, %v4695_v24  ;;  %v2663_v4 = vld [vmem:[%s12953_s4 + $0x468] sm:$0xff] }
 0x808   :  { %v7812_v23 = vpop.eup %7811  ;;  %v5400_v62 = vadd.f32 1.0, %v7810_v18  ;;  %7831 = vpow2.f32 %v6221_v44  ;;  %v4710_v25 = vadd.f32 %v6619_v41, %v3875_v19  ;;  %v4704_v37 = vpop.f32.mrb[149].mxu1  ;;  %v2662_v44 = vld [vmem:[%s12953_s4 + $0x460] sm:$0xff]  ;;  %v13147_v41 = vld [vmem:[#allocation92_spill] sm:$0xff] }
 0x809   :  { %v7814_v36 = vpop.eup %7813  ;;  %7833 = vrcp.f32 %v5397_v53  ;;  %v5399_v35 = vadd.f32 1.0, %v7812_v23  ;;  %v4705_v3 = vadd.f32 %v4704_v37, %v3870_v57  ;;  %v3915_v23 = vadd.f32 %v13147_v41, %v2663_v4  ;;  %v2665_v37 = vld [vmem:[%s12953_s4 + $0x478] sm:$0xff] }
 0x80a   :  { %v7816_v39 = vpop.eup %7815  ;;  %5857 = vst.msk [vmem:[%s12954_s5 + $0x3b8] sm:$0xff] %vm5737_vm3, %v7814_v36  ;;  %7835 = vrcp.f32 %v5400_v62  ;;  %v6223_v61 = vmul.f32 -1.442695, %v4710_v25 }
 0x80b   :  { %v7818_v21 = vpop.eup %7817  ;;  %5856 = vst.msk [vmem:[%s12954_s5 + $0x3b0] sm:$0xff] %vm5737_vm3, %v7816_v39  ;;  %7837 = vrcp.f32 %v5399_v35  ;;  %v6622_v16 = vpop.f32.mrb[150].mxu1  ;;  %v6222_v51 = vmul.f32 -1.442695, %v4705_v3 }
 0x80c   :  { %v7820_v5 = vpop.eup %7819  ;;  %v5402_v12 = vadd.f32 1.0, %v7818_v21  ;;  %7839 = vpow2.f32 %v6220_v22  ;;  %v4720_v48 = vadd.f32 %v6622_v16, %v3885_v10  ;;  %v4714_v7 = vpop.f32.mrb[151].mxu1  ;;  %v13148_v22 = vld [vmem:[#allocation91_spill] sm:$0xff]  ;;  %v13149_v16 = vld [vmem:[#allocation94_spill] sm:$0xff] }
 0x80d   :  { %v7822_v38 = vpop.eup %7821  ;;  %v5401_v42 = vadd.f32 1.0, %v7820_v5  ;;  %7841 = vpow2.f32 %v6223_v61  ;;  %v4715_v0 = vadd.f32 %v4714_v7, %v3880_v20  ;;  %v3910_v25 = vadd.f32 %v13148_v22, %v2662_v44  ;;  %v2667_v7 = vld [vmem:[%s12953_s4 + $0x488] sm:$0xff] }
 0x80e   :  { %v7824_v2 = vpop.eup %7823  ;;  %5859 = vst.msk [vmem:[%s12954_s5 + $0x3c8] sm:$0xff] %vm5737_vm3, %v7822_v38  ;;  %7843 = vrcp.f32 %v5402_v12  ;;  %v6225_v45 = vmul.f32 -1.442695, %v4720_v48  ;;  %v3925_v5 = vadd.f32 %v13149_v16, %v2665_v37 }
 0x80f   :  { %v7826_v40 = vpop.eup %7825  ;;  %5858 = vst.msk [vmem:[%s12954_s5 + $0x3c0] sm:$0xff] %vm5737_vm3, %v7824_v2  ;;  %7845 = vrcp.f32 %v5401_v42  ;;  %v6625_v33 = vpop.f32.mrb[152].mxu1  ;;  %v6224_v11 = vmul.f32 -1.442695, %v4715_v0 }
 0x810   :  { %v7828_v8 = vpop.eup %7827  ;;  %v5404_v26 = vadd.f32 1.0, %v7826_v40  ;;  %7847 = vpow2.f32 %v6222_v51  ;;  %v4730_v29 = vadd.f32 %v6625_v33, %v3895_v47  ;;  %v4724_v17 = vpop.f32.mrb[153].mxu1  ;;  %v13150_v51 = vld [vmem:[#allocation93_spill] sm:$0xff]  ;;  %v13151_v33 = vld [vmem:[#allocation96_spill] sm:$0xff] }
 0x811   :  { %v7830_v28 = vpop.eup %7829  ;;  %v5403_v49 = vadd.f32 1.0, %v7828_v8  ;;  %7849 = vpow2.f32 %v6225_v45  ;;  %v4725_v60 = vadd.f32 %v4724_v17, %v3890_v14  ;;  %v3920_v48 = vadd.f32 %v13150_v51, %v2664_v30  ;;  %v2669_v17 = vld [vmem:[%s12953_s4 + $0x498] sm:$0xff] }
 0x812   :  { %v7832_v56 = vpop.eup %7831  ;;  %5861 = vst.msk [vmem:[%s12954_s5 + $0x3d8] sm:$0xff] %vm5737_vm3, %v7830_v28  ;;  %7851 = vrcp.f32 %v5404_v26  ;;  %v6227_v1 = vmul.f32 -1.442695, %v4730_v29  ;;  %v3935_v8 = vadd.f32 %v13151_v33, %v2667_v7 }
 0x813   :  { %v7834_v32 = vpop.eup %7833  ;;  %7853 = vrcp.f32 %v5403_v49  ;;  %v5406_v24 = vadd.f32 1.0, %v7832_v56  ;;  %v6226_v63 = vmul.f32 -1.442695, %v4725_v60  ;;  %v6628_v52 = vpop.f32.mrb[154].mxu1 }
 0x814   :  { %v7836_v19 = vpop.eup %7835  ;;  %5860 = vst.msk [vmem:[%s12954_s5 + $0x3d0] sm:$0xff] %vm5737_vm3, %v7834_v32  ;;  %7855 = vpow2.f32 %v6224_v11  ;;  %v4740_v18 = vadd.f32 %v6628_v52, %v3905_v55  ;;  %v4734_v15 = vpop.f32.mrb[155].mxu1  ;;  %v13152_v11 = vld [vmem:[#allocation95_spill] sm:$0xff] }
 0x815   :  { %v7838_v57 = vpop.eup %7837  ;;  %5863 = vst.msk [vmem:[%s12954_s5 + $0x3e8] sm:$0xff] %vm5737_vm3, %v7836_v19  ;;  %7857 = vrcp.f32 %v5406_v24  ;;  %v4735_v54 = vadd.f32 %v4734_v15, %v3900_v58  ;;  %v3930_v29 = vadd.f32 %v13152_v11, %v2666_v46  ;;  %v13153_v24 = vld [vmem:[#allocation98_spill] sm:$0xff] }
 0x816   :  { %v7840_v53 = vpop.eup %7839  ;;  %5862 = vst.msk [vmem:[%s12954_s5 + $0x3e0] sm:$0xff] %vm5737_vm3, %v7838_v57  ;;  %7859 = vpow2.f32 %v6227_v1  ;;  %v6229_v6 = vmul.f32 -1.442695, %v4740_v18  ;;  %v13154_v18 = vld [vmem:[#allocation97_spill] sm:$0xff]  ;;  %v2671_v57 = vld [vmem:[%s12953_s4 + $0x4a8] sm:$0xff] }
 0x817   :  { %v7842_v62 = vpop.eup %7841  ;;  %v5405_v36 = vadd.f32 1.0, %v7840_v53  ;;  %7861 = vpow2.f32 %v6226_v63  ;;  %v6228_v35 = vmul.f32 -1.442695, %v4735_v54  ;;  %v6631_v3 = vpop.f32.mrb[156].mxu1  ;;  %v3945_v63 = vadd.f32 %v13153_v24, %v2669_v17 }
 0x818   :  { %v7844_v39 = vpop.eup %7843  ;;  %v5408_v10 = vadd.f32 1.0, %v7842_v62  ;;  %7863 = vpow2.f32 %v6229_v6  ;;  %v4750_v61 = vadd.f32 %v6631_v3, %v3915_v23  ;;  %v4744_v21 = vpop.f32.mrb[157].mxu1  ;;  %v3940_v15 = vadd.f32 %v13154_v18, %v2668_v13  ;;  %v2670_v6 = vld [vmem:[%s12953_s4 + $0x4a0] sm:$0xff] }
 0x819   :  { %v7846_v9 = vpop.eup %7845  ;;  %5865 = vst.msk [vmem:[%s12954_s5 + $0x3f8] sm:$0xff] %vm5737_vm3, %v7844_v39  ;;  %7865 = vrcp.f32 %v5405_v36  ;;  %v4745_v20 = vadd.f32 %v4744_v21, %v3910_v25 }
 0x81a   :  { %v7848_v43 = vpop.eup %7847  ;;  %5864 = vst.msk [vmem:[%s12954_s5 + $0x3f0] sm:$0xff] %vm5737_vm3, %v7846_v9  ;;  %7867 = vrcp.f32 %v5408_v10  ;;  %v6231_v27 = vmul.f32 -1.442695, %v4750_v61  ;;  %v13156_v61 = vld [vmem:[#allocation99_spill] sm:$0xff]  ;;  %v2673_v9 = vld [vmem:[%s12953_s4 + $0x4b8] sm:$0xff] }
 0x81b   :  { %v7850_v12 = vpop.eup %7849  ;;  %v5407_v38 = vadd.f32 1.0, %v7848_v43  ;;  %7869 = vpow2.f32 %v6228_v35  ;;  %v6230_v42 = vmul.f32 -1.442695, %v4745_v20  ;;  %v6634_v0 = vpop.f32.mrb[158].mxu1  ;;  %v13155_v35 = vld [vmem:[#allocation100_spill] sm:$0xff]  ;;  %v3950_v21 = vadd.f32 %v13156_v61, %v2670_v6 }
 0x81c   :  { %v7852_v2 = vpop.eup %7851  ;;  %v5410_v47 = vadd.f32 1.0, %v7850_v12  ;;  %7871 = vpow2.f32 %v6231_v27  ;;  %v4760_v45 = vadd.f32 %v6634_v0, %v3925_v5  ;;  %v4754_v40 = vpop.f32.mrb[159].mxu1  ;;  %v3955_v3 = vadd.f32 %v13155_v35, %v2671_v57  ;;  %v2672_v27 = vld [vmem:[%s12953_s4 + $0x4b0] sm:$0xff] }
 0x81d   :  { %v7854_v34 = vpop.eup %7853  ;;  %5867 = vst.msk [vmem:[%s12954_s5 + $0x408] sm:$0xff] %vm5737_vm3, %v7852_v2  ;;  %7873 = vrcp.f32 %v5407_v38  ;;  %v4755_v14 = vadd.f32 %v4754_v40, %v3920_v48 }
 0x81e   :  { %v7856_v31 = vpop.eup %7855  ;;  %5866 = vst.msk [vmem:[%s12954_s5 + $0x400] sm:$0xff] %vm5737_vm3, %v7854_v34  ;;  %7875 = vrcp.f32 %v5410_v47  ;;  %v6233_v59 = vmul.f32 -1.442695, %v4760_v45  ;;  %v13158_v45 = vld [vmem:[#allocation101_spill] sm:$0xff]  ;;  %v2675_v34 = vld [vmem:[%s12953_s4 + $0x4c8] sm:$0xff] }
 0x81f   :  { %v7858_v26 = vpop.eup %7857  ;;  %v5409_v28 = vadd.f32 1.0, %v7856_v31  ;;  %7877 = vpow2.f32 %v6230_v42  ;;  %v6232_v49 = vmul.f32 -1.442695, %v4755_v14  ;;  %v6637_v60 = vpop.f32.mrb[160].mxu1  ;;  %v13157_v42 = vld [vmem:[#allocation102_spill] sm:$0xff]  ;;  %v3960_v40 = vadd.f32 %v13158_v45, %v2672_v27 }
 0x820   :  { %v7860_v56 = vpop.eup %7859  ;;  %5869 = vst.msk [vmem:[%s12954_s5 + $0x418] sm:$0xff] %vm5737_vm3, %v7858_v26  ;;  %7879 = vpow2.f32 %v6233_v59  ;;  %v4770_v55 = vadd.f32 %v6637_v60, %v3935_v8  ;;  %v4764_v1 = vpop.f32.mrb[161].mxu1  ;;  %v3965_v0 = vadd.f32 %v13157_v42, %v2673_v9  ;;  %v2674_v8 = vld [vmem:[%s12953_s4 + $0x4c0] sm:$0xff]  ;;  %v13159_v60 = vld [vmem:[#allocation104_spill] sm:$0xff] }
 0x821   :  { %v7862_v32 = vpop.eup %7861  ;;  %7881 = vrcp.f32 %v5409_v28  ;;  %v5412_v50 = vadd.f32 1.0, %v7860_v56  ;;  %v4765_v58 = vadd.f32 %v4764_v1, %v3930_v29  ;;  %v3975_v56 = vadd.f32 %v13159_v60, %v2675_v34  ;;  %v13160_v1 = vld [vmem:[#allocation103_spill] sm:$0xff] }
 0x822   :  { %v7864_v4 = vpop.eup %7863  ;;  %v5411_v52 = vadd.f32 1.0, %v7862_v32  ;;  %7883 = vpow2.f32 %v6232_v49  ;;  %v6235_v19 = vmul.f32 -1.442695, %v4770_v55  ;;  %v3970_v32 = vadd.f32 %v13160_v1, %v2674_v8 }
 0x823   :  { %v7866_v44 = vpop.eup %7865  ;;  %7885 = vrcp.f32 %v5412_v50  ;;  %v5414_v54 = vadd.f32 1.0, %v7864_v4  ;;  %v6234_v53 = vmul.f32 -1.442695, %v4765_v58  ;;  %v6640_v41 = vpop.f32.mrb[162].mxu1 }
 0x824   :  { %v7868_v23 = vpop.eup %7867  ;;  %5868 = vst.msk [vmem:[%s12954_s5 + $0x410] sm:$0xff] %vm5737_vm3, %v7866_v44  ;;  %7887 = vrcp.f32 %v5411_v52  ;;  %v4780_v62 = vadd.f32 %v6640_v41, %v3945_v63  ;;  %v4774_v22 = vpop.f32.mrb[163].mxu1 }
 0x825   :  { %v7870_v25 = vpop.eup %7869  ;;  %5871 = vst.msk [vmem:[%s12954_s5 + $0x428] sm:$0xff] %vm5737_vm3, %v7868_v23  ;;  %7889 = vrcp.f32 %v5414_v54  ;;  %v4775_v37 = vadd.f32 %v4774_v22, %v3940_v15 }
 0x826   :  { %v7872_v36 = vpop.eup %7871  ;;  %v5413_v39 = vadd.f32 1.0, %v7870_v25  ;;  %7891 = vpow2.f32 %v6235_v19  ;;  %v6237_v30 = vmul.f32 -1.442695, %v4780_v62 }
 0x827   :  { %v7874_v10 = vpop.eup %7873  ;;  %v5416_v20 = vadd.f32 1.0, %v7872_v36  ;;  %7893 = vpow2.f32 %v6234_v53  ;;  %v6236_v43 = vmul.f32 -1.442695, %v4775_v37  ;;  %v6643_v16 = vpop.f32.mrb[164].mxu1 }
 0x828   :  { %v7876_v5 = vpop.eup %7875  ;;  %5870 = vst.msk [vmem:[%s12954_s5 + $0x420] sm:$0xff] %vm5737_vm3, %v7874_v10  ;;  %7895 = vrcp.f32 %v5413_v39  ;;  %v4790_v12 = vadd.f32 %v6643_v16, %v3955_v3  ;;  %v4784_v51 = vpop.f32.mrb[165].mxu1 }
 0x829   :  { %v7878_v48 = vpop.eup %7877  ;;  %5873 = vst.msk [vmem:[%s12954_s5 + $0x438] sm:$0xff] %vm5737_vm3, %v7876_v5  ;;  %7897 = vrcp.f32 %v5416_v20  ;;  %v4785_v7 = vadd.f32 %v4784_v51, %v3950_v21 }
 0x82a   :  { %v7880_v38 = vpop.eup %7879  ;;  %v5415_v2 = vadd.f32 1.0, %v7878_v48  ;;  %7899 = vpow2.f32 %v6237_v30  ;;  %v6239_v46 = vmul.f32 -1.442695, %v4790_v12 }
 0x82b   :  { %v7882_v47 = vpop.eup %7881  ;;  %v5418_v14 = vadd.f32 1.0, %v7880_v38  ;;  %7901 = vpow2.f32 %v6236_v43  ;;  %v6646_v31 = vpop.f32.mrb[166].mxu1  ;;  %v6238_v59 = vmul.f32 -1.442695, %v4785_v7 }
 0x82c   :  { %v7884_v33 = vpop.eup %7883  ;;  %5872 = vst.msk [vmem:[%s12954_s5 + $0x430] sm:$0xff] %vm5737_vm3, %v7882_v47  ;;  %7903 = vrcp.f32 %v5415_v2  ;;  %v4800_v26 = vadd.f32 %v6646_v31, %v3965_v0  ;;  %v4794_v11 = vpop.f32.mrb[167].mxu1 }
 0x82d   :  { %v7886_v29 = vpop.eup %7885  ;;  %7905 = vrcp.f32 %v5418_v14  ;;  %v5417_v17 = vadd.f32 1.0, %v7884_v33  ;;  %v4795_v28 = vadd.f32 %v4794_v11, %v3960_v40 }
 0x82e   :  { %v7888_v49 = vpop.eup %7887  ;;  %5875 = vst.msk [vmem:[%s12954_s5 + $0x448] sm:$0xff] %vm5737_vm3, %v7886_v29  ;;  %7907 = vpow2.f32 %v6239_v46  ;;  %v6241_v13 = vmul.f32 -1.442695, %v4800_v26 }
 0x82f   :  { %v7890_v55 = vpop.eup %7889  ;;  %5874 = vst.msk [vmem:[%s12954_s5 + $0x440] sm:$0xff] %vm5737_vm3, %v7888_v49  ;;  %7909 = vrcp.f32 %v5417_v17  ;;  %v6240_v50 = vmul.f32 -1.442695, %v4795_v28  ;;  %v6649_v58 = vpop.f32.mrb[168].mxu1 }
 0x830   :  { %v7892_v4 = vpop.eup %7891  ;;  %5877 = vst.msk [vmem:[%s12954_s5 + $0x458] sm:$0xff] %vm5737_vm3, %v7890_v55  ;;  %7911 = vpow2.f32 %v6238_v59  ;;  %v4810_v24 = vadd.f32 %v6649_v58, %v3975_v56  ;;  %v4804_v63 = vpop.f32.mrb[169].mxu1 }
 0x831   :  { %v7894_v52 = vpop.eup %7893  ;;  %v5420_v19 = vadd.f32 1.0, %v7892_v4  ;;  %7913 = vpow2.f32 %v6241_v13  ;;  %v4805_v44 = vadd.f32 %v4804_v63, %v3970_v32 }
 0x832   :  { %v7896_v18 = vpop.eup %7895  ;;  %v5419_v15 = vadd.f32 1.0, %v7894_v52  ;;  %7915 = vpow2.f32 %v6240_v50  ;;  %v6243_v57 = vmul.f32 -1.442695, %v4810_v24 }
 0x833   :  { %v7898_v54 = vpop.eup %7897  ;;  %5876 = vst.msk [vmem:[%s12954_s5 + $0x450] sm:$0xff] %vm5737_vm3, %v7896_v18  ;;  %7917 = vrcp.f32 %v5420_v19  ;;  %v6242_v53 = vmul.f32 -1.442695, %v4805_v44 }
 0x834   :  { %v7900_v41 = vpop.eup %7899  ;;  %5879 = vst.msk [vmem:[%s12954_s5 + $0x468] sm:$0xff] %vm5737_vm3, %v7898_v54  ;;  %7919 = vrcp.f32 %v5419_v15 }
 0x835   :  { %v7902_v23 = vpop.eup %7901  ;;  %v5422_v6 = vadd.f32 1.0, %v7900_v41  ;;  %7921 = vpow2.f32 %v6243_v57 }
 0x836   :  { %v7904_v62 = vpop.eup %7903  ;;  %v5421_v22 = vadd.f32 1.0, %v7902_v23  ;;  %7923 = vpow2.f32 %v6242_v53 }
 0x837   :  { %v7906_v25 = vpop.eup %7905  ;;  %5878 = vst.msk [vmem:[%s12954_s5 + $0x460] sm:$0xff] %vm5737_vm3, %v7904_v62  ;;  %7925 = vrcp.f32 %v5422_v6 }
 0x838   :  { %v7908_v37 = vpop.eup %7907  ;;  %5881 = vst.msk [vmem:[%s12954_s5 + $0x478] sm:$0xff] %vm5737_vm3, %v7906_v25  ;;  %7927 = vrcp.f32 %v5421_v22 }
 0x839   :  { %v7910_v36 = vpop.eup %7909  ;;  %v5424_v35 = vadd.f32 1.0, %v7908_v37 }
 0x83a   :  { %v7912_v3 = vpop.eup %7911  ;;  %5880 = vst.msk [vmem:[%s12954_s5 + $0x470] sm:$0xff] %vm5737_vm3, %v7910_v36 }
 0x83b   :  { %v7914_v39 = vpop.eup %7913  ;;  %7929 = vrcp.f32 %v5424_v35  ;;  %v5423_v30 = vadd.f32 1.0, %v7912_v3 }
 0x83c   :  { %v7916_v10 = vpop.eup %7915  ;;  %v5426_v61 = vadd.f32 1.0, %v7914_v39 }
 0x83d   :  { %v7918_v21 = vpop.eup %7917  ;;  %7931 = vrcp.f32 %v5423_v30  ;;  %v5425_v9 = vadd.f32 1.0, %v7916_v10 }
 0x83e   :  { %v7920_v20 = vpop.eup %7919  ;;  %5883 = vst.msk [vmem:[%s12954_s5 + $0x488] sm:$0xff] %vm5737_vm3, %v7918_v21  ;;  %7933 = vrcp.f32 %v5426_v61 }
 0x83f   :  { %v7922_v43 = vpop.eup %7921  ;;  %5882 = vst.msk [vmem:[%s12954_s5 + $0x480] sm:$0xff] %vm5737_vm3, %v7920_v20  ;;  %7935 = vrcp.f32 %v5425_v9 }
 0x840   :  { %v7924_v16 = vpop.eup %7923  ;;  %v5428_v5 = vadd.f32 1.0, %v7922_v43 }
 0x841   :  { %v7926_v27 = vpop.eup %7925  ;;  %v5427_v12 = vadd.f32 1.0, %v7924_v16 }
 0x842   :  { %v7928_v51 = vpop.eup %7927  ;;  %5885 = vst.msk [vmem:[%s12954_s5 + $0x498] sm:$0xff] %vm5737_vm3, %v7926_v27  ;;  %7937 = vrcp.f32 %v5428_v5 }
 0x843   :  { %5884 = vst.msk [vmem:[%s12954_s5 + $0x490] sm:$0xff] %vm5737_vm3, %v7928_v51  ;;  %7939 = vrcp.f32 %v5427_v12 }
 0x845   :  { %v7930_v48 = vpop.eup %7929 }
 0x846   :  { %5887 = vst.msk [vmem:[%s12954_s5 + $0x4a8] sm:$0xff] %vm5737_vm3, %v7930_v48 }
 0x847   :  { %v7932_v7 = vpop.eup %7931 }
 0x848   :  { %v7934_v38 = vpop.eup %7933  ;;  %5886 = vst.msk [vmem:[%s12954_s5 + $0x4a0] sm:$0xff] %vm5737_vm3, %v7932_v7 }
 0x849   :  { %v7936_v42 = vpop.eup %7935  ;;  %5889 = vst.msk [vmem:[%s12954_s5 + $0x4b8] sm:$0xff] %vm5737_vm3, %v7934_v38 }
 0x84a   :  { %5888 = vst.msk [vmem:[%s12954_s5 + $0x4b0] sm:$0xff] %vm5737_vm3, %v7936_v42 }
 0x84c   :  { %v7938_v0 = vpop.eup %7937 }
 0x84d   :  { %v7940_v2 = vpop.eup %7939  ;;  %5891 = vst.msk [vmem:[%s12954_s5 + $0x4c8] sm:$0xff] %vm5737_vm3, %v7938_v0 }
 0x84e   :  { %5890 = vst.msk [vmem:[%s12954_s5 + $0x4c0] sm:$0xff] %vm5737_vm3, %v7940_v2 }

</bundles_post_ra>
